<compile_context>
chip_gen: v7x
topology: tpu7x:2x2x1
jax: 0.10.0
libtpu: 0.0.40
codegen_flags: <defaults>
</compile_context>

<pallas_src>
import jax
import jax.numpy as jnp
from jax import lax
from jax.experimental import pallas as pl
from jax.experimental.pallas import tpu as pltpu


# Set to jnp.bfloat16 on v6e/v7x for 2x MXU throughput (relax the tolerance
# in __main__ to ~3e-2 if you do).  f32 keeps the 2e-3 check and v5e-safe
# epilogues.
MATMUL_DTYPE = jnp.float32


# -----------------------------------------------------------------------------
# Host-side packing: 3x3 conv weights -> block-banded (W*Cin, W*Cout) matrices
# -----------------------------------------------------------------------------
def _pack_conv_params(w, b, Wsp):
    """w: (3, 3, Cin, Cout), b: (1, Cout)  ->
       wbig: (3, Wsp*Cin, Wsp*Cout)   (one banded matrix per kernel row dy)
       btile: (1, Wsp*Cout)           (bias tiled over the packed width)"""
    Cin, Cout = w.shape[2], w.shape[3]
    wi = jnp.arange(Wsp)[:, None]
    wo = jnp.arange(Wsp)[None, :]
    mats = []
    for dy in range(3):
        m = jnp.zeros((Wsp, Cin, Wsp, Cout), w.dtype)
        for dx in range(3):
            mask = (wi - wo == (dx - 1)).astype(w.dtype)              # (W, W)
            m = m + mask[:, None, :, None] * w[dy, dx][None, :, None, :]
        mats.append(m.reshape(Wsp * Cin, Wsp * Cout))
    wbig = jnp.stack(mats, axis=0)
    btile = jnp.tile(b.reshape(1, Cout), (1, Wsp))
    return wbig, btile


# -----------------------------------------------------------------------------
# The fused encoder kernel
# -----------------------------------------------------------------------------
def _make_encoder_kernel(N, Hs, Ws, cins, couts):
    def kernel(x_ref, w0, w1, w2, w3, b0, b1, b2, b3,
               wf_ref, bf_ref, gam_ref, bet_ref, o_ref,
               buf0, buf1, buf2, buf3, hbuf, gap_scr):
        wrefs = (w0, w1, w2, w3)
        brefs = (b0, b1, b2, b3)
        bufs = (buf0, buf1, buf2, buf3)

        # --- stage the input into the zero-padded layer-0 buffer (pad in VMEM) ---
        buf0[...] = jnp.zeros_like(buf0)
        Hp0 = Hs[0] + 2
        for n in range(N):
            buf0[pl.ds(n * Hp0 + 2, Hs[0]), :] = x_ref[pl.ds(n * Hs[0], Hs[0]), :]

        def conv_relu(k):
            """3 banded MXU matmuls over all images+rows at once, f32 acc,
            then bias + ReLU on the VPU."""
            R = N * (Hs[k] + 2)
            nout = Ws[k] * couts[k]
            acc = jnp.zeros((R, nout), jnp.float32)
            for dy in range(3):                       # only 3 matmuls per layer
                lhs = bufs[k][pl.ds(dy, R), :].astype(MATMUL_DTYPE)
                acc = acc + jnp.dot(lhs, wrefs[k][dy],
                                    preferred_element_type=jnp.float32)
            return jnp.maximum(acc + brefs[k][...], 0.0)        # (R, W*Cout)

        # --- 3 x (conv -> relu -> 2x2 maxpool), pooling on the VPU ---
        for k in range(3):
            Hk, Wk, Ck = Hs[k], Ws[k], couts[k]
            Hp_in = Hk + 2
            R = N * Hp_in
            y = conv_relu(k)                                    # (R, Wk*Ck)
            # vertical (row-pair) max
            vm = jnp.maximum(y[0:R - 1, :], y[1:R, :])          # (R-1, Wk*Ck)
            Ho, Wo = Hk // 2, Wk // 2
            # horizontal (column-pair) max: lane-block ops into hbuf
            for wo in range(Wo):
                lo = 2 * wo * Ck
                hbuf[0:R - 1, wo * Ck:(wo + 1) * Ck] = jnp.maximum(
                    vm[:, lo:lo + Ck], vm[:, lo + Ck:lo + 2 * Ck])
            # repack pooled rows into the next layer's zero-padded buffer
            nxt = bufs[k + 1]
            nxt[...] = jnp.zeros_like(nxt)
            Hp_out = Ho + 2
            for n in range(N):
                for ho in range(Ho):
                    src = n * Hp_in + 1 + 2 * ho
                    dst = n * Hp_out + 2 + ho
                    nxt[pl.ds(dst, 1), :] = hbuf[pl.ds(src, 1), 0:Wo * Ck]

        # --- conv4 -> relu -> global average pool (AdaptiveAvgPool2d((1,1))) ---
        H3, W3, C3 = Hs[3], Ws[3], couts[3]
        Hp3 = H3 + 2
        y3 = conv_relu(3)                                       # (N*Hp3, W3*C3)
        s = y3[:, 0:C3]
        for w_ in range(1, W3):
            s = s + y3[:, w_ * C3:(w_ + 1) * C3]                # (N*Hp3, C3)
        inv = 1.0 / float(H3 * W3)
        for n in range(N):
            rows = s[n * Hp3 + 1:n * Hp3 + 1 + H3, :]           # (H3, C3)
            gap_scr[pl.ds(n, 1), :] = jnp.sum(rows, axis=0, keepdims=True) * inv

        # --- Linear(256 -> E) + LayerNorm(E), batch folded into M, all in VMEM ---
        g = gap_scr[...]                                        # (N, C3)
        h = jnp.dot(g, wf_ref[...],
                    preferred_element_type=jnp.float32) + bf_ref[...]
        mu = jnp.mean(h, axis=-1, keepdims=True)
        xc = h - mu
        var = jnp.mean(xc * xc, axis=-1, keepdims=True)
        o_ref[...] = xc * lax.rsqrt(var + 1e-5) * gam_ref[...] + bet_ref[...]

    return kernel


# -----------------------------------------------------------------------------
# Wrapper: pack params/input, allocate VMEM scratch, single pallas_call
# -----------------------------------------------------------------------------
def _encoder_pallas(x_nchw, params):
    N, Cin, H, W = x_nchw.shape
    assert H == W and H % 8 == 0, "demo assumes square spatial, divisible by 8"
    couts = tuple(params[f"w{k}"].shape[3] for k in range(4))
    cins = (Cin,) + couts[:3]
    Hs = [H // (2 ** k) for k in range(4)]
    Ws = [W // (2 ** k) for k in range(4)]
    emb = params["wf"].shape[-1]

    # pack input rows: (N*H, W*Cin), lanes ordered w-major / channel-minor
    x2 = jnp.transpose(x_nchw, (0, 2, 3, 1)).astype(jnp.float32)
    x2 = x2.reshape(N * H, W * Cin)

    wbigs, btiles = [], []
    for k in range(4):
        wb, bt = _pack_conv_params(params[f"w{k}"], params[f"b{k}"], Ws[k])
        wbigs.append(wb.astype(MATMUL_DTYPE))
        btiles.append(bt.astype(jnp.float32))

    # VMEM scratch: one zero-padded activation buffer per layer (+pool scratch)
    bufs = [pltpu.VMEM((N * (Hs[k] + 2) + 2, Ws[k] * cins[k]), jnp.float32)
            for k in range(4)]
    hbuf_cols = max((Ws[k] // 2) * couts[k] for k in range(3))
    hbuf = pltpu.VMEM((N * (Hs[0] + 2), hbuf_cols), jnp.float32)
    gap = pltpu.VMEM((N, couts[3]), jnp.float32)

    kernel = _make_encoder_kernel(N, Hs, Ws, cins, couts)

    return pl.pallas_call(
        kernel,
        out_shape=jax.ShapeDtypeStruct((N, emb), jnp.float32),
        scratch_shapes=bufs + [hbuf, gap],
    )(x2, *wbigs, *btiles,
      params["wf"].astype(jnp.float32), params["bf"],
      params["gamma"], params["beta"])


encoder_forward = jax.jit(_encoder_pallas)


# -----------------------------------------------------------------------------
# Parameters (deterministic, synthetic) and pure-JAX reference
# -----------------------------------------------------------------------------
def init_params(key, in_ch=4, embedding_dim=128):
    chans = [in_ch, 32, 64, 128, 256]
    params = {}
    keys = jax.random.split(key, 12)
    ki = 0
    for li in range(4):
        cin, cout = chans[li], chans[li + 1]
        w = jax.random.normal(keys[ki], (3, 3, cin, cout), jnp.float32)
        params[f"w{li}"] = w / jnp.sqrt(9.0 * cin)
        params[f"b{li}"] = 0.01 * jax.random.normal(keys[ki + 1], (1, cout),
                                                    jnp.float32)
        ki += 2
    params["wf"] = jax.random.normal(keys[ki], (256, embedding_dim),
                                     jnp.float32) / jnp.sqrt(256.0)
    params["bf"] = 0.01 * jax.random.normal(keys[ki + 1], (1, embedding_dim),
                                            jnp.float32)
    params["gamma"] = jnp.ones((1, embedding_dim), jnp.float32)   # LN defaults
    params["beta"] = jnp.zeros((1, embedding_dim), jnp.float32)
    return params


def reference_forward(x_nchw, params):
    x = jnp.transpose(x_nchw, (0, 2, 3, 1)).astype(jnp.float32)

    def conv(xx, w, b):  # w: (3,3,Cin,Cout) = HWIO
        y = lax.conv_general_dilated(
            xx, w, window_strides=(1, 1), padding="SAME",
            dimension_numbers=("NHWC", "HWIO", "NHWC"))
        return jnp.maximum(y + b.reshape(1, 1, 1, -1), 0.0)

    def pool(xx):
        return lax.reduce_window(xx, -jnp.inf, lax.max,
                                 (1, 2, 2, 1), (1, 2, 2, 1), "VALID")

    y = pool(conv(x, params["w0"], params["b0"]))
    y = pool(conv(y, params["w1"], params["b1"]))
    y = pool(conv(y, params["w2"], params["b2"]))
    y = conv(y, params["w3"], params["b3"])
    y = jnp.mean(y, axis=(1, 2))
    h = y @ params["wf"] + params["bf"]
    mu = jnp.mean(h, axis=-1, keepdims=True)
    var = jnp.mean((h - mu) ** 2, axis=-1, keepdims=True)
    return (h - mu) / jnp.sqrt(var + 1e-5) * params["gamma"] + params["beta"]


if __name__ == "__main__":
    key = jax.random.PRNGKey(0)
    kx, kp = jax.random.split(key)
    # NCHW like the PyTorch module: batch=2, channels=4, spatial=16x16
    x = jax.random.normal(kx, (2, 4, 16, 16), jnp.float32)
    params = init_params(kp, in_ch=4, embedding_dim=128)

    out = encoder_forward(x, params)
    out = jax.block_until_ready(out)
    assert out.shape == (2, 128), out.shape

    ref = reference_forward(x, params)
    max_err = float(jnp.max(jnp.abs(out - ref)))
    assert jnp.allclose(out, ref, rtol=2e-3, atol=2e-3), max_err

    print("KERNEL_OK")
</pallas_src>

<mosaic_0001>
module attributes {stable_mosaic.version = 11 : i64} {
  func.func @kernel(%arg0: memref<32x64xf32, #tpu.memory_space<vmem>>, %arg1: memref<3x64x512xf32, #tpu.memory_space<vmem>>, %arg2: memref<3x256x512xf32, #tpu.memory_space<vmem>>, %arg3: memref<3x256x512xf32, #tpu.memory_space<vmem>>, %arg4: memref<3x256x512xf32, #tpu.memory_space<vmem>>, %arg5: memref<1x512xf32, #tpu.memory_space<vmem>>, %arg6: memref<1x512xf32, #tpu.memory_space<vmem>>, %arg7: memref<1x512xf32, #tpu.memory_space<vmem>>, %arg8: memref<1x512xf32, #tpu.memory_space<vmem>>, %arg9: memref<256x128xf32, #tpu.memory_space<vmem>>, %arg10: memref<1x128xf32, #tpu.memory_space<vmem>>, %arg11: memref<1x128xf32, #tpu.memory_space<vmem>>, %arg12: memref<1x128xf32, #tpu.memory_space<vmem>>, %arg13: memref<2x128xf32, #tpu.memory_space<vmem>>, %arg14: memref<38x64xf32, #tpu.memory_space<vmem>>, %arg15: memref<22x256xf32, #tpu.memory_space<vmem>>, %arg16: memref<14x256xf32, #tpu.memory_space<vmem>>, %arg17: memref<10x256xf32, #tpu.memory_space<vmem>>, %arg18: memref<36x256xf32, #tpu.memory_space<vmem>>, %arg19: memref<2x256xf32, #tpu.memory_space<vmem>>) attributes {dimension_semantics = [], scalar_prefetch = 0 : i64, scratch_operands = 6 : i64, tpu.core_type = #tpu.core_type<tc>} {
    %cst = arith.constant 0.000000e+00 : f32
    %0 = vector.broadcast %cst : f32 to vector<38x64xf32>
    %c0 = arith.constant 0 : index
    %c0_0 = arith.constant 0 : index
    %1 = vector.load %arg14[%c0, %c0_0] : memref<38x64xf32, #tpu.memory_space<vmem>>, vector<38x64xf32>
    tpu.vector_store %arg14[%c0, %c0_0], %0 {strides = array<i32>} : memref<38x64xf32, #tpu.memory_space<vmem>>, vector<38x64xf32>,
    %c0_1 = arith.constant 0 : index
    %c0_2 = arith.constant 0 : index
    %2 = vector.load %arg0[%c0_1, %c0_2] : memref<32x64xf32, #tpu.memory_space<vmem>>, vector<16x64xf32>
    %c2 = arith.constant 2 : index
    %c0_3 = arith.constant 0 : index
    %3 = vector.load %arg14[%c2, %c0_3] : memref<38x64xf32, #tpu.memory_space<vmem>>, vector<16x64xf32>
    tpu.vector_store %arg14[%c2, %c0_3], %2 {strides = array<i32>} : memref<38x64xf32, #tpu.memory_space<vmem>>, vector<16x64xf32>,
    %c16 = arith.constant 16 : index
    %c0_4 = arith.constant 0 : index
    %4 = vector.load %arg0[%c16, %c0_4] : memref<32x64xf32, #tpu.memory_space<vmem>>, vector<16x64xf32>
    %c20 = arith.constant 20 : index
    %c0_5 = arith.constant 0 : index
    %5 = vector.load %arg14[%c20, %c0_5] : memref<38x64xf32, #tpu.memory_space<vmem>>, vector<16x64xf32>
    tpu.vector_store %arg14[%c20, %c0_5], %4 {strides = array<i32>} : memref<38x64xf32, #tpu.memory_space<vmem>>, vector<16x64xf32>,
    %cst_6 = arith.constant 0.000000e+00 : f32
    %6 = vector.broadcast %cst_6 : f32 to vector<36x512xf32>
    %c0_7 = arith.constant 0 : index
    %c0_8 = arith.constant 0 : index
    %7 = vector.load %arg14[%c0_7, %c0_8] : memref<38x64xf32, #tpu.memory_space<vmem>>, vector<36x64xf32>
    %c0_9 = arith.constant 0 : index
    %c0_10 = arith.constant 0 : index
    %c0_11 = arith.constant 0 : index
    %8 = vector.load %arg1[%c0_9, %c0_10, %c0_11] : memref<3x64x512xf32, #tpu.memory_space<vmem>>, vector<1x64x512xf32>
    %9 = vector.shape_cast %8 : vector<1x64x512xf32> to vector<64x512xf32>
    %cst_12 = arith.constant dense<0.000000e+00> : vector<36x512xf32>
    %10 = tpu.matmul %7, %9, %cst_12 {dimension_numbers = #tpu.dot_dimension_numbers<[1], [0], [0], [1], [0, 0, 1, 1], [], []>} : vector<36x64xf32>, vector<64x512xf32>, vector<36x512xf32> -> vector<36x512xf32>
    %11 = arith.addf %6, %10 : vector<36x512xf32>
    %c1 = arith.constant 1 : index
    %c0_13 = arith.constant 0 : index
    %12 = vector.load %arg14[%c1, %c0_13] : memref<38x64xf32, #tpu.memory_space<vmem>>, vector<36x64xf32>
    %c1_14 = arith.constant 1 : index
    %c0_15 = arith.constant 0 : index
    %c0_16 = arith.constant 0 : index
    %13 = vector.load %arg1[%c1_14, %c0_15, %c0_16] : memref<3x64x512xf32, #tpu.memory_space<vmem>>, vector<1x64x512xf32>
    %14 = vector.shape_cast %13 : vector<1x64x512xf32> to vector<64x512xf32>
    %cst_17 = arith.constant dense<0.000000e+00> : vector<36x512xf32>
    %15 = tpu.matmul %12, %14, %cst_17 {dimension_numbers = #tpu.dot_dimension_numbers<[1], [0], [0], [1], [0, 0, 1, 1], [], []>} : vector<36x64xf32>, vector<64x512xf32>, vector<36x512xf32> -> vector<36x512xf32>
    %16 = arith.addf %11, %15 : vector<36x512xf32>
    %c2_18 = arith.constant 2 : index
    %c0_19 = arith.constant 0 : index
    %17 = vector.load %arg14[%c2_18, %c0_19] : memref<38x64xf32, #tpu.memory_space<vmem>>, vector<36x64xf32>
    %c2_20 = arith.constant 2 : index
    %c0_21 = arith.constant 0 : index
    %c0_22 = arith.constant 0 : index
    %18 = vector.load %arg1[%c2_20, %c0_21, %c0_22] : memref<3x64x512xf32, #tpu.memory_space<vmem>>, vector<1x64x512xf32>
    %19 = vector.shape_cast %18 : vector<1x64x512xf32> to vector<64x512xf32>
    %cst_23 = arith.constant dense<0.000000e+00> : vector<36x512xf32>
    %20 = tpu.matmul %17, %19, %cst_23 {dimension_numbers = #tpu.dot_dimension_numbers<[1], [0], [0], [1], [0, 0, 1, 1], [], []>} : vector<36x64xf32>, vector<64x512xf32>, vector<36x512xf32> -> vector<36x512xf32>
    %21 = arith.addf %16, %20 : vector<36x512xf32>
    %c0_24 = arith.constant 0 : index
    %c0_25 = arith.constant 0 : index
    %22 = vector.load %arg5[%c0_24, %c0_25] : memref<1x512xf32, #tpu.memory_space<vmem>>, vector<1x512xf32>
    %23 = vector.broadcast %22 : vector<1x512xf32> to vector<36x512xf32>
    %24 = arith.addf %21, %23 : vector<36x512xf32>
    %cst_26 = arith.constant 0.000000e+00 : f32
    %25 = vector.broadcast %cst_26 : f32 to vector<36x512xf32>
    %26 = arith.maximumf %24, %25 : vector<36x512xf32>
    %27 = vector.extract_strided_slice %26 {offsets = [0, 0], sizes = [35, 512], strides = [1, 1]} : vector<36x512xf32> to vector<35x512xf32>
    %28 = vector.extract_strided_slice %26 {offsets = [1, 0], sizes = [35, 512], strides = [1, 1]} : vector<36x512xf32> to vector<35x512xf32>
    %29 = arith.maximumf %27, %28 : vector<35x512xf32>
    %30 = vector.extract_strided_slice %29 {offsets = [0, 0], sizes = [35, 32], strides = [1, 1]} : vector<35x512xf32> to vector<35x32xf32>
    %31 = vector.extract_strided_slice %29 {offsets = [0, 32], sizes = [35, 32], strides = [1, 1]} : vector<35x512xf32> to vector<35x32xf32>
    %32 = arith.maximumf %30, %31 : vector<35x32xf32>
    %c0_27 = arith.constant 0 : index
    %c0_28 = arith.constant 0 : index
    %33 = vector.load %arg18[%c0_27, %c0_28] : memref<36x256xf32, #tpu.memory_space<vmem>>, vector<35x32xf32>
    tpu.vector_store %arg18[%c0_27, %c0_28], %32 {strides = array<i32>} : memref<36x256xf32, #tpu.memory_space<vmem>>, vector<35x32xf32>,
    %34 = vector.extract_strided_slice %29 {offsets = [0, 64], sizes = [35, 32], strides = [1, 1]} : vector<35x512xf32> to vector<35x32xf32>
    %35 = vector.extract_strided_slice %29 {offsets = [0, 96], sizes = [35, 32], strides = [1, 1]} : vector<35x512xf32> to vector<35x32xf32>
    %36 = arith.maximumf %34, %35 : vector<35x32xf32>
    %c0_29 = arith.constant 0 : index
    %c32 = arith.constant 32 : index
    %37 = vector.load %arg18[%c0_29, %c32] : memref<36x256xf32, #tpu.memory_space<vmem>>, vector<35x32xf32>
    tpu.vector_store %arg18[%c0_29, %c32], %36 {strides = array<i32>} : memref<36x256xf32, #tpu.memory_space<vmem>>, vector<35x32xf32>,
    %38 = vector.extract_strided_slice %29 {offsets = [0, 128], sizes = [35, 32], strides = [1, 1]} : vector<35x512xf32> to vector<35x32xf32>
    %39 = vector.extract_strided_slice %29 {offsets = [0, 160], sizes = [35, 32], strides = [1, 1]} : vector<35x512xf32> to vector<35x32xf32>
    %40 = arith.maximumf %38, %39 : vector<35x32xf32>
    %c0_30 = arith.constant 0 : index
    %c64 = arith.constant 64 : index
    %41 = vector.load %arg18[%c0_30, %c64] : memref<36x256xf32, #tpu.memory_space<vmem>>, vector<35x32xf32>
    tpu.vector_store %arg18[%c0_30, %c64], %40 {strides = array<i32>} : memref<36x256xf32, #tpu.memory_space<vmem>>, vector<35x32xf32>,
    %42 = vector.extract_strided_slice %29 {offsets = [0, 192], sizes = [35, 32], strides = [1, 1]} : vector<35x512xf32> to vector<35x32xf32>
    %43 = vector.extract_strided_slice %29 {offsets = [0, 224], sizes = [35, 32], strides = [1, 1]} : vector<35x512xf32> to vector<35x32xf32>
    %44 = arith.maximumf %42, %43 : vector<35x32xf32>
    %c0_31 = arith.constant 0 : index
    %c96 = arith.constant 96 : index
    %45 = vector.load %arg18[%c0_31, %c96] : memref<36x256xf32, #tpu.memory_space<vmem>>, vector<35x32xf32>
    tpu.vector_store %arg18[%c0_31, %c96], %44 {strides = array<i32>} : memref<36x256xf32, #tpu.memory_space<vmem>>, vector<35x32xf32>,
    %46 = vector.extract_strided_slice %29 {offsets = [0, 256], sizes = [35, 32], strides = [1, 1]} : vector<35x512xf32> to vector<35x32xf32>
    %47 = vector.extract_strided_slice %29 {offsets = [0, 288], sizes = [35, 32], strides = [1, 1]} : vector<35x512xf32> to vector<35x32xf32>
    %48 = arith.maximumf %46, %47 : vector<35x32xf32>
    %c0_32 = arith.constant 0 : index
    %c128 = arith.constant 128 : index
    %49 = vector.load %arg18[%c0_32, %c128] : memref<36x256xf32, #tpu.memory_space<vmem>>, vector<35x32xf32>
    tpu.vector_store %arg18[%c0_32, %c128], %48 {strides = array<i32>} : memref<36x256xf32, #tpu.memory_space<vmem>>, vector<35x32xf32>,
    %50 = vector.extract_strided_slice %29 {offsets = [0, 320], sizes = [35, 32], strides = [1, 1]} : vector<35x512xf32> to vector<35x32xf32>
    %51 = vector.extract_strided_slice %29 {offsets = [0, 352], sizes = [35, 32], strides = [1, 1]} : vector<35x512xf32> to vector<35x32xf32>
    %52 = arith.maximumf %50, %51 : vector<35x32xf32>
    %c0_33 = arith.constant 0 : index
    %c160 = arith.constant 160 : index
    %53 = vector.load %arg18[%c0_33, %c160] : memref<36x256xf32, #tpu.memory_space<vmem>>, vector<35x32xf32>
    tpu.vector_store %arg18[%c0_33, %c160], %52 {strides = array<i32>} : memref<36x256xf32, #tpu.memory_space<vmem>>, vector<35x32xf32>,
    %54 = vector.extract_strided_slice %29 {offsets = [0, 384], sizes = [35, 32], strides = [1, 1]} : vector<35x512xf32> to vector<35x32xf32>
    %55 = vector.extract_strided_slice %29 {offsets = [0, 416], sizes = [35, 32], strides = [1, 1]} : vector<35x512xf32> to vector<35x32xf32>
    %56 = arith.maximumf %54, %55 : vector<35x32xf32>
    %c0_34 = arith.constant 0 : index
    %c192 = arith.constant 192 : index
    %57 = vector.load %arg18[%c0_34, %c192] : memref<36x256xf32, #tpu.memory_space<vmem>>, vector<35x32xf32>
    tpu.vector_store %arg18[%c0_34, %c192], %56 {strides = array<i32>} : memref<36x256xf32, #tpu.memory_space<vmem>>, vector<35x32xf32>,
    %58 = vector.extract_strided_slice %29 {offsets = [0, 448], sizes = [35, 32], strides = [1, 1]} : vector<35x512xf32> to vector<35x32xf32>
    %59 = vector.extract_strided_slice %29 {offsets = [0, 480], sizes = [35, 32], strides = [1, 1]} : vector<35x512xf32> to vector<35x32xf32>
    %60 = arith.maximumf %58, %59 : vector<35x32xf32>
    %c0_35 = arith.constant 0 : index
    %c224 = arith.constant 224 : index
    %61 = vector.load %arg18[%c0_35, %c224] : memref<36x256xf32, #tpu.memory_space<vmem>>, vector<35x32xf32>
    tpu.vector_store %arg18[%c0_35, %c224], %60 {strides = array<i32>} : memref<36x256xf32, #tpu.memory_space<vmem>>, vector<35x32xf32>,
    %cst_36 = arith.constant 0.000000e+00 : f32
    %62 = vector.broadcast %cst_36 : f32 to vector<22x256xf32>
    %c0_37 = arith.constant 0 : index
    %c0_38 = arith.constant 0 : index
    %63 = vector.load %arg15[%c0_37, %c0_38] : memref<22x256xf32, #tpu.memory_space<vmem>>, vector<22x256xf32>
    tpu.vector_store %arg15[%c0_37, %c0_38], %62 {strides = array<i32>} : memref<22x256xf32, #tpu.memory_space<vmem>>, vector<22x256xf32>,
    %c1_39 = arith.constant 1 : index
    %c0_40 = arith.constant 0 : index
    %64 = vector.load %arg18[%c1_39, %c0_40] : memref<36x256xf32, #tpu.memory_space<vmem>>, vector<1x256xf32>
    %c2_41 = arith.constant 2 : index
    %c0_42 = arith.constant 0 : index
    %65 = vector.load %arg15[%c2_41, %c0_42] : memref<22x256xf32, #tpu.memory_space<vmem>>, vector<1x256xf32>
    tpu.vector_store %arg15[%c2_41, %c0_42], %64 {strides = array<i32>} : memref<22x256xf32, #tpu.memory_space<vmem>>, vector<1x256xf32>,
    %c3 = arith.constant 3 : index
    %c0_43 = arith.constant 0 : index
    %66 = vector.load %arg18[%c3, %c0_43] : memref<36x256xf32, #tpu.memory_space<vmem>>, vector<1x256xf32>
    %c3_44 = arith.constant 3 : index
    %c0_45 = arith.constant 0 : index
    %67 = vector.load %arg15[%c3_44, %c0_45] : memref<22x256xf32, #tpu.memory_space<vmem>>, vector<1x256xf32>
    tpu.vector_store %arg15[%c3_44, %c0_45], %66 {strides = array<i32>} : memref<22x256xf32, #tpu.memory_space<vmem>>, vector<1x256xf32>,
    %c5 = arith.constant 5 : index
    %c0_46 = arith.constant 0 : index
    %68 = vector.load %arg18[%c5, %c0_46] : memref<36x256xf32, #tpu.memory_space<vmem>>, vector<1x256xf32>
    %c4 = arith.constant 4 : index
    %c0_47 = arith.constant 0 : index
    %69 = vector.load %arg15[%c4, %c0_47] : memref<22x256xf32, #tpu.memory_space<vmem>>, vector<1x256xf32>
    tpu.vector_store %arg15[%c4, %c0_47], %68 {strides = array<i32>} : memref<22x256xf32, #tpu.memory_space<vmem>>, vector<1x256xf32>,
    %c7 = arith.constant 7 : index
    %c0_48 = arith.constant 0 : index
    %70 = vector.load %arg18[%c7, %c0_48] : memref<36x256xf32, #tpu.memory_space<vmem>>, vector<1x256xf32>
    %c5_49 = arith.constant 5 : index
    %c0_50 = arith.constant 0 : index
    %71 = vector.load %arg15[%c5_49, %c0_50] : memref<22x256xf32, #tpu.memory_space<vmem>>, vector<1x256xf32>
    tpu.vector_store %arg15[%c5_49, %c0_50], %70 {strides = array<i32>} : memref<22x256xf32, #tpu.memory_space<vmem>>, vector<1x256xf32>,
    %c9 = arith.constant 9 : index
    %c0_51 = arith.constant 0 : index
    %72 = vector.load %arg18[%c9, %c0_51] : memref<36x256xf32, #tpu.memory_space<vmem>>, vector<1x256xf32>
    %c6 = arith.constant 6 : index
    %c0_52 = arith.constant 0 : index
    %73 = vector.load %arg15[%c6, %c0_52] : memref<22x256xf32, #tpu.memory_space<vmem>>, vector<1x256xf32>
    tpu.vector_store %arg15[%c6, %c0_52], %72 {strides = array<i32>} : memref<22x256xf32, #tpu.memory_space<vmem>>, vector<1x256xf32>,
    %c11 = arith.constant 11 : index
    %c0_53 = arith.constant 0 : index
    %74 = vector.load %arg18[%c11, %c0_53] : memref<36x256xf32, #tpu.memory_space<vmem>>, vector<1x256xf32>
    %c7_54 = arith.constant 7 : index
    %c0_55 = arith.constant 0 : index
    %75 = vector.load %arg15[%c7_54, %c0_55] : memref<22x256xf32, #tpu.memory_space<vmem>>, vector<1x256xf32>
    tpu.vector_store %arg15[%c7_54, %c0_55], %74 {strides = array<i32>} : memref<22x256xf32, #tpu.memory_space<vmem>>, vector<1x256xf32>,
    %c13 = arith.constant 13 : index
    %c0_56 = arith.constant 0 : index
    %76 = vector.load %arg18[%c13, %c0_56] : memref<36x256xf32, #tpu.memory_space<vmem>>, vector<1x256xf32>
    %c8 = arith.constant 8 : index
    %c0_57 = arith.constant 0 : index
    %77 = vector.load %arg15[%c8, %c0_57] : memref<22x256xf32, #tpu.memory_space<vmem>>, vector<1x256xf32>
    tpu.vector_store %arg15[%c8, %c0_57], %76 {strides = array<i32>} : memref<22x256xf32, #tpu.memory_space<vmem>>, vector<1x256xf32>,
    %c15 = arith.constant 15 : index
    %c0_58 = arith.constant 0 : index
    %78 = vector.load %arg18[%c15, %c0_58] : memref<36x256xf32, #tpu.memory_space<vmem>>, vector<1x256xf32>
    %c9_59 = arith.constant 9 : index
    %c0_60 = arith.constant 0 : index
    %79 = vector.load %arg15[%c9_59, %c0_60] : memref<22x256xf32, #tpu.memory_space<vmem>>, vector<1x256xf32>
    tpu.vector_store %arg15[%c9_59, %c0_60], %78 {strides = array<i32>} : memref<22x256xf32, #tpu.memory_space<vmem>>, vector<1x256xf32>,
    %c19 = arith.constant 19 : index
    %c0_61 = arith.constant 0 : index
    %80 = vector.load %arg18[%c19, %c0_61] : memref<36x256xf32, #tpu.memory_space<vmem>>, vector<1x256xf32>
    %c12 = arith.constant 12 : index
    %c0_62 = arith.constant 0 : index
    %81 = vector.load %arg15[%c12, %c0_62] : memref<22x256xf32, #tpu.memory_space<vmem>>, vector<1x256xf32>
    tpu.vector_store %arg15[%c12, %c0_62], %80 {strides = array<i32>} : memref<22x256xf32, #tpu.memory_space<vmem>>, vector<1x256xf32>,
    %c21 = arith.constant 21 : index
    %c0_63 = arith.constant 0 : index
    %82 = vector.load %arg18[%c21, %c0_63] : memref<36x256xf32, #tpu.memory_space<vmem>>, vector<1x256xf32>
    %c13_64 = arith.constant 13 : index
    %c0_65 = arith.constant 0 : index
    %83 = vector.load %arg15[%c13_64, %c0_65] : memref<22x256xf32, #tpu.memory_space<vmem>>, vector<1x256xf32>
    tpu.vector_store %arg15[%c13_64, %c0_65], %82 {strides = array<i32>} : memref<22x256xf32, #tpu.memory_space<vmem>>, vector<1x256xf32>,
    %c23 = arith.constant 23 : index
    %c0_66 = arith.constant 0 : index
    %84 = vector.load %arg18[%c23, %c0_66] : memref<36x256xf32, #tpu.memory_space<vmem>>, vector<1x256xf32>
    %c14 = arith.constant 14 : index
    %c0_67 = arith.constant 0 : index
    %85 = vector.load %arg15[%c14, %c0_67] : memref<22x256xf32, #tpu.memory_space<vmem>>, vector<1x256xf32>
    tpu.vector_store %arg15[%c14, %c0_67], %84 {strides = array<i32>} : memref<22x256xf32, #tpu.memory_space<vmem>>, vector<1x256xf32>,
    %c25 = arith.constant 25 : index
    %c0_68 = arith.constant 0 : index
    %86 = vector.load %arg18[%c25, %c0_68] : memref<36x256xf32, #tpu.memory_space<vmem>>, vector<1x256xf32>
    %c15_69 = arith.constant 15 : index
    %c0_70 = arith.constant 0 : index
    %87 = vector.load %arg15[%c15_69, %c0_70] : memref<22x256xf32, #tpu.memory_space<vmem>>, vector<1x256xf32>
    tpu.vector_store %arg15[%c15_69, %c0_70], %86 {strides = array<i32>} : memref<22x256xf32, #tpu.memory_space<vmem>>, vector<1x256xf32>,
    %c27 = arith.constant 27 : index
    %c0_71 = arith.constant 0 : index
    %88 = vector.load %arg18[%c27, %c0_71] : memref<36x256xf32, #tpu.memory_space<vmem>>, vector<1x256xf32>
    %c16_72 = arith.constant 16 : index
    %c0_73 = arith.constant 0 : index
    %89 = vector.load %arg15[%c16_72, %c0_73] : memref<22x256xf32, #tpu.memory_space<vmem>>, vector<1x256xf32>
    tpu.vector_store %arg15[%c16_72, %c0_73], %88 {strides = array<i32>} : memref<22x256xf32, #tpu.memory_space<vmem>>, vector<1x256xf32>,
    %c29 = arith.constant 29 : index
    %c0_74 = arith.constant 0 : index
    %90 = vector.load %arg18[%c29, %c0_74] : memref<36x256xf32, #tpu.memory_space<vmem>>, vector<1x256xf32>
    %c17 = arith.constant 17 : index
    %c0_75 = arith.constant 0 : index
    %91 = vector.load %arg15[%c17, %c0_75] : memref<22x256xf32, #tpu.memory_space<vmem>>, vector<1x256xf32>
    tpu.vector_store %arg15[%c17, %c0_75], %90 {strides = array<i32>} : memref<22x256xf32, #tpu.memory_space<vmem>>, vector<1x256xf32>,
    %c31 = arith.constant 31 : index
    %c0_76 = arith.constant 0 : index
    %92 = vector.load %arg18[%c31, %c0_76] : memref<36x256xf32, #tpu.memory_space<vmem>>, vector<1x256xf32>
    %c18 = arith.constant 18 : index
    %c0_77 = arith.constant 0 : index
    %93 = vector.load %arg15[%c18, %c0_77] : memref<22x256xf32, #tpu.memory_space<vmem>>, vector<1x256xf32>
    tpu.vector_store %arg15[%c18, %c0_77], %92 {strides = array<i32>} : memref<22x256xf32, #tpu.memory_space<vmem>>, vector<1x256xf32>,
    %c33 = arith.constant 33 : index
    %c0_78 = arith.constant 0 : index
    %94 = vector.load %arg18[%c33, %c0_78] : memref<36x256xf32, #tpu.memory_space<vmem>>, vector<1x256xf32>
    %c19_79 = arith.constant 19 : index
    %c0_80 = arith.constant 0 : index
    %95 = vector.load %arg15[%c19_79, %c0_80] : memref<22x256xf32, #tpu.memory_space<vmem>>, vector<1x256xf32>
    tpu.vector_store %arg15[%c19_79, %c0_80], %94 {strides = array<i32>} : memref<22x256xf32, #tpu.memory_space<vmem>>, vector<1x256xf32>,
    %cst_81 = arith.constant 0.000000e+00 : f32
    %96 = vector.broadcast %cst_81 : f32 to vector<20x512xf32>
    %c0_82 = arith.constant 0 : index
    %c0_83 = arith.constant 0 : index
    %97 = vector.load %arg15[%c0_82, %c0_83] : memref<22x256xf32, #tpu.memory_space<vmem>>, vector<20x256xf32>
    %c0_84 = arith.constant 0 : index
    %c0_85 = arith.constant 0 : index
    %c0_86 = arith.constant 0 : index
    %98 = vector.load %arg2[%c0_84, %c0_85, %c0_86] : memref<3x256x512xf32, #tpu.memory_space<vmem>>, vector<1x256x512xf32>
    %99 = vector.shape_cast %98 : vector<1x256x512xf32> to vector<256x512xf32>
    %cst_87 = arith.constant dense<0.000000e+00> : vector<20x512xf32>
    %100 = tpu.matmul %97, %99, %cst_87 {dimension_numbers = #tpu.dot_dimension_numbers<[1], [0], [0], [1], [0, 0, 1, 1], [], []>} : vector<20x256xf32>, vector<256x512xf32>, vector<20x512xf32> -> vector<20x512xf32>
    %101 = arith.addf %96, %100 : vector<20x512xf32>
    %c1_88 = arith.constant 1 : index
    %c0_89 = arith.constant 0 : index
    %102 = vector.load %arg15[%c1_88, %c0_89] : memref<22x256xf32, #tpu.memory_space<vmem>>, vector<20x256xf32>
    %c1_90 = arith.constant 1 : index
    %c0_91 = arith.constant 0 : index
    %c0_92 = arith.constant 0 : index
    %103 = vector.load %arg2[%c1_90, %c0_91, %c0_92] : memref<3x256x512xf32, #tpu.memory_space<vmem>>, vector<1x256x512xf32>
    %104 = vector.shape_cast %103 : vector<1x256x512xf32> to vector<256x512xf32>
    %cst_93 = arith.constant dense<0.000000e+00> : vector<20x512xf32>
    %105 = tpu.matmul %102, %104, %cst_93 {dimension_numbers = #tpu.dot_dimension_numbers<[1], [0], [0], [1], [0, 0, 1, 1], [], []>} : vector<20x256xf32>, vector<256x512xf32>, vector<20x512xf32> -> vector<20x512xf32>
    %106 = arith.addf %101, %105 : vector<20x512xf32>
    %c2_94 = arith.constant 2 : index
    %c0_95 = arith.constant 0 : index
    %107 = vector.load %arg15[%c2_94, %c0_95] : memref<22x256xf32, #tpu.memory_space<vmem>>, vector<20x256xf32>
    %c2_96 = arith.constant 2 : index
    %c0_97 = arith.constant 0 : index
    %c0_98 = arith.constant 0 : index
    %108 = vector.load %arg2[%c2_96, %c0_97, %c0_98] : memref<3x256x512xf32, #tpu.memory_space<vmem>>, vector<1x256x512xf32>
    %109 = vector.shape_cast %108 : vector<1x256x512xf32> to vector<256x512xf32>
    %cst_99 = arith.constant dense<0.000000e+00> : vector<20x512xf32>
    %110 = tpu.matmul %107, %109, %cst_99 {dimension_numbers = #tpu.dot_dimension_numbers<[1], [0], [0], [1], [0, 0, 1, 1], [], []>} : vector<20x256xf32>, vector<256x512xf32>, vector<20x512xf32> -> vector<20x512xf32>
    %111 = arith.addf %106, %110 : vector<20x512xf32>
    %c0_100 = arith.constant 0 : index
    %c0_101 = arith.constant 0 : index
    %112 = vector.load %arg6[%c0_100, %c0_101] : memref<1x512xf32, #tpu.memory_space<vmem>>, vector<1x512xf32>
    %113 = vector.broadcast %112 : vector<1x512xf32> to vector<20x512xf32>
    %114 = arith.addf %111, %113 : vector<20x512xf32>
    %cst_102 = arith.constant 0.000000e+00 : f32
    %115 = vector.broadcast %cst_102 : f32 to vector<20x512xf32>
    %116 = arith.maximumf %114, %115 : vector<20x512xf32>
    %117 = vector.extract_strided_slice %116 {offsets = [0, 0], sizes = [19, 512], strides = [1, 1]} : vector<20x512xf32> to vector<19x512xf32>
    %118 = vector.extract_strided_slice %116 {offsets = [1, 0], sizes = [19, 512], strides = [1, 1]} : vector<20x512xf32> to vector<19x512xf32>
    %119 = arith.maximumf %117, %118 : vector<19x512xf32>
    %120 = vector.extract_strided_slice %119 {offsets = [0, 0], sizes = [19, 64], strides = [1, 1]} : vector<19x512xf32> to vector<19x64xf32>
    %121 = vector.extract_strided_slice %119 {offsets = [0, 64], sizes = [19, 64], strides = [1, 1]} : vector<19x512xf32> to vector<19x64xf32>
    %122 = arith.maximumf %120, %121 : vector<19x64xf32>
    %c0_103 = arith.constant 0 : index
    %c0_104 = arith.constant 0 : index
    %123 = vector.load %arg18[%c0_103, %c0_104] : memref<36x256xf32, #tpu.memory_space<vmem>>, vector<19x64xf32>
    tpu.vector_store %arg18[%c0_103, %c0_104], %122 {strides = array<i32>} : memref<36x256xf32, #tpu.memory_space<vmem>>, vector<19x64xf32>,
    %124 = vector.extract_strided_slice %119 {offsets = [0, 128], sizes = [19, 64], strides = [1, 1]} : vector<19x512xf32> to vector<19x64xf32>
    %125 = vector.extract_strided_slice %119 {offsets = [0, 192], sizes = [19, 64], strides = [1, 1]} : vector<19x512xf32> to vector<19x64xf32>
    %126 = arith.maximumf %124, %125 : vector<19x64xf32>
    %c0_105 = arith.constant 0 : index
    %c64_106 = arith.constant 64 : index
    %127 = vector.load %arg18[%c0_105, %c64_106] : memref<36x256xf32, #tpu.memory_space<vmem>>, vector<19x64xf32>
    tpu.vector_store %arg18[%c0_105, %c64_106], %126 {strides = array<i32>} : memref<36x256xf32, #tpu.memory_space<vmem>>, vector<19x64xf32>,
    %128 = vector.extract_strided_slice %119 {offsets = [0, 256], sizes = [19, 64], strides = [1, 1]} : vector<19x512xf32> to vector<19x64xf32>
    %129 = vector.extract_strided_slice %119 {offsets = [0, 320], sizes = [19, 64], strides = [1, 1]} : vector<19x512xf32> to vector<19x64xf32>
    %130 = arith.maximumf %128, %129 : vector<19x64xf32>
    %c0_107 = arith.constant 0 : index
    %c128_108 = arith.constant 128 : index
    %131 = vector.load %arg18[%c0_107, %c128_108] : memref<36x256xf32, #tpu.memory_space<vmem>>, vector<19x64xf32>
    tpu.vector_store %arg18[%c0_107, %c128_108], %130 {strides = array<i32>} : memref<36x256xf32, #tpu.memory_space<vmem>>, vector<19x64xf32>,
    %132 = vector.extract_strided_slice %119 {offsets = [0, 384], sizes = [19, 64], strides = [1, 1]} : vector<19x512xf32> to vector<19x64xf32>
    %133 = vector.extract_strided_slice %119 {offsets = [0, 448], sizes = [19, 64], strides = [1, 1]} : vector<19x512xf32> to vector<19x64xf32>
    %134 = arith.maximumf %132, %133 : vector<19x64xf32>
    %c0_109 = arith.constant 0 : index
    %c192_110 = arith.constant 192 : index
    %135 = vector.load %arg18[%c0_109, %c192_110] : memref<36x256xf32, #tpu.memory_space<vmem>>, vector<19x64xf32>
    tpu.vector_store %arg18[%c0_109, %c192_110], %134 {strides = array<i32>} : memref<36x256xf32, #tpu.memory_space<vmem>>, vector<19x64xf32>,
    %cst_111 = arith.constant 0.000000e+00 : f32
    %136 = vector.broadcast %cst_111 : f32 to vector<14x256xf32>
    %c0_112 = arith.constant 0 : index
    %c0_113 = arith.constant 0 : index
    %137 = vector.load %arg16[%c0_112, %c0_113] : memref<14x256xf32, #tpu.memory_space<vmem>>, vector<14x256xf32>
    tpu.vector_store %arg16[%c0_112, %c0_113], %136 {strides = array<i32>} : memref<14x256xf32, #tpu.memory_space<vmem>>, vector<14x256xf32>,
    %c1_114 = arith.constant 1 : index
    %c0_115 = arith.constant 0 : index
    %138 = vector.load %arg18[%c1_114, %c0_115] : memref<36x256xf32, #tpu.memory_space<vmem>>, vector<1x256xf32>
    %c2_116 = arith.constant 2 : index
    %c0_117 = arith.constant 0 : index
    %139 = vector.load %arg16[%c2_116, %c0_117] : memref<14x256xf32, #tpu.memory_space<vmem>>, vector<1x256xf32>
    tpu.vector_store %arg16[%c2_116, %c0_117], %138 {strides = array<i32>} : memref<14x256xf32, #tpu.memory_space<vmem>>, vector<1x256xf32>,
    %c3_118 = arith.constant 3 : index
    %c0_119 = arith.constant 0 : index
    %140 = vector.load %arg18[%c3_118, %c0_119] : memref<36x256xf32, #tpu.memory_space<vmem>>, vector<1x256xf32>
    %c3_120 = arith.constant 3 : index
    %c0_121 = arith.constant 0 : index
    %141 = vector.load %arg16[%c3_120, %c0_121] : memref<14x256xf32, #tpu.memory_space<vmem>>, vector<1x256xf32>
    tpu.vector_store %arg16[%c3_120, %c0_121], %140 {strides = array<i32>} : memref<14x256xf32, #tpu.memory_space<vmem>>, vector<1x256xf32>,
    %c5_122 = arith.constant 5 : index
    %c0_123 = arith.constant 0 : index
    %142 = vector.load %arg18[%c5_122, %c0_123] : memref<36x256xf32, #tpu.memory_space<vmem>>, vector<1x256xf32>
    %c4_124 = arith.constant 4 : index
    %c0_125 = arith.constant 0 : index
    %143 = vector.load %arg16[%c4_124, %c0_125] : memref<14x256xf32, #tpu.memory_space<vmem>>, vector<1x256xf32>
    tpu.vector_store %arg16[%c4_124, %c0_125], %142 {strides = array<i32>} : memref<14x256xf32, #tpu.memory_space<vmem>>, vector<1x256xf32>,
    %c7_126 = arith.constant 7 : index
    %c0_127 = arith.constant 0 : index
    %144 = vector.load %arg18[%c7_126, %c0_127] : memref<36x256xf32, #tpu.memory_space<vmem>>, vector<1x256xf32>
    %c5_128 = arith.constant 5 : index
    %c0_129 = arith.constant 0 : index
    %145 = vector.load %arg16[%c5_128, %c0_129] : memref<14x256xf32, #tpu.memory_space<vmem>>, vector<1x256xf32>
    tpu.vector_store %arg16[%c5_128, %c0_129], %144 {strides = array<i32>} : memref<14x256xf32, #tpu.memory_space<vmem>>, vector<1x256xf32>,
    %c11_130 = arith.constant 11 : index
    %c0_131 = arith.constant 0 : index
    %146 = vector.load %arg18[%c11_130, %c0_131] : memref<36x256xf32, #tpu.memory_space<vmem>>, vector<1x256xf32>
    %c8_132 = arith.constant 8 : index
    %c0_133 = arith.constant 0 : index
    %147 = vector.load %arg16[%c8_132, %c0_133] : memref<14x256xf32, #tpu.memory_space<vmem>>, vector<1x256xf32>
    tpu.vector_store %arg16[%c8_132, %c0_133], %146 {strides = array<i32>} : memref<14x256xf32, #tpu.memory_space<vmem>>, vector<1x256xf32>,
    %c13_134 = arith.constant 13 : index
    %c0_135 = arith.constant 0 : index
    %148 = vector.load %arg18[%c13_134, %c0_135] : memref<36x256xf32, #tpu.memory_space<vmem>>, vector<1x256xf32>
    %c9_136 = arith.constant 9 : index
    %c0_137 = arith.constant 0 : index
    %149 = vector.load %arg16[%c9_136, %c0_137] : memref<14x256xf32, #tpu.memory_space<vmem>>, vector<1x256xf32>
    tpu.vector_store %arg16[%c9_136, %c0_137], %148 {strides = array<i32>} : memref<14x256xf32, #tpu.memory_space<vmem>>, vector<1x256xf32>,
    %c15_138 = arith.constant 15 : index
    %c0_139 = arith.constant 0 : index
    %150 = vector.load %arg18[%c15_138, %c0_139] : memref<36x256xf32, #tpu.memory_space<vmem>>, vector<1x256xf32>
    %c10 = arith.constant 10 : index
    %c0_140 = arith.constant 0 : index
    %151 = vector.load %arg16[%c10, %c0_140] : memref<14x256xf32, #tpu.memory_space<vmem>>, vector<1x256xf32>
    tpu.vector_store %arg16[%c10, %c0_140], %150 {strides = array<i32>} : memref<14x256xf32, #tpu.memory_space<vmem>>, vector<1x256xf32>,
    %c17_141 = arith.constant 17 : index
    %c0_142 = arith.constant 0 : index
    %152 = vector.load %arg18[%c17_141, %c0_142] : memref<36x256xf32, #tpu.memory_space<vmem>>, vector<1x256xf32>
    %c11_143 = arith.constant 11 : index
    %c0_144 = arith.constant 0 : index
    %153 = vector.load %arg16[%c11_143, %c0_144] : memref<14x256xf32, #tpu.memory_space<vmem>>, vector<1x256xf32>
    tpu.vector_store %arg16[%c11_143, %c0_144], %152 {strides = array<i32>} : memref<14x256xf32, #tpu.memory_space<vmem>>, vector<1x256xf32>,
    %cst_145 = arith.constant 0.000000e+00 : f32
    %154 = vector.broadcast %cst_145 : f32 to vector<12x512xf32>
    %c0_146 = arith.constant 0 : index
    %c0_147 = arith.constant 0 : index
    %155 = vector.load %arg16[%c0_146, %c0_147] : memref<14x256xf32, #tpu.memory_space<vmem>>, vector<12x256xf32>
    %c0_148 = arith.constant 0 : index
    %c0_149 = arith.constant 0 : index
    %c0_150 = arith.constant 0 : index
    %156 = vector.load %arg3[%c0_148, %c0_149, %c0_150] : memref<3x256x512xf32, #tpu.memory_space<vmem>>, vector<1x256x512xf32>
    %157 = vector.shape_cast %156 : vector<1x256x512xf32> to vector<256x512xf32>
    %cst_151 = arith.constant dense<0.000000e+00> : vector<12x512xf32>
    %158 = tpu.matmul %155, %157, %cst_151 {dimension_numbers = #tpu.dot_dimension_numbers<[1], [0], [0], [1], [0, 0, 1, 1], [], []>} : vector<12x256xf32>, vector<256x512xf32>, vector<12x512xf32> -> vector<12x512xf32>
    %159 = arith.addf %154, %158 : vector<12x512xf32>
    %c1_152 = arith.constant 1 : index
    %c0_153 = arith.constant 0 : index
    %160 = vector.load %arg16[%c1_152, %c0_153] : memref<14x256xf32, #tpu.memory_space<vmem>>, vector<12x256xf32>
    %c1_154 = arith.constant 1 : index
    %c0_155 = arith.constant 0 : index
    %c0_156 = arith.constant 0 : index
    %161 = vector.load %arg3[%c1_154, %c0_155, %c0_156] : memref<3x256x512xf32, #tpu.memory_space<vmem>>, vector<1x256x512xf32>
    %162 = vector.shape_cast %161 : vector<1x256x512xf32> to vector<256x512xf32>
    %cst_157 = arith.constant dense<0.000000e+00> : vector<12x512xf32>
    %163 = tpu.matmul %160, %162, %cst_157 {dimension_numbers = #tpu.dot_dimension_numbers<[1], [0], [0], [1], [0, 0, 1, 1], [], []>} : vector<12x256xf32>, vector<256x512xf32>, vector<12x512xf32> -> vector<12x512xf32>
    %164 = arith.addf %159, %163 : vector<12x512xf32>
    %c2_158 = arith.constant 2 : index
    %c0_159 = arith.constant 0 : index
    %165 = vector.load %arg16[%c2_158, %c0_159] : memref<14x256xf32, #tpu.memory_space<vmem>>, vector<12x256xf32>
    %c2_160 = arith.constant 2 : index
    %c0_161 = arith.constant 0 : index
    %c0_162 = arith.constant 0 : index
    %166 = vector.load %arg3[%c2_160, %c0_161, %c0_162] : memref<3x256x512xf32, #tpu.memory_space<vmem>>, vector<1x256x512xf32>
    %167 = vector.shape_cast %166 : vector<1x256x512xf32> to vector<256x512xf32>
    %cst_163 = arith.constant dense<0.000000e+00> : vector<12x512xf32>
    %168 = tpu.matmul %165, %167, %cst_163 {dimension_numbers = #tpu.dot_dimension_numbers<[1], [0], [0], [1], [0, 0, 1, 1], [], []>} : vector<12x256xf32>, vector<256x512xf32>, vector<12x512xf32> -> vector<12x512xf32>
    %169 = arith.addf %164, %168 : vector<12x512xf32>
    %c0_164 = arith.constant 0 : index
    %c0_165 = arith.constant 0 : index
    %170 = vector.load %arg7[%c0_164, %c0_165] : memref<1x512xf32, #tpu.memory_space<vmem>>, vector<1x512xf32>
    %171 = vector.broadcast %170 : vector<1x512xf32> to vector<12x512xf32>
    %172 = arith.addf %169, %171 : vector<12x512xf32>
    %cst_166 = arith.constant 0.000000e+00 : f32
    %173 = vector.broadcast %cst_166 : f32 to vector<12x512xf32>
    %174 = arith.maximumf %172, %173 : vector<12x512xf32>
    %175 = vector.extract_strided_slice %174 {offsets = [0, 0], sizes = [11, 512], strides = [1, 1]} : vector<12x512xf32> to vector<11x512xf32>
    %176 = vector.extract_strided_slice %174 {offsets = [1, 0], sizes = [11, 512], strides = [1, 1]} : vector<12x512xf32> to vector<11x512xf32>
    %177 = arith.maximumf %175, %176 : vector<11x512xf32>
    %178 = vector.extract_strided_slice %177 {offsets = [0, 0], sizes = [11, 128], strides = [1, 1]} : vector<11x512xf32> to vector<11x128xf32>
    %179 = vector.extract_strided_slice %177 {offsets = [0, 128], sizes = [11, 128], strides = [1, 1]} : vector<11x512xf32> to vector<11x128xf32>
    %180 = arith.maximumf %178, %179 : vector<11x128xf32>
    %c0_167 = arith.constant 0 : index
    %c0_168 = arith.constant 0 : index
    %181 = vector.load %arg18[%c0_167, %c0_168] : memref<36x256xf32, #tpu.memory_space<vmem>>, vector<11x128xf32>
    tpu.vector_store %arg18[%c0_167, %c0_168], %180 {strides = array<i32>} : memref<36x256xf32, #tpu.memory_space<vmem>>, vector<11x128xf32>,
    %182 = vector.extract_strided_slice %177 {offsets = [0, 256], sizes = [11, 128], strides = [1, 1]} : vector<11x512xf32> to vector<11x128xf32>
    %183 = vector.extract_strided_slice %177 {offsets = [0, 384], sizes = [11, 128], strides = [1, 1]} : vector<11x512xf32> to vector<11x128xf32>
    %184 = arith.maximumf %182, %183 : vector<11x128xf32>
    %c0_169 = arith.constant 0 : index
    %c128_170 = arith.constant 128 : index
    %185 = vector.load %arg18[%c0_169, %c128_170] : memref<36x256xf32, #tpu.memory_space<vmem>>, vector<11x128xf32>
    tpu.vector_store %arg18[%c0_169, %c128_170], %184 {strides = array<i32>} : memref<36x256xf32, #tpu.memory_space<vmem>>, vector<11x128xf32>,
    %cst_171 = arith.constant 0.000000e+00 : f32
    %186 = vector.broadcast %cst_171 : f32 to vector<10x256xf32>
    %c0_172 = arith.constant 0 : index
    %c0_173 = arith.constant 0 : index
    %187 = vector.load %arg17[%c0_172, %c0_173] : memref<10x256xf32, #tpu.memory_space<vmem>>, vector<10x256xf32>
    tpu.vector_store %arg17[%c0_172, %c0_173], %186 {strides = array<i32>} : memref<10x256xf32, #tpu.memory_space<vmem>>, vector<10x256xf32>,
    %c1_174 = arith.constant 1 : index
    %c0_175 = arith.constant 0 : index
    %188 = vector.load %arg18[%c1_174, %c0_175] : memref<36x256xf32, #tpu.memory_space<vmem>>, vector<1x256xf32>
    %c2_176 = arith.constant 2 : index
    %c0_177 = arith.constant 0 : index
    %189 = vector.load %arg17[%c2_176, %c0_177] : memref<10x256xf32, #tpu.memory_space<vmem>>, vector<1x256xf32>
    tpu.vector_store %arg17[%c2_176, %c0_177], %188 {strides = array<i32>} : memref<10x256xf32, #tpu.memory_space<vmem>>, vector<1x256xf32>,
    %c3_178 = arith.constant 3 : index
    %c0_179 = arith.constant 0 : index
    %190 = vector.load %arg18[%c3_178, %c0_179] : memref<36x256xf32, #tpu.memory_space<vmem>>, vector<1x256xf32>
    %c3_180 = arith.constant 3 : index
    %c0_181 = arith.constant 0 : index
    %191 = vector.load %arg17[%c3_180, %c0_181] : memref<10x256xf32, #tpu.memory_space<vmem>>, vector<1x256xf32>
    tpu.vector_store %arg17[%c3_180, %c0_181], %190 {strides = array<i32>} : memref<10x256xf32, #tpu.memory_space<vmem>>, vector<1x256xf32>,
    %c7_182 = arith.constant 7 : index
    %c0_183 = arith.constant 0 : index
    %192 = vector.load %arg18[%c7_182, %c0_183] : memref<36x256xf32, #tpu.memory_space<vmem>>, vector<1x256xf32>
    %c6_184 = arith.constant 6 : index
    %c0_185 = arith.constant 0 : index
    %193 = vector.load %arg17[%c6_184, %c0_185] : memref<10x256xf32, #tpu.memory_space<vmem>>, vector<1x256xf32>
    tpu.vector_store %arg17[%c6_184, %c0_185], %192 {strides = array<i32>} : memref<10x256xf32, #tpu.memory_space<vmem>>, vector<1x256xf32>,
    %c9_186 = arith.constant 9 : index
    %c0_187 = arith.constant 0 : index
    %194 = vector.load %arg18[%c9_186, %c0_187] : memref<36x256xf32, #tpu.memory_space<vmem>>, vector<1x256xf32>
    %c7_188 = arith.constant 7 : index
    %c0_189 = arith.constant 0 : index
    %195 = vector.load %arg17[%c7_188, %c0_189] : memref<10x256xf32, #tpu.memory_space<vmem>>, vector<1x256xf32>
    tpu.vector_store %arg17[%c7_188, %c0_189], %194 {strides = array<i32>} : memref<10x256xf32, #tpu.memory_space<vmem>>, vector<1x256xf32>,
    %cst_190 = arith.constant 0.000000e+00 : f32
    %196 = vector.broadcast %cst_190 : f32 to vector<8x512xf32>
    %c0_191 = arith.constant 0 : index
    %c0_192 = arith.constant 0 : index
    %197 = vector.load %arg17[%c0_191, %c0_192] : memref<10x256xf32, #tpu.memory_space<vmem>>, vector<8x256xf32>
    %c0_193 = arith.constant 0 : index
    %c0_194 = arith.constant 0 : index
    %c0_195 = arith.constant 0 : index
    %198 = vector.load %arg4[%c0_193, %c0_194, %c0_195] : memref<3x256x512xf32, #tpu.memory_space<vmem>>, vector<1x256x512xf32>
    %199 = vector.shape_cast %198 : vector<1x256x512xf32> to vector<256x512xf32>
    %cst_196 = arith.constant dense<0.000000e+00> : vector<8x512xf32>
    %200 = tpu.matmul %197, %199, %cst_196 {dimension_numbers = #tpu.dot_dimension_numbers<[1], [0], [0], [1], [0, 0, 1, 1], [], []>} : vector<8x256xf32>, vector<256x512xf32>, vector<8x512xf32> -> vector<8x512xf32>
    %201 = arith.addf %196, %200 : vector<8x512xf32>
    %c1_197 = arith.constant 1 : index
    %c0_198 = arith.constant 0 : index
    %202 = vector.load %arg17[%c1_197, %c0_198] : memref<10x256xf32, #tpu.memory_space<vmem>>, vector<8x256xf32>
    %c1_199 = arith.constant 1 : index
    %c0_200 = arith.constant 0 : index
    %c0_201 = arith.constant 0 : index
    %203 = vector.load %arg4[%c1_199, %c0_200, %c0_201] : memref<3x256x512xf32, #tpu.memory_space<vmem>>, vector<1x256x512xf32>
    %204 = vector.shape_cast %203 : vector<1x256x512xf32> to vector<256x512xf32>
    %cst_202 = arith.constant dense<0.000000e+00> : vector<8x512xf32>
    %205 = tpu.matmul %202, %204, %cst_202 {dimension_numbers = #tpu.dot_dimension_numbers<[1], [0], [0], [1], [0, 0, 1, 1], [], []>} : vector<8x256xf32>, vector<256x512xf32>, vector<8x512xf32> -> vector<8x512xf32>
    %206 = arith.addf %201, %205 : vector<8x512xf32>
    %c2_203 = arith.constant 2 : index
    %c0_204 = arith.constant 0 : index
    %207 = vector.load %arg17[%c2_203, %c0_204] : memref<10x256xf32, #tpu.memory_space<vmem>>, vector<8x256xf32>
    %c2_205 = arith.constant 2 : index
    %c0_206 = arith.constant 0 : index
    %c0_207 = arith.constant 0 : index
    %208 = vector.load %arg4[%c2_205, %c0_206, %c0_207] : memref<3x256x512xf32, #tpu.memory_space<vmem>>, vector<1x256x512xf32>
    %209 = vector.shape_cast %208 : vector<1x256x512xf32> to vector<256x512xf32>
    %cst_208 = arith.constant dense<0.000000e+00> : vector<8x512xf32>
    %210 = tpu.matmul %207, %209, %cst_208 {dimension_numbers = #tpu.dot_dimension_numbers<[1], [0], [0], [1], [0, 0, 1, 1], [], []>} : vector<8x256xf32>, vector<256x512xf32>, vector<8x512xf32> -> vector<8x512xf32>
    %211 = arith.addf %206, %210 : vector<8x512xf32>
    %c0_209 = arith.constant 0 : index
    %c0_210 = arith.constant 0 : index
    %212 = vector.load %arg8[%c0_209, %c0_210] : memref<1x512xf32, #tpu.memory_space<vmem>>, vector<1x512xf32>
    %213 = vector.broadcast %212 : vector<1x512xf32> to vector<8x512xf32>
    %214 = arith.addf %211, %213 : vector<8x512xf32>
    %cst_211 = arith.constant 0.000000e+00 : f32
    %215 = vector.broadcast %cst_211 : f32 to vector<8x512xf32>
    %216 = arith.maximumf %214, %215 : vector<8x512xf32>
    %217 = vector.extract_strided_slice %216 {offsets = [0, 0], sizes = [8, 256], strides = [1, 1]} : vector<8x512xf32> to vector<8x256xf32>
    %218 = vector.extract_strided_slice %216 {offsets = [0, 256], sizes = [8, 256], strides = [1, 1]} : vector<8x512xf32> to vector<8x256xf32>
    %219 = arith.addf %217, %218 : vector<8x256xf32>
    %220 = vector.extract_strided_slice %219 {offsets = [1, 0], sizes = [2, 256], strides = [1, 1]} : vector<8x256xf32> to vector<2x256xf32>
    %cst_212 = arith.constant dense<0.000000e+00> : vector<256xf32>
    %221 = vector.multi_reduction <add>, %220, %cst_212 [0] : vector<2x256xf32> to vector<256xf32>
    %222 = vector.shape_cast %221 : vector<256xf32> to vector<1x256xf32>
    %cst_213 = arith.constant 2.500000e-01 : f32
    %223 = vector.broadcast %cst_213 : f32 to vector<1x256xf32>
    %224 = arith.mulf %222, %223 : vector<1x256xf32>
    %c0_214 = arith.constant 0 : index
    %c0_215 = arith.constant 0 : index
    %225 = vector.load %arg19[%c0_214, %c0_215] : memref<2x256xf32, #tpu.memory_space<vmem>>, vector<1x256xf32>
    tpu.vector_store %arg19[%c0_214, %c0_215], %224 {strides = array<i32>} : memref<2x256xf32, #tpu.memory_space<vmem>>, vector<1x256xf32>,
    %226 = vector.extract_strided_slice %219 {offsets = [5, 0], sizes = [2, 256], strides = [1, 1]} : vector<8x256xf32> to vector<2x256xf32>
    %cst_216 = arith.constant dense<0.000000e+00> : vector<256xf32>
    %227 = vector.multi_reduction <add>, %226, %cst_216 [0] : vector<2x256xf32> to vector<256xf32>
    %228 = vector.shape_cast %227 : vector<256xf32> to vector<1x256xf32>
    %cst_217 = arith.constant 2.500000e-01 : f32
    %229 = vector.broadcast %cst_217 : f32 to vector<1x256xf32>
    %230 = arith.mulf %228, %229 : vector<1x256xf32>
    %c1_218 = arith.constant 1 : index
    %c0_219 = arith.constant 0 : index
    %231 = vector.load %arg19[%c1_218, %c0_219] : memref<2x256xf32, #tpu.memory_space<vmem>>, vector<1x256xf32>
    tpu.vector_store %arg19[%c1_218, %c0_219], %230 {strides = array<i32>} : memref<2x256xf32, #tpu.memory_space<vmem>>, vector<1x256xf32>,
    %c0_220 = arith.constant 0 : index
    %c0_221 = arith.constant 0 : index
    %232 = vector.load %arg19[%c0_220, %c0_221] : memref<2x256xf32, #tpu.memory_space<vmem>>, vector<2x256xf32>
    %c0_222 = arith.constant 0 : index
    %c0_223 = arith.constant 0 : index
    %233 = vector.load %arg9[%c0_222, %c0_223] : memref<256x128xf32, #tpu.memory_space<vmem>>, vector<256x128xf32>
    %cst_224 = arith.constant dense<0.000000e+00> : vector<2x128xf32>
    %234 = tpu.matmul %232, %233, %cst_224 {dimension_numbers = #tpu.dot_dimension_numbers<[1], [0], [0], [1], [0, 0, 1, 1], [], []>} : vector<2x256xf32>, vector<256x128xf32>, vector<2x128xf32> -> vector<2x128xf32>
    %c0_225 = arith.constant 0 : index
    %c0_226 = arith.constant 0 : index
    %235 = vector.load %arg10[%c0_225, %c0_226] : memref<1x128xf32, #tpu.memory_space<vmem>>, vector<1x128xf32>
    %236 = vector.broadcast %235 : vector<1x128xf32> to vector<2x128xf32>
    %237 = arith.addf %234, %236 : vector<2x128xf32>
    %cst_227 = arith.constant dense<0.000000e+00> : vector<2xf32>
    %238 = vector.multi_reduction <add>, %237, %cst_227 [1] : vector<2x128xf32> to vector<2xf32>
    %239 = vector.shape_cast %238 : vector<2xf32> to vector<2x1xf32>
    %cst_228 = arith.constant 1.280000e+02 : f32
    %240 = vector.broadcast %cst_228 : f32 to vector<2x1xf32>
    %241 = arith.divf %239, %240 : vector<2x1xf32>
    %242 = vector.broadcast %241 : vector<2x1xf32> to vector<2x128xf32>
    %243 = arith.subf %237, %242 : vector<2x128xf32>
    %244 = arith.mulf %243, %243 : vector<2x128xf32>
    %cst_229 = arith.constant dense<0.000000e+00> : vector<2xf32>
    %245 = vector.multi_reduction <add>, %244, %cst_229 [1] : vector<2x128xf32> to vector<2xf32>
    %246 = vector.shape_cast %245 : vector<2xf32> to vector<2x1xf32>
    %cst_230 = arith.constant 1.280000e+02 : f32
    %247 = vector.broadcast %cst_230 : f32 to vector<2x1xf32>
    %248 = arith.divf %246, %247 : vector<2x1xf32>
    %cst_231 = arith.constant 9.99999974E-6 : f32
    %249 = vector.broadcast %cst_231 : f32 to vector<2x1xf32>
    %250 = arith.addf %248, %249 : vector<2x1xf32>
    %251 = math.rsqrt %250 : vector<2x1xf32>
    %252 = vector.broadcast %251 : vector<2x1xf32> to vector<2x128xf32>
    %253 = arith.mulf %243, %252 : vector<2x128xf32>
    %c0_232 = arith.constant 0 : index
    %c0_233 = arith.constant 0 : index
    %254 = vector.load %arg11[%c0_232, %c0_233] : memref<1x128xf32, #tpu.memory_space<vmem>>, vector<1x128xf32>
    %255 = vector.broadcast %254 : vector<1x128xf32> to vector<2x128xf32>
    %256 = arith.mulf %253, %255 : vector<2x128xf32>
    %c0_234 = arith.constant 0 : index
    %c0_235 = arith.constant 0 : index
    %257 = vector.load %arg12[%c0_234, %c0_235] : memref<1x128xf32, #tpu.memory_space<vmem>>, vector<1x128xf32>
    %258 = vector.broadcast %257 : vector<1x128xf32> to vector<2x128xf32>
    %259 = arith.addf %256, %258 : vector<2x128xf32>
    %c0_236 = arith.constant 0 : index
    %c0_237 = arith.constant 0 : index
    %260 = vector.load %arg13[%c0_236, %c0_237] : memref<2x128xf32, #tpu.memory_space<vmem>>, vector<2x128xf32>
    tpu.vector_store %arg13[%c0_236, %c0_237], %259 {strides = array<i32>} : memref<2x128xf32, #tpu.memory_space<vmem>>, vector<2x128xf32>,
    return
  }
}

</mosaic_0001>

<bundles_post_ra>
// kernel: _encoder_pallas.1
= control target key start
LH: loop header
LB: loop body
LE: loop exit
PB: predicated region body
PF: predicated region fallthrough
CT: control target
= control target key end

     0   :  { %vm45_vm0 = vcmask 523264   ;;  %vm50_vm1 = vcmask 521216   ;;  %v6936_v7 = vmov 0.0   ;;  %s11492_s0 = inlined_call_operand.vmem [shape: f32[32,64], index: 0, kind: input, shape index: {}]   ;;  %s11493_s1 = inlined_call_operand.vmem [shape: f32[3,64,512], index: 1, kind: input, shape index: {}]   ;;  %s11494_s2 = inlined_call_operand.vmem [shape: f32[3,256,512], index: 2, kind: input, shape index: {}]   ;;  %s11495_s3 = inlined_call_operand.vmem [shape: f32[3,256,512], index: 3, kind: input, shape index: {}]   ;;  %s11496_s4 = inlined_call_operand.vmem [shape: f32[3,256,512], index: 4, kind: input, shape index: {}]   ;;  %s11497_s5 = inlined_call_operand.vmem [shape: f32[1,512], index: 5, kind: input, shape index: {}]   ;;  %s11498_s6 = inlined_call_operand.vmem [shape: f32[1,512], index: 6, kind: input, shape index: {}]   ;;  %s11499_s7 = inlined_call_operand.vmem [shape: f32[1,512], index: 7, kind: input, shape index: {}]   ;;  %s11500_s8 = inlined_call_operand.vmem [shape: f32[1,512], index: 8, kind: input, shape index: {}]   ;;  %s11501_s9 = inlined_call_operand.vmem [shape: f32[256,128], index: 9, kind: input, shape index: {}]   ;;  %s11502_s10 = inlined_call_operand.vmem [shape: f32[1,128], index: 10, kind: input, shape index: {}]   ;;  %s11503_s11 = inlined_call_operand.vmem [shape: f32[1,128], index: 11, kind: input, shape index: {}]   ;;  %s11504_s12 = inlined_call_operand.vmem [shape: f32[1,128], index: 12, kind: input, shape index: {}]   ;;  %s11505_s13 = inlined_call_operand.hbm [shape: f32[2,128], index: 13, kind: output, shape index: {}]  }
   0x1   :  { %v4635_v0 = vld [vmem:[%s11493_s1 + $0x108] sm:$0xff]  ;;  %v4634_v5 = vld [vmem:[%s11493_s1 + $0x100] sm:$0xff]  ;;  %214 = vmatprep.mubr.f32.mxu1 %v6936_v7  ;;  %1225 = vst [vmem:[#allocation3] sm:$0xff] %v6936_v7  ;;  %1226 = vst [vmem:[#allocation3 + $0x8] sm:$0xff] %v6936_v7  ;;  %419 = vmatprep.mubr.f32.mxu0 %v6936_v7 }
   0x2   :  { %v4639_v1 = vld [vmem:[%s11493_s1 + $0x128] sm:$0xff]  ;;  %v4638_v6 = vld [vmem:[%s11493_s1 + $0x120] sm:$0xff]  ;;  %1227 = vst [vmem:[#allocation3 + $0x10] sm:$0xff] %v6936_v7  ;;  %1228 = vst [vmem:[#allocation3 + $0x18] sm:$0xff] %v6936_v7 }
   0x3   :  { %v66_v2 = vld [vmem:[%s11493_s1 + $0x8] sm:$0xff]  ;;  %v5535_v3 = vpack.c.bf16 %v4639_v1, %v4635_v0  ;;  %1229 = vst [vmem:[#allocation3 + $0x20] sm:$0x3f] %v6936_v7  ;;  %1230 = vst [vmem:[#allocation3 + $0x28] sm:$0x3f] %v6936_v7  ;;  %v5537_v9 = vpack.c.bf16 %v4638_v6, %v4634_v5  ;;  %v65_v10 = vld [vmem:[%s11493_s1] sm:$0xff] }
   0x4   :  { %v70_v4 = vld [vmem:[%s11493_s1 + $0x28] sm:$0xff]  ;;  %2469 = vst [vmem:[#allocation4] sm:$0xff] %v6936_v7  ;;  %2470 = vst [vmem:[#allocation4 + $0x8] sm:$0xff] %v6936_v7  ;;  %v69_v11 = vld [vmem:[%s11493_s1 + $0x20] sm:$0xff] }
   0x5   :  { %2471 = vst [vmem:[#allocation4 + $0x10] sm:$0x3f] %v6936_v7  ;;  %2472 = vst [vmem:[#allocation4 + $0x18] sm:$0x3f] %v6936_v7  ;;  %v5567_v8 = vpack.c.bf16 %v70_v4, %v66_v2  ;;  %v4643_v12 = vld [vmem:[%s11493_s1 + $0x148] sm:$0xff]  ;;  %5536 = vmatprep.subr.bf16.mxu1 %v5535_v3  ;;  %v5569_v13 = vpack.c.bf16 %v69_v11, %v65_v10  ;;  %v4642_v19 = vld [vmem:[%s11493_s1 + $0x140] sm:$0xff] }
   0x6   :  { %3484 = vst [vmem:[#allocation5] sm:$0xff] %v6936_v7  ;;  %3485 = vst [vmem:[#allocation5 + $0x8] sm:$0xff] %v6936_v7  ;;  %v4647_v14 = vld [vmem:[%s11493_s1 + $0x168] sm:$0xff]  ;;  %5538 = vmatpush1.bf16.msra.mxu1 %v5537_v9  ;;  %v4646_v20 = vld [vmem:[%s11493_s1 + $0x160] sm:$0xff] }
   0x7   :  { %3486 = vst [vmem:[#allocation5 + $0x10] sm:$0x3] %v6936_v7  ;;  %3487 = vst [vmem:[#allocation5 + $0x18] sm:$0x3] %v6936_v7  ;;  %v74_v15 = vld [vmem:[%s11493_s1 + $0x48] sm:$0xff]  ;;  %5568 = vmatprep.subr.bf16.mxu0 %v5567_v8  ;;  %v5539_v17 = vpack.c.bf16 %v4647_v14, %v4643_v12  ;;  %v73_v21 = vld [vmem:[%s11493_s1 + $0x40] sm:$0xff]  ;;  %v5541_v22 = vpack.c.bf16 %v4646_v20, %v4642_v19 }
   0x8   :  { %46 = vst.msk [vmem:[#allocation2] sm:$0xff] %vm45_vm0, %v6936_v7  ;;  %47 = vst.msk [vmem:[#allocation2 + $0x8] sm:$0xff] %vm45_vm0, %v6936_v7  ;;  %v78_v16 = vld [vmem:[%s11493_s1 + $0x68] sm:$0xff]  ;;  %5570 = vmatpush1.bf16.msra.mxu0 %v5569_v13  ;;  %v77_v23 = vld [vmem:[%s11493_s1 + $0x60] sm:$0xff] }
   0x9   :  { %48 = vst.msk [vmem:[#allocation2 + $0x10] sm:$0xff] %vm45_vm0, %v6936_v7  ;;  %49 = vst.msk [vmem:[#allocation2 + $0x18] sm:$0xff] %vm45_vm0, %v6936_v7  ;;  %v5571_v18 = vpack.c.bf16 %v78_v16, %v74_v15  ;;  %v4651_v24 = vld [vmem:[%s11493_s1 + $0x188] sm:$0xff]  ;;  %5540 = vmatprep.subr.bf16.mxu1 %v5539_v17  ;;  %v5573_v26 = vpack.c.bf16 %v77_v23, %v73_v21  ;;  %v4650_v30 = vld [vmem:[%s11493_s1 + $0x180] sm:$0xff] }
   0xa   :  { %51 = vst.msk [vmem:[#allocation2 + $0x20] sm:$0x3f] %vm50_vm1, %v6936_v7  ;;  %v4655_v25 = vld [vmem:[%s11493_s1 + $0x1a8] sm:$0xff]  ;;  %v4654_v32 = vld [vmem:[%s11493_s1 + $0x1a0] sm:$0xff]  ;;  %5542 = vmatpush1.bf16.msra.mxu1 %v5541_v22  ;;  %v4637_v48 = vld [vmem:[%s11493_s1 + $0x118] sm:$0xff] }
   0xb   :  { %5572 = vmatprep.subr.bf16.mxu0 %v5571_v18  ;;  %v5543_v27 = vpack.c.bf16 %v4655_v25, %v4651_v24  ;;  %v82_v28 = vld [vmem:[%s11493_s1 + $0x88] sm:$0xff]  ;;  %v81_v33 = vld [vmem:[%s11493_s1 + $0x80] sm:$0xff]  ;;  %v5545_v35 = vpack.c.bf16 %v4654_v32, %v4650_v30  ;;  %v4641_v49 = vld [vmem:[%s11493_s1 + $0x138] sm:$0xff] }
   0xc   :  { %v86_v29 = vld [vmem:[%s11493_s1 + $0xa8] sm:$0xff]  ;;  %v85_v34 = vld [vmem:[%s11493_s1 + $0xa0] sm:$0xff]  ;;  %5574 = vmatpush1.bf16.msra.mxu0 %v5573_v26  ;;  %v5551_v54 = vpack.c.bf16 %v4641_v49, %v4637_v48  ;;  %v4636_v55 = vld [vmem:[%s11493_s1 + $0x110] sm:$0xff] }
   0xd   :  { %v5575_v31 = vpack.c.bf16 %v86_v29, %v82_v28  ;;  %v4659_v36 = vld [vmem:[%s11493_s1 + $0x1c8] sm:$0xff]  ;;  %5544 = vmatprep.subr.bf16.mxu1 %v5543_v27  ;;  %v5577_v39 = vpack.c.bf16 %v85_v34, %v81_v33  ;;  %v4658_v42 = vld [vmem:[%s11493_s1 + $0x1c0] sm:$0xff]  ;;  %v4640_v56 = vld [vmem:[%s11493_s1 + $0x130] sm:$0xff] }
   0xe   :  { %v4663_v37 = vld [vmem:[%s11493_s1 + $0x1e8] sm:$0xff]  ;;  %v4662_v43 = vld [vmem:[%s11493_s1 + $0x1e0] sm:$0xff]  ;;  %5546 = vmatpush1.bf16.msra.mxu1 %v5545_v35  ;;  %v4645_v59 = vld [vmem:[%s11493_s1 + $0x158] sm:$0xff]  ;;  %v5553_v0 = vpack.c.bf16 %v4640_v56, %v4636_v55 }
   0xf   :  { %v90_v38 = vld [vmem:[%s11493_s1 + $0xc8] sm:$0xff]  ;;  %v5547_v40 = vpack.c.bf16 %v4663_v37, %v4659_v36  ;;  %5576 = vmatprep.subr.bf16.mxu0 %v5575_v31  ;;  %v89_v45 = vld [vmem:[%s11493_s1 + $0xc0] sm:$0xff]  ;;  %v5549_v50 = vpack.c.bf16 %v4662_v43, %v4658_v42  ;;  %v4649_v60 = vld [vmem:[%s11493_s1 + $0x178] sm:$0xff] }
  0x10   :  { %v94_v41 = vld [vmem:[%s11493_s1 + $0xe8] sm:$0xff]  ;;  %v93_v46 = vld [vmem:[%s11493_s1 + $0xe0] sm:$0xff]  ;;  %5578 = vmatpush1.bf16.msra.mxu0 %v5577_v39  ;;  %v56_v63 = vld [vmem:[%s11492_s0 + $0x10] sm:$0xff]  ;;  %v5555_v9 = vpack.c.bf16 %v4649_v60, %v4645_v59 }
  0x11   :  { %v5579_v44 = vpack.c.bf16 %v94_v41, %v90_v38  ;;  %v52_v47 = vld [vmem:[%s11492_s0] sm:$0xff]  ;;  %v53_v51 = vld [vmem:[%s11492_s0 + $0x8] sm:$0xff]  ;;  %5548 = vmatprep.subr.bf16.mxu1 %v5547_v40  ;;  %v5581_v53 = vpack.c.bf16 %v93_v46, %v89_v45  ;;  %58 = vst.msk [vmem:[#allocation2 + $0x14] sm:$0xff] %vm45_vm0, %v56_v63  ;;  %v4644_v3 = vld [vmem:[%s11493_s1 + $0x150] sm:$0xff] }
  0x12   :  { %54 = vst.msk [vmem:[#allocation2 + $0x2] sm:$0xff] %vm45_vm0, %v52_v47  ;;  %v4687_v52 = vld [vmem:[%s11493_s1 + $0x208] sm:$0xff]  ;;  %55 = vst.msk [vmem:[#allocation2 + $0xa] sm:$0xff] %vm45_vm0, %v53_v51  ;;  %v4686_v61 = vld [vmem:[%s11493_s1 + $0x200] sm:$0xff]  ;;  %5550 = vmatpush1.bf16.msra.mxu1 %v5549_v50 }
  0x13   :  { %v4691_v57 = vld [vmem:[%s11493_s1 + $0x228] sm:$0xff]  ;;  %5580 = vmatprep.subr.bf16.mxu0 %v5579_v44  ;;  %v4690_v62 = vld [vmem:[%s11493_s1 + $0x220] sm:$0xff]  ;;  %5552 = vmatprep.subr.bf16.mxu1 %v5551_v54  ;;  %v4648_v4 = vld [vmem:[%s11493_s1 + $0x170] sm:$0xff] }
  0x14   :  { %v5599_v58 = vpack.c.bf16 %v4691_v57, %v4687_v52  ;;  %v4695_v1 = vld [vmem:[%s11493_s1 + $0x248] sm:$0xff]  ;;  %5582 = vmatpush1.bf16.msra.mxu0 %v5581_v53  ;;  %v4694_v5 = vld [vmem:[%s11493_s1 + $0x240] sm:$0xff]  ;;  %v5601_v10 = vpack.c.bf16 %v4690_v62, %v4686_v61  ;;  %v4653_v13 = vld [vmem:[%s11493_s1 + $0x198] sm:$0xff]  ;;  %v5557_v17 = vpack.c.bf16 %v4648_v4, %v4644_v3 }
  0x15   :  { %v4699_v2 = vld [vmem:[%s11493_s1 + $0x268] sm:$0xff]  ;;  %v4698_v11 = vld [vmem:[%s11493_s1 + $0x260] sm:$0xff]  ;;  %v4657_v14 = vld [vmem:[%s11493_s1 + $0x1b8] sm:$0xff] }
  0x16   :  { %5600 = vmatprep.subr.bf16.mxu0 %v5599_v58  ;;  %v5603_v12 = vpack.c.bf16 %v4699_v2, %v4695_v1  ;;  %v57_v15 = vld [vmem:[%s11492_s0 + $0x18] sm:$0xff]  ;;  %v4703_v18 = vld [vmem:[%s11493_s1 + $0x288] sm:$0xff]  ;;  %v5605_v21 = vpack.c.bf16 %v4698_v11, %v4694_v5  ;;  %v5559_v22 = vpack.c.bf16 %v4657_v14, %v4653_v13  ;;  %v4652_v23 = vld [vmem:[%s11493_s1 + $0x190] sm:$0xff] }
  0x17   :  { %59 = vst.msk [vmem:[#allocation2 + $0x1c] sm:$0xff] %vm45_vm0, %v57_v15  ;;  %v4707_v19 = vld [vmem:[%s11493_s1 + $0x2a8] sm:$0xff]  ;;  %v4656_v24 = vld [vmem:[%s11493_s1 + $0x1b0] sm:$0xff]  ;;  %v4702_v25 = vld [vmem:[%s11493_s1 + $0x280] sm:$0xff] }
  0x18   :  { %v5607_v26 = vpack.c.bf16 %v4707_v19, %v4703_v18  ;;  %v4706_v27 = vld [vmem:[%s11493_s1 + $0x2a0] sm:$0xff]  ;;  %v4661_v28 = vld [vmem:[%s11493_s1 + $0x1d8] sm:$0xff]  ;;  %v4711_v31 = vld [vmem:[%s11493_s1 + $0x2c8] sm:$0xff]  ;;  %v5561_v34 = vpack.c.bf16 %v4656_v24, %v4652_v23 }
  0x19   :  { %v7191_v6 = vld [vmem:[#allocation2 + $0x1] sm:$0xff]  ;;  %v7211_v16 = vld [vmem:[#allocation2 + $0x9] sm:$0xff]  ;;  %v4665_v29 = vld [vmem:[%s11493_s1 + $0x1f8] sm:$0xff]  ;;  %v5609_v35 = vpack.c.bf16 %v4706_v27, %v4702_v25 }
  0x1a   :  { %v7193_v8 = vld [vmem:[#allocation2] sm:$0xff]  ;;  %4666 = vmatmul.mubr.msk.f32.vlgmr.msra.gmra.mrb[0].mxu1 %vm45_vm0, %v7191_v6  ;;  %v7222_v20 = vld [vmem:[#allocation2 + $0x8] sm:$0xff]  ;;  %v7246_v30 = vld [vmem:[#allocation2 + $0x11] sm:$0xff]  ;;  %v5563_v36 = vpack.c.bf16 %v4665_v29, %v4661_v28 }
  0x1b   :  { %4676 = vmatmul.mubr.msk.f32.vlgmr.msra.gmra.mrb[0].mxu0 %vm45_vm0, %v7193_v8  ;;  %5554 = vmatpush1.bf16.msra.mxu1 %v5553_v0  ;;  %v4715_v32 = vld [vmem:[%s11493_s1 + $0x2e8] sm:$0xff]  ;;  %v7256_v33 = vld [vmem:[#allocation2 + $0x10] sm:$0xff]  ;;  %v4710_v39 = vld [vmem:[%s11493_s1 + $0x2c0] sm:$0xff] }
  0x1c   :  { %220 = vmatprep.mubr.f32.mxu1 %v6936_v7  ;;  %425 = vmatprep.mubr.f32.mxu0 %v6936_v7  ;;  %v4660_v37 = vld [vmem:[%s11493_s1 + $0x1d0] sm:$0xff]  ;;  %v5611_v40 = vpack.c.bf16 %v4715_v32, %v4711_v31  ;;  %v4714_v41 = vld [vmem:[%s11493_s1 + $0x2e0] sm:$0xff]  ;;  %v68_v42 = vld [vmem:[%s11493_s1 + $0x18] sm:$0xff] }
  0x1d   :  { %5556 = vmatprep.subr.bf16.mxu1 %v5555_v9  ;;  %5602 = vmatpush1.bf16.msra.mxu0 %v5601_v10  ;;  %v4664_v38 = vld [vmem:[%s11493_s1 + $0x1f0] sm:$0xff]  ;;  %v72_v43 = vld [vmem:[%s11493_s1 + $0x38] sm:$0xff]  ;;  %v5613_v47 = vpack.c.bf16 %v4714_v41, %v4710_v39  ;;  %v7314_v56 = vld [vmem:[#allocation2 + $0x2] sm:$0xff] }
  0x1e   :  { %4667 = vmatmul.mubr.msk.f32.gmra.mrb[2].mxu1 %vm45_vm0, %v7211_v16  ;;  %5604 = vmatprep.subr.bf16.mxu0 %v5603_v12  ;;  %v7281_v44 = vld [vmem:[#allocation2 + $0x19] sm:$0xff]  ;;  %v5565_v46 = vpack.c.bf16 %v4664_v38, %v4660_v37  ;;  %v5583_v48 = vpack.c.bf16 %v72_v43, %v68_v42  ;;  %v7291_v49 = vld [vmem:[#allocation2 + $0x21] sm:$0xf]  ;;  %v67_v51 = vld [vmem:[%s11493_s1 + $0x10] sm:$0xff] }
  0x1f   :  { %4677 = vmatmul.mubr.msk.f32.gmra.mrb[2].mxu0 %vm45_vm0, %v7222_v20  ;;  %5558 = vmatpush1.bf16.msra.mxu1 %v5557_v17  ;;  %v7284_v45 = vld [vmem:[#allocation2 + $0x18] sm:$0xff]  ;;  %v7294_v50 = vld [vmem:[#allocation2 + $0x20] sm:$0xf]  ;;  %v71_v52 = vld [vmem:[%s11493_s1 + $0x30] sm:$0xff] }
  0x20   :  { %226 = vmatprep.mubr.f32.mxu1 %v6936_v7  ;;  %431 = vmatprep.mubr.f32.mxu0 %v6936_v7  ;;  %v76_v53 = vld [vmem:[%s11493_s1 + $0x58] sm:$0xff]  ;;  %v5585_v55 = vpack.c.bf16 %v71_v52, %v67_v51  ;;  %v75_v57 = vld [vmem:[%s11493_s1 + $0x50] sm:$0xff] }
  0x21   :  { %5606 = vmatpush1.bf16.msra.mxu0 %v5605_v21  ;;  %5560 = vmatprep.subr.bf16.mxu1 %v5559_v22  ;;  %v80_v54 = vld [vmem:[%s11493_s1 + $0x78] sm:$0xff]  ;;  %v79_v58 = vld [vmem:[%s11493_s1 + $0x70] sm:$0xff] }
  0x22   :  { %4668 = vmatmul.mubr.msk.f32.gmra.mrb[4].mxu1 %vm45_vm0, %v7246_v30  ;;  %5608 = vmatprep.subr.bf16.mxu0 %v5607_v26  ;;  %v5587_v59 = vpack.c.bf16 %v80_v54, %v76_v53 }
  0x23   :  { %4678 = vmatmul.mubr.msk.f32.gmra.mrb[4].mxu0 %vm45_vm0, %v7256_v33  ;;  %232 = vmatprep.mubr.f32.mxu1 %v6936_v7 }
  0x24   :  { %5562 = vmatpush1.bf16.msra.mxu1 %v5561_v34  ;;  %437 = vmatprep.mubr.f32.mxu0 %v6936_v7 }
  0x25   :  { %5610 = vmatpush1.bf16.msra.mxu0 %v5609_v35  ;;  %5564 = vmatprep.subr.bf16.mxu1 %v5563_v36 }
  0x26   :  { %4669 = vmatmul.mubr.msk.f32.gmra.mrb[6].mxu1 %vm45_vm0, %v7281_v44  ;;  %5612 = vmatprep.subr.bf16.mxu0 %v5611_v40 }
  0x27   :  { %4679 = vmatmul.mubr.msk.f32.gmra.mrb[6].mxu0 %vm45_vm0, %v7284_v45  ;;  %238 = vmatprep.mubr.f32.mxu1 %v6936_v7 }
  0x28   :  { %443 = vmatprep.mubr.f32.mxu0 %v6936_v7  ;;  %5566 = vmatpush1.bf16.msra.mxu1 %v5565_v46 }
  0x29   :  { %5614 = vmatpush1.bf16.msra.mxu0 %v5613_v47  ;;  %5584 = vmatprep.subr.bf16.mxu1 %v5583_v48 }
  0x2a   :  { %4670 = vmatmul.mubr.msk.f32.gmra.mrb[8].mxu1 %vm45_vm0, %v7291_v49 }
  0x2b   :  { %4680 = vmatmul.mubr.msk.f32.gmra.mrb[8].mxu0 %vm45_vm0, %v7294_v50  ;;  %309 = vmatprep.mubr.f32.mxu1 %v6936_v7 }
  0x2c   :  { %662 = vmatprep.mubr.f32.mxu0 %v6936_v7 }
  0x2d   :  { %18 = vsyncpa [#allocation9], 0  ;;  %v84_v60 = vld [vmem:[%s11493_s1 + $0x98] sm:$0xff]  ;;  %v5589_v62 = vpack.c.bf16 %v79_v58, %v75_v57  ;;  %v7334_v63 = vld [vmem:[#allocation2 + $0xa] sm:$0xff]  ;;  %v810_v43 = vlaneseq  ;;  %vm890_vm2 = vcmask 1046528   ;;  %vm992_vm3 = vcmask 261120  }
  0x2e   :  { %4671 = vmatmul.mubr.msk.f32.vlgmr.msra.gmra.mrb[10].mxu1 %vm45_vm0, %v7191_v6  ;;  %v88_v61 = vld [vmem:[%s11493_s1 + $0xb8] sm:$0xff]  ;;  %v83_v1 = vld [vmem:[%s11493_s1 + $0x90] sm:$0xff]  ;;  %v549_v17 = vld [vmem:[#allocation2 + $0x22] sm:$0xf]  ;;  %s6938_s15 = smov 64   ;;  %s6939_s30 = smov 32  }
  0x2f   :  { %4718 = vmatmul.mubr.msk.f32.vlgmr.msra.gmra.mrb[0].mxu0 %vm45_vm0, %v7314_v56  ;;  %5586 = vmatpush1.bf16.msra.mxu1 %v5585_v55  ;;  %v5591_v0 = vpack.c.bf16 %v88_v61, %v84_v60  ;;  %v87_v2 = vld [vmem:[%s11493_s1 + $0xb0] sm:$0xff]  ;;  %v92_v3 = vld [vmem:[%s11493_s1 + $0xd8] sm:$0xff]  ;;  %v7453_v46 = vshrl.u32 %v810_v43, 7  ;;  %vm997_vm4 = vcmask 256000   ;;  %vm1019_vm5 = vcmask 523520   ;;  %s6941_s27 = smov [#allocation8]  }
  0x30   :  { %315 = vmatprep.mubr.f32.mxu1 %v6936_v7  ;;  %668 = vmatprep.mubr.f32.mxu0 %v6936_v7  ;;  %v96_v4 = vld [vmem:[%s11493_s1 + $0xf8] sm:$0xff]  ;;  %v5593_v6 = vpack.c.bf16 %v87_v2, %v83_v1  ;;  %v91_v10 = vld [vmem:[%s11493_s1 + $0xd0] sm:$0xff]  ;;  %vm1071_vm6 = vcmask 785920   ;;  %vm1093_vm7 = vcmask 1048320   ;;  %vm8074_vm8 = vcmp.lt.s32.totalorder %v810_v43, 256 }
  0x31   :  { %5588 = vmatprep.subr.bf16.mxu1 %v5587_v59  ;;  %v7354_v5 = vld [vmem:[#allocation2 + $0x12] sm:$0xff]  ;;  %v5595_v9 = vpack.c.bf16 %v96_v4, %v92_v3  ;;  %v548_v14 = vld [vmem:[#allocation2 + $0x1a] sm:$0xff]  ;;  %v7464_v51 = vsub.s32 1, %v7453_v46  ;;  %vm1024_vm9 = vcmask 518400   ;;  %vm1076_vm10 = vcmask 780800  }
  0x32   :  { %4672 = vmatmul.mubr.msk.f32.gmra.mrb[12].mxu1 %vm45_vm0, %v7211_v16  ;;  %v95_v11 = vld [vmem:[%s11493_s1 + $0xf0] sm:$0xff]  ;;  %v4689_v12 = vld [vmem:[%s11493_s1 + $0x218] sm:$0xff]  ;;  %vm1098_vm11 = vcmask 1043200   ;;  %vm2073_vm12 = vcmask 1045504   ;;  %vm2387_vm13 = vcmask 518144   ;;  %vm2416_vm14 = vcmask 1048064  }
  0x33   :  { %4719 = vmatmul.mubr.msk.f32.gmra.mrb[2].mxu0 %vm45_vm0, %v7334_v63  ;;  %5590 = vmatpush1.bf16.msra.mxu1 %v5589_v62  ;;  %v4693_v13 = vld [vmem:[%s11493_s1 + $0x238] sm:$0xff]  ;;  %v5597_v15 = vpack.c.bf16 %v95_v11, %v91_v10  ;;  %v4688_v18 = vld [vmem:[%s11493_s1 + $0x210] sm:$0xff]  ;;  %vm2419_vm15 = vcmask 1042944  }
  0x34   :  { %321 = vmatprep.mubr.f32.mxu1 %v6936_v7  ;;  %674 = vmatprep.mubr.f32.mxu0 %v6936_v7  ;;  %v5615_v16 = vpack.c.bf16 %v4693_v13, %v4689_v12  ;;  %v4692_v19 = vld [vmem:[%s11493_s1 + $0x230] sm:$0xff]  ;;  %v4697_v21 = vld [vmem:[%s11493_s1 + $0x258] sm:$0xff] }
  0x35   :  { %5592 = vmatprep.subr.bf16.mxu1 %v5591_v0  ;;  %v4701_v22 = vld [vmem:[%s11493_s1 + $0x278] sm:$0xff]  ;;  %v5617_v23 = vpack.c.bf16 %v4692_v19, %v4688_v18  ;;  %v4696_v25 = vld [vmem:[%s11493_s1 + $0x250] sm:$0xff] }
  0x36   :  { %4673 = vmatmul.mubr.msk.f32.gmra.mrb[14].mxu1 %vm45_vm0, %v7246_v30  ;;  %v5619_v24 = vpack.c.bf16 %v4701_v22, %v4697_v21  ;;  %v4700_v26 = vld [vmem:[%s11493_s1 + $0x270] sm:$0xff]  ;;  %v4705_v27 = vld [vmem:[%s11493_s1 + $0x298] sm:$0xff] }
  0x37   :  { %4720 = vmatmul.mubr.msk.f32.gmra.mrb[4].mxu0 %vm45_vm0, %v7354_v5  ;;  %327 = vmatprep.mubr.f32.mxu1 %v6936_v7  ;;  %v4709_v28 = vld [vmem:[%s11493_s1 + $0x2b8] sm:$0xff]  ;;  %v5621_v29 = vpack.c.bf16 %v4700_v26, %v4696_v25  ;;  %v4704_v31 = vld [vmem:[%s11493_s1 + $0x290] sm:$0xff] }
  0x38   :  { %5594 = vmatpush1.bf16.msra.mxu1 %v5593_v6  ;;  %680 = vmatprep.mubr.f32.mxu0 %v6936_v7  ;;  %v5623_v30 = vpack.c.bf16 %v4709_v28, %v4705_v27  ;;  %v4708_v32 = vld [vmem:[%s11493_s1 + $0x2b0] sm:$0xff]  ;;  %v4713_v34 = vld [vmem:[%s11493_s1 + $0x2d8] sm:$0xff] }
  0x39   :  { %5596 = vmatprep.subr.bf16.mxu1 %v5595_v9  ;;  %v5625_v35 = vpack.c.bf16 %v4708_v32, %v4704_v31  ;;  %v4712_v37 = vld [vmem:[%s11493_s1 + $0x2d0] sm:$0xff] }
  0x3a   :  { %4674 = vmatmul.mubr.msk.f32.gmra.mrb[16].mxu1 %vm45_vm0, %v7281_v44  ;;  %v4716_v38 = vld [vmem:[%s11493_s1 + $0x2f0] sm:$0xff] }
  0x3b   :  { %4721 = vmatmul.mubr.msk.f32.gmra.mrb[6].mxu0 %vm45_vm0, %v548_v14  ;;  %333 = vmatprep.mubr.f32.mxu1 %v6936_v7 }
  0x3c   :  { %686 = vmatprep.mubr.f32.mxu0 %v6936_v7  ;;  %5598 = vmatpush1.bf16.msra.mxu1 %v5597_v15 }
  0x3d   :  { %5616 = vmatprep.subr.bf16.mxu1 %v5615_v16 }
  0x3e   :  { %4675 = vmatmul.mubr.msk.f32.gmra.mrb[18].mxu1 %vm45_vm0, %v7291_v49  ;;  %v7456_v49 = vsub.s32 0, %v7453_v46 }
  0x3f   :  { %4722 = vmatmul.mubr.msk.f32.gmra.mrb[8].mxu0 %vm45_vm0, %v549_v17  ;;  %514 = vmatprep.mubr.f32.mxu1 %v6936_v7 }
  0x42   :  { %4681 = vmatmul.mubr.msk.f32.vlgmr.msra.gmra.mrb[10].mxu1 %vm45_vm0, %v7193_v8  ;;  %v4717_v8 = vld [vmem:[%s11493_s1 + $0x2f8] sm:$0xff] }
  0x43   :  { %5618 = vmatpush1.bf16.msra.mxu1 %v5617_v23  ;;  %520 = vmatprep.mubr.f32.mxu1 %v6936_v7  ;;  %v5627_v36 = vpack.c.bf16 %v4717_v8, %v4713_v34 }
  0x44   :  { %5620 = vmatprep.subr.bf16.mxu1 %v5619_v24 }
  0x46   :  { %4682 = vmatmul.mubr.msk.f32.gmra.mrb[12].mxu1 %vm45_vm0, %v7222_v20  ;;  %v5629_v20 = vpack.c.bf16 %v4716_v38, %v4712_v37 }
  0x47   :  { %5622 = vmatpush1.bf16.msra.mxu1 %v5621_v29  ;;  %526 = vmatprep.mubr.f32.mxu1 %v6936_v7 }
  0x48   :  { %5624 = vmatprep.subr.bf16.mxu1 %v5623_v30 }
  0x4a   :  { %4683 = vmatmul.mubr.msk.f32.gmra.mrb[14].mxu1 %vm45_vm0, %v7256_v33 }
  0x4b   :  { %532 = vmatprep.mubr.f32.mxu1 %v6936_v7  ;;  %5626 = vmatpush1.bf16.msra.mxu1 %v5625_v35 }
  0x4c   :  { %5628 = vmatprep.subr.bf16.mxu1 %v5627_v36 }
  0x4e   :  { %4684 = vmatmul.mubr.msk.f32.gmra.mrb[16].mxu1 %vm45_vm0, %v7284_v45 }
  0x4f   :  { %538 = vmatprep.mubr.f32.mxu1 %v6936_v7  ;;  %5630 = vmatpush1.bf16.msra.mxu1 %v5629_v20 }
  0x52   :  { %4685 = vmatmul.mubr.msk.f32.gmra.mrb[18].mxu1 %vm45_vm0, %v7294_v50 }
  0x53   :  { %757 = vmatprep.mubr.f32.mxu1 %v6936_v7 }
  0x56   :  { %4723 = vmatmul.mubr.msk.f32.vlgmr.msra.gmra.mrb[10].mxu1 %vm45_vm0, %v7314_v56 }
  0x57   :  { %763 = vmatprep.mubr.f32.mxu1 %v6936_v7 }
  0x5a   :  { %4724 = vmatmul.mubr.msk.f32.gmra.mrb[12].mxu1 %vm45_vm0, %v7334_v63 }
  0x5b   :  { %769 = vmatprep.mubr.f32.mxu1 %v6936_v7 }
  0x5e   :  { %4725 = vmatmul.mubr.msk.f32.gmra.mrb[14].mxu1 %vm45_vm0, %v7354_v5 }
  0x5f   :  { %775 = vmatprep.mubr.f32.mxu1 %v6936_v7 }
  0x62   :  { %4726 = vmatmul.mubr.msk.f32.gmra.mrb[16].mxu1 %vm45_vm0, %v548_v14 }
  0x63   :  { %781 = vmatprep.mubr.f32.mxu1 %v6936_v7  ;;  %v7461_v7 = vld [vmem:[%s11497_s5] sm:$0xf]  ;;  %s6937_s5 = smov 96  }
  0x64   :  { %v813_v52 = vrot.slane %v7461_v7, %v7456_v49  ;;  %v817_v54 = vrot.slane %v7461_v7, %v7464_v51 }
  0x66   :  { %4727 = vmatmul.mubr.msk.f32.gmra.mrb[18].mxu1 %vm45_vm0, %v549_v17 }
  0xed   :  { %v216_v33 = vpop.f32.mrb[0].mxu1 }
  0xee   :  { %v218_v39 = vpop.f32.mrb[1].mxu1 }
  0xf1   :  { %v222_v40 = vpop.f32.mrb[2].mxu1 }
  0xf2   :  { %v224_v41 = vpop.f32.mrb[3].mxu1 }
  0xf5   :  { %v228_v42 = vpop.f32.mrb[4].mxu1 }
  0xf6   :  { %v230_v44 = vpop.f32.mrb[5].mxu1 }
  0xf9   :  { %v234_v45 = vpop.f32.mrb[6].mxu1 }
  0xfa   :  { %v236_v47 = vpop.f32.mrb[7].mxu1 }
  0xfd   :  { %v240_v48 = vpop.f32.mrb[8].mxu1 }
  0xfe   :  { %v242_v50 = vpop.f32.mrb[9].mxu1 }
 0x102   :  { %v664_v53 = vpop.f32.mrb[0].mxu0 }
 0x103   :  { %v6815_v55 = vadd.f32 %v664_v53, %v216_v33  ;;  %v666_v56 = vpop.f32.mrb[1].mxu0 }
 0x104   :  { %v6816_v57 = vadd.f32 %v666_v56, %v218_v39 }
 0x105   :  { %v830_v58 = vadd.f32 %v6815_v55, %v813_v52 }
 0x106   :  { %v831_v59 = vadd.f32 %v6816_v57, %v817_v54  ;;  %v670_v60 = vpop.f32.mrb[2].mxu0 }
 0x107   :  { %v6817_v61 = vadd.f32 %v670_v60, %v222_v40  ;;  %v672_v62 = vpop.f32.mrb[3].mxu0  ;;  %v850_v0 = vmax.f32 %v830_v58, 0.0 }
 0x108   :  { %v6818_v63 = vadd.f32 %v672_v62, %v224_v41  ;;  %v851_v2 = vmax.f32 %v831_v59, 0.0  ;;  %v7530_v62 = vsub.s32 3, %v7453_v46 }
 0x109   :  { %v834_v1 = vadd.f32 %v6817_v61, %v813_v52  ;;  %v891_v12 = vrot.slane %v850_v0, 1  ;;  %v7525_v61 = vsub.s32 2, %v7453_v46 }
 0x10a   :  { %v835_v3 = vadd.f32 %v6818_v63, %v817_v54  ;;  %v676_v4 = vpop.f32.mrb[4].mxu0  ;;  %v894_v15 = vrot.slane %v851_v2, 1 }
 0x10b   :  { %v854_v5 = vmax.f32 %v834_v1, 0.0  ;;  %v6819_v6 = vadd.f32 %v676_v4, %v228_v42  ;;  %v678_v9 = vpop.f32.mrb[5].mxu0  ;;  %v821_v63 = vrot.slane %v7461_v7, %v7525_v61 }
 0x10c   :  { %v855_v10 = vmax.f32 %v835_v3, 0.0  ;;  %v6820_v11 = vadd.f32 %v678_v9, %v230_v44 }
 0x10d   :  { %v892_v13 = vrot.slane %v854_v5, 1  ;;  %v838_v14 = vadd.f32 %v6819_v6, %v813_v52 }
 0x10e   :  { %v895_v16 = vrot.slane %v855_v10, 1  ;;  %v839_v17 = vadd.f32 %v6820_v11, %v817_v54  ;;  %v682_v18 = vpop.f32.mrb[6].mxu0 }
 0x10f   :  { %v858_v19 = vmax.f32 %v838_v14, 0.0  ;;  %v6821_v21 = vadd.f32 %v682_v18, %v234_v45  ;;  %v684_v22 = vpop.f32.mrb[7].mxu0  ;;  %v893_v23 = vsel %vm890_vm2, %v891_v12, %v892_v13 }
 0x110   :  { %v859_v24 = vmax.f32 %v839_v17, 0.0  ;;  %v6822_v25 = vadd.f32 %v684_v22, %v236_v47  ;;  %v7471_v26 = vmax.f32 %v850_v0, %v893_v23  ;;  %v896_v27 = vsel %vm890_vm2, %v894_v15, %v895_v16 }
 0x111   :  { %v903_v28 = vrot.slane %v858_v19, 1  ;;  %v842_v29 = vadd.f32 %v6821_v21, %v813_v52  ;;  %v7474_v30 = vmax.f32 %v851_v2, %v896_v27  ;;  %v825_v0 = vrot.slane %v7461_v7, %v7530_v62 }
 0x112   :  { %v905_v31 = vrot.slane %v859_v24, 1  ;;  %v843_v32 = vadd.f32 %v6822_v25, %v817_v54  ;;  %972 = vrot.lane.b32.xlu0 %v7471_v26, %s6937_s5  ;;  %v688_v34 = vpop.f32.mrb[8].mxu0 }
 0x113   :  { %v862_v8 = vmax.f32 %v842_v29, 0.0  ;;  %v6823_v35 = vadd.f32 %v688_v34, %v240_v48  ;;  %v690_v36 = vpop.f32.mrb[9].mxu0  ;;  %v904_v37 = vsel %vm890_vm2, %v892_v13, %v903_v28 }
 0x114   :  { %v863_v38 = vmax.f32 %v843_v32, 0.0  ;;  %v6824_v20 = vadd.f32 %v690_v36, %v242_v50  ;;  %v906_v33 = vsel %vm890_vm2, %v895_v16, %v905_v31  ;;  %v7480_v39 = vmax.f32 %v854_v5, %v904_v37 }
 0x115   :  { %v911_v40 = vrot.slane %v862_v8, 1  ;;  %v7482_v41 = vadd.f32 %v6823_v35, %v813_v52  ;;  %v7484_v42 = vmax.f32 %v855_v10, %v906_v33 }
 0x116   :  { %v913_v44 = vrot.slane %v863_v38, 1  ;;  %v7486_v45 = vadd.f32 %v6824_v20, %v817_v54  ;;  %1031 = vrot.lane.b32.xlu0 %v7474_v30, %s6937_s5 }
 0x117   :  { %v866_v47 = vmax.f32 %v7482_v41, 0.0  ;;  %1033 = vrot.lane.b32.xlu1 %v7484_v42, %s6937_s5  ;;  %v912_v48 = vsel %vm890_vm2, %v903_v28, %v911_v40 }
 0x118   :  { %v867_v50 = vmax.f32 %v7486_v45, 0.0  ;;  %v7495_v53 = vmax.f32 %v858_v19, %v912_v48  ;;  %v914_v52 = vsel %vm890_vm2, %v905_v31, %v913_v44 }
 0x119   :  { %v7500_v54 = vrot.slane %v866_v47, 1  ;;  %v7502_v55 = vmax.f32 %v859_v24, %v914_v52 }
 0x11a   :  { %v7506_v56 = vrot.slane %v867_v50, 1  ;;  %974 = vrot.lane.b32.xlu0 %v7480_v39, %s6937_s5 }
 0x11b   :  { %976 = vrot.lane.b32.xlu1 %v7495_v53, %s6937_s5  ;;  %v920_v57 = vsel %vm890_vm2, %v911_v40, %v7500_v54 }
 0x11c   :  { %v7514_v58 = vmax.f32 %v862_v8, %v920_v57  ;;  %v922_v59 = vsel %vm890_vm2, %v913_v44, %v7506_v56 }
 0x11d   :  { %v7518_v60 = vmax.f32 %v863_v38, %v922_v59 }
 0x11e   :  { %1035 = vrot.lane.b32.xlu0 %v7502_v55, %s6937_s5 }
 0x11f   :  { %978 = vrot.lane.b32.xlu1 %v7514_v58, %s6937_s5 }
 0x123   :  { %1037 = vrot.lane.b32.xlu1 %v7518_v60, %s6937_s5 }
 0x129   :  { %v759_v1 = vpop.f32.mrb[10].mxu1 }
 0x12a   :  { %v832_v2 = vadd.f32 %v821_v63, %v759_v1  ;;  %v761_v3 = vpop.f32.mrb[11].mxu1 }
 0x12b   :  { %v833_v4 = vadd.f32 %v825_v0, %v761_v3 }
 0x12c   :  { %v852_v6 = vmax.f32 %v832_v2, 0.0 }
 0x12d   :  { %v765_v5 = vpop.f32.mrb[12].mxu1  ;;  %v853_v11 = vmax.f32 %v833_v4, 0.0 }
 0x12e   :  { %v836_v9 = vadd.f32 %v821_v63, %v765_v5  ;;  %v767_v10 = vpop.f32.mrb[13].mxu1  ;;  %v897_v16 = vrot.slane %v852_v6, 1 }
 0x12f   :  { %v837_v12 = vadd.f32 %v825_v0, %v767_v10  ;;  %v900_v21 = vrot.slane %v853_v11, 1 }
 0x130   :  { %v856_v13 = vmax.f32 %v836_v9, 0.0 }
 0x131   :  { %v857_v14 = vmax.f32 %v837_v12, 0.0  ;;  %v771_v15 = vpop.f32.mrb[14].mxu1 }
 0x132   :  { %v898_v17 = vrot.slane %v856_v13, 1  ;;  %v840_v18 = vadd.f32 %v821_v63, %v771_v15  ;;  %v773_v19 = vpop.f32.mrb[15].mxu1  ;;  %v7577_v15 = vmax.f32 %v866_v47, %v7500_v54 }
 0x133   :  { %v901_v22 = vrot.slane %v857_v14, 1  ;;  %v841_v7 = vadd.f32 %v825_v0, %v773_v19 }
 0x134   :  { %v860_v23 = vmax.f32 %v840_v18, 0.0  ;;  %v899_v24 = vsel %vm890_vm2, %v897_v16, %v898_v17  ;;  %v4731_v18 = vld [vmem:[%s11494_s2 + $0x418] sm:$0xff] }
 0x135   :  { %v861_v25 = vmax.f32 %v841_v7, 0.0  ;;  %v777_v27 = vpop.f32.mrb[16].mxu1  ;;  %v7537_v28 = vmax.f32 %v852_v6, %v899_v24  ;;  %v902_v29 = vsel %vm890_vm2, %v900_v21, %v901_v22  ;;  %v4728_v7 = vld [vmem:[%s11494_s2 + $0x400] sm:$0xff] }
 0x136   :  { %v907_v31 = vrot.slane %v860_v23, 1  ;;  %v844_v32 = vadd.f32 %v821_v63, %v777_v27  ;;  %v779_v34 = vpop.f32.mrb[17].mxu1  ;;  %v7540_v8 = vmax.f32 %v853_v11, %v902_v29  ;;  %v4734_v27 = vld [vmem:[%s11494_s2 + $0x430] sm:$0xff] }
 0x137   :  { %v909_v35 = vrot.slane %v861_v25, 1  ;;  %v845_v36 = vadd.f32 %v825_v0, %v779_v34  ;;  %1105 = vrot.lane.b32.xlu0 %v7537_v28, %s6937_s5  ;;  %v4741_v34 = vld [vmem:[%s11494_s2 + $0x468] sm:$0xff] }
 0x138   :  { %v864_v37 = vmax.f32 %v844_v32, 0.0  ;;  %v908_v38 = vsel %vm890_vm2, %v898_v17, %v907_v31  ;;  %v7588_v17 = vmax.f32 %v867_v50, %v7506_v56  ;;  %v4729_v50 = vld [vmem:[%s11494_s2 + $0x408] sm:$0xff] }
 0x139   :  { %v865_v20 = vmax.f32 %v845_v36, 0.0  ;;  %v783_v33 = vpop.f32.mrb[18].mxu1  ;;  %v7545_v40 = vmax.f32 %v856_v13, %v908_v38  ;;  %v910_v44 = vsel %vm890_vm2, %v901_v22, %v909_v35  ;;  %v4733_v56 = vld [vmem:[%s11494_s2 + $0x428] sm:$0xff]  ;;  %v4735_v22 = vld [vmem:[%s11494_s2 + $0x438] sm:$0xff] }
 0x13a   :  { %v915_v48 = vrot.slane %v864_v37, 1  ;;  %v848_v52 = vadd.f32 %v821_v63, %v783_v33  ;;  %v785_v57 = vpop.f32.mrb[19].mxu1  ;;  %v7548_v59 = vmax.f32 %v857_v14, %v910_v44  ;;  %v5631_v21 = vpack.c.bf16 %v4733_v56, %v4729_v50  ;;  %v4737_v32 = vld [vmem:[%s11494_s2 + $0x448] sm:$0xff]  ;;  %v4736_v33 = vld [vmem:[%s11494_s2 + $0x440] sm:$0xff]  ;;  %v4746_v50 = vld [vmem:[%s11494_s2 + $0x490] sm:$0xff] }
 0x13b   :  { %v917_v1 = vrot.slane %v865_v20, 1  ;;  %v849_v2 = vadd.f32 %v825_v0, %v785_v57  ;;  %1160 = vrot.lane.b32.xlu0 %v7540_v8, %s6937_s5  ;;  %1107 = vrot.lane.b32.xlu1 %v7545_v40, %s6937_s5  ;;  %v5695_v24 = vpack.c.bf16 %v4735_v22, %v4731_v18  ;;  %v5635_v38 = vpack.c.bf16 %v4741_v34, %v4737_v32  ;;  %v4740_v44 = vld [vmem:[%s11494_s2 + $0x460] sm:$0xff]  ;;  %v4750_v56 = vld [vmem:[%s11494_s2 + $0x4b0] sm:$0xff] }
 0x13c   :  { %v868_v3 = vmax.f32 %v848_v52, 0.0  ;;  %v916_v4 = vsel %vm890_vm2, %v907_v31, %v915_v48  ;;  %5632 = vmatprep.subr.bf16.mxu0 %v5631_v21  ;;  %v5637_v57 = vpack.c.bf16 %v4740_v44, %v4736_v33  ;;  %v5705_v18 = vpack.c.bf16 %v4750_v56, %v4746_v50  ;;  %v4765_v32 = vld [vmem:[%s11494_s2 + $0x528] sm:$0xff]  ;;  %v4763_v34 = vld [vmem:[%s11494_s2 + $0x518] sm:$0xff]  ;;  %v4762_v44 = vld [vmem:[%s11494_s2 + $0x510] sm:$0xff] }
 0x13d   :  { %v869_v5 = vmax.f32 %v849_v2, 0.0  ;;  %v7555_v6 = vmax.f32 %v860_v23, %v916_v4  ;;  %v918_v9 = vsel %vm890_vm2, %v909_v35, %v917_v1  ;;  %v4732_v23 = vld [vmem:[%s11494_s2 + $0x420] sm:$0xff]  ;;  %5696 = vmatprep.subr.bf16.mxu1 %v5695_v24  ;;  %v4739_v35 = vld [vmem:[%s11494_s2 + $0x458] sm:$0xff] }
 0x13e   :  { %v923_v63 = vrot.slane %v868_v3, 1  ;;  %v7558_v10 = vmax.f32 %v861_v25, %v918_v9  ;;  %v5633_v25 = vpack.c.bf16 %v4732_v23, %v4728_v7  ;;  %v4747_v4 = vld [vmem:[%s11494_s2 + $0x498] sm:$0xff]  ;;  %v4752_v23 = vld [vmem:[%s11494_s2 + $0x4c0] sm:$0xff] }
 0x13f   :  { %v925_v11 = vrot.slane %v869_v5, 1  ;;  %1109 = vrot.lane.b32.xlu0 %v7555_v6, %s6937_s5  ;;  %1162 = vrot.lane.b32.xlu1 %v7548_v59, %s6937_s5  ;;  %v4759_v7 = vld [vmem:[%s11494_s2 + $0x4f8] sm:$0xff]  ;;  %v4756_v24 = vld [vmem:[%s11494_s2 + $0x4e0] sm:$0xff] }
 0x140   :  { %v924_v0 = vsel %vm890_vm2, %v915_v48, %v923_v63  ;;  %v7583_v16 = vmax.f32 %v868_v3, %v923_v63  ;;  %5634 = vmatpush1.bf16.msra.mxu0 %v5633_v25  ;;  %v4749_v3 = vld [vmem:[%s11494_s2 + $0x4a8] sm:$0xff]  ;;  %v4783_v50 = vld [vmem:[%s11494_s2 + $0x5b8] sm:$0xff] }
 0x141   :  { %v7565_v12 = vmax.f32 %v864_v37, %v924_v0  ;;  %v926_v13 = vsel %vm890_vm2, %v917_v1, %v925_v11  ;;  %v7594_v41 = vmax.f32 %v869_v5, %v925_v11  ;;  %v4742_v1 = vld [vmem:[%s11494_s2 + $0x470] sm:$0xff]  ;;  %5636 = vmatprep.subr.bf16.mxu0 %v5635_v38  ;;  %v4751_v11 = vld [vmem:[%s11494_s2 + $0x4b8] sm:$0xff]  ;;  %v4744_v0 = vld [vmem:[%s11494_s2 + $0x480] sm:$0xff] }
 0x142   :  { %v7568_v14 = vmax.f32 %v865_v20, %v926_v13  ;;  %v4743_v20 = vld [vmem:[%s11494_s2 + $0x478] sm:$0xff]  ;;  %v4748_v13 = vld [vmem:[%s11494_s2 + $0x4a0] sm:$0xff] }
 0x143   :  { %1164 = vrot.lane.b32.xlu0 %v7558_v10, %s6937_s5  ;;  %1111 = vrot.lane.b32.xlu1 %v7565_v12, %s6937_s5  ;;  %v5699_v52 = vpack.c.bf16 %v4743_v20, %v4739_v35  ;;  %v4764_v38 = vld [vmem:[%s11494_s2 + $0x520] sm:$0xff] }
 0x144   :  { %5638 = vmatpush1.bf16.msra.mxu0 %v5637_v57 }
 0x147   :  { %980 = vrot.lane.b32.xlu0 %v7577_v15, %s6937_s5  ;;  %1166 = vrot.lane.b32.xlu1 %v7568_v14, %s6937_s5 }
 0x14b   :  { %1039 = vrot.lane.b32.xlu0 %v7588_v17, %s6937_s5  ;;  %1113 = vrot.lane.b32.xlu1 %v7583_v16, %s6937_s5 }
 0x14f   :  { %1168 = vrot.lane.b32.xlu1 %v7594_v41, %s6937_s5 }
 0x184   :  { %v973_v47 = vpop.permute.xlu0 %972 }
 0x185   :  { %v987_v54 = vmax.f32 %v7471_v26, %v973_v47 }
 0x187   :  { %993 = vst.msk [vmem:[#allocation6] sm:$0xff] %vm992_vm3, %v987_v54  ;;  %1004 = vrot.lane.b32.xlu0 %v987_v54, %s6937_s5 }
 0x188   :  { %v1032_v45 = vpop.permute.xlu0 %1031 }
 0x189   :  { %v1046_v19 = vmax.f32 %v7474_v30, %v1032_v45  ;;  %v1034_v26 = vpop.permute.xlu1 %1033  ;;  %v4730_v30 = vld [vmem:[%s11494_s2 + $0x410] sm:$0xff]  ;;  %v5641_v45 = vpack.c.bf16 %v4748_v13, %v4744_v0 }
 0x18a   :  { %v5697_v29 = vpack.c.bf16 %v4734_v27, %v4730_v30  ;;  %v1047_v5 = vmax.f32 %v7484_v42, %v1034_v26  ;;  %v5703_v42 = vpack.c.bf16 %v4751_v11, %v4747_v4  ;;  %v4755_v26 = vld [vmem:[%s11494_s2 + $0x4d8] sm:$0xff]  ;;  %v5645_v30 = vpack.c.bf16 %v4756_v24, %v4752_v23  ;;  %v4758_v27 = vld [vmem:[%s11494_s2 + $0x4f0] sm:$0xff]  ;;  %v4789_v23 = vld [vmem:[%s11494_s2 + $0x5e8] sm:$0xff] }
 0x18b   :  { %1056 = vrot.lane.b32.xlu0 %v1046_v19, %s6938_s15  ;;  %v5707_v25 = vpack.c.bf16 %v4759_v7, %v4755_v26  ;;  %v4770_v11 = vld [vmem:[%s11494_s2 + $0x550] sm:$0xff]  ;;  %v4785_v7 = vld [vmem:[%s11494_s2 + $0x5c8] sm:$0xff]  ;;  %v4787_v24 = vld [vmem:[%s11494_s2 + $0x5d8] sm:$0xff] }
 0x18c   :  { %v975_v31 = vpop.permute.xlu0 %974  ;;  %5698 = vmatpush1.bf16.msra.mxu1 %v5697_v29  ;;  %v4761_v29 = vld [vmem:[%s11494_s2 + $0x508] sm:$0xff] }
 0x18d   :  { %v988_v36 = vmax.f32 %v7480_v39, %v975_v31  ;;  %v977_v37 = vpop.permute.xlu1 %976  ;;  %v4738_v39 = vld [vmem:[%s11494_s2 + $0x450] sm:$0xff]  ;;  %5700 = vmatprep.subr.bf16.mxu1 %v5699_v52  ;;  %v5647_v35 = vpack.c.bf16 %v4765_v32, %v4761_v29  ;;  %v4769_v52 = vld [vmem:[%s11494_s2 + $0x548] sm:$0xff]  ;;  %v4788_v29 = vld [vmem:[%s11494_s2 + $0x5e0] sm:$0xff] }
 0x18e   :  { %v989_v48 = vmax.f32 %v7495_v53, %v977_v37  ;;  %v5701_v2 = vpack.c.bf16 %v4742_v1, %v4738_v39  ;;  %v4745_v53 = vld [vmem:[%s11494_s2 + $0x488] sm:$0xff]  ;;  %v4760_v37 = vld [vmem:[%s11494_s2 + $0x500] sm:$0xff] }
 0x18f   :  { %994 = vst.msk [vmem:[#allocation6 + $0x10] sm:$0xff] %vm992_vm3, %v988_v36  ;;  %1078 = vrot.lane.b32.xlu0 %v1046_v19, %s6939_s30  ;;  %1006 = vrot.lane.b32.xlu1 %v988_v36, %s6937_s5  ;;  %v5639_v63 = vpack.c.bf16 %v4749_v3, %v4745_v53  ;;  %v4757_v19 = vld [vmem:[%s11494_s2 + $0x4e8] sm:$0xff]  ;;  %v4767_v36 = vld [vmem:[%s11494_s2 + $0x538] sm:$0xff]  ;;  %v5649_v33 = vpack.c.bf16 %v4764_v38, %v4760_v37 }
 0x190   :  { %995 = vst.msk [vmem:[#allocation6 + $0x20] sm:$0xff] %vm992_vm3, %v989_v48  ;;  %5702 = vmatpush1.bf16.msra.mxu1 %v5701_v2  ;;  %v1036_v47 = vpop.permute.xlu0 %1035  ;;  %v5711_v20 = vpack.c.bf16 %v4767_v36, %v4763_v34  ;;  %v4773_v1 = vld [vmem:[%s11494_s2 + $0x568] sm:$0xff]  ;;  %v4771_v2 = vld [vmem:[%s11494_s2 + $0x558] sm:$0xff]  ;;  %v4790_v34 = vld [vmem:[%s11494_s2 + $0x5f0] sm:$0xff] }
 0x191   :  { %v979_v9 = vpop.permute.xlu1 %978  ;;  %5640 = vmatprep.subr.bf16.mxu0 %v5639_v63  ;;  %5704 = vmatprep.subr.bf16.mxu1 %v5703_v42  ;;  %v1048_v21 = vmax.f32 %v7502_v55, %v1036_v47  ;;  %v4754_v55 = vld [vmem:[%s11494_s2 + $0x4d0] sm:$0xff]  ;;  %v4775_v53 = vld [vmem:[%s11494_s2 + $0x578] sm:$0xff]  ;;  %v5651_v3 = vpack.c.bf16 %v4773_v1, %v4769_v52  ;;  %v4772_v63 = vld [vmem:[%s11494_s2 + $0x560] sm:$0xff] }
 0x192   :  { %v990_v54 = vmax.f32 %v7514_v58, %v979_v9  ;;  %v4753_v58 = vld [vmem:[%s11494_s2 + $0x4c8] sm:$0xff]  ;;  %5642 = vmatpush1.bf16.msra.mxu0 %v5641_v45  ;;  %v5709_v31 = vpack.c.bf16 %v4758_v27, %v4754_v55  ;;  %v5715_v4 = vpack.c.bf16 %v4775_v53, %v4771_v2  ;;  %v4768_v9 = vld [vmem:[%s11494_s2 + $0x540] sm:$0xff]  ;;  %v4779_v42 = vld [vmem:[%s11494_s2 + $0x598] sm:$0xff] }
 0x193   :  { %1008 = vrot.lane.b32.xlu0 %v989_v48, %s6937_s5  ;;  %1058 = vrot.lane.b32.xlu1 %v1047_v5, %s6938_s15  ;;  %v5643_v22 = vpack.c.bf16 %v4757_v19, %v4753_v58  ;;  %v4766_v48 = vld [vmem:[%s11494_s2 + $0x530] sm:$0xff]  ;;  %v5653_v0 = vpack.c.bf16 %v4772_v63, %v4768_v9  ;;  %v4777_v47 = vld [vmem:[%s11494_s2 + $0x588] sm:$0xff]  ;;  %v5719_v56 = vpack.c.bf16 %v4783_v50, %v4779_v42 }
 0x194   :  { %996 = vst.msk [vmem:[#allocation6 + $0x30] sm:$0xff] %vm992_vm3, %v990_v54  ;;  %5706 = vmatpush1.bf16.msra.mxu1 %v5705_v18  ;;  %v5713_v39 = vpack.c.bf16 %v4766_v48, %v4762_v44  ;;  %v4776_v18 = vld [vmem:[%s11494_s2 + $0x580] sm:$0xff]  ;;  %v4778_v19 = vld [vmem:[%s11494_s2 + $0x590] sm:$0xff]  ;;  %v4793_v36 = vld [vmem:[%s11494_s2 + $0x608] sm:$0xff] }
 0x195   :  { %5644 = vmatprep.subr.bf16.mxu0 %v5643_v22  ;;  %5708 = vmatprep.subr.bf16.mxu1 %v5707_v25  ;;  %v1038_v57 = vpop.permute.xlu1 %1037  ;;  %v4780_v58 = vld [vmem:[%s11494_s2 + $0x5a0] sm:$0xff]  ;;  %v5659_v25 = vpack.c.bf16 %v4789_v23, %v4785_v7  ;;  %v4797_v37 = vld [vmem:[%s11494_s2 + $0x628] sm:$0xff]  ;;  %v4795_v38 = vld [vmem:[%s11494_s2 + $0x618] sm:$0xff] }
 0x196   :  { %5646 = vmatpush1.bf16.msra.mxu0 %v5645_v30  ;;  %v5657_v26 = vpack.c.bf16 %v4780_v58, %v4776_v18  ;;  %v4791_v30 = vld [vmem:[%s11494_s2 + $0x5f8] sm:$0xff]  ;;  %v4784_v27 = vld [vmem:[%s11494_s2 + $0x5c0] sm:$0xff]  ;;  %v4794_v2 = vld [vmem:[%s11494_s2 + $0x610] sm:$0xff] }
 0x197   :  { %1060 = vrot.lane.b32.xlu0 %v1048_v21, %s6938_s15  ;;  %1080 = vrot.lane.b32.xlu1 %v1047_v5, %s6939_s30  ;;  %v1049_v5 = vmax.f32 %v7518_v60, %v1038_v57  ;;  %v4774_v60 = vld [vmem:[%s11494_s2 + $0x570] sm:$0xff]  ;;  %v5723_v55 = vpack.c.bf16 %v4791_v30, %v4787_v24  ;;  %v5661_v32 = vpack.c.bf16 %v4788_v29, %v4784_v27  ;;  %v4799_v44 = vld [vmem:[%s11494_s2 + $0x638] sm:$0xff] }
 0x198   :  { %5710 = vmatpush1.bf16.msra.mxu1 %v5709_v31  ;;  %5648 = vmatprep.subr.bf16.mxu0 %v5647_v35  ;;  %v5717_v13 = vpack.c.bf16 %v4774_v60, %v4770_v11  ;;  %v4786_v31 = vld [vmem:[%s11494_s2 + $0x5d0] sm:$0xff]  ;;  %v4792_v48 = vld [vmem:[%s11494_s2 + $0x600] sm:$0xff] }
 0x199   :  { %5712 = vmatprep.subr.bf16.mxu1 %v5711_v20  ;;  %v5725_v35 = vpack.c.bf16 %v4790_v34, %v4786_v31  ;;  %v4796_v52 = vld [vmem:[%s11494_s2 + $0x620] sm:$0xff]  ;;  %v4798_v53 = vld [vmem:[%s11494_s2 + $0x630] sm:$0xff] }
 0x19a   :  { %5650 = vmatpush1.bf16.msra.mxu0 %v5649_v33  ;;  %v5663_v33 = vpack.c.bf16 %v4797_v37, %v4793_v36  ;;  %v5665_v1 = vpack.c.bf16 %v4796_v52, %v4792_v48  ;;  %v4800_v60 = vld [vmem:[%s11494_s2 + $0x640] sm:$0xff]  ;;  %v4802_v50 = vld [vmem:[%s11494_s2 + $0x650] sm:$0xff]  ;;  %v4819_v36 = vld [vmem:[%s11494_s2 + $0x6d8] sm:$0xff] }
 0x19b   :  { %1082 = vrot.lane.b32.xlu0 %v1048_v21, %s6939_s30  ;;  %1010 = vrot.lane.b32.xlu1 %v990_v54, %s6937_s5  ;;  %v4781_v54 = vld [vmem:[%s11494_s2 + $0x5a8] sm:$0xff]  ;;  %v4782_v21 = vld [vmem:[%s11494_s2 + $0x5b0] sm:$0xff] }
 0x19c   :  { %5714 = vmatpush1.bf16.msra.mxu1 %v5713_v39  ;;  %5652 = vmatprep.subr.bf16.mxu0 %v5651_v3  ;;  %v5655_v45 = vpack.c.bf16 %v4781_v54, %v4777_v47  ;;  %v5721_v22 = vpack.c.bf16 %v4782_v21, %v4778_v19  ;;  %v5727_v39 = vpack.c.bf16 %v4799_v44, %v4795_v38  ;;  %v4811_v21 = vld [vmem:[%s11494_s2 + $0x698] sm:$0xff]  ;;  %v4808_v7 = vld [vmem:[%s11494_s2 + $0x680] sm:$0xff]  ;;  %v4814_v27 = vld [vmem:[%s11494_s2 + $0x6b0] sm:$0xff] }
 0x19d   :  { %5716 = vmatprep.subr.bf16.mxu1 %v5715_v4  ;;  %v5729_v3 = vpack.c.bf16 %v4798_v53, %v4794_v2  ;;  %v4805_v4 = vld [vmem:[%s11494_s2 + $0x668] sm:$0xff]  ;;  %v4812_v30 = vld [vmem:[%s11494_s2 + $0x6a0] sm:$0xff]  ;;  %v4823_v37 = vld [vmem:[%s11494_s2 + $0x6f8] sm:$0xff] }
 0x19e   :  { %5654 = vmatpush1.bf16.msra.mxu0 %v5653_v0  ;;  %v4807_v0 = vld [vmem:[%s11494_s2 + $0x678] sm:$0xff]  ;;  %v5673_v29 = vpack.c.bf16 %v4812_v30, %v4808_v7  ;;  %v4816_v38 = vld [vmem:[%s11494_s2 + $0x6c0] sm:$0xff]  ;;  %v4818_v48 = vld [vmem:[%s11494_s2 + $0x6d0] sm:$0xff] }
 0x19f   :  { %1062 = vrot.lane.b32.xlu1 %v1049_v5, %s6938_s15  ;;  %5656 = vmatprep.subr.bf16.mxu0 %v5655_v45  ;;  %v4820_v44 = vld [vmem:[%s11494_s2 + $0x6e0] sm:$0xff]  ;;  %v4822_v52 = vld [vmem:[%s11494_s2 + $0x6f0] sm:$0xff] }
 0x1a0   :  { %5718 = vmatpush1.bf16.msra.mxu1 %v5717_v13  ;;  %v4804_v13 = vld [vmem:[%s11494_s2 + $0x660] sm:$0xff] }
 0x1a1   :  { %5720 = vmatprep.subr.bf16.mxu1 %v5719_v56  ;;  %v5669_v45 = vpack.c.bf16 %v4804_v13, %v4800_v60  ;;  %v4806_v56 = vld [vmem:[%s11494_s2 + $0x670] sm:$0xff]  ;;  %v4840_v30 = vld [vmem:[%s11494_s2 + $0x780] sm:$0xff] }
 0x1a2   :  { %5658 = vmatpush1.bf16.msra.mxu0 %v5657_v26  ;;  %v5733_v18 = vpack.c.bf16 %v4806_v56, %v4802_v50  ;;  %v4826_v60 = vld [vmem:[%s11494_s2 + $0x710] sm:$0xff]  ;;  %v4835_v50 = vld [vmem:[%s11494_s2 + $0x758] sm:$0xff] }
 0x1a3   :  { %1084 = vrot.lane.b32.xlu1 %v1049_v5, %s6939_s30  ;;  %5660 = vmatprep.subr.bf16.mxu0 %v5659_v25  ;;  %v4803_v5 = vld [vmem:[%s11494_s2 + $0x658] sm:$0xff]  ;;  %v4830_v13 = vld [vmem:[%s11494_s2 + $0x730] sm:$0xff] }
 0x1a4   :  { %5722 = vmatpush1.bf16.msra.mxu1 %v5721_v22  ;;  %v5731_v42 = vpack.c.bf16 %v4807_v0, %v4803_v5  ;;  %v4815_v22 = vld [vmem:[%s11494_s2 + $0x6b8] sm:$0xff]  ;;  %v4824_v5 = vld [vmem:[%s11494_s2 + $0x700] sm:$0xff] }
 0x1a5   :  { %5724 = vmatprep.subr.bf16.mxu1 %v5723_v55  ;;  %v5735_v25 = vpack.c.bf16 %v4815_v22, %v4811_v21  ;;  %v4810_v55 = vld [vmem:[%s11494_s2 + $0x690] sm:$0xff]  ;;  %v4828_v0 = vld [vmem:[%s11494_s2 + $0x720] sm:$0xff]  ;;  %v4839_v56 = vld [vmem:[%s11494_s2 + $0x778] sm:$0xff] }
 0x1a6   :  { %5662 = vmatpush1.bf16.msra.mxu0 %v5661_v32  ;;  %v5737_v31 = vpack.c.bf16 %v4814_v27, %v4810_v55  ;;  %v4838_v21 = vld [vmem:[%s11494_s2 + $0x770] sm:$0xff]  ;;  %v4844_v27 = vld [vmem:[%s11494_s2 + $0x7a0] sm:$0xff] }
 0x1a7   :  { %5664 = vmatprep.subr.bf16.mxu0 %v5663_v33  ;;  %v5739_v33 = vpack.c.bf16 %v4823_v37, %v4819_v36  ;;  %v4851_v37 = vld [vmem:[%s11494_s2 + $0x7d8] sm:$0xff] }
 0x1a8   :  { %5726 = vmatpush1.bf16.msra.mxu1 %v5725_v35 }
 0x1a9   :  { %v1106_v20 = vpop.permute.xlu0 %1105  ;;  %5728 = vmatprep.subr.bf16.mxu1 %v5727_v39  ;;  %v5741_v39 = vpack.c.bf16 %v4822_v52, %v4818_v48  ;;  %v4852_v48 = vld [vmem:[%s11494_s2 + $0x7e0] sm:$0xff]  ;;  %v4850_v52 = vld [vmem:[%s11494_s2 + $0x7d0] sm:$0xff] }
 0x1aa   :  { %v1120_v57 = vmax.f32 %v7537_v28, %v1106_v20  ;;  %v4801_v28 = vld [vmem:[%s11494_s2 + $0x648] sm:$0xff]  ;;  %5666 = vmatpush1.bf16.msra.mxu0 %v5665_v1 }
 0x1ab   :  { %v5667_v11 = vpack.c.bf16 %v4805_v4, %v4801_v28  ;;  %v4829_v1 = vld [vmem:[%s11494_s2 + $0x728] sm:$0xff]  ;;  %v4827_v28 = vld [vmem:[%s11494_s2 + $0x718] sm:$0xff] }
 0x1ac   :  { %1125 = vst.msk [vmem:[#allocation6 + $0x8] sm:$0xff] %vm992_vm3, %v1120_v57  ;;  %1135 = vrot.lane.b32.xlu0 %v1120_v57, %s6937_s5  ;;  %5730 = vmatpush1.bf16.msra.mxu1 %v5729_v3  ;;  %v5677_v57 = vpack.c.bf16 %v4820_v44, %v4816_v38  ;;  %v4831_v4 = vld [vmem:[%s11494_s2 + $0x738] sm:$0xff] }
 0x1ad   :  { %v1161_v9 = vpop.permute.xlu0 %1160  ;;  %v1108_v63 = vpop.permute.xlu1 %1107  ;;  %5668 = vmatprep.subr.bf16.mxu0 %v5667_v11  ;;  %5732 = vmatprep.subr.bf16.mxu1 %v5731_v42  ;;  %v5743_v11 = vpack.c.bf16 %v4831_v4, %v4827_v28  ;;  %v4855_v38 = vld [vmem:[%s11494_s2 + $0x7f8] sm:$0xff] }
 0x1ae   :  { %v1175_v47 = vmax.f32 %v7540_v8, %v1161_v9  ;;  %v1121_v54 = vmax.f32 %v7545_v40, %v1108_v63  ;;  %v4809_v8 = vld [vmem:[%s11494_s2 + $0x688] sm:$0xff]  ;;  %5670 = vmatpush1.bf16.msra.mxu0 %v5669_v45  ;;  %v5755_v44 = vpack.c.bf16 %v4855_v38, %v4851_v37  ;;  %v1328_v28 = vld [vmem:[%s11494_s2 + $0x38] sm:$0xff] }
 0x1af   :  { %v4813_v40 = vld [vmem:[%s11494_s2 + $0x6a8] sm:$0xff] }
 0x1b0   :  { %1126 = vst.msk [vmem:[#allocation6 + $0x18] sm:$0xff] %vm992_vm3, %v1121_v54  ;;  %1185 = vrot.lane.b32.xlu0 %v1175_v47, %s6938_s15  ;;  %1137 = vrot.lane.b32.xlu1 %v1121_v54, %s6937_s5  ;;  %v5671_v26 = vpack.c.bf16 %v4813_v40, %v4809_v8  ;;  %v5745_v54 = vpack.c.bf16 %v4830_v13, %v4826_v60 }
 0x1b1   :  { %v1110_v58 = vpop.permute.xlu0 %1109  ;;  %v1163_v19 = vpop.permute.xlu1 %1162  ;;  %5734 = vmatpush1.bf16.msra.mxu1 %v5733_v18  ;;  %v4832_v18 = vld [vmem:[%s11494_s2 + $0x740] sm:$0xff] }
 0x1b2   :  { %v1122_v23 = vmax.f32 %v7555_v6, %v1110_v58  ;;  %v1176_v24 = vmax.f32 %v7548_v59, %v1163_v19  ;;  %5672 = vmatprep.subr.bf16.mxu0 %v5671_v26  ;;  %v4817_v59 = vld [vmem:[%s11494_s2 + $0x6c8] sm:$0xff]  ;;  %5736 = vmatprep.subr.bf16.mxu1 %v5735_v25  ;;  %v5747_v58 = vpack.c.bf16 %v4839_v56, %v4835_v50  ;;  %v4836_v19 = vld [vmem:[%s11494_s2 + $0x760] sm:$0xff]  ;;  %v4834_v26 = vld [vmem:[%s11494_s2 + $0x750] sm:$0xff] }
 0x1b3   :  { %v4821_v6 = vld [vmem:[%s11494_s2 + $0x6e8] sm:$0xff]  ;;  %5674 = vmatpush1.bf16.msra.mxu0 %v5673_v29  ;;  %v5685_v22 = vpack.c.bf16 %v4836_v19, %v4832_v18  ;;  %v5749_v7 = vpack.c.bf16 %v4838_v21, %v4834_v26  ;;  %v4847_v25 = vld [vmem:[%s11494_s2 + $0x7b8] sm:$0xff]  ;;  %v4842_v29 = vld [vmem:[%s11494_s2 + $0x790] sm:$0xff] }
 0x1b4   :  { %1127 = vst.msk [vmem:[#allocation6 + $0x28] sm:$0xff] %vm992_vm3, %v1122_v23  ;;  %1205 = vrot.lane.b32.xlu0 %v1175_v47, %s6939_s30  ;;  %1187 = vrot.lane.b32.xlu1 %v1176_v24, %s6938_s15  ;;  %v5675_v35 = vpack.c.bf16 %v4821_v6, %v4817_v59  ;;  %v5681_v47 = vpack.c.bf16 %v4828_v0, %v4824_v5 }
 0x1b5   :  { %v1165_v32 = vpop.permute.xlu0 %1164  ;;  %v1112_v34 = vpop.permute.xlu1 %1111  ;;  %5738 = vmatpush1.bf16.msra.mxu1 %v5737_v31  ;;  %v4846_v31 = vld [vmem:[%s11494_s2 + $0x7b0] sm:$0xff]  ;;  %v5689_v6 = vpack.c.bf16 %v4844_v27, %v4840_v30 }
 0x1b6   :  { %v1123_v20 = vmax.f32 %v7565_v12, %v1112_v34  ;;  %5676 = vmatprep.subr.bf16.mxu0 %v5675_v35  ;;  %v4825_v12 = vld [vmem:[%s11494_s2 + $0x708] sm:$0xff]  ;;  %5740 = vmatprep.subr.bf16.mxu1 %v5739_v33  ;;  %v1177_v9 = vmax.f32 %v7558_v10, %v1165_v32  ;;  %v5753_v32 = vpack.c.bf16 %v4846_v31, %v4842_v29 }
 0x1b7   :  { %5678 = vmatpush1.bf16.msra.mxu0 %v5677_v57  ;;  %v5679_v3 = vpack.c.bf16 %v4829_v1, %v4825_v12  ;;  %v4833_v10 = vld [vmem:[%s11494_s2 + $0x748] sm:$0xff]  ;;  %v4854_v57 = vld [vmem:[%s11494_s2 + $0x7f0] sm:$0xff] }
 0x1b8   :  { %1128 = vst.msk [vmem:[#allocation6 + $0x38] sm:$0xff] %vm992_vm3, %v1123_v20  ;;  %1139 = vrot.lane.b32.xlu0 %v1122_v23, %s6937_s5  ;;  %1207 = vrot.lane.b32.xlu1 %v1176_v24, %s6939_s30  ;;  %v4843_v24 = vld [vmem:[%s11494_s2 + $0x798] sm:$0xff]  ;;  %v4849_v34 = vld [vmem:[%s11494_s2 + $0x7c8] sm:$0xff]  ;;  %v5757_v1 = vpack.c.bf16 %v4854_v57, %v4850_v52 }
 0x1b9   :  { %v981_v2 = vpop.permute.xlu0 %980  ;;  %v1167_v53 = vpop.permute.xlu1 %1166  ;;  %5742 = vmatpush1.bf16.msra.mxu1 %v5741_v39  ;;  %5680 = vmatprep.subr.bf16.mxu0 %v5679_v3  ;;  %v5751_v55 = vpack.c.bf16 %v4847_v25, %v4843_v24  ;;  %v4853_v35 = vld [vmem:[%s11494_s2 + $0x7e8] sm:$0xff]  ;;  %v1324_v3 = vld [vmem:[%s11494_s2 + $0x18] sm:$0xff]  ;;  %v1325_v52 = vld [vmem:[%s11494_s2 + $0x20] sm:$0xff] }
 0x1ba   :  { %v991_v63 = vmax.f32 %v7577_v15, %v981_v2  ;;  %v4837_v15 = vld [vmem:[%s11494_s2 + $0x768] sm:$0xff]  ;;  %5744 = vmatprep.subr.bf16.mxu1 %v5743_v11  ;;  %v1178_v8 = vmax.f32 %v7568_v14, %v1167_v53  ;;  %v5691_v36 = vpack.c.bf16 %v4853_v35, %v4849_v34  ;;  %v5823_v5 = vpack.c.bf16 %v1328_v28, %v1324_v3  ;;  %v1323_v57 = vld [vmem:[%s11494_s2 + $0x10] sm:$0xff] }
 0x1bb   :  { %5682 = vmatpush1.bf16.msra.mxu0 %v5681_v47  ;;  %v5683_v45 = vpack.c.bf16 %v4837_v15, %v4833_v10  ;;  %v4841_v14 = vld [vmem:[%s11494_s2 + $0x788] sm:$0xff] }
 0x1bc   :  { %998 = vst.msk [vmem:[#allocation6 + $0x40] sm:$0x7] %vm997_vm4, %v991_v63  ;;  %1189 = vrot.lane.b32.xlu0 %v1177_v9, %s6938_s15  ;;  %1141 = vrot.lane.b32.xlu1 %v1123_v20, %s6937_s5  ;;  %v4848_v20 = vld [vmem:[%s11494_s2 + $0x7c0] sm:$0xff]  ;;  %v1326_v2 = vld [vmem:[%s11494_s2 + $0x28] sm:$0xff] }
 0x1bd   :  { %v1114_v42 = vpop.permute.xlu1 %1113  ;;  %5746 = vmatpush1.bf16.msra.mxu1 %v5745_v54  ;;  %5684 = vmatprep.subr.bf16.mxu0 %v5683_v45  ;;  %v1040_v59 = vpop.permute.xlu0 %1039  ;;  %v5693_v12 = vpack.c.bf16 %v4852_v48, %v4848_v20  ;;  %v1321_v48 = vld [vmem:[%s11494_s2] sm:$0xff] }
 0x1be   :  { %v1124_v40 = vmax.f32 %v7583_v16, %v1114_v42  ;;  %v4845_v16 = vld [vmem:[%s11494_s2 + $0x7a8] sm:$0xff]  ;;  %5748 = vmatprep.subr.bf16.mxu1 %v5747_v58  ;;  %v1050_v33 = vmax.f32 %v7588_v17, %v1040_v59 }
 0x1bf   :  { %5686 = vmatpush1.bf16.msra.mxu0 %v5685_v22  ;;  %v5687_v23 = vpack.c.bf16 %v4845_v16, %v4841_v14  ;;  %v1322_v17 = vld [vmem:[%s11494_s2 + $0x8] sm:$0xff] }
 0x1c0   :  { %1129 = vst.msk [vmem:[#allocation6 + $0x48] sm:$0x7] %vm997_vm4, %v1124_v40  ;;  %1209 = vrot.lane.b32.xlu0 %v1177_v9, %s6939_s30  ;;  %1191 = vrot.lane.b32.xlu1 %v1178_v8, %s6938_s15  ;;  %v5759_v53 = vpack.c.bf16 %v1326_v2, %v1322_v17  ;;  %v1330_v17 = vld [vmem:[%s11494_s2 + $0x48] sm:$0xff] }
 0x1c1   :  { %5750 = vmatpush1.bf16.msra.mxu1 %v5749_v7  ;;  %5688 = vmatprep.subr.bf16.mxu0 %v5687_v23  ;;  %v1169_v39 = vpop.permute.xlu1 %1168  ;;  %v1334_v2 = vld [vmem:[%s11494_s2 + $0x68] sm:$0xff] }
 0x1c2   :  { %5752 = vmatprep.subr.bf16.mxu1 %v5751_v55  ;;  %v1179_v4 = vmax.f32 %v7594_v41, %v1169_v39 }
 0x1c3   :  { %5690 = vmatpush1.bf16.msra.mxu0 %v5689_v6 }
 0x1c4   :  { %1012 = vrot.lane.b32.xlu0 %v991_v63, %s6937_s5  ;;  %1211 = vrot.lane.b32.xlu1 %v1178_v8, %s6939_s30 }
 0x1c5   :  { %5754 = vmatpush1.bf16.msra.mxu1 %v5753_v32  ;;  %5692 = vmatprep.subr.bf16.mxu0 %v5691_v36 }
 0x1c6   :  { %5756 = vmatprep.subr.bf16.mxu1 %v5755_v44 }
 0x1c7   :  { %5694 = vmatpush1.bf16.msra.mxu0 %v5693_v12 }
 0x1c8   :  { %1064 = vrot.lane.b32.xlu0 %v1050_v33, %s6938_s15  ;;  %1143 = vrot.lane.b32.xlu1 %v1124_v40, %s6937_s5 }
 0x1c9   :  { %5758 = vmatpush1.bf16.msra.mxu1 %v5757_v1  ;;  %5760 = vmatprep.subr.bf16.mxu0 %v5759_v53  ;;  %v1327_v1 = vld [vmem:[%s11494_s2 + $0x30] sm:$0xff]  ;;  %v1332_v53 = vld [vmem:[%s11494_s2 + $0x58] sm:$0xff] }
 0x1ca   :  { %5824 = vmatprep.subr.bf16.mxu1 %v5823_v5 }
 0x1cc   :  { %1086 = vrot.lane.b32.xlu0 %v1050_v33, %s6939_s30  ;;  %1193 = vrot.lane.b32.xlu1 %v1179_v4, %s6938_s15 }
 0x1d0   :  { %1213 = vrot.lane.b32.xlu1 %v1179_v4, %s6939_s30  ;;  %v1336_v4 = vld [vmem:[%s11494_s2 + $0x78] sm:$0xff] }
 0x1f9   :  { %v1005_v9 = vpop.permute.xlu0 %1004 }
 0x1fa   :  { %1020 = vst.msk [vmem:[#allocation6] sm:$0xff] %vm1019_vm5, %v1005_v9 }
 0x1fd   :  { %v1057_v63 = vpop.permute.xlu0 %1056 }
 0x1fe   :  { %1072 = vst.msk [vmem:[#allocation6] sm:$0xff] %vm1071_vm6, %v1057_v63 }
 0x201   :  { %v1079_v41 = vpop.permute.xlu0 %1078  ;;  %v1007_v11 = vpop.permute.xlu1 %1006 }
 0x202   :  { %1094 = vst.msk [vmem:[#allocation6] sm:$0xff] %vm1093_vm7, %v1079_v41 }
 0x203   :  { %1021 = vst.msk [vmem:[#allocation6 + $0x10] sm:$0xff] %vm1019_vm5, %v1007_v11  ;;  %v5761_v11 = vpack.c.bf16 %v1325_v52, %v1321_v48  ;;  %v1360_v48 = vld [vmem:[%s11494_s2 + $0x138] sm:$0xff] }
 0x205   :  { %v1009_v0 = vpop.permute.xlu0 %1008  ;;  %v1059_v60 = vpop.permute.xlu1 %1058 }
 0x206   :  { %1022 = vst.msk [vmem:[#allocation6 + $0x20] sm:$0xff] %vm1019_vm5, %v1009_v0  ;;  %v5825_v0 = vpack.c.bf16 %v1327_v1, %v1323_v57 }
 0x207   :  { %1073 = vst.msk [vmem:[#allocation6 + $0x10] sm:$0xff] %vm1071_vm6, %v1059_v60  ;;  %v1329_v60 = vld [vmem:[%s11494_s2 + $0x40] sm:$0xff] }
 0x209   :  { %v1061_v13 = vpop.permute.xlu0 %1060  ;;  %v1081_v47 = vpop.permute.xlu1 %1080 }
 0x20a   :  { %1074 = vst.msk [vmem:[#allocation6 + $0x20] sm:$0xff] %vm1071_vm6, %v1061_v13  ;;  %v1333_v13 = vld [vmem:[%s11494_s2 + $0x60] sm:$0xff] }
 0x20b   :  { %1095 = vst.msk [vmem:[#allocation6 + $0x10] sm:$0xff] %vm1093_vm7, %v1081_v47  ;;  %v1331_v47 = vld [vmem:[%s11494_s2 + $0x50] sm:$0xff] }
 0x20d   :  { %v1083_v54 = vpop.permute.xlu0 %1082  ;;  %v1011_v10 = vpop.permute.xlu1 %1010 }
 0x20e   :  { %1096 = vst.msk [vmem:[#allocation6 + $0x20] sm:$0xff] %vm1093_vm7, %v1083_v54 }
 0x20f   :  { %1023 = vst.msk [vmem:[#allocation6 + $0x30] sm:$0xff] %vm1019_vm5, %v1011_v10 }
 0x211   :  { %v1063_v15 = vpop.permute.xlu1 %1062 }
 0x212   :  { %1075 = vst.msk [vmem:[#allocation6 + $0x30] sm:$0xff] %vm1071_vm6, %v1063_v15  ;;  %v5763_v15 = vpack.c.bf16 %v1334_v2, %v1330_v17  ;;  %v1357_v17 = vld [vmem:[%s11494_s2 + $0x120] sm:$0xff]  ;;  %v1355_v2 = vld [vmem:[%s11494_s2 + $0x110] sm:$0xff] }
 0x215   :  { %v1085_v42 = vpop.permute.xlu1 %1084 }
 0x216   :  { %1097 = vst.msk [vmem:[#allocation6 + $0x30] sm:$0xff] %vm1093_vm7, %v1085_v42  ;;  %v5827_v42 = vpack.c.bf16 %v1336_v4, %v1332_v53  ;;  %v1359_v53 = vld [vmem:[%s11494_s2 + $0x130] sm:$0xff] }
 0x21e   :  { %v1136_v45 = vpop.permute.xlu0 %1135 }
 0x21f   :  { %1150 = vst.msk [vmem:[#allocation6 + $0x8] sm:$0xff] %vm1019_vm5, %v1136_v45  ;;  %v1335_v45 = vld [vmem:[%s11494_s2 + $0x70] sm:$0xff] }
 0x222   :  { %v1186_v50 = vpop.permute.xlu0 %1185  ;;  %v1138_v56 = vpop.permute.xlu1 %1137 }
 0x223   :  { %1200 = vst.msk [vmem:[#allocation6 + $0x8] sm:$0xff] %vm1071_vm6, %v1186_v50  ;;  %v1338_v50 = vld [vmem:[%s11494_s2 + $0x88] sm:$0xff] }
 0x224   :  { %1151 = vst.msk [vmem:[#allocation6 + $0x18] sm:$0xff] %vm1019_vm5, %v1138_v56  ;;  %v1342_v56 = vld [vmem:[%s11494_s2 + $0xa8] sm:$0xff] }
 0x226   :  { %v1206_v18 = vpop.permute.xlu0 %1205  ;;  %v1188_v8 = vpop.permute.xlu1 %1187 }
 0x227   :  { %1220 = vst.msk [vmem:[#allocation6 + $0x8] sm:$0xff] %vm1093_vm7, %v1206_v18 }
 0x228   :  { %1201 = vst.msk [vmem:[#allocation6 + $0x18] sm:$0xff] %vm1071_vm6, %v1188_v8  ;;  %v1340_v8 = vld [vmem:[%s11494_s2 + $0x98] sm:$0xff] }
 0x22a   :  { %v1140_v40 = vpop.permute.xlu0 %1139  ;;  %v1208_v58 = vpop.permute.xlu1 %1207 }
 0x22b   :  { %1152 = vst.msk [vmem:[#allocation6 + $0x28] sm:$0xff] %vm1019_vm5, %v1140_v40  ;;  %v1344_v40 = vld [vmem:[%s11494_s2 + $0xb8] sm:$0xff] }
 0x22c   :  { %1221 = vst.msk [vmem:[#allocation6 + $0x18] sm:$0xff] %vm1093_vm7, %v1208_v58  ;;  %v5765_v58 = vpack.c.bf16 %v1333_v13, %v1329_v60  ;;  %v5841_v60 = vpack.c.bf16 %v1359_v53, %v1355_v2  ;;  %v1361_v13 = vld [vmem:[%s11494_s2 + $0x140] sm:$0xff]  ;;  %v1400_v2 = vld [vmem:[%s11494_s2 + $0x278] sm:$0xff] }
 0x22e   :  { %v1232_v26 = vld [vmem:[#allocation6 + $0x1] ss:$8 sm:$0x3]  ;;  %v1241_v21 = vld [vmem:[#allocation6 + $0x3] ss:$8 sm:$0x3]  ;;  %v1190_v22 = vpop.permute.xlu0 %1189  ;;  %v1142_v7 = vpop.permute.xlu1 %1141 }
 0x22f   :  { %v1246_v14 = vld [vmem:[#allocation6 + $0x5] ss:$8 sm:$0x3]  ;;  %v1251_v16 = vld [vmem:[#allocation6 + $0x7] ss:$8 sm:$0x3] }
 0x230   :  { %1238 = vst.msk [vmem:[#allocation3 + $0x2] ss:$8 sm:$0x3] %vm8074_vm8, %v1232_v26  ;;  %1243 = vst.msk [vmem:[#allocation3 + $0x3] ss:$8 sm:$0x3] %vm8074_vm8, %v1241_v21  ;;  %v5829_v26 = vpack.c.bf16 %v1335_v45, %v1331_v47 }
 0x231   :  { %1202 = vst.msk [vmem:[#allocation6 + $0x28] sm:$0xff] %vm1071_vm6, %v1190_v22  ;;  %v1337_v21 = vld [vmem:[%s11494_s2 + $0x80] sm:$0xff] }
 0x232   :  { %1153 = vst.msk [vmem:[#allocation6 + $0x38] sm:$0xff] %vm1019_vm5, %v1142_v7  ;;  %v1210_v24 = vpop.permute.xlu0 %1209  ;;  %v1192_v25 = vpop.permute.xlu1 %1191  ;;  %v1341_v22 = vld [vmem:[%s11494_s2 + $0xa0] sm:$0xff]  ;;  %v5767_v7 = vpack.c.bf16 %v1342_v56, %v1338_v50  ;;  %v1374_v50 = vld [vmem:[%s11494_s2 + $0x1a8] sm:$0xff]  ;;  %v1372_v56 = vld [vmem:[%s11494_s2 + $0x198] sm:$0xff] }
 0x233   :  { %1248 = vst.msk [vmem:[#allocation3 + $0x4] ss:$8 sm:$0x3] %vm8074_vm8, %v1246_v14  ;;  %1253 = vst.msk [vmem:[#allocation3 + $0x5] ss:$8 sm:$0x3] %vm8074_vm8, %v1251_v16  ;;  %v5831_v14 = vpack.c.bf16 %v1344_v40, %v1340_v8 }
 0x234   :  { %v1256_v43 = vld [vmem:[#allocation6 + $0x11] ss:$8 sm:$0x3]  ;;  %v1261_v23 = vld [vmem:[#allocation6 + $0x13] ss:$8 sm:$0x3] }
 0x235   :  { %v1266_v30 = vld [vmem:[#allocation6 + $0x15] ss:$8 sm:$0x3]  ;;  %v1271_v55 = vld [vmem:[#allocation6 + $0x17] ss:$8 sm:$0x3] }
 0x236   :  { %1258 = vst.msk [vmem:[#allocation3 + $0x6] ss:$8 sm:$0x3] %vm8074_vm8, %v1256_v43  ;;  %1263 = vst.msk [vmem:[#allocation3 + $0x7] ss:$8 sm:$0x3] %vm8074_vm8, %v1261_v23  ;;  %v1013_v27 = vpop.permute.xlu0 %1012  ;;  %v1212_v29 = vpop.permute.xlu1 %1211 }
 0x237   :  { %1222 = vst.msk [vmem:[#allocation6 + $0x28] sm:$0xff] %vm1093_vm7, %v1210_v24  ;;  %v1339_v16 = vld [vmem:[%s11494_s2 + $0x90] sm:$0xff]  ;;  %v1346_v23 = vld [vmem:[%s11494_s2 + $0xc8] sm:$0xff]  ;;  %v1365_v47 = vld [vmem:[%s11494_s2 + $0x160] sm:$0xff] }
 0x238   :  { %1203 = vst.msk [vmem:[#allocation6 + $0x38] sm:$0xff] %vm1071_vm6, %v1192_v25  ;;  %v1343_v43 = vld [vmem:[%s11494_s2 + $0xb0] sm:$0xff]  ;;  %v1350_v24 = vld [vmem:[%s11494_s2 + $0xe8] sm:$0xff]  ;;  %v1348_v25 = vld [vmem:[%s11494_s2 + $0xd8] sm:$0xff]  ;;  %v5781_v40 = vpack.c.bf16 %v1365_v47, %v1361_v13 }
 0x239   :  { %1268 = vst.msk [vmem:[#allocation3 + $0x10] ss:$8 sm:$0x3] %vm8074_vm8, %v1266_v30  ;;  %1273 = vst.msk [vmem:[#allocation3 + $0x11] ss:$8 sm:$0x3] %vm8074_vm8, %v1271_v55  ;;  %v5769_v55 = vpack.c.bf16 %v1341_v22, %v1337_v21 }
 0x23a   :  { %1025 = vst.msk [vmem:[#allocation6 + $0x40] sm:$0x7] %vm1024_vm9, %v1013_v27  ;;  %v1065_v6 = vpop.permute.xlu0 %1064  ;;  %v1144_v32 = vpop.permute.xlu1 %1143  ;;  %v1352_v30 = vld [vmem:[%s11494_s2 + $0xf8] sm:$0xff]  ;;  %v5833_v27 = vpack.c.bf16 %v1343_v43, %v1339_v16  ;;  %v1373_v21 = vld [vmem:[%s11494_s2 + $0x1a0] sm:$0xff]  ;;  %v1375_v16 = vld [vmem:[%s11494_s2 + $0x1b0] sm:$0xff] }
 0x23b   :  { %1223 = vst.msk [vmem:[#allocation6 + $0x38] sm:$0xff] %vm1093_vm7, %v1212_v29  ;;  %v1345_v29 = vld [vmem:[%s11494_s2 + $0xc0] sm:$0xff]  ;;  %v1378_v43 = vld [vmem:[%s11494_s2 + $0x1c8] sm:$0xff]  ;;  %v1404_v47 = vld [vmem:[%s11494_s2 + $0x298] sm:$0xff] }
 0x23c   :  { %1077 = vst.msk [vmem:[#allocation6 + $0x40] sm:$0x7] %vm1076_vm10, %v1065_v6  ;;  %v1349_v6 = vld [vmem:[%s11494_s2 + $0xe0] sm:$0xff]  ;;  %v1406_v13 = vld [vmem:[%s11494_s2 + $0x2a8] sm:$0xff] }
 0x23d   :  { %1154 = vst.msk [vmem:[#allocation6 + $0x48] sm:$0x7] %vm1024_vm9, %v1144_v32  ;;  %v1450_v39 = vld [vmem:[#allocation3 + $0x8] sm:$0xfe]  ;;  %v1449_v12 = vld [vmem:[#allocation3] sm:$0xfe]  ;;  %v5773_v52 = vpack.c.bf16 %v1349_v6, %v1345_v29 }
 0x23e   :  { %v1276_v31 = vld [vmem:[#allocation6 + $0x23] ss:$8 sm:$0x3]  ;;  %v1281_v59 = vld [vmem:[#allocation6 + $0x25] ss:$8 sm:$0x3]  ;;  %v1087_v37 = vpop.permute.xlu0 %1086  ;;  %v1194_v38 = vpop.permute.xlu1 %1193 }
 0x23f   :  { %1278 = vst.msk [vmem:[#allocation3 + $0x14] ss:$8 sm:$0x3] %vm8074_vm8, %v1276_v31  ;;  %1283 = vst.msk [vmem:[#allocation3 + $0x15] ss:$8 sm:$0x3] %vm8074_vm8, %v1281_v59  ;;  %v5771_v31 = vpack.c.bf16 %v1350_v24, %v1346_v23  ;;  %v5835_v59 = vpack.c.bf16 %v1352_v30, %v1348_v25 }
 0x240   :  { %v1286_v34 = vld [vmem:[#allocation6 + $0x27] ss:$8 sm:$0x3]  ;;  %1099 = vst.msk [vmem:[#allocation6 + $0x40] sm:$0x7] %vm1098_vm11, %v1087_v37  ;;  %v1591_v5 = vrot.slane %v1450_v39, 1 }
 0x241   :  { %1288 = vst.msk [vmem:[#allocation3 + $0x16] ss:$8 sm:$0x3] %vm8074_vm8, %v1286_v34  ;;  %v1588_v63 = vrot.slane %v1449_v12, 1  ;;  %v1347_v32 = vld [vmem:[%s11494_s2 + $0xd0] sm:$0xff]  ;;  %v1354_v37 = vld [vmem:[%s11494_s2 + $0x108] sm:$0xff] }
 0x242   :  { %v1291_v35 = vld [vmem:[#allocation6 + $0x31] ss:$8 sm:$0x3]  ;;  %v1296_v36 = vld [vmem:[#allocation6 + $0x33] ss:$8 sm:$0x3]  ;;  %v1214_v44 = vpop.permute.xlu1 %1213 }
 0x243   :  { %1293 = vst.msk [vmem:[#allocation3 + $0x17] ss:$8 sm:$0x3] %vm8074_vm8, %v1291_v35  ;;  %1298 = vst.msk [vmem:[#allocation3 + $0x20] ss:$8 sm:$0x3] %vm8074_vm8, %v1296_v36 }
 0x244   :  { %v1301_v20 = vld [vmem:[#allocation6 + $0x35] ss:$8 sm:$0x3]  ;;  %v1306_v33 = vld [vmem:[#allocation6 + $0x37] ss:$8 sm:$0x3] }
 0x245   :  { %1204 = vst.msk [vmem:[#allocation6 + $0x48] sm:$0x7] %vm1076_vm10, %v1194_v38  ;;  %v1351_v34 = vld [vmem:[%s11494_s2 + $0xf0] sm:$0xff]  ;;  %v1353_v39 = vld [vmem:[%s11494_s2 + $0x100] sm:$0xff]  ;;  %v1382_v23 = vld [vmem:[%s11494_s2 + $0x1e8] sm:$0xff] }
 0x246   :  { %1303 = vst.msk [vmem:[#allocation3 + $0x21] ss:$8 sm:$0x3] %vm8074_vm8, %v1301_v20  ;;  %1308 = vst.msk [vmem:[#allocation3 + $0x22] ss:$8 sm:$0x3] %vm8074_vm8, %v1306_v33  ;;  %v5837_v57 = vpack.c.bf16 %v1351_v34, %v1347_v32 }
 0x247   :  { %1224 = vst.msk [vmem:[#allocation6 + $0x48] sm:$0x7] %vm1098_vm11, %v1214_v44  ;;  %v1358_v33 = vld [vmem:[%s11494_s2 + $0x128] sm:$0xff]  ;;  %v1356_v44 = vld [vmem:[%s11494_s2 + $0x118] sm:$0xff]  ;;  %v1316_v8 = vld [vmem:[#allocation3 + $0x8] sm:$0xff] }
 0x248   :  { %v5775_v4 = vpack.c.bf16 %v1358_v33, %v1354_v37  ;;  %v1380_v24 = vld [vmem:[%s11494_s2 + $0x1d8] sm:$0xff]  ;;  %v1381_v29 = vld [vmem:[%s11494_s2 + $0x1e0] sm:$0xff]  ;;  %v1379_v6 = vld [vmem:[%s11494_s2 + $0x1d0] sm:$0xff] }
 0x249   :  { %v1384_v25 = vld [vmem:[%s11494_s2 + $0x1f8] sm:$0xff]  ;;  %v1383_v32 = vld [vmem:[%s11494_s2 + $0x1f0] sm:$0xff]  ;;  %v1386_v34 = vld [vmem:[%s11494_s2 + $0x208] sm:$0xff] }
 0x24a   :  { %v8136_v3 = vld [vmem:[#allocation3 + $0x18] sm:$0xff]  ;;  %v8138_v28 = vld [vmem:[#allocation3 + $0x10] sm:$0xff] }
 0x24b   :  { %v1592_v9 = vrot.slane %v8136_v3, 1  ;;  %v1589_v41 = vrot.slane %v8138_v28, 1  ;;  %v1392_v37 = vld [vmem:[%s11494_s2 + $0x238] sm:$0xff]  ;;  %v1385_v33 = vld [vmem:[%s11494_s2 + $0x200] sm:$0xff] }
 0x24d   :  { %v1593_v54 = vsel %vm890_vm2, %v1591_v5, %v1592_v9  ;;  %v1590_v10 = vsel %vm890_vm2, %v1588_v63, %v1589_v41  ;;  %v5839_v5 = vpack.c.bf16 %v1360_v48, %v1356_v44  ;;  %v1366_v63 = vld [vmem:[%s11494_s2 + $0x168] sm:$0xff]  ;;  %v1389_v44 = vld [vmem:[%s11494_s2 + $0x220] sm:$0xff] }
 0x24e   :  { %v1311_v18 = vld [vmem:[#allocation6 + $0x41] ss:$8 sm:$0x3]  ;;  %1668 = vmatprep.mubr.f32.mxu0 %v1593_v54  ;;  %1751 = vmatprep.mubr.f32.mxu1 %v1593_v54  ;;  %v1363_v54 = vld [vmem:[%s11494_s2 + $0x150] sm:$0xff]  ;;  %v5793_v53 = vpack.c.bf16 %v1389_v44, %v1385_v33 }
 0x24f   :  { %1313 = vst.msk [vmem:[#allocation3 + $0x23] ss:$8 sm:$0x3] %vm8074_vm8, %v1311_v18  ;;  %1669 = vmatmul.mubr.f32.vlgmr.msra.gmra.mrb[10].mxu0 %v1590_v10  ;;  %1752 = vmatmul.mubr.f32.vlgmr.msra.gmra.mrb[20].mxu1 %v1590_v10  ;;  %v1367_v10 = vld [vmem:[%s11494_s2 + $0x170] sm:$0xff]  ;;  %v1376_v18 = vld [vmem:[%s11494_s2 + $0x1b8] sm:$0xff] }
 0x250   :  { %5762 = vmatpush1.bf16.msra.mxu0 %v5761_v11  ;;  %5826 = vmatpush1.bf16.msra.mxu1 %v5825_v0  ;;  %v1368_v11 = vld [vmem:[%s11494_s2 + $0x178] sm:$0xff]  ;;  %v5777_v0 = vpack.c.bf16 %v1357_v17, %v1353_v39  ;;  %v1391_v39 = vld [vmem:[%s11494_s2 + $0x230] sm:$0xff] }
 0x251   :  { %5764 = vmatprep.subr.bf16.mxu0 %v5763_v15  ;;  %5828 = vmatprep.subr.bf16.mxu1 %v5827_v42  ;;  %v1370_v15 = vld [vmem:[%s11494_s2 + $0x188] sm:$0xff]  ;;  %v1396_v17 = vld [vmem:[%s11494_s2 + $0x258] sm:$0xff] }
 0x252   :  { %v5783_v22 = vpack.c.bf16 %v1374_v50, %v1370_v15  ;;  %v1428_v33 = vld [vmem:[%s11494_s2 + $0x358] sm:$0xff] }
 0x253   :  { %v1432_v44 = vld [vmem:[%s11494_s2 + $0x378] sm:$0xff] }
 0x254   :  { %5766 = vmatpush1.bf16.msra.mxu0 %v5765_v58  ;;  %5830 = vmatpush1.bf16.msra.mxu1 %v5829_v26  ;;  %v5845_v58 = vpack.c.bf16 %v1367_v10, %v1363_v54  ;;  %v1369_v26 = vld [vmem:[%s11494_s2 + $0x180] sm:$0xff]  ;;  %v1408_v54 = vld [vmem:[%s11494_s2 + $0x2b8] sm:$0xff] }
 0x255   :  { %5768 = vmatprep.subr.bf16.mxu0 %v5767_v7  ;;  %5832 = vmatprep.subr.bf16.mxu1 %v5831_v14  ;;  %v5847_v7 = vpack.c.bf16 %v1376_v18, %v1372_v56  ;;  %v1371_v14 = vld [vmem:[%s11494_s2 + $0x190] sm:$0xff]  ;;  %v5785_v30 = vpack.c.bf16 %v1373_v21, %v1369_v26  ;;  %v5863_v56 = vpack.c.bf16 %v1408_v54, %v1404_v47  ;;  %v1412_v26 = vld [vmem:[%s11494_s2 + $0x2d8] sm:$0xff] }
 0x256   :  { %v1452_v35 = vld [vmem:[#allocation3 + $0x28] sm:$0x1f]  ;;  %v1451_v36 = vld [vmem:[#allocation3 + $0x20] sm:$0x1f]  ;;  %v1416_v21 = vld [vmem:[%s11494_s2 + $0x2f8] sm:$0xff] }
 0x257   :  { %v1596_v38 = vrot.slane %v1452_v35, 1  ;;  %v1594_v20 = vrot.slane %v1451_v36, 1  ;;  %v1390_v35 = vld [vmem:[%s11494_s2 + $0x228] sm:$0xff]  ;;  %v1388_v36 = vld [vmem:[%s11494_s2 + $0x218] sm:$0xff]  ;;  %v1403_v18 = vld [vmem:[%s11494_s2 + $0x290] sm:$0xff] }
 0x258   :  { %5770 = vmatpush1.bf16.msra.mxu0 %v5769_v55  ;;  %5834 = vmatpush1.bf16.msra.mxu1 %v5833_v27  ;;  %v5849_v55 = vpack.c.bf16 %v1375_v16, %v1371_v14  ;;  %v1377_v27 = vld [vmem:[%s11494_s2 + $0x1c0] sm:$0xff]  ;;  %v5791_v48 = vpack.c.bf16 %v1390_v35, %v1386_v34  ;;  %v1435_v47 = vld [vmem:[%s11494_s2 + $0x390] sm:$0xff] }
 0x259   :  { %v1597_v12 = vsel %vm890_vm2, %v1592_v9, %v1596_v38  ;;  %5772 = vmatprep.subr.bf16.mxu0 %v5771_v31  ;;  %5836 = vmatprep.subr.bf16.mxu1 %v5835_v59  ;;  %v1595_v1 = vsel %vm890_vm2, %v1589_v41, %v1594_v20  ;;  %v1362_v9 = vld [vmem:[%s11494_s2 + $0x148] sm:$0xff]  ;;  %v1364_v41 = vld [vmem:[%s11494_s2 + $0x158] sm:$0xff]  ;;  %v5787_v31 = vpack.c.bf16 %v1382_v23, %v1378_v43  ;;  %v1409_v14 = vld [vmem:[%s11494_s2 + $0x2c0] sm:$0xff] }
 0x25a   :  { %1674 = vmatprep.mubr.f32.mxu0 %v1597_v12  ;;  %1757 = vmatprep.mubr.f32.mxu1 %v1597_v12  ;;  %v5779_v42 = vpack.c.bf16 %v1366_v63, %v1362_v9  ;;  %v5843_v45 = vpack.c.bf16 %v1368_v11, %v1364_v41  ;;  %v5851_v59 = vpack.c.bf16 %v1384_v25, %v1380_v24  ;;  %v1394_v12 = vld [vmem:[%s11494_s2 + $0x248] sm:$0xff]  ;;  %v1397_v9 = vld [vmem:[%s11494_s2 + $0x260] sm:$0xff]  ;;  %v1395_v11 = vld [vmem:[%s11494_s2 + $0x250] sm:$0xff] }
 0x25b   :  { %1675 = vmatmul.mubr.f32.gmra.mrb[12].mxu0 %v1595_v1  ;;  %1758 = vmatmul.mubr.f32.gmra.mrb[22].mxu1 %v1595_v1  ;;  %v1398_v1 = vld [vmem:[%s11494_s2 + $0x268] sm:$0xff]  ;;  %v5859_v41 = vpack.c.bf16 %v1400_v2, %v1396_v17  ;;  %v1413_v16 = vld [vmem:[%s11494_s2 + $0x2e0] sm:$0xff]  ;;  %v5867_v23 = vpack.c.bf16 %v1416_v21, %v1412_v26  ;;  %v1411_v24 = vld [vmem:[%s11494_s2 + $0x2d0] sm:$0xff] }
 0x25c   :  { %5774 = vmatpush1.bf16.msra.mxu0 %v5773_v52  ;;  %5838 = vmatpush1.bf16.msra.mxu1 %v5837_v57  ;;  %v5855_v52 = vpack.c.bf16 %v1392_v37, %v1388_v36  ;;  %v1387_v57 = vld [vmem:[%s11494_s2 + $0x210] sm:$0xff]  ;;  %v5795_v63 = vpack.c.bf16 %v1398_v1, %v1394_v12  ;;  %v5875_v1 = vpack.c.bf16 %v1432_v44, %v1428_v33 }
 0x25d   :  { %1680 = vmatprep.mubr.f32.mxu0 %v1596_v38  ;;  %1763 = vmatprep.mubr.f32.mxu1 %v1596_v38  ;;  %v5789_v38 = vpack.c.bf16 %v1381_v29, %v1377_v27  ;;  %v1415_v25 = vld [vmem:[%s11494_s2 + $0x2f0] sm:$0xff]  ;;  %v1420_v27 = vld [vmem:[%s11494_s2 + $0x318] sm:$0xff] }
 0x25e   :  { %5776 = vmatprep.subr.bf16.mxu0 %v5775_v4  ;;  %5840 = vmatprep.subr.bf16.mxu1 %v5839_v5  ;;  %v5857_v4 = vpack.c.bf16 %v1391_v39, %v1387_v57  ;;  %v1393_v5 = vld [vmem:[%s11494_s2 + $0x240] sm:$0xff]  ;;  %v1424_v29 = vld [vmem:[%s11494_s2 + $0x338] sm:$0xff]  ;;  %v1419_v36 = vld [vmem:[%s11494_s2 + $0x310] sm:$0xff] }
 0x25f   :  { %1681 = vmatmul.mubr.f32.gmra.mrb[14].mxu0 %v1594_v20  ;;  %1764 = vmatmul.mubr.f32.gmra.mrb[24].mxu1 %v1594_v20  ;;  %v5853_v20 = vpack.c.bf16 %v1383_v32, %v1379_v6  ;;  %v5797_v10 = vpack.c.bf16 %v1397_v9, %v1393_v5  ;;  %v1417_v6 = vld [vmem:[%s11494_s2 + $0x300] sm:$0xff]  ;;  %v5871_v35 = vpack.c.bf16 %v1424_v29, %v1420_v27  ;;  %v1423_v37 = vld [vmem:[%s11494_s2 + $0x330] sm:$0xff]  ;;  %v1436_v5 = vld [vmem:[%s11494_s2 + $0x398] sm:$0xff] }
 0x260   :  { %5778 = vmatpush1.bf16.msra.mxu0 %v5777_v0  ;;  %5842 = vmatpush1.bf16.msra.mxu1 %v5841_v60  ;;  %v1399_v0 = vld [vmem:[%s11494_s2 + $0x270] sm:$0xff]  ;;  %v1402_v60 = vld [vmem:[%s11494_s2 + $0x288] sm:$0xff]  ;;  %v1421_v32 = vld [vmem:[%s11494_s2 + $0x320] sm:$0xff] }
 0x261   :  { %1834 = vmatprep.mubr.f32.mxu0 %v1316_v8  ;;  %1917 = vmatprep.mubr.f32.mxu1 %v1316_v8  ;;  %v5861_v15 = vpack.c.bf16 %v1399_v0, %v1395_v11  ;;  %v5799_v50 = vpack.c.bf16 %v1406_v13, %v1402_v60  ;;  %v1407_v8 = vld [vmem:[%s11494_s2 + $0x2b0] sm:$0xff]  ;;  %v1425_v57 = vld [vmem:[%s11494_s2 + $0x340] sm:$0xff]  ;;  %v1440_v9 = vld [vmem:[%s11494_s2 + $0x3b8] sm:$0xff] }
 0x262   :  { %5780 = vmatprep.subr.bf16.mxu0 %v5779_v42  ;;  %5844 = vmatprep.subr.bf16.mxu1 %v5843_v45  ;;  %v1401_v42 = vld [vmem:[%s11494_s2 + $0x280] sm:$0xff]  ;;  %v1427_v17 = vld [vmem:[%s11494_s2 + $0x350] sm:$0xff]  ;;  %v5879_v13 = vpack.c.bf16 %v1440_v9, %v1436_v5 }
 0x263   :  { %v1405_v45 = vld [vmem:[%s11494_s2 + $0x2a0] sm:$0xff]  ;;  %v1431_v2 = vld [vmem:[%s11494_s2 + $0x370] sm:$0xff] }
 0x264   :  { %5782 = vmatpush1.bf16.msra.mxu0 %v5781_v40  ;;  %5846 = vmatpush1.bf16.msra.mxu1 %v5845_v58  ;;  %v1410_v40 = vld [vmem:[%s11494_s2 + $0x2c8] sm:$0xff]  ;;  %v1429_v39 = vld [vmem:[%s11494_s2 + $0x360] sm:$0xff]  ;;  %v1439_v54 = vld [vmem:[%s11494_s2 + $0x3b0] sm:$0xff] }
 0x265   :  { %5784 = vmatprep.subr.bf16.mxu0 %v5783_v22  ;;  %5848 = vmatprep.subr.bf16.mxu1 %v5847_v7  ;;  %v1414_v58 = vld [vmem:[%s11494_s2 + $0x2e8] sm:$0xff]  ;;  %v5801_v22 = vpack.c.bf16 %v1405_v45, %v1401_v42  ;;  %v5865_v7 = vpack.c.bf16 %v1407_v8, %v1403_v18  ;;  %v1433_v11 = vld [vmem:[%s11494_s2 + $0x380] sm:$0xff]  ;;  %v1444_v42 = vld [vmem:[%s11494_s2 + $0x3d8] sm:$0xff] }
 0x266   :  { %v5803_v43 = vpack.c.bf16 %v1414_v58, %v1410_v40  ;;  %v1437_v0 = vld [vmem:[%s11494_s2 + $0x3a0] sm:$0xff]  ;;  %v1448_v45 = vld [vmem:[%s11494_s2 + $0x3f8] sm:$0xff]  ;;  %v1443_v26 = vld [vmem:[%s11494_s2 + $0x3d0] sm:$0xff] }
 0x267   :  { %v1441_v18 = vld [vmem:[%s11494_s2 + $0x3c0] sm:$0xff]  ;;  %v5883_v58 = vpack.c.bf16 %v1448_v45, %v1444_v42  ;;  %v1447_v21 = vld [vmem:[%s11494_s2 + $0x3f0] sm:$0xff] }
 0x268   :  { %5786 = vmatpush1.bf16.msra.mxu0 %v5785_v30  ;;  %5850 = vmatpush1.bf16.msra.mxu1 %v5849_v55  ;;  %v1418_v30 = vld [vmem:[%s11494_s2 + $0x308] sm:$0xff]  ;;  %v1445_v8 = vld [vmem:[%s11494_s2 + $0x3e0] sm:$0xff]  ;;  %v4858_v27 = vld [vmem:[%s11494_s2 + $0x810] sm:$0xff] }
 0x269   :  { %5788 = vmatprep.subr.bf16.mxu0 %v5787_v31  ;;  %5852 = vmatprep.subr.bf16.mxu1 %v5851_v59  ;;  %v1422_v55 = vld [vmem:[%s11494_s2 + $0x328] sm:$0xff]  ;;  %v5805_v31 = vpack.c.bf16 %v1413_v16, %v1409_v14  ;;  %v5869_v59 = vpack.c.bf16 %v1415_v25, %v1411_v24  ;;  %v4859_v14 = vld [vmem:[%s11494_s2 + $0x818] sm:$0xff]  ;;  %v4862_v29 = vld [vmem:[%s11494_s2 + $0x830] sm:$0xff] }
 0x26a   :  { %v5807_v34 = vpack.c.bf16 %v1422_v55, %v1418_v30  ;;  %v4863_v16 = vld [vmem:[%s11494_s2 + $0x838] sm:$0xff]  ;;  %v4856_v30 = vld [vmem:[%s11494_s2 + $0x800] sm:$0xff]  ;;  %v4878_v5 = vld [vmem:[%s11494_s2 + $0x8b0] sm:$0xff] }
 0x26b   :  { %v5951_v25 = vpack.c.bf16 %v4863_v16, %v4859_v14  ;;  %v4860_v55 = vld [vmem:[%s11494_s2 + $0x820] sm:$0xff] }
 0x26c   :  { %5790 = vmatpush1.bf16.msra.mxu0 %v5789_v38  ;;  %5854 = vmatpush1.bf16.msra.mxu1 %v5853_v20  ;;  %v1426_v38 = vld [vmem:[%s11494_s2 + $0x348] sm:$0xff]  ;;  %v4884_v45 = vld [vmem:[%s11494_s2 + $0x8e0] sm:$0xff] }
 0x26d   :  { %5792 = vmatprep.subr.bf16.mxu0 %v5791_v48  ;;  %5856 = vmatprep.subr.bf16.mxu1 %v5855_v52  ;;  %v1430_v20 = vld [vmem:[%s11494_s2 + $0x368] sm:$0xff]  ;;  %v5809_v48 = vpack.c.bf16 %v1421_v32, %v1417_v6  ;;  %v5873_v52 = vpack.c.bf16 %v1423_v37, %v1419_v36  ;;  %v4867_v6 = vld [vmem:[%s11494_s2 + $0x858] sm:$0xff]  ;;  %v4864_v36 = vld [vmem:[%s11494_s2 + $0x840] sm:$0xff] }
 0x26e   :  { %v5811_v12 = vpack.c.bf16 %v1430_v20, %v1426_v38  ;;  %v4871_v32 = vld [vmem:[%s11494_s2 + $0x878] sm:$0xff]  ;;  %v4868_v37 = vld [vmem:[%s11494_s2 + $0x860] sm:$0xff]  ;;  %v4866_v38 = vld [vmem:[%s11494_s2 + $0x850] sm:$0xff] }
 0x26f   :  { %v1315_v20 = vld [vmem:[#allocation3] sm:$0xff]  ;;  %v5955_v44 = vpack.c.bf16 %v4871_v32, %v4867_v6 }
 0x270   :  { %5794 = vmatpush1.bf16.msra.mxu0 %v5793_v53  ;;  %5858 = vmatpush1.bf16.msra.mxu1 %v5857_v4  ;;  %v1434_v53 = vld [vmem:[%s11494_s2 + $0x388] sm:$0xff] }
 0x271   :  { %5796 = vmatprep.subr.bf16.mxu0 %v5795_v63  ;;  %5860 = vmatprep.subr.bf16.mxu1 %v5859_v41  ;;  %v1438_v4 = vld [vmem:[%s11494_s2 + $0x3a8] sm:$0xff]  ;;  %v5813_v63 = vpack.c.bf16 %v1429_v39, %v1425_v57  ;;  %v5877_v41 = vpack.c.bf16 %v1431_v2, %v1427_v17  ;;  %v4875_v39 = vld [vmem:[%s11494_s2 + $0x898] sm:$0xff]  ;;  %v5893_v17 = vpack.c.bf16 %v4868_v37, %v4864_v36 }
 0x272   :  { %v5815_v60 = vpack.c.bf16 %v1438_v4, %v1434_v53  ;;  %v4877_v57 = vld [vmem:[%s11494_s2 + $0x8a8] sm:$0xff]  ;;  %v4876_v53 = vld [vmem:[%s11494_s2 + $0x8a0] sm:$0xff]  ;;  %v4874_v4 = vld [vmem:[%s11494_s2 + $0x890] sm:$0xff] }
 0x273   :  { %v5961_v42 = vpack.c.bf16 %v4878_v5, %v4874_v4  ;;  %v4910_v4 = vld [vmem:[%s11494_s2 + $0x9b0] sm:$0xff]  ;;  %v4913_v5 = vld [vmem:[%s11494_s2 + $0x9c8] sm:$0xff] }
 0x274   :  { %5798 = vmatpush1.bf16.msra.mxu0 %v5797_v10  ;;  %5862 = vmatpush1.bf16.msra.mxu1 %v5861_v15  ;;  %v1442_v10 = vld [vmem:[%s11494_s2 + $0x3c8] sm:$0xff] }
 0x275   :  { %5800 = vmatprep.subr.bf16.mxu0 %v5799_v50  ;;  %5864 = vmatprep.subr.bf16.mxu1 %v5863_v56  ;;  %v1446_v15 = vld [vmem:[%s11494_s2 + $0x3e8] sm:$0xff]  ;;  %v5817_v50 = vpack.c.bf16 %v1437_v0, %v1433_v11  ;;  %v5881_v56 = vpack.c.bf16 %v1439_v54, %v1435_v47  ;;  %v4883_v47 = vld [vmem:[%s11494_s2 + $0x8d8] sm:$0xff] }
 0x276   :  { %v5819_v40 = vpack.c.bf16 %v1446_v15, %v1442_v10  ;;  %v4881_v11 = vld [vmem:[%s11494_s2 + $0x8c8] sm:$0xff]  ;;  %v4887_v54 = vld [vmem:[%s11494_s2 + $0x8f8] sm:$0xff] }
 0x277   :  { %v4885_v0 = vld [vmem:[%s11494_s2 + $0x8e8] sm:$0xff] }
 0x278   :  { %5802 = vmatpush1.bf16.msra.mxu0 %v5801_v22  ;;  %5866 = vmatpush1.bf16.msra.mxu1 %v5865_v7  ;;  %v4857_v22 = vld [vmem:[%s11494_s2 + $0x808] sm:$0xff] }
 0x279   :  { %5804 = vmatprep.subr.bf16.mxu0 %v5803_v43  ;;  %5868 = vmatprep.subr.bf16.mxu1 %v5867_v23  ;;  %v4861_v7 = vld [vmem:[%s11494_s2 + $0x828] sm:$0xff]  ;;  %v5821_v43 = vpack.c.bf16 %v1445_v8, %v1441_v18  ;;  %v5885_v23 = vpack.c.bf16 %v1447_v21, %v1443_v26  ;;  %v5899_v18 = vpack.c.bf16 %v4885_v0, %v4881_v11 }
 0x27a   :  { %v5887_v24 = vpack.c.bf16 %v4861_v7, %v4857_v22  ;;  %v5963_v8 = vpack.c.bf16 %v4887_v54, %v4883_v47  ;;  %v4893_v21 = vld [vmem:[%s11494_s2 + $0x928] sm:$0xff]  ;;  %v4891_v22 = vld [vmem:[%s11494_s2 + $0x918] sm:$0xff]  ;;  %v4916_v47 = vld [vmem:[%s11494_s2 + $0x9e0] sm:$0xff] }
 0x27b   :  { %v4895_v7 = vld [vmem:[%s11494_s2 + $0x938] sm:$0xff] }
 0x27c   :  { %5806 = vmatpush1.bf16.msra.mxu0 %v5805_v31  ;;  %5870 = vmatpush1.bf16.msra.mxu1 %v5869_v59  ;;  %v4865_v31 = vld [vmem:[%s11494_s2 + $0x848] sm:$0xff] }
 0x27d   :  { %5808 = vmatprep.subr.bf16.mxu0 %v5807_v34  ;;  %5872 = vmatprep.subr.bf16.mxu1 %v5871_v35  ;;  %v4869_v59 = vld [vmem:[%s11494_s2 + $0x868] sm:$0xff]  ;;  %v5889_v34 = vpack.c.bf16 %v4860_v55, %v4856_v30  ;;  %v5953_v35 = vpack.c.bf16 %v4862_v29, %v4858_v27  ;;  %v4890_v30 = vld [vmem:[%s11494_s2 + $0x910] sm:$0xff] }
 0x27e   :  { %v5891_v33 = vpack.c.bf16 %v4869_v59, %v4865_v31  ;;  %v4894_v55 = vld [vmem:[%s11494_s2 + $0x930] sm:$0xff]  ;;  %v4897_v27 = vld [vmem:[%s11494_s2 + $0x948] sm:$0xff]  ;;  %v4899_v31 = vld [vmem:[%s11494_s2 + $0x958] sm:$0xff] }
 0x27f   :  { %v4901_v29 = vld [vmem:[%s11494_s2 + $0x968] sm:$0xff]  ;;  %v4903_v59 = vld [vmem:[%s11494_s2 + $0x978] sm:$0xff]  ;;  %v5969_v32 = vpack.c.bf16 %v4894_v55, %v4890_v30  ;;  %v4928_v30 = vld [vmem:[%s11494_s2 + $0xa40] sm:$0xff] }
 0x280   :  { %5810 = vmatpush1.bf16.msra.mxu0 %v5809_v48  ;;  %5874 = vmatpush1.bf16.msra.mxu1 %v5873_v52  ;;  %v4870_v48 = vld [vmem:[%s11494_s2 + $0x870] sm:$0xff]  ;;  %v4873_v52 = vld [vmem:[%s11494_s2 + $0x888] sm:$0xff]  ;;  %v5907_v36 = vpack.c.bf16 %v4901_v29, %v4897_v27  ;;  %v5971_v37 = vpack.c.bf16 %v4903_v59, %v4899_v31  ;;  %v4932_v55 = vld [vmem:[%s11494_s2 + $0xa60] sm:$0xff] }
 0x281   :  { %5812 = vmatprep.subr.bf16.mxu0 %v5811_v12  ;;  %5876 = vmatprep.subr.bf16.mxu1 %v5875_v1  ;;  %v4879_v12 = vld [vmem:[%s11494_s2 + $0x8b8] sm:$0xff]  ;;  %v4872_v1 = vld [vmem:[%s11494_s2 + $0x880] sm:$0xff]  ;;  %v5957_v2 = vpack.c.bf16 %v4870_v48, %v4866_v38  ;;  %v5895_v9 = vpack.c.bf16 %v4877_v57, %v4873_v52  ;;  %v4898_v38 = vld [vmem:[%s11494_s2 + $0x950] sm:$0xff] }
 0x282   :  { %v5897_v10 = vpack.c.bf16 %v4876_v53, %v4872_v1  ;;  %v4907_v48 = vld [vmem:[%s11494_s2 + $0x998] sm:$0xff]  ;;  %v4908_v1 = vld [vmem:[%s11494_s2 + $0x9a0] sm:$0xff]  ;;  %v4906_v53 = vld [vmem:[%s11494_s2 + $0x990] sm:$0xff] }
 0x283   :  { %v4911_v52 = vld [vmem:[%s11494_s2 + $0x9b8] sm:$0xff]  ;;  %v5977_v0 = vpack.c.bf16 %v4910_v4, %v4906_v53  ;;  %v4930_v31 = vld [vmem:[%s11494_s2 + $0xa50] sm:$0xff]  ;;  %v4944_v53 = vld [vmem:[%s11494_s2 + $0xac0] sm:$0xff] }
 0x284   :  { %5814 = vmatpush1.bf16.msra.mxu0 %v5813_v63  ;;  %5878 = vmatpush1.bf16.msra.mxu1 %v5877_v41  ;;  %v5959_v63 = vpack.c.bf16 %v4879_v12, %v4875_v39  ;;  %v1937_v41 = vld [vmem:[#allocation3 + $0x8] sm:$0xfc]  ;;  %v4904_v12 = vld [vmem:[%s11494_s2 + $0x980] sm:$0xff] }
 0x285   :  { %5816 = vmatprep.subr.bf16.mxu0 %v5815_v60  ;;  %5880 = vmatprep.subr.bf16.mxu1 %v5879_v13  ;;  %v1320_v60 = vld [vmem:[#allocation3 + $0x28] sm:$0xf]  ;;  %v2078_v13 = vrot.slane %v8136_v3, 2  ;;  %v2077_v15 = vrot.slane %v1937_v41, 2  ;;  %v4919_v41 = vld [vmem:[%s11494_s2 + $0x9f8] sm:$0xff]  ;;  %v5913_v11 = vpack.c.bf16 %v4908_v1, %v4904_v12  ;;  %v4948_v4 = vld [vmem:[%s11494_s2 + $0xae0] sm:$0xff] }
 0x286   :  { %v4934_v59 = vld [vmem:[%s11494_s2 + $0xa70] sm:$0xff]  ;;  %v4947_v12 = vld [vmem:[%s11494_s2 + $0xad8] sm:$0xff] }
 0x287   :  { %v2079_v26 = vsel %vm2073_vm12, %v2077_v15, %v2078_v13  ;;  %v4914_v15 = vld [vmem:[%s11494_s2 + $0x9d0] sm:$0xff]  ;;  %v4951_v1 = vld [vmem:[%s11494_s2 + $0xaf8] sm:$0xff] }
 0x288   :  { %5818 = vmatpush1.bf16.msra.mxu0 %v5817_v50  ;;  %5882 = vmatpush1.bf16.msra.mxu1 %v5881_v56  ;;  %v4882_v50 = vld [vmem:[%s11494_s2 + $0x8d0] sm:$0xff]  ;;  %v1319_v56 = vld [vmem:[#allocation3 + $0x20] sm:$0xf] }
 0x289   :  { %5820 = vmatprep.subr.bf16.mxu0 %v5819_v40  ;;  %5884 = vmatprep.subr.bf16.mxu1 %v5883_v58  ;;  %v4886_v40 = vld [vmem:[%s11494_s2 + $0x8f0] sm:$0xff]  ;;  %v4889_v58 = vld [vmem:[%s11494_s2 + $0x908] sm:$0xff] }
 0x28a   :  { %v5965_v16 = vpack.c.bf16 %v4886_v40, %v4882_v50  ;;  %v4923_v50 = vld [vmem:[%s11494_s2 + $0xa18] sm:$0xff]  ;;  %v4920_v40 = vld [vmem:[%s11494_s2 + $0xa00] sm:$0xff] }
 0x28c   :  { %5822 = vmatpush1.bf16.msra.mxu0 %v5821_v43  ;;  %5886 = vmatpush1.bf16.msra.mxu1 %v5885_v23  ;;  %v4888_v43 = vld [vmem:[%s11494_s2 + $0x900] sm:$0xff] }
 0x28d   :  { %5888 = vmatprep.subr.bf16.mxu0 %v5887_v24  ;;  %5952 = vmatprep.subr.bf16.mxu1 %v5951_v25  ;;  %v4892_v23 = vld [vmem:[%s11494_s2 + $0x920] sm:$0xff]  ;;  %v5903_v24 = vpack.c.bf16 %v4893_v21, %v4889_v58  ;;  %v5967_v25 = vpack.c.bf16 %v4895_v7, %v4891_v22  ;;  %v4922_v22 = vld [vmem:[%s11494_s2 + $0xa10] sm:$0xff] }
 0x28e   :  { %v5905_v6 = vpack.c.bf16 %v4892_v23, %v4888_v43  ;;  %v4924_v58 = vld [vmem:[%s11494_s2 + $0xa20] sm:$0xff]  ;;  %v4926_v7 = vld [vmem:[%s11494_s2 + $0xa30] sm:$0xff]  ;;  %v4931_v43 = vld [vmem:[%s11494_s2 + $0xa58] sm:$0xff] }
 0x28f   :  { %1835 = vmatmul.mubr.f32.vlgmr.msra.gmra.mrb[10].mxu0 %v1315_v20  ;;  %1918 = vmatmul.mubr.f32.vlgmr.msra.gmra.mrb[20].mxu1 %v1315_v20  ;;  %v4902_v20 = vld [vmem:[%s11494_s2 + $0x970] sm:$0xff]  ;;  %v4935_v23 = vld [vmem:[%s11494_s2 + $0xa78] sm:$0xff] }
 0x290   :  { %1840 = vmatprep.mubr.f32.mxu0 %v8136_v3  ;;  %1923 = vmatprep.mubr.f32.mxu1 %v8136_v3  ;;  %v5973_v39 = vpack.c.bf16 %v4902_v20, %v4898_v38  ;;  %v5987_v29 = vpack.c.bf16 %v4935_v23, %v4931_v43  ;;  %v4936_v38 = vld [vmem:[%s11494_s2 + $0xa80] sm:$0xff]  ;;  %v4962_v43 = vld [vmem:[%s11494_s2 + $0xb50] sm:$0xff] }
 0x291   :  { %5890 = vmatpush1.bf16.msra.mxu0 %v5889_v34  ;;  %5954 = vmatpush1.bf16.msra.mxu1 %v5953_v35  ;;  %v4896_v34 = vld [vmem:[%s11494_s2 + $0x940] sm:$0xff]  ;;  %v4966_v23 = vld [vmem:[%s11494_s2 + $0xb70] sm:$0xff] }
 0x292   :  { %5892 = vmatprep.subr.bf16.mxu0 %v5891_v33  ;;  %5956 = vmatprep.subr.bf16.mxu1 %v5955_v44  ;;  %v4900_v35 = vld [vmem:[%s11494_s2 + $0x960] sm:$0xff]  ;;  %v4905_v33 = vld [vmem:[%s11494_s2 + $0x988] sm:$0xff] }
 0x293   :  { %1841 = vmatmul.mubr.f32.gmra.mrb[12].mxu0 %v8138_v28  ;;  %1924 = vmatmul.mubr.f32.gmra.mrb[22].mxu1 %v8138_v28  ;;  %v4880_v28 = vld [vmem:[%s11494_s2 + $0x8c0] sm:$0xff]  ;;  %v4909_v44 = vld [vmem:[%s11494_s2 + $0x9a8] sm:$0xff]  ;;  %v5909_v57 = vpack.c.bf16 %v4900_v35, %v4896_v34  ;;  %v4939_v34 = vld [vmem:[%s11494_s2 + $0xa98] sm:$0xff] }
 0x294   :  { %1846 = vmatprep.mubr.f32.mxu0 %v1320_v60  ;;  %1929 = vmatprep.mubr.f32.mxu1 %v1320_v60  ;;  %v5901_v14 = vpack.c.bf16 %v4884_v45, %v4880_v28  ;;  %v4912_v60 = vld [vmem:[%s11494_s2 + $0x9c0] sm:$0xff]  ;;  %v4921_v28 = vld [vmem:[%s11494_s2 + $0xa08] sm:$0xff]  ;;  %v4943_v35 = vld [vmem:[%s11494_s2 + $0xab8] sm:$0xff] }
 0x295   :  { %5894 = vmatpush1.bf16.msra.mxu0 %v5893_v17  ;;  %5958 = vmatpush1.bf16.msra.mxu1 %v5957_v2  ;;  %v5911_v17 = vpack.c.bf16 %v4909_v44, %v4905_v33  ;;  %v5975_v2 = vpack.c.bf16 %v4911_v52, %v4907_v48  ;;  %v4925_v45 = vld [vmem:[%s11494_s2 + $0xa28] sm:$0xff]  ;;  %v4940_v20 = vld [vmem:[%s11494_s2 + $0xaa0] sm:$0xff]  ;;  %v5991_v44 = vpack.c.bf16 %v4943_v35, %v4939_v34  ;;  %v4938_v48 = vld [vmem:[%s11494_s2 + $0xa90] sm:$0xff] }
 0x296   :  { %5896 = vmatprep.subr.bf16.mxu0 %v5895_v9  ;;  %5960 = vmatprep.subr.bf16.mxu1 %v5959_v63  ;;  %v4917_v9 = vld [vmem:[%s11494_s2 + $0x9e8] sm:$0xff]  ;;  %v4915_v63 = vld [vmem:[%s11494_s2 + $0x9d8] sm:$0xff]  ;;  %v4942_v52 = vld [vmem:[%s11494_s2 + $0xab0] sm:$0xff] }
 0x297   :  { %1847 = vmatmul.mubr.f32.gmra.mrb[14].mxu0 %v1319_v56  ;;  %1930 = vmatmul.mubr.f32.gmra.mrb[24].mxu1 %v1319_v56  ;;  %v5915_v54 = vpack.c.bf16 %v4917_v9, %v4913_v5  ;;  %v4927_v56 = vld [vmem:[%s11494_s2 + $0xa38] sm:$0xff]  ;;  %v5995_v9 = vpack.c.bf16 %v4951_v1, %v4947_v12  ;;  %v4970_v34 = vld [vmem:[%s11494_s2 + $0xb90] sm:$0xff] }
 0x298   :  { %2154 = vmatprep.mubr.f32.mxu0 %v2079_v26  ;;  %2237 = vmatprep.mubr.f32.mxu1 %v2079_v26  ;;  %v5919_v26 = vpack.c.bf16 %v4925_v45, %v4921_v28  ;;  %v5983_v21 = vpack.c.bf16 %v4927_v56, %v4923_v50  ;;  %v4954_v50 = vld [vmem:[%s11494_s2 + $0xb10] sm:$0xff] }
 0x299   :  { %5898 = vmatpush1.bf16.msra.mxu0 %v5897_v10  ;;  %5962 = vmatpush1.bf16.msra.mxu1 %v5961_v42  ;;  %v5979_v10 = vpack.c.bf16 %v4919_v41, %v4915_v63  ;;  %v4918_v42 = vld [vmem:[%s11494_s2 + $0x9f0] sm:$0xff] }
 0x29a   :  { %5900 = vmatprep.subr.bf16.mxu0 %v5899_v18  ;;  %5964 = vmatprep.subr.bf16.mxu1 %v5963_v8  ;;  %v5917_v18 = vpack.c.bf16 %v4916_v47, %v4912_v60  ;;  %v5981_v8 = vpack.c.bf16 %v4918_v42, %v4914_v15  ;;  %v4946_v63 = vld [vmem:[%s11494_s2 + $0xad0] sm:$0xff]  ;;  %v4955_v60 = vld [vmem:[%s11494_s2 + $0xb18] sm:$0xff]  ;;  %v4952_v15 = vld [vmem:[%s11494_s2 + $0xb00] sm:$0xff] }
 0x29b   :  { %v4950_v41 = vld [vmem:[%s11494_s2 + $0xaf0] sm:$0xff]  ;;  %v4959_v47 = vld [vmem:[%s11494_s2 + $0xb38] sm:$0xff]  ;;  %v4956_v42 = vld [vmem:[%s11494_s2 + $0xb20] sm:$0xff] }
 0x29c   :  { %v5999_v45 = vpack.c.bf16 %v4959_v47, %v4955_v60  ;;  %v4958_v56 = vld [vmem:[%s11494_s2 + $0xb30] sm:$0xff] }
 0x29d   :  { %5902 = vmatpush1.bf16.msra.mxu0 %v5901_v14  ;;  %5966 = vmatpush1.bf16.msra.mxu1 %v5965_v16  ;;  %v4929_v14 = vld [vmem:[%s11494_s2 + $0xa48] sm:$0xff]  ;;  %v4974_v35 = vld [vmem:[%s11494_s2 + $0xbb0] sm:$0xff] }
 0x29e   :  { %5904 = vmatprep.subr.bf16.mxu0 %v5903_v24  ;;  %5968 = vmatprep.subr.bf16.mxu1 %v5967_v25  ;;  %v4933_v16 = vld [vmem:[%s11494_s2 + $0xa68] sm:$0xff]  ;;  %v5921_v24 = vpack.c.bf16 %v4924_v58, %v4920_v40  ;;  %v5985_v25 = vpack.c.bf16 %v4926_v7, %v4922_v22  ;;  %v4963_v40 = vld [vmem:[%s11494_s2 + $0xb58] sm:$0xff]  ;;  %v4960_v22 = vld [vmem:[%s11494_s2 + $0xb40] sm:$0xff] }
 0x29f   :  { %v5923_v27 = vpack.c.bf16 %v4933_v16, %v4929_v14  ;;  %v4967_v58 = vld [vmem:[%s11494_s2 + $0xb78] sm:$0xff]  ;;  %v4964_v7 = vld [vmem:[%s11494_s2 + $0xb60] sm:$0xff]  ;;  %v4978_v12 = vld [vmem:[%s11494_s2 + $0xbd0] sm:$0xff] }
 0x2a0   :  { %v6003_v16 = vpack.c.bf16 %v4967_v58, %v4963_v40  ;;  %v4982_v1 = vld [vmem:[%s11494_s2 + $0xbf0] sm:$0xff] }
 0x2a1   :  { %5906 = vmatpush1.bf16.msra.mxu0 %v5905_v6  ;;  %5970 = vmatpush1.bf16.msra.mxu1 %v5969_v32  ;;  %v4937_v6 = vld [vmem:[%s11494_s2 + $0xa88] sm:$0xff] }
 0x2a2   :  { %5908 = vmatprep.subr.bf16.mxu0 %v5907_v36  ;;  %5972 = vmatprep.subr.bf16.mxu1 %v5971_v37  ;;  %v4941_v32 = vld [vmem:[%s11494_s2 + $0xaa8] sm:$0xff]  ;;  %v5925_v36 = vpack.c.bf16 %v4932_v55, %v4928_v30  ;;  %v5989_v37 = vpack.c.bf16 %v4934_v59, %v4930_v31  ;;  %v4971_v30 = vld [vmem:[%s11494_s2 + $0xb98] sm:$0xff]  ;;  %v4968_v31 = vld [vmem:[%s11494_s2 + $0xb80] sm:$0xff] }
 0x2a3   :  { %v5927_v33 = vpack.c.bf16 %v4941_v32, %v4937_v6  ;;  %v4975_v55 = vld [vmem:[%s11494_s2 + $0xbb8] sm:$0xff]  ;;  %v4972_v59 = vld [vmem:[%s11494_s2 + $0xba0] sm:$0xff] }
 0x2a4   :  { %v6007_v32 = vpack.c.bf16 %v4975_v55, %v4971_v30 }
 0x2a5   :  { %5910 = vmatpush1.bf16.msra.mxu0 %v5909_v57  ;;  %5974 = vmatpush1.bf16.msra.mxu1 %v5973_v39  ;;  %v4945_v57 = vld [vmem:[%s11494_s2 + $0xac8] sm:$0xff] }
 0x2a6   :  { %5912 = vmatprep.subr.bf16.mxu0 %v5911_v17  ;;  %5976 = vmatprep.subr.bf16.mxu1 %v5975_v2  ;;  %v4949_v39 = vld [vmem:[%s11494_s2 + $0xae8] sm:$0xff]  ;;  %v5929_v17 = vpack.c.bf16 %v4940_v20, %v4936_v38  ;;  %v5993_v2 = vpack.c.bf16 %v4942_v52, %v4938_v48  ;;  %v4979_v38 = vld [vmem:[%s11494_s2 + $0xbd8] sm:$0xff]  ;;  %v4976_v48 = vld [vmem:[%s11494_s2 + $0xbc0] sm:$0xff] }
 0x2a7   :  { %v5931_v5 = vpack.c.bf16 %v4949_v39, %v4945_v57  ;;  %v4983_v20 = vld [vmem:[%s11494_s2 + $0xbf8] sm:$0xff]  ;;  %v4980_v39 = vld [vmem:[%s11494_s2 + $0xbe0] sm:$0xff] }
 0x2a8   :  { %v6011_v57 = vpack.c.bf16 %v4983_v20, %v4979_v38 }
 0x2a9   :  { %5914 = vmatpush1.bf16.msra.mxu0 %v5913_v11  ;;  %5978 = vmatpush1.bf16.msra.mxu1 %v5977_v0  ;;  %v4953_v11 = vld [vmem:[%s11494_s2 + $0xb08] sm:$0xff] }
 0x2aa   :  { %5916 = vmatprep.subr.bf16.mxu0 %v5915_v54  ;;  %5980 = vmatprep.subr.bf16.mxu1 %v5979_v10  ;;  %v4957_v0 = vld [vmem:[%s11494_s2 + $0xb28] sm:$0xff]  ;;  %v5933_v54 = vpack.c.bf16 %v4948_v4, %v4944_v53  ;;  %v5997_v10 = vpack.c.bf16 %v4950_v41, %v4946_v63  ;;  %v1939_v53 = vld [vmem:[#allocation3 + $0x28] sm:$0x3f] }
 0x2ab   :  { %v5935_v28 = vpack.c.bf16 %v4957_v0, %v4953_v11  ;;  %v1936_v4 = vld [vmem:[#allocation3] sm:$0xfc]  ;;  %v2082_v63 = vrot.slane %v1939_v53, 2 }
 0x2ac   :  { %v1938_v41 = vld [vmem:[#allocation3 + $0x20] sm:$0x3f]  ;;  %v2074_v11 = vrot.slane %v1936_v4, 2 }
 0x2ad   :  { %5918 = vmatpush1.bf16.msra.mxu0 %v5917_v18  ;;  %5982 = vmatpush1.bf16.msra.mxu1 %v5981_v8  ;;  %v4961_v18 = vld [vmem:[%s11494_s2 + $0xb48] sm:$0xff]  ;;  %v2080_v60 = vrot.slane %v1938_v41, 2  ;;  %v2083_v47 = vsel %vm2073_vm12, %v2078_v13, %v2082_v63 }
 0x2ae   :  { %5920 = vmatprep.subr.bf16.mxu0 %v5919_v26  ;;  %5984 = vmatprep.subr.bf16.mxu1 %v5983_v21  ;;  %v4965_v8 = vld [vmem:[%s11494_s2 + $0xb68] sm:$0xff]  ;;  %v5937_v26 = vpack.c.bf16 %v4956_v42, %v4952_v15  ;;  %v6001_v21 = vpack.c.bf16 %v4958_v56, %v4954_v50 }
 0x2af   :  { %v5939_v14 = vpack.c.bf16 %v4965_v8, %v4961_v18 }
 0x2b1   :  { %5922 = vmatpush1.bf16.msra.mxu0 %v5921_v24  ;;  %5986 = vmatpush1.bf16.msra.mxu1 %v5985_v25  ;;  %v4969_v24 = vld [vmem:[%s11494_s2 + $0xb88] sm:$0xff] }
 0x2b2   :  { %5924 = vmatprep.subr.bf16.mxu0 %v5923_v27  ;;  %5988 = vmatprep.subr.bf16.mxu1 %v5987_v29  ;;  %v4973_v25 = vld [vmem:[%s11494_s2 + $0xba8] sm:$0xff]  ;;  %v5941_v27 = vpack.c.bf16 %v4964_v7, %v4960_v22  ;;  %v6005_v29 = vpack.c.bf16 %v4966_v23, %v4962_v43 }
 0x2b3   :  { %v5943_v6 = vpack.c.bf16 %v4973_v25, %v4969_v24 }
 0x2b5   :  { %5926 = vmatpush1.bf16.msra.mxu0 %v5925_v36  ;;  %5990 = vmatpush1.bf16.msra.mxu1 %v5989_v37  ;;  %v4977_v36 = vld [vmem:[%s11494_s2 + $0xbc8] sm:$0xff] }
 0x2b6   :  { %5928 = vmatprep.subr.bf16.mxu0 %v5927_v33  ;;  %5992 = vmatprep.subr.bf16.mxu1 %v5991_v44  ;;  %v4981_v37 = vld [vmem:[%s11494_s2 + $0xbe8] sm:$0xff]  ;;  %v5945_v33 = vpack.c.bf16 %v4972_v59, %v4968_v31  ;;  %v6009_v44 = vpack.c.bf16 %v4974_v35, %v4970_v34 }
 0x2b7   :  { %v5947_v52 = vpack.c.bf16 %v4981_v37, %v4977_v36 }
 0x2b9   :  { %5930 = vmatpush1.bf16.msra.mxu0 %v5929_v17  ;;  %5994 = vmatpush1.bf16.msra.mxu1 %v5993_v2  ;;  %v5949_v17 = vpack.c.bf16 %v4980_v39, %v4976_v48  ;;  %v6013_v2 = vpack.c.bf16 %v4982_v1, %v4978_v12 }
 0x2ba   :  { %5932 = vmatprep.subr.bf16.mxu0 %v5931_v5  ;;  %5996 = vmatprep.subr.bf16.mxu1 %v5995_v9  ;;  %v6911_v5 = vld [vmem:[#allocation3 + $0x10] sm:$0xff] }
 0x2bb   :  { %v2075_v9 = vrot.slane %v6911_v5, 2 }
 0x2bd   :  { %5934 = vmatpush1.bf16.msra.mxu0 %v5933_v54  ;;  %5998 = vmatpush1.bf16.msra.mxu1 %v5997_v10  ;;  %v2076_v0 = vsel %vm2073_vm12, %v2074_v11, %v2075_v9  ;;  %v2081_v54 = vsel %vm2073_vm12, %v2075_v9, %v2080_v60  ;;  %v2268_v10 = vld [vmem:[%s11498_s6] sm:$0xf] }
 0x2be   :  { %5936 = vmatprep.subr.bf16.mxu0 %v5935_v28  ;;  %6000 = vmatprep.subr.bf16.mxu1 %v5999_v45  ;;  %v2273_v15 = vrot.slane %v2268_v10, %v7456_v49  ;;  %v2281_v3 = vrot.slane %v2268_v10, %v7525_v61  ;;  %v2277_v13 = vrot.slane %v2268_v10, %v7464_v51 }
 0x2bf   :  { %v2285_v42 = vrot.slane %v2268_v10, %v7530_v62 }
 0x2c1   :  { %5938 = vmatpush1.bf16.msra.mxu0 %v5937_v26  ;;  %6002 = vmatpush1.bf16.msra.mxu1 %v6001_v21 }
 0x2c2   :  { %5940 = vmatprep.subr.bf16.mxu0 %v5939_v14  ;;  %6004 = vmatprep.subr.bf16.mxu1 %v6003_v16 }
 0x2c5   :  { %5942 = vmatpush1.bf16.msra.mxu0 %v5941_v27  ;;  %6006 = vmatpush1.bf16.msra.mxu1 %v6005_v29 }
 0x2c6   :  { %5944 = vmatprep.subr.bf16.mxu0 %v5943_v6  ;;  %6008 = vmatprep.subr.bf16.mxu1 %v6007_v32 }
 0x2c9   :  { %5946 = vmatpush1.bf16.msra.mxu0 %v5945_v33  ;;  %6010 = vmatpush1.bf16.msra.mxu1 %v6009_v44 }
 0x2ca   :  { %5948 = vmatprep.subr.bf16.mxu0 %v5947_v52  ;;  %6012 = vmatprep.subr.bf16.mxu1 %v6011_v57 }
 0x2cd   :  { %5950 = vmatpush1.bf16.msra.mxu0 %v5949_v17  ;;  %6014 = vmatpush1.bf16.msra.mxu1 %v6013_v2 }
 0x2d0   :  { %2155 = vmatmul.mubr.f32.vlgmr.msra.gmra.mrb[10].mxu0 %v2076_v0  ;;  %2238 = vmatmul.mubr.f32.vlgmr.msra.gmra.mrb[20].mxu1 %v2076_v0 }
 0x2d1   :  { %2160 = vmatprep.mubr.f32.mxu0 %v2083_v47  ;;  %2243 = vmatprep.mubr.f32.mxu1 %v2083_v47 }
 0x2d4   :  { %2161 = vmatmul.mubr.f32.gmra.mrb[12].mxu0 %v2081_v54  ;;  %2244 = vmatmul.mubr.f32.gmra.mrb[22].mxu1 %v2081_v54 }
 0x2d5   :  { %2166 = vmatprep.mubr.f32.mxu0 %v2082_v63  ;;  %2249 = vmatprep.mubr.f32.mxu1 %v2082_v63 }
 0x2d8   :  { %2167 = vmatmul.mubr.f32.gmra.mrb[14].mxu0 %v2080_v60  ;;  %2250 = vmatmul.mubr.f32.gmra.mrb[24].mxu1 %v2080_v60 }
 0x3a3   :  { %v2156_v28 = vpop.f32.mrb[10].mxu0  ;;  %v2239_v45 = vpop.f32.mrb[20].mxu1 }
 0x3a4   :  { %v2290_v50 = vadd.f32 %v2273_v15, %v2156_v28  ;;  %v2292_v56 = vadd.f32 %v2281_v3, %v2239_v45  ;;  %v2158_v18 = vpop.f32.mrb[11].mxu0  ;;  %v2241_v8 = vpop.f32.mrb[21].mxu1 }
 0x3a5   :  { %v2291_v40 = vadd.f32 %v2277_v13, %v2158_v18  ;;  %v2293_v58 = vadd.f32 %v2285_v42, %v2241_v8 }
 0x3a6   :  { %v2302_v26 = vmax.f32 %v2290_v50, 0.0  ;;  %v2304_v21 = vmax.f32 %v2292_v56, 0.0 }
 0x3a7   :  { %v2303_v22 = vmax.f32 %v2291_v40, 0.0  ;;  %v2305_v7 = vmax.f32 %v2293_v58, 0.0  ;;  %v2162_v14 = vpop.f32.mrb[12].mxu0  ;;  %v2245_v16 = vpop.f32.mrb[22].mxu1 }
 0x3a8   :  { %v2294_v43 = vadd.f32 %v2273_v15, %v2162_v14  ;;  %v2296_v23 = vadd.f32 %v2281_v3, %v2245_v16  ;;  %v2164_v24 = vpop.f32.mrb[13].mxu0  ;;  %v2247_v25 = vpop.f32.mrb[23].mxu1  ;;  %v2326_v27 = vrot.slane %v2302_v26, 1  ;;  %v2332_v29 = vrot.slane %v2304_v21, 1  ;;  %v4991_v14 = vld [vmem:[%s11495_s3 + $0x438] sm:$0xff]  ;;  %v4984_v16 = vld [vmem:[%s11495_s3 + $0x400] sm:$0xff] }
 0x3a9   :  { %v2295_v30 = vadd.f32 %v2277_v13, %v2164_v24  ;;  %v2297_v55 = vadd.f32 %v2285_v42, %v2247_v25  ;;  %v2329_v6 = vrot.slane %v2303_v22, 1  ;;  %v2335_v32 = vrot.slane %v2305_v7, 1  ;;  %v4986_v25 = vld [vmem:[%s11495_s3 + $0x410] sm:$0xff] }
 0x3aa   :  { %v2306_v31 = vmax.f32 %v2294_v43, 0.0  ;;  %v2308_v59 = vmax.f32 %v2296_v23, 0.0  ;;  %v4988_v43 = vld [vmem:[%s11495_s3 + $0x420] sm:$0xff] }
 0x3ab   :  { %v2307_v34 = vmax.f32 %v2295_v30, 0.0  ;;  %v2309_v35 = vmax.f32 %v2297_v55, 0.0  ;;  %v2168_v36 = vpop.f32.mrb[14].mxu0  ;;  %v2251_v37 = vpop.f32.mrb[24].mxu1  ;;  %v6017_v24 = vpack.c.bf16 %v4988_v43, %v4984_v16  ;;  %v4990_v30 = vld [vmem:[%s11495_s3 + $0x430] sm:$0xff]  ;;  %v4993_v55 = vld [vmem:[%s11495_s3 + $0x448] sm:$0xff] }
 0x3ac   :  { %v2327_v38 = vrot.slane %v2306_v31, 1  ;;  %v2333_v20 = vrot.slane %v2308_v59, 1  ;;  %v8911_v33 = vadd.f32 %v2273_v15, %v2168_v36  ;;  %v8913_v44 = vadd.f32 %v2281_v3, %v2251_v37  ;;  %v2170_v48 = vpop.f32.mrb[15].mxu0  ;;  %v2253_v52 = vpop.f32.mrb[25].mxu1  ;;  %v5016_v43 = vld [vmem:[%s11495_s3 + $0x500] sm:$0xff] }
 0x3ad   :  { %v2330_v57 = vrot.slane %v2307_v34, 1  ;;  %v2336_v39 = vrot.slane %v2309_v35, 1  ;;  %v2299_v12 = vadd.f32 %v2277_v13, %v2170_v48  ;;  %v2301_v1 = vadd.f32 %v2285_v42, %v2253_v52  ;;  %v5005_v52 = vld [vmem:[%s11495_s3 + $0x4a8] sm:$0xff] }
 0x3ae   :  { %v2310_v17 = vmax.f32 %v8911_v33, 0.0  ;;  %v2312_v2 = vmax.f32 %v8913_v44, 0.0  ;;  %v2328_v53 = vsel %vm890_vm2, %v2326_v27, %v2327_v38  ;;  %v2334_v4 = vsel %vm890_vm2, %v2332_v29, %v2333_v20  ;;  %v4997_v29 = vld [vmem:[%s11495_s3 + $0x468] sm:$0xff] }
 0x3af   :  { %v2311_v5 = vmax.f32 %v2299_v12, 0.0  ;;  %v2313_v9 = vmax.f32 %v2301_v1, 0.0  ;;  %v2337_v63 = vsel %vm890_vm2, %v2335_v32, %v2336_v39  ;;  %v2331_v41 = vsel %vm890_vm2, %v2329_v6, %v2330_v57  ;;  %v4999_v6 = vld [vmem:[%s11495_s3 + $0x478] sm:$0xff]  ;;  %v4992_v32 = vld [vmem:[%s11495_s3 + $0x440] sm:$0xff]  ;;  %v5001_v33 = vld [vmem:[%s11495_s3 + $0x488] sm:$0xff] }
 0x3b0   :  { %v2338_v11 = vrot.slane %v2310_v17, 1  ;;  %v8923_v0 = vrot.slane %v2312_v2, 1  ;;  %v8925_v60 = vmax.f32 %v2305_v7, %v2337_v63  ;;  %v8927_v47 = vmax.f32 %v2303_v22, %v2331_v41  ;;  %v4987_v22 = vld [vmem:[%s11495_s3 + $0x418] sm:$0xff] }
 0x3b1   :  { %v2340_v54 = vrot.slane %v2311_v5, 1  ;;  %v2344_v10 = vrot.slane %v2313_v9, 1  ;;  %v8929_v15 = vmax.f32 %v2302_v26, %v2328_v53  ;;  %v8931_v3 = vmax.f32 %v2304_v21, %v2334_v4  ;;  %v4985_v26 = vld [vmem:[%s11495_s3 + $0x408] sm:$0xff]  ;;  %v5004_v53 = vld [vmem:[%s11495_s3 + $0x4a0] sm:$0xff]  ;;  %v5002_v4 = vld [vmem:[%s11495_s3 + $0x490] sm:$0xff] }
 0x3b2   :  { %2442 = vrot.lane.b32.xlu1 %v8925_v60, %s6938_s15  ;;  %2392 = vrot.lane.b32.xlu0 %v8927_v47, %s6938_s15  ;;  %v2339_v13 = vsel %vm890_vm2, %v2327_v38, %v2338_v11  ;;  %v2343_v8 = vsel %vm890_vm2, %v2333_v20, %v8923_v0  ;;  %v4989_v21 = vld [vmem:[%s11495_s3 + $0x428] sm:$0xff]  ;;  %v6079_v23 = vpack.c.bf16 %v4991_v14, %v4987_v22  ;;  %v4994_v38 = vld [vmem:[%s11495_s3 + $0x450] sm:$0xff] }
 0x3b3   :  { %v8938_v42 = vmax.f32 %v2311_v5, %v2340_v54  ;;  %v2341_v28 = vsel %vm890_vm2, %v2330_v57, %v2340_v54  ;;  %v2345_v45 = vsel %vm890_vm2, %v2336_v39, %v2344_v10  ;;  %v8946_v18 = vmax.f32 %v2306_v31, %v2339_v13  ;;  %v4995_v31 = vld [vmem:[%s11495_s3 + $0x458] sm:$0xff]  ;;  %v4998_v20 = vld [vmem:[%s11495_s3 + $0x470] sm:$0xff]  ;;  %v5013_v54 = vld [vmem:[%s11495_s3 + $0x4e8] sm:$0xff] }
 0x3b4   :  { %v8942_v50 = vmax.f32 %v2307_v34, %v2341_v28  ;;  %v8944_v56 = vmax.f32 %v2309_v35, %v2345_v45  ;;  %v8950_v40 = vmax.f32 %v2308_v59, %v2343_v8  ;;  %v8956_v58 = vmax.f32 %v2313_v9, %v2344_v10  ;;  %6080 = vmatprep.subr.bf16.mxu1 %v6079_v23  ;;  %v4996_v34 = vld [vmem:[%s11495_s3 + $0x460] sm:$0xff]  ;;  %v5003_v57 = vld [vmem:[%s11495_s3 + $0x498] sm:$0xff]  ;;  %v5006_v5 = vld [vmem:[%s11495_s3 + $0x4b0] sm:$0xff] }
 0x3b5   :  { %v6015_v7 = vpack.c.bf16 %v4989_v21, %v4985_v26  ;;  %v6081_v27 = vpack.c.bf16 %v4990_v30, %v4986_v25  ;;  %v6019_v59 = vpack.c.bf16 %v4997_v29, %v4993_v55  ;;  %v9008_v35 = vmax.f32 %v2310_v17, %v2338_v11  ;;  %v5007_v39 = vld [vmem:[%s11495_s3 + $0x4b8] sm:$0xff]  ;;  %v5000_v17 = vld [vmem:[%s11495_s3 + $0x480] sm:$0xff]  ;;  %v5009_v9 = vld [vmem:[%s11495_s3 + $0x4c8] sm:$0xff] }
 0x3b6   :  { %2396 = vrot.lane.b32.xlu0 %v8938_v42, %s6938_s15  ;;  %2394 = vrot.lane.b32.xlu1 %v8942_v50, %s6938_s15  ;;  %v6083_v36 = vpack.c.bf16 %v4999_v6, %v4995_v31  ;;  %v6021_v37 = vpack.c.bf16 %v4996_v34, %v4992_v32  ;;  %v6085_v48 = vpack.c.bf16 %v4998_v20, %v4994_v38  ;;  %v5011_v10 = vld [vmem:[%s11495_s3 + $0x4d8] sm:$0xff]  ;;  %v5012_v28 = vld [vmem:[%s11495_s3 + $0x4e0] sm:$0xff] }
 0x3b7   :  { %6016 = vmatprep.subr.bf16.mxu0 %v6015_v7  ;;  %6082 = vmatpush1.bf16.msra.mxu1 %v6081_v27  ;;  %v6023_v12 = vpack.c.bf16 %v5005_v52, %v5001_v33  ;;  %v6087_v1 = vpack.c.bf16 %v5007_v39, %v5003_v57  ;;  %v9050_v63 = vmax.f32 %v2312_v2, %v8923_v0  ;;  %v5015_v13 = vld [vmem:[%s11495_s3 + $0x4f8] sm:$0xff]  ;;  %v5008_v0 = vld [vmem:[%s11495_s3 + $0x4c0] sm:$0xff]  ;;  %v5010_v45 = vld [vmem:[%s11495_s3 + $0x4d0] sm:$0xff] }
 0x3b8   :  { %6018 = vmatpush1.bf16.msra.mxu0 %v6017_v24  ;;  %6084 = vmatprep.subr.bf16.mxu1 %v6083_v36  ;;  %v6025_v41 = vpack.c.bf16 %v5004_v53, %v5000_v17  ;;  %v6089_v11 = vpack.c.bf16 %v5006_v5, %v5002_v4  ;;  %v6027_v44 = vpack.c.bf16 %v5013_v54, %v5009_v9  ;;  %v5014_v8 = vld [vmem:[%s11495_s3 + $0x4f0] sm:$0xff]  ;;  %v5017_v26 = vld [vmem:[%s11495_s3 + $0x508] sm:$0xff]  ;;  %v5019_v22 = vld [vmem:[%s11495_s3 + $0x518] sm:$0xff] }
 0x3b9   :  { %6020 = vmatprep.subr.bf16.mxu0 %v6019_v59  ;;  %v6091_v2 = vpack.c.bf16 %v5015_v13, %v5011_v10  ;;  %v5021_v21 = vld [vmem:[%s11495_s3 + $0x528] sm:$0xff]  ;;  %v5023_v7 = vld [vmem:[%s11495_s3 + $0x538] sm:$0xff]  ;;  %v6029_v14 = vpack.c.bf16 %v5012_v28, %v5008_v0  ;;  %v6093_v16 = vpack.c.bf16 %v5014_v8, %v5010_v45  ;;  %v5020_v23 = vld [vmem:[%s11495_s3 + $0x520] sm:$0xff] }
 0x3ba   :  { %2444 = vrot.lane.b32.xlu0 %v8944_v56, %s6938_s15  ;;  %2446 = vrot.lane.b32.xlu1 %v8956_v58, %s6938_s15  ;;  %v6031_v24 = vpack.c.bf16 %v5021_v21, %v5017_v26  ;;  %v6095_v25 = vpack.c.bf16 %v5023_v7, %v5019_v22  ;;  %v5018_v30 = vld [vmem:[%s11495_s3 + $0x510] sm:$0xff]  ;;  %v5025_v27 = vld [vmem:[%s11495_s3 + $0x548] sm:$0xff]  ;;  %v6033_v6 = vpack.c.bf16 %v5020_v23, %v5016_v43 }
 0x3bb   :  { %6086 = vmatpush1.bf16.msra.mxu1 %v6085_v48  ;;  %v5022_v55 = vld [vmem:[%s11495_s3 + $0x530] sm:$0xff]  ;;  %v5029_v29 = vld [vmem:[%s11495_s3 + $0x568] sm:$0xff]  ;;  %v5027_v31 = vld [vmem:[%s11495_s3 + $0x558] sm:$0xff] }
 0x3bc   :  { %6022 = vmatpush1.bf16.msra.mxu0 %v6021_v37  ;;  %6088 = vmatprep.subr.bf16.mxu1 %v6087_v1  ;;  %v5031_v59 = vld [vmem:[%s11495_s3 + $0x578] sm:$0xff]  ;;  %v6097_v32 = vpack.c.bf16 %v5022_v55, %v5018_v30  ;;  %v5024_v34 = vld [vmem:[%s11495_s3 + $0x540] sm:$0xff]  ;;  %v6035_v37 = vpack.c.bf16 %v5029_v29, %v5025_v27  ;;  %v5026_v20 = vld [vmem:[%s11495_s3 + $0x550] sm:$0xff] }
 0x3bd   :  { %6024 = vmatprep.subr.bf16.mxu0 %v6023_v12  ;;  %v5028_v36 = vld [vmem:[%s11495_s3 + $0x560] sm:$0xff]  ;;  %v6099_v38 = vpack.c.bf16 %v5031_v59, %v5027_v31  ;;  %v5030_v33 = vld [vmem:[%s11495_s3 + $0x570] sm:$0xff]  ;;  %v5033_v48 = vld [vmem:[%s11495_s3 + $0x588] sm:$0xff] }
 0x3be   :  { %2373 = vrot.lane.b32.xlu0 %v8929_v15, %s6938_s15  ;;  %2375 = vrot.lane.b32.xlu1 %v8946_v18, %s6938_s15  ;;  %v5037_v52 = vld [vmem:[%s11495_s3 + $0x5a8] sm:$0xff]  ;;  %v5035_v57 = vld [vmem:[%s11495_s3 + $0x598] sm:$0xff]  ;;  %v6037_v12 = vpack.c.bf16 %v5028_v36, %v5024_v34  ;;  %v6101_v1 = vpack.c.bf16 %v5030_v33, %v5026_v20 }
 0x3bf   :  { %6090 = vmatpush1.bf16.msra.mxu1 %v6089_v11  ;;  %v5039_v39 = vld [vmem:[%s11495_s3 + $0x5b8] sm:$0xff]  ;;  %v5032_v17 = vld [vmem:[%s11495_s3 + $0x580] sm:$0xff]  ;;  %v6039_v4 = vpack.c.bf16 %v5037_v52, %v5033_v48  ;;  %v5034_v9 = vld [vmem:[%s11495_s3 + $0x590] sm:$0xff] }
 0x3c0   :  { %6026 = vmatpush1.bf16.msra.mxu0 %v6025_v41  ;;  %6092 = vmatprep.subr.bf16.mxu1 %v6091_v2  ;;  %v5036_v53 = vld [vmem:[%s11495_s3 + $0x5a0] sm:$0xff]  ;;  %v6103_v5 = vpack.c.bf16 %v5039_v39, %v5035_v57  ;;  %v5038_v41 = vld [vmem:[%s11495_s3 + $0x5b0] sm:$0xff]  ;;  %v5041_v11 = vld [vmem:[%s11495_s3 + $0x5c8] sm:$0xff] }
 0x3c1   :  { %6028 = vmatprep.subr.bf16.mxu0 %v6027_v44  ;;  %v5045_v54 = vld [vmem:[%s11495_s3 + $0x5e8] sm:$0xff]  ;;  %v5043_v10 = vld [vmem:[%s11495_s3 + $0x5d8] sm:$0xff]  ;;  %v6041_v44 = vpack.c.bf16 %v5036_v53, %v5032_v17  ;;  %v6105_v2 = vpack.c.bf16 %v5038_v41, %v5034_v9  ;;  %v5040_v0 = vld [vmem:[%s11495_s3 + $0x5c0] sm:$0xff] }
 0x3c2   :  { %2377 = vrot.lane.b32.xlu0 %v9008_v35, %s6938_s15  ;;  %2424 = vrot.lane.b32.xlu1 %v8931_v3, %s6938_s15  ;;  %v5047_v13 = vld [vmem:[%s11495_s3 + $0x5f8] sm:$0xff]  ;;  %v5044_v28 = vld [vmem:[%s11495_s3 + $0x5e0] sm:$0xff]  ;;  %v6043_v45 = vpack.c.bf16 %v5045_v54, %v5041_v11 }
 0x3c3   :  { %6094 = vmatpush1.bf16.msra.mxu1 %v6093_v16  ;;  %v6107_v8 = vpack.c.bf16 %v5047_v13, %v5043_v10  ;;  %v5042_v26 = vld [vmem:[%s11495_s3 + $0x5d0] sm:$0xff]  ;;  %v5049_v22 = vld [vmem:[%s11495_s3 + $0x608] sm:$0xff]  ;;  %v5055_v16 = vld [vmem:[%s11495_s3 + $0x638] sm:$0xff]  ;;  %v6045_v43 = vpack.c.bf16 %v5044_v28, %v5040_v0 }
 0x3c4   :  { %6030 = vmatpush1.bf16.msra.mxu0 %v6029_v14  ;;  %6096 = vmatprep.subr.bf16.mxu1 %v6095_v25  ;;  %v5046_v21 = vld [vmem:[%s11495_s3 + $0x5f0] sm:$0xff]  ;;  %v5053_v7 = vld [vmem:[%s11495_s3 + $0x628] sm:$0xff]  ;;  %v5051_v14 = vld [vmem:[%s11495_s3 + $0x618] sm:$0xff] }
 0x3c5   :  { %6032 = vmatprep.subr.bf16.mxu0 %v6031_v24  ;;  %v6109_v23 = vpack.c.bf16 %v5046_v21, %v5042_v26  ;;  %v5048_v24 = vld [vmem:[%s11495_s3 + $0x600] sm:$0xff]  ;;  %v6047_v30 = vpack.c.bf16 %v5053_v7, %v5049_v22  ;;  %v6111_v55 = vpack.c.bf16 %v5055_v16, %v5051_v14  ;;  %v5050_v27 = vld [vmem:[%s11495_s3 + $0x610] sm:$0xff]  ;;  %v5057_v31 = vld [vmem:[%s11495_s3 + $0x648] sm:$0xff] }
 0x3c6   :  { %2426 = vrot.lane.b32.xlu0 %v8950_v40, %s6938_s15  ;;  %2428 = vrot.lane.b32.xlu1 %v9050_v63, %s6938_s15  ;;  %v5052_v25 = vld [vmem:[%s11495_s3 + $0x620] sm:$0xff]  ;;  %v5054_v29 = vld [vmem:[%s11495_s3 + $0x630] sm:$0xff] }
 0x3c7   :  { %6098 = vmatpush1.bf16.msra.mxu1 %v6097_v32  ;;  %v5061_v59 = vld [vmem:[%s11495_s3 + $0x668] sm:$0xff]  ;;  %v5063_v32 = vld [vmem:[%s11495_s3 + $0x678] sm:$0xff]  ;;  %v6049_v34 = vpack.c.bf16 %v5052_v25, %v5048_v24  ;;  %v6113_v36 = vpack.c.bf16 %v5054_v29, %v5050_v27  ;;  %v5056_v20 = vld [vmem:[%s11495_s3 + $0x640] sm:$0xff] }
 0x3c8   :  { %6034 = vmatpush1.bf16.msra.mxu0 %v6033_v6  ;;  %6100 = vmatprep.subr.bf16.mxu1 %v6099_v38  ;;  %v5059_v6 = vld [vmem:[%s11495_s3 + $0x658] sm:$0xff]  ;;  %v5060_v33 = vld [vmem:[%s11495_s3 + $0x660] sm:$0xff]  ;;  %v5058_v48 = vld [vmem:[%s11495_s3 + $0x650] sm:$0xff] }
 0x3c9   :  { %6036 = vmatprep.subr.bf16.mxu0 %v6035_v37  ;;  %v6051_v37 = vpack.c.bf16 %v5061_v59, %v5057_v31  ;;  %v6115_v38 = vpack.c.bf16 %v5063_v32, %v5059_v6  ;;  %v6053_v52 = vpack.c.bf16 %v5060_v33, %v5056_v20  ;;  %v5062_v57 = vld [vmem:[%s11495_s3 + $0x670] sm:$0xff]  ;;  %v5065_v39 = vld [vmem:[%s11495_s3 + $0x688] sm:$0xff]  ;;  %v5067_v53 = vld [vmem:[%s11495_s3 + $0x698] sm:$0xff] }
 0x3ca   :  { %v5064_v9 = vld [vmem:[%s11495_s3 + $0x680] sm:$0xff]  ;;  %v5066_v11 = vld [vmem:[%s11495_s3 + $0x690] sm:$0xff]  ;;  %v5073_v13 = vld [vmem:[%s11495_s3 + $0x6c8] sm:$0xff] }
 0x3cb   :  { %6102 = vmatpush1.bf16.msra.mxu1 %v6101_v1  ;;  %v6117_v1 = vpack.c.bf16 %v5062_v57, %v5058_v48  ;;  %v5068_v41 = vld [vmem:[%s11495_s3 + $0x6a0] sm:$0xff]  ;;  %v5070_v10 = vld [vmem:[%s11495_s3 + $0x6b0] sm:$0xff]  ;;  %v5075_v28 = vld [vmem:[%s11495_s3 + $0x6d8] sm:$0xff] }
 0x3cc   :  { %6038 = vmatpush1.bf16.msra.mxu0 %v6037_v12  ;;  %6104 = vmatprep.subr.bf16.mxu1 %v6103_v5  ;;  %v5069_v12 = vld [vmem:[%s11495_s3 + $0x6a8] sm:$0xff]  ;;  %v6057_v54 = vpack.c.bf16 %v5068_v41, %v5064_v9  ;;  %v5072_v24 = vld [vmem:[%s11495_s3 + $0x6c0] sm:$0xff]  ;;  %v5083_v31 = vld [vmem:[%s11495_s3 + $0x718] sm:$0xff] }
 0x3cd   :  { %6040 = vmatprep.subr.bf16.mxu0 %v6039_v4  ;;  %v6055_v17 = vpack.c.bf16 %v5069_v12, %v5065_v39  ;;  %v5071_v4 = vld [vmem:[%s11495_s3 + $0x6b8] sm:$0xff]  ;;  %v5085_v29 = vld [vmem:[%s11495_s3 + $0x728] sm:$0xff]  ;;  %v5082_v20 = vld [vmem:[%s11495_s3 + $0x710] sm:$0xff] }
 0x3ce   :  { %v6119_v5 = vpack.c.bf16 %v5071_v4, %v5067_v53  ;;  %v5087_v59 = vld [vmem:[%s11495_s3 + $0x738] sm:$0xff]  ;;  %v5093_v48 = vld [vmem:[%s11495_s3 + $0x768] sm:$0xff]  ;;  %v5088_v4 = vld [vmem:[%s11495_s3 + $0x740] sm:$0xff] }
 0x3cf   :  { %6106 = vmatpush1.bf16.msra.mxu1 %v6105_v2  ;;  %v6121_v2 = vpack.c.bf16 %v5070_v10, %v5066_v11  ;;  %v5091_v39 = vld [vmem:[%s11495_s3 + $0x758] sm:$0xff]  ;;  %v5090_v9 = vld [vmem:[%s11495_s3 + $0x750] sm:$0xff] }
 0x3d0   :  { %6042 = vmatpush1.bf16.msra.mxu0 %v6041_v44  ;;  %6108 = vmatprep.subr.bf16.mxu1 %v6107_v8  ;;  %v5077_v44 = vld [vmem:[%s11495_s3 + $0x6e8] sm:$0xff]  ;;  %v5095_v12 = vld [vmem:[%s11495_s3 + $0x778] sm:$0xff]  ;;  %v5094_v10 = vld [vmem:[%s11495_s3 + $0x770] sm:$0xff] }
 0x3d1   :  { %6044 = vmatprep.subr.bf16.mxu0 %v6043_v45  ;;  %v6059_v0 = vpack.c.bf16 %v5077_v44, %v5073_v13  ;;  %v5079_v45 = vld [vmem:[%s11495_s3 + $0x6f8] sm:$0xff]  ;;  %v6131_v53 = vpack.c.bf16 %v5095_v12, %v5091_v39  ;;  %v5097_v13 = vld [vmem:[%s11495_s3 + $0x788] sm:$0xff] }
 0x3d2   :  { %v6123_v8 = vpack.c.bf16 %v5079_v45, %v5075_v28  ;;  %v5101_v44 = vld [vmem:[%s11495_s3 + $0x7a8] sm:$0xff]  ;;  %v5096_v28 = vld [vmem:[%s11495_s3 + $0x780] sm:$0xff] }
 0x3d3   :  { %6110 = vmatpush1.bf16.msra.mxu1 %v6109_v23 }
 0x3d4   :  { %6046 = vmatpush1.bf16.msra.mxu0 %v6045_v43  ;;  %6112 = vmatprep.subr.bf16.mxu1 %v6111_v55 }
 0x3d5   :  { %6048 = vmatprep.subr.bf16.mxu0 %v6047_v30 }
 0x3d7   :  { %6114 = vmatpush1.bf16.msra.mxu1 %v6113_v36  ;;  %v6127_v36 = vpack.c.bf16 %v5087_v59, %v5083_v31 }
 0x3d8   :  { %6050 = vmatpush1.bf16.msra.mxu0 %v6049_v34  ;;  %6116 = vmatprep.subr.bf16.mxu1 %v6115_v38  ;;  %v5084_v38 = vld [vmem:[%s11495_s3 + $0x720] sm:$0xff] }
 0x3d9   :  { %6052 = vmatprep.subr.bf16.mxu0 %v6051_v37  ;;  %v5080_v37 = vld [vmem:[%s11495_s3 + $0x700] sm:$0xff] }
 0x3da   :  { %v6065_v33 = vpack.c.bf16 %v5084_v38, %v5080_v37 }
 0x3db   :  { %6118 = vmatpush1.bf16.msra.mxu1 %v6117_v1 }
 0x3dc   :  { %6054 = vmatpush1.bf16.msra.mxu0 %v6053_v52  ;;  %6120 = vmatprep.subr.bf16.mxu1 %v6119_v5  ;;  %v5092_v5 = vld [vmem:[%s11495_s3 + $0x760] sm:$0xff] }
 0x3dd   :  { %6056 = vmatprep.subr.bf16.mxu0 %v6055_v17 }
 0x3df   :  { %6122 = vmatpush1.bf16.msra.mxu1 %v6121_v2  ;;  %v6133_v2 = vpack.c.bf16 %v5094_v10, %v5090_v9  ;;  %v2510_v9 = vld [vmem:[%s11495_s3] sm:$0xff]  ;;  %v2512_v10 = vld [vmem:[%s11495_s3 + $0x10] sm:$0xff] }
 0x3e0   :  { %6058 = vmatpush1.bf16.msra.mxu0 %v6057_v54  ;;  %6124 = vmatprep.subr.bf16.mxu1 %v6123_v8  ;;  %v6069_v54 = vpack.c.bf16 %v5092_v5, %v5088_v4  ;;  %v5100_v8 = vld [vmem:[%s11495_s3 + $0x7a0] sm:$0xff] }
 0x3e1   :  { %6060 = vmatprep.subr.bf16.mxu0 %v6059_v0  ;;  %v5103_v0 = vld [vmem:[%s11495_s3 + $0x7b8] sm:$0xff] }
 0x424   :  { %v2443_v26 = vpop.permute.xlu1 %2442  ;;  %v2393_v21 = vpop.permute.xlu0 %2392 }
 0x425   :  { %v2451_v22 = vmax.f32 %v8925_v60, %v2443_v26  ;;  %v2401_v7 = vmax.f32 %v8927_v47, %v2393_v21  ;;  %v5076_v60 = vld [vmem:[%s11495_s3 + $0x6e0] sm:$0xff]  ;;  %v5074_v47 = vld [vmem:[%s11495_s3 + $0x6d0] sm:$0xff] }
 0x426   :  { %v6061_v25 = vpack.c.bf16 %v5076_v60, %v5072_v24  ;;  %v5098_v26 = vld [vmem:[%s11495_s3 + $0x790] sm:$0xff]  ;;  %v6073_v60 = vpack.c.bf16 %v5100_v8, %v5096_v28 }
 0x427   :  { %2407 = vrot.lane.b32.xlu0 %v2401_v7, %s6938_s15  ;;  %2457 = vrot.lane.b32.xlu1 %v2451_v22, %s6938_s15  ;;  %v5102_v21 = vld [vmem:[%s11495_s3 + $0x7b0] sm:$0xff] }
 0x428   :  { %v2397_v14 = vpop.permute.xlu0 %2396  ;;  %v2395_v16 = vpop.permute.xlu1 %2394  ;;  %6062 = vmatpush1.bf16.msra.mxu0 %v6061_v25  ;;  %v6137_v25 = vpack.c.bf16 %v5102_v21, %v5098_v26  ;;  %v2521_v26 = vld [vmem:[%s11495_s3 + $0x58] sm:$0xff] }
 0x429   :  { %v2403_v43 = vmax.f32 %v8938_v42, %v2397_v14  ;;  %v2402_v23 = vmax.f32 %v8942_v50, %v2395_v16  ;;  %v5078_v42 = vld [vmem:[%s11495_s3 + $0x6f0] sm:$0xff]  ;;  %v5081_v50 = vld [vmem:[%s11495_s3 + $0x708] sm:$0xff]  ;;  %v2525_v21 = vld [vmem:[%s11495_s3 + $0x78] sm:$0xff] }
 0x42a   :  { %v6125_v27 = vpack.c.bf16 %v5078_v42, %v5074_v47  ;;  %v6063_v34 = vpack.c.bf16 %v5085_v29, %v5081_v50  ;;  %v5105_v14 = vld [vmem:[%s11495_s3 + $0x7c8] sm:$0xff]  ;;  %v5111_v47 = vld [vmem:[%s11495_s3 + $0x7f8] sm:$0xff]  ;;  %v5104_v50 = vld [vmem:[%s11495_s3 + $0x7c0] sm:$0xff] }
 0x42b   :  { %2411 = vrot.lane.b32.xlu0 %v2403_v43, %s6938_s15  ;;  %2409 = vrot.lane.b32.xlu1 %v2402_v23, %s6938_s15  ;;  %v5109_v16 = vld [vmem:[%s11495_s3 + $0x7e8] sm:$0xff]  ;;  %v5107_v43 = vld [vmem:[%s11495_s3 + $0x7d8] sm:$0xff] }
 0x42c   :  { %v2445_v30 = vpop.permute.xlu0 %2444  ;;  %v2447_v55 = vpop.permute.xlu1 %2446  ;;  %6126 = vmatpush1.bf16.msra.mxu1 %v6125_v27  ;;  %6064 = vmatprep.subr.bf16.mxu0 %v6063_v34  ;;  %v6075_v42 = vpack.c.bf16 %v5109_v16, %v5105_v14  ;;  %v2511_v27 = vld [vmem:[%s11495_s3 + $0x8] sm:$0xff]  ;;  %v2518_v14 = vld [vmem:[%s11495_s3 + $0x40] sm:$0xff] }
 0x42d   :  { %v2452_v6 = vmax.f32 %v8944_v56, %v2445_v30  ;;  %v2453_v32 = vmax.f32 %v8956_v58, %v2447_v55  ;;  %v5086_v56 = vld [vmem:[%s11495_s3 + $0x730] sm:$0xff]  ;;  %v5089_v58 = vld [vmem:[%s11495_s3 + $0x748] sm:$0xff]  ;;  %6128 = vmatprep.subr.bf16.mxu1 %v6127_v36  ;;  %6066 = vmatpush1.bf16.msra.mxu0 %v6065_v33  ;;  %v6139_v30 = vpack.c.bf16 %v5111_v47, %v5107_v43 }
 0x42e   :  { %v6129_v52 = vpack.c.bf16 %v5086_v56, %v5082_v20  ;;  %v6067_v57 = vpack.c.bf16 %v5093_v48, %v5089_v58  ;;  %v5110_v55 = vld [vmem:[%s11495_s3 + $0x7f0] sm:$0xff]  ;;  %v2515_v29 = vld [vmem:[%s11495_s3 + $0x28] sm:$0xff] }
 0x42f   :  { %2459 = vrot.lane.b32.xlu0 %v2452_v6, %s6938_s15  ;;  %2461 = vrot.lane.b32.xlu1 %v2453_v32, %s6938_s15  ;;  %v2513_v6 = vld [vmem:[%s11495_s3 + $0x18] sm:$0xff]  ;;  %v6143_v20 = vpack.c.bf16 %v2515_v29, %v2511_v27  ;;  %v2526_v27 = vld [vmem:[%s11495_s3 + $0x80] sm:$0xff] }
 0x430   :  { %v2374_v1 = vpop.permute.xlu0 %2373  ;;  %v2376_v17 = vpop.permute.xlu1 %2375  ;;  %6130 = vmatpush1.bf16.msra.mxu1 %v6129_v52  ;;  %6068 = vmatprep.subr.bf16.mxu0 %v6067_v57  ;;  %v2517_v32 = vld [vmem:[%s11495_s3 + $0x38] sm:$0xff]  ;;  %v2530_v29 = vld [vmem:[%s11495_s3 + $0xa0] sm:$0xff] }
 0x431   :  { %v2382_v41 = vmax.f32 %v8929_v15, %v2374_v1  ;;  %v2383_v11 = vmax.f32 %v8946_v18, %v2376_v17  ;;  %v6071_v15 = vpack.c.bf16 %v5101_v44, %v5097_v13  ;;  %v5099_v18 = vld [vmem:[%s11495_s3 + $0x798] sm:$0xff]  ;;  %6132 = vmatprep.subr.bf16.mxu1 %v6131_v53  ;;  %6070 = vmatpush1.bf16.msra.mxu0 %v6069_v54  ;;  %v2514_v54 = vld [vmem:[%s11495_s3 + $0x20] sm:$0xff]  ;;  %v2516_v13 = vld [vmem:[%s11495_s3 + $0x30] sm:$0xff] }
 0x432   :  { %v6135_v45 = vpack.c.bf16 %v5103_v0, %v5099_v18  ;;  %v6207_v33 = vpack.c.bf16 %v2517_v32, %v2513_v6  ;;  %v2519_v44 = vld [vmem:[%s11495_s3 + $0x48] sm:$0xff] }
 0x433   :  { %2385 = vst.msk [vmem:[#allocation6] sm:$0xff] %vm45_vm0, %v2382_v41  ;;  %2386 = vst.msk [vmem:[#allocation6 + $0x10] sm:$0xff] %vm45_vm0, %v2383_v11  ;;  %6072 = vmatprep.subr.bf16.mxu0 %v6071_v15  ;;  %v2523_v18 = vld [vmem:[%s11495_s3 + $0x68] sm:$0xff] }
 0x434   :  { %v2378_v22 = vpop.permute.xlu0 %2377  ;;  %v2425_v7 = vpop.permute.xlu1 %2424  ;;  %6134 = vmatpush1.bf16.msra.mxu1 %v6133_v2  ;;  %v6147_v47 = vpack.c.bf16 %v2523_v18, %v2519_v44  ;;  %v2535_v6 = vld [vmem:[%s11495_s3 + $0xc8] sm:$0xff] }
 0x435   :  { %v2384_v23 = vmax.f32 %v9008_v35, %v2378_v22  ;;  %v2433_v24 = vmax.f32 %v8931_v3, %v2425_v7  ;;  %v5108_v35 = vld [vmem:[%s11495_s3 + $0x7e0] sm:$0xff]  ;;  %v5106_v3 = vld [vmem:[%s11495_s3 + $0x7d0] sm:$0xff]  ;;  %6136 = vmatprep.subr.bf16.mxu1 %v6135_v45  ;;  %6074 = vmatpush1.bf16.msra.mxu0 %v6073_v60  ;;  %v6145_v22 = vpack.c.bf16 %v2514_v54, %v2510_v9  ;;  %v2555_v44 = vld [vmem:[%s11495_s3 + $0x168] sm:$0xff] }
 0x436   :  { %v6077_v37 = vpack.c.bf16 %v5108_v35, %v5104_v50  ;;  %6076 = vmatprep.subr.bf16.mxu0 %v6075_v42  ;;  %v6141_v38 = vpack.c.bf16 %v5110_v55, %v5106_v3  ;;  %v6209_v7 = vpack.c.bf16 %v2516_v13, %v2512_v10  ;;  %v2524_v60 = vld [vmem:[%s11495_s3 + $0x70] sm:$0xff]  ;;  %v2527_v42 = vld [vmem:[%s11495_s3 + $0x88] sm:$0xff]  ;;  %v2529_v35 = vld [vmem:[%s11495_s3 + $0x98] sm:$0xff] }
 0x437   :  { %2436 = vst.msk [vmem:[#allocation6 + $0x8] sm:$0xff] %vm45_vm0, %v2433_v24  ;;  %v2520_v24 = vld [vmem:[%s11495_s3 + $0x50] sm:$0xff]  ;;  %v2531_v50 = vld [vmem:[%s11495_s3 + $0xa8] sm:$0xff]  ;;  %v2533_v3 = vld [vmem:[%s11495_s3 + $0xb8] sm:$0xff] }
 0x438   :  { %2388 = vst.msk [vmem:[#allocation6 + $0x20] sm:$0x7] %vm2387_vm13, %v2384_v23  ;;  %v2427_v31 = vpop.permute.xlu0 %2426  ;;  %v2429_v59 = vpop.permute.xlu1 %2428  ;;  %6138 = vmatpush1.bf16.msra.mxu1 %v6137_v25  ;;  %v2522_v23 = vld [vmem:[%s11495_s3 + $0x60] sm:$0xff]  ;;  %v6211_v25 = vpack.c.bf16 %v2525_v21, %v2521_v26  ;;  %v6213_v55 = vpack.c.bf16 %v2524_v60, %v2520_v24  ;;  %v6151_v32 = vpack.c.bf16 %v2531_v50, %v2527_v42  ;;  %v2544_v54 = vld [vmem:[%s11495_s3 + $0x110] sm:$0xff]  ;;  %v2551_v13 = vld [vmem:[%s11495_s3 + $0x148] sm:$0xff] }
 0x439   :  { %v2434_v34 = vmax.f32 %v8950_v40, %v2427_v31  ;;  %v2435_v36 = vmax.f32 %v9050_v63, %v2429_v59  ;;  %6140 = vmatprep.subr.bf16.mxu1 %v6139_v30  ;;  %6078 = vmatpush1.bf16.msra.mxu0 %v6077_v37  ;;  %v6149_v30 = vpack.c.bf16 %v2522_v23, %v2518_v14  ;;  %v2528_v31 = vld [vmem:[%s11495_s3 + $0x90] sm:$0xff]  ;;  %v2537_v37 = vld [vmem:[%s11495_s3 + $0xd8] sm:$0xff]  ;;  %v2546_v9 = vld [vmem:[%s11495_s3 + $0x120] sm:$0xff] }
 0x43a   :  { %6144 = vmatprep.subr.bf16.mxu0 %v6143_v20  ;;  %v2532_v59 = vld [vmem:[%s11495_s3 + $0xb0] sm:$0xff]  ;;  %v2563_v14 = vld [vmem:[%s11495_s3 + $0x1a8] sm:$0xff]  ;;  %v2558_v60 = vld [vmem:[%s11495_s3 + $0x180] sm:$0xff] }
 0x43b   :  { %2437 = vst.msk [vmem:[#allocation6 + $0x18] sm:$0xff] %vm45_vm0, %v2434_v34  ;;  %v6215_v34 = vpack.c.bf16 %v2533_v3, %v2529_v35  ;;  %v2548_v10 = vld [vmem:[%s11495_s3 + $0x130] sm:$0xff]  ;;  %v2567_v3 = vld [vmem:[%s11495_s3 + $0x1c8] sm:$0xff]  ;;  %vm4392_vm0 = vcmask 1041408  }
 0x43c   :  { %2438 = vst.msk [vmem:[#allocation6 + $0x28] sm:$0x7] %vm2387_vm13, %v2435_v36  ;;  %6142 = vmatpush1.bf16.msra.mxu1 %v6141_v38  ;;  %v2539_v36 = vld [vmem:[%s11495_s3 + $0xe8] sm:$0xff]  ;;  %v2541_v38 = vld [vmem:[%s11495_s3 + $0xf8] sm:$0xff]  ;;  %v2552_v21 = vld [vmem:[%s11495_s3 + $0x150] sm:$0xff] }
 0x43d   :  { %6208 = vmatprep.subr.bf16.mxu1 %v6207_v33  ;;  %v6153_v33 = vpack.c.bf16 %v2530_v29, %v2526_v27  ;;  %v2560_v50 = vld [vmem:[%s11495_s3 + $0x190] sm:$0xff]  ;;  %v2573_v27 = vld [vmem:[%s11495_s3 + $0x1f8] sm:$0xff] }
 0x43e   :  { %v2564_v35 = vld [vmem:[%s11495_s3 + $0x1b0] sm:$0xff] }
 0x499   :  { %v2408_v40 = vpop.permute.xlu0 %2407  ;;  %v2458_v56 = vpop.permute.xlu1 %2457 }
 0x49a   :  { %2417 = vst.msk [vmem:[#allocation6] sm:$0xff] %vm2416_vm14, %v2408_v40  ;;  %2466 = vst.msk [vmem:[#allocation6 + $0x8] sm:$0xff] %vm2416_vm14, %v2458_v56  ;;  %v6217_v40 = vpack.c.bf16 %v2532_v59, %v2528_v31  ;;  %v2534_v56 = vld [vmem:[%s11495_s3 + $0xc0] sm:$0xff]  ;;  %v6233_v31 = vpack.c.bf16 %v2564_v35, %v2560_v50 }
 0x49b   :  { %v2566_v59 = vld [vmem:[%s11495_s3 + $0x1c0] sm:$0xff] }
 0x49d   :  { %v2412_v63 = vpop.permute.xlu0 %2411  ;;  %v2410_v58 = vpop.permute.xlu1 %2409 }
 0x49e   :  { %2420 = vst.msk [vmem:[#allocation6 + $0x20] sm:$0x7] %vm2419_vm15, %v2412_v63  ;;  %v2538_v63 = vld [vmem:[%s11495_s3 + $0xe0] sm:$0xff] }
 0x49f   :  { %2418 = vst.msk [vmem:[#allocation6 + $0x10] sm:$0xff] %vm2416_vm14, %v2410_v58  ;;  %v6155_v58 = vpack.c.bf16 %v2539_v36, %v2535_v6  ;;  %v2570_v6 = vld [vmem:[%s11495_s3 + $0x1e0] sm:$0xff]  ;;  %v2568_v36 = vld [vmem:[%s11495_s3 + $0x1d0] sm:$0xff] }
 0x4a1   :  { %v2460_v48 = vpop.permute.xlu0 %2459  ;;  %v2462_v52 = vpop.permute.xlu1 %2461  ;;  %v2473_v57 = vld [vmem:[#allocation6 + $0x1] ss:$8 sm:$0x3]  ;;  %v2477_v39 = vld [vmem:[#allocation6 + $0x3] ss:$8 sm:$0x3] }
 0x4a2   :  { %2467 = vst.msk [vmem:[#allocation6 + $0x18] sm:$0xff] %vm2416_vm14, %v2460_v48  ;;  %v2481_v12 = vld [vmem:[#allocation6 + $0x5] ss:$8 sm:$0x3]  ;;  %v6219_v48 = vpack.c.bf16 %v2541_v38, %v2537_v37  ;;  %v2572_v37 = vld [vmem:[%s11495_s3 + $0x1f0] sm:$0xff]  ;;  %v2575_v38 = vld [vmem:[%s11495_s3 + $0x208] sm:$0xff] }
 0x4a3   :  { %2468 = vst.msk [vmem:[#allocation6 + $0x28] sm:$0x7] %vm2419_vm15, %v2462_v52  ;;  %v2485_v1 = vld [vmem:[#allocation6 + $0x7] ss:$8 sm:$0x3]  ;;  %v2536_v52 = vld [vmem:[%s11495_s3 + $0xd0] sm:$0xff] }
 0x4a4   :  { %2475 = vst.msk [vmem:[#allocation4 + $0x2] ss:$8 sm:$0x3] %vm8074_vm8, %v2473_v57  ;;  %2479 = vst.msk [vmem:[#allocation4 + $0x3] ss:$8 sm:$0x3] %vm8074_vm8, %v2477_v39 }
 0x4a5   :  { %2483 = vst.msk [vmem:[#allocation4 + $0x4] ss:$8 sm:$0x3] %vm8074_vm8, %v2481_v12  ;;  %2487 = vst.msk [vmem:[#allocation4 + $0x5] ss:$8 sm:$0x3] %vm8074_vm8, %v2485_v1 }
 0x4a6   :  { %v2540_v57 = vld [vmem:[%s11495_s3 + $0xf0] sm:$0xff]  ;;  %v2543_v39 = vld [vmem:[%s11495_s3 + $0x108] sm:$0xff]  ;;  %v2545_v1 = vld [vmem:[%s11495_s3 + $0x118] sm:$0xff] }
 0x4a7   :  { %v2547_v12 = vld [vmem:[%s11495_s3 + $0x128] sm:$0xff] }
 0x4a9   :  { %v2489_v53 = vld [vmem:[#allocation6 + $0x13] ss:$8 sm:$0x3]  ;;  %v2493_v4 = vld [vmem:[#allocation6 + $0x15] ss:$8 sm:$0x3] }
 0x4aa   :  { %v2502_v17 = vld [vmem:[#allocation6 + $0x21] ss:$8 sm:$0x3]  ;;  %2491 = vst.msk [vmem:[#allocation4 + $0x10] ss:$8 sm:$0x3] %vm8074_vm8, %v2489_v53  ;;  %v6157_v53 = vpack.c.bf16 %v2538_v63, %v2534_v56  ;;  %v6173_v56 = vpack.c.bf16 %v2570_v6, %v2566_v59  ;;  %v6237_v63 = vpack.c.bf16 %v2572_v37, %v2568_v36 }
 0x4ab   :  { %2504 = vst.msk [vmem:[#allocation4 + $0x13] ss:$8 sm:$0x3] %vm8074_vm8, %v2502_v17  ;;  %v2497_v5 = vld [vmem:[#allocation6 + $0x17] ss:$8 sm:$0x3] }
 0x4ac   :  { %2495 = vst.msk [vmem:[#allocation4 + $0x11] ss:$8 sm:$0x3] %vm8074_vm8, %v2493_v4  ;;  %2499 = vst.msk [vmem:[#allocation4 + $0x12] ss:$8 sm:$0x3] %vm8074_vm8, %v2497_v5  ;;  %v6221_v4 = vpack.c.bf16 %v2540_v57, %v2536_v52 }
 0x4ad   :  { %v2639_v41 = vld [vmem:[#allocation4 + $0x8] sm:$0xfe]  ;;  %v2638_v11 = vld [vmem:[#allocation4] sm:$0xfe] }
 0x4ae   :  { %v2778_v0 = vrot.slane %v2639_v41, 1  ;;  %v2775_v45 = vrot.slane %v2638_v11, 1  ;;  %v2507_v20 = vld [vmem:[#allocation4 + $0x8] sm:$0xff]  ;;  %v2549_v17 = vld [vmem:[%s11495_s3 + $0x138] sm:$0xff]  ;;  %v6159_v41 = vpack.c.bf16 %v2547_v12, %v2543_v39  ;;  %v2576_v39 = vld [vmem:[%s11495_s3 + $0x210] sm:$0xff] }
 0x4af   :  { %v2542_v5 = vld [vmem:[%s11495_s3 + $0x100] sm:$0xff]  ;;  %v6223_v11 = vpack.c.bf16 %v2549_v17, %v2545_v1  ;;  %v2580_v12 = vld [vmem:[%s11495_s3 + $0x230] sm:$0xff]  ;;  %v2583_v1 = vld [vmem:[%s11495_s3 + $0x248] sm:$0xff] }
 0x4b0   :  { %v6161_v18 = vpack.c.bf16 %v2546_v9, %v2542_v5  ;;  %v2587_v17 = vld [vmem:[%s11495_s3 + $0x268] sm:$0xff]  ;;  %v6241_v9 = vpack.c.bf16 %v2580_v12, %v2576_v39 }
 0x4b3   :  { %v2641_v2 = vld [vmem:[#allocation4 + $0x18] sm:$0x1f]  ;;  %v2640_v15 = vld [vmem:[#allocation4 + $0x10] sm:$0x1f] }
 0x4b4   :  { %v2779_v28 = vrot.slane %v2641_v2, 1  ;;  %v2776_v8 = vrot.slane %v2640_v15, 1  ;;  %v2553_v2 = vld [vmem:[%s11495_s3 + $0x158] sm:$0xff] }
 0x4b5   :  { %v2557_v15 = vld [vmem:[%s11495_s3 + $0x178] sm:$0xff] }
 0x4b6   :  { %v2780_v16 = vsel %vm890_vm2, %v2778_v0, %v2779_v28  ;;  %v2777_v43 = vsel %vm890_vm2, %v2775_v45, %v2776_v8  ;;  %v6225_v0 = vpack.c.bf16 %v2548_v10, %v2544_v54  ;;  %v2554_v45 = vld [vmem:[%s11495_s3 + $0x160] sm:$0xff]  ;;  %v6227_v26 = vpack.c.bf16 %v2557_v15, %v2553_v2  ;;  %v2591_v2 = vld [vmem:[%s11495_s3 + $0x288] sm:$0xff] }
 0x4b7   :  { %2849 = vmatprep.mubr.f32.mxu0 %v2780_v16  ;;  %2926 = vmatprep.mubr.f32.mxu1 %v2780_v16  ;;  %v2561_v16 = vld [vmem:[%s11495_s3 + $0x198] sm:$0xff]  ;;  %v6179_v54 = vpack.c.bf16 %v2587_v17, %v2583_v1  ;;  %v2595_v15 = vld [vmem:[%s11495_s3 + $0x2a8] sm:$0xff]  ;;  %v2616_v1 = vld [vmem:[%s11495_s3 + $0x350] sm:$0xff] }
 0x4b8   :  { %2850 = vmatmul.mubr.f32.vlgmr.msra.gmra.mrb[16].mxu0 %v2777_v43  ;;  %2927 = vmatmul.mubr.f32.vlgmr.msra.gmra.mrb[26].mxu1 %v2777_v43  ;;  %v2565_v43 = vld [vmem:[%s11495_s3 + $0x1b8] sm:$0xff]  ;;  %v2620_v17 = vld [vmem:[%s11495_s3 + $0x370] sm:$0xff] }
 0x4b9   :  { %6146 = vmatpush1.bf16.msra.mxu0 %v6145_v22  ;;  %6210 = vmatpush1.bf16.msra.mxu1 %v6209_v7  ;;  %v2556_v22 = vld [vmem:[%s11495_s3 + $0x170] sm:$0xff]  ;;  %v2559_v7 = vld [vmem:[%s11495_s3 + $0x188] sm:$0xff]  ;;  %v6231_v42 = vpack.c.bf16 %v2565_v43, %v2561_v16 }
 0x4ba   :  { %2855 = vmatprep.mubr.f32.mxu0 %v2779_v28  ;;  %2932 = vmatprep.mubr.f32.mxu1 %v2779_v28  ;;  %v2550_v28 = vld [vmem:[%s11495_s3 + $0x140] sm:$0xff]  ;;  %v6229_v24 = vpack.c.bf16 %v2556_v22, %v2552_v21  ;;  %v6183_v21 = vpack.c.bf16 %v2595_v15, %v2591_v2  ;;  %v2599_v16 = vld [vmem:[%s11495_s3 + $0x2c8] sm:$0xff]  ;;  %v2624_v2 = vld [vmem:[%s11495_s3 + $0x390] sm:$0xff] }
 0x4bb   :  { %6148 = vmatprep.subr.bf16.mxu0 %v6147_v47  ;;  %6212 = vmatprep.subr.bf16.mxu1 %v6211_v25  ;;  %v6165_v23 = vpack.c.bf16 %v2554_v45, %v2550_v28  ;;  %v2562_v47 = vld [vmem:[%s11495_s3 + $0x1a0] sm:$0xff]  ;;  %v6167_v25 = vpack.c.bf16 %v2563_v14, %v2559_v7  ;;  %v2592_v7 = vld [vmem:[%s11495_s3 + $0x290] sm:$0xff]  ;;  %v2603_v43 = vld [vmem:[%s11495_s3 + $0x2e8] sm:$0xff] }
 0x4bc   :  { %2856 = vmatmul.mubr.f32.gmra.mrb[18].mxu0 %v2776_v8  ;;  %2933 = vmatmul.mubr.f32.gmra.mrb[28].mxu1 %v2776_v8  ;;  %v6163_v8 = vpack.c.bf16 %v2555_v44, %v2551_v13  ;;  %v6169_v29 = vpack.c.bf16 %v2562_v47, %v2558_v60  ;;  %v2584_v13 = vld [vmem:[%s11495_s3 + $0x250] sm:$0xff]  ;;  %v6187_v50 = vpack.c.bf16 %v2603_v43, %v2599_v16 }
 0x4bd   :  { %6150 = vmatpush1.bf16.msra.mxu0 %v6149_v30  ;;  %6214 = vmatpush1.bf16.msra.mxu1 %v6213_v55  ;;  %v2571_v30 = vld [vmem:[%s11495_s3 + $0x1e8] sm:$0xff]  ;;  %v2569_v55 = vld [vmem:[%s11495_s3 + $0x1d8] sm:$0xff]  ;;  %v2588_v44 = vld [vmem:[%s11495_s3 + $0x270] sm:$0xff] }
 0x4be   :  { %3003 = vmatprep.mubr.f32.mxu0 %v2507_v20  ;;  %3080 = vmatprep.mubr.f32.mxu1 %v2507_v20  ;;  %v2579_v20 = vld [vmem:[%s11495_s3 + $0x228] sm:$0xff]  ;;  %v6245_v45 = vpack.c.bf16 %v2588_v44, %v2584_v13  ;;  %v2596_v14 = vld [vmem:[%s11495_s3 + $0x2b0] sm:$0xff] }
 0x4bf   :  { %6152 = vmatprep.subr.bf16.mxu0 %v6151_v32  ;;  %6216 = vmatprep.subr.bf16.mxu1 %v6215_v34  ;;  %v6171_v32 = vpack.c.bf16 %v2571_v30, %v2567_v3  ;;  %v6235_v34 = vpack.c.bf16 %v2573_v27, %v2569_v55  ;;  %v6175_v52 = vpack.c.bf16 %v2579_v20, %v2575_v38  ;;  %v2600_v3 = vld [vmem:[%s11495_s3 + $0x2d0] sm:$0xff]  ;;  %v2607_v55 = vld [vmem:[%s11495_s3 + $0x308] sm:$0xff] }
 0x4c0   :  { %v6249_v47 = vpack.c.bf16 %v2596_v14, %v2592_v7  ;;  %v2604_v30 = vld [vmem:[%s11495_s3 + $0x2f0] sm:$0xff]  ;;  %v2611_v27 = vld [vmem:[%s11495_s3 + $0x328] sm:$0xff] }
 0x4c1   :  { %6154 = vmatpush1.bf16.msra.mxu0 %v6153_v33  ;;  %6218 = vmatpush1.bf16.msra.mxu1 %v6217_v40  ;;  %v2577_v33 = vld [vmem:[%s11495_s3 + $0x218] sm:$0xff]  ;;  %v6253_v6 = vpack.c.bf16 %v2604_v30, %v2600_v3  ;;  %v6191_v36 = vpack.c.bf16 %v2611_v27, %v2607_v55  ;;  %v2608_v38 = vld [vmem:[%s11495_s3 + $0x310] sm:$0xff]  ;;  %v5112_v3 = vld [vmem:[%s11495_s3 + $0x800] sm:$0xff] }
 0x4c2   :  { %6156 = vmatprep.subr.bf16.mxu0 %v6155_v58  ;;  %6220 = vmatprep.subr.bf16.mxu1 %v6219_v48  ;;  %v2581_v40 = vld [vmem:[%s11495_s3 + $0x238] sm:$0xff]  ;;  %v2574_v58 = vld [vmem:[%s11495_s3 + $0x200] sm:$0xff]  ;;  %v2612_v20 = vld [vmem:[%s11495_s3 + $0x330] sm:$0xff] }
 0x4c3   :  { %v2578_v48 = vld [vmem:[%s11495_s3 + $0x220] sm:$0xff]  ;;  %v6239_v57 = vpack.c.bf16 %v2581_v40, %v2577_v33  ;;  %v2615_v33 = vld [vmem:[%s11495_s3 + $0x348] sm:$0xff]  ;;  %v2628_v15 = vld [vmem:[%s11495_s3 + $0x3b0] sm:$0xff] }
 0x4c4   :  { %v6177_v5 = vpack.c.bf16 %v2578_v48, %v2574_v58  ;;  %v2619_v40 = vld [vmem:[%s11495_s3 + $0x368] sm:$0xff]  ;;  %v6257_v48 = vpack.c.bf16 %v2612_v20, %v2608_v38  ;;  %v2632_v16 = vld [vmem:[%s11495_s3 + $0x3d0] sm:$0xff]  ;;  %v5116_v30 = vld [vmem:[%s11495_s3 + $0x820] sm:$0xff] }
 0x4c5   :  { %6158 = vmatpush1.bf16.msra.mxu0 %v6157_v53  ;;  %6222 = vmatpush1.bf16.msra.mxu1 %v6221_v4  ;;  %v2585_v53 = vld [vmem:[%s11495_s3 + $0x258] sm:$0xff]  ;;  %v6195_v39 = vpack.c.bf16 %v2619_v40, %v2615_v33  ;;  %v2636_v43 = vld [vmem:[%s11495_s3 + $0x3f0] sm:$0xff]  ;;  %v5129_v40 = vld [vmem:[%s11495_s3 + $0x888] sm:$0xff] }
 0x4c6   :  { %6160 = vmatprep.subr.bf16.mxu0 %v6159_v41  ;;  %6224 = vmatprep.subr.bf16.mxu1 %v6223_v11  ;;  %v2589_v4 = vld [vmem:[%s11495_s3 + $0x278] sm:$0xff]  ;;  %v2582_v41 = vld [vmem:[%s11495_s3 + $0x240] sm:$0xff]  ;;  %v5114_v55 = vld [vmem:[%s11495_s3 + $0x810] sm:$0xff] }
 0x4c7   :  { %v2586_v11 = vld [vmem:[%s11495_s3 + $0x260] sm:$0xff]  ;;  %v6243_v10 = vpack.c.bf16 %v2589_v4, %v2585_v53  ;;  %v2623_v53 = vld [vmem:[%s11495_s3 + $0x388] sm:$0xff]  ;;  %v5118_v27 = vld [vmem:[%s11495_s3 + $0x830] sm:$0xff] }
 0x4c8   :  { %v6181_v28 = vpack.c.bf16 %v2586_v11, %v2582_v41  ;;  %v2627_v4 = vld [vmem:[%s11495_s3 + $0x3a8] sm:$0xff]  ;;  %v6261_v11 = vpack.c.bf16 %v2620_v17, %v2616_v1  ;;  %v6337_v38 = vpack.c.bf16 %v5118_v27, %v5114_v55  ;;  %v5122_v20 = vld [vmem:[%s11495_s3 + $0x850] sm:$0xff]  ;;  %v5135_v1 = vld [vmem:[%s11495_s3 + $0x8b8] sm:$0xff] }
 0x4c9   :  { %6162 = vmatpush1.bf16.msra.mxu0 %v6161_v18  ;;  %6226 = vmatpush1.bf16.msra.mxu1 %v6225_v0  ;;  %v2593_v18 = vld [vmem:[%s11495_s3 + $0x298] sm:$0xff]  ;;  %v6199_v13 = vpack.c.bf16 %v2627_v4, %v2623_v53  ;;  %v5126_v33 = vld [vmem:[%s11495_s3 + $0x870] sm:$0xff]  ;;  %v5153_v55 = vld [vmem:[%s11495_s3 + $0x948] sm:$0xff] }
 0x4ca   :  { %6164 = vmatprep.subr.bf16.mxu0 %v6163_v8  ;;  %6228 = vmatprep.subr.bf16.mxu1 %v6227_v26  ;;  %v2597_v0 = vld [vmem:[%s11495_s3 + $0x2b8] sm:$0xff]  ;;  %v2590_v8 = vld [vmem:[%s11495_s3 + $0x280] sm:$0xff]  ;;  %v6341_v4 = vpack.c.bf16 %v5126_v33, %v5122_v20  ;;  %v5157_v27 = vld [vmem:[%s11495_s3 + $0x968] sm:$0xff] }
 0x4cb   :  { %v2594_v26 = vld [vmem:[%s11495_s3 + $0x2a0] sm:$0xff]  ;;  %v6247_v22 = vpack.c.bf16 %v2597_v0, %v2593_v18  ;;  %v2631_v18 = vld [vmem:[%s11495_s3 + $0x3c8] sm:$0xff]  ;;  %v5158_v20 = vld [vmem:[%s11495_s3 + $0x970] sm:$0xff] }
 0x4cc   :  { %v6185_v60 = vpack.c.bf16 %v2594_v26, %v2590_v8  ;;  %v2635_v0 = vld [vmem:[%s11495_s3 + $0x3e8] sm:$0xff]  ;;  %v6265_v26 = vpack.c.bf16 %v2628_v15, %v2624_v2 }
 0x4cd   :  { %6166 = vmatpush1.bf16.msra.mxu0 %v6165_v23  ;;  %6230 = vmatpush1.bf16.msra.mxu1 %v6229_v24  ;;  %v2601_v23 = vld [vmem:[%s11495_s3 + $0x2d8] sm:$0xff]  ;;  %v6203_v7 = vpack.c.bf16 %v2635_v0, %v2631_v18  ;;  %v5141_v15 = vld [vmem:[%s11495_s3 + $0x8e8] sm:$0xff] }
 0x4ce   :  { %6168 = vmatprep.subr.bf16.mxu0 %v6167_v25  ;;  %6232 = vmatprep.subr.bf16.mxu1 %v6231_v42  ;;  %v2605_v24 = vld [vmem:[%s11495_s3 + $0x2f8] sm:$0xff]  ;;  %v2598_v25 = vld [vmem:[%s11495_s3 + $0x2c0] sm:$0xff]  ;;  %v5161_v33 = vld [vmem:[%s11495_s3 + $0x988] sm:$0xff] }
 0x4cf   :  { %v2602_v42 = vld [vmem:[%s11495_s3 + $0x2e0] sm:$0xff]  ;;  %v6251_v35 = vpack.c.bf16 %v2605_v24, %v2601_v23  ;;  %v5113_v23 = vld [vmem:[%s11495_s3 + $0x808] sm:$0xff]  ;;  %v5139_v18 = vld [vmem:[%s11495_s3 + $0x8d8] sm:$0xff] }
 0x4d0   :  { %v6189_v59 = vpack.c.bf16 %v2602_v42, %v2598_v25  ;;  %v5117_v24 = vld [vmem:[%s11495_s3 + $0x828] sm:$0xff]  ;;  %v6269_v42 = vpack.c.bf16 %v2636_v43, %v2632_v16  ;;  %v5143_v0 = vld [vmem:[%s11495_s3 + $0x8f8] sm:$0xff] }
 0x4d1   :  { %6170 = vmatpush1.bf16.msra.mxu0 %v6169_v29  ;;  %6234 = vmatpush1.bf16.msra.mxu1 %v6233_v31  ;;  %v2609_v29 = vld [vmem:[%s11495_s3 + $0x318] sm:$0xff]  ;;  %v5145_v16 = vld [vmem:[%s11495_s3 + $0x908] sm:$0xff] }
 0x4d2   :  { %6172 = vmatprep.subr.bf16.mxu0 %v6171_v32  ;;  %6236 = vmatprep.subr.bf16.mxu1 %v6235_v34  ;;  %v2613_v31 = vld [vmem:[%s11495_s3 + $0x338] sm:$0xff]  ;;  %v2606_v32 = vld [vmem:[%s11495_s3 + $0x300] sm:$0xff]  ;;  %v5149_v43 = vld [vmem:[%s11495_s3 + $0x928] sm:$0xff] }
 0x4d3   :  { %v2610_v34 = vld [vmem:[%s11495_s3 + $0x320] sm:$0xff]  ;;  %v6255_v37 = vpack.c.bf16 %v2613_v31, %v2609_v29  ;;  %v5121_v29 = vld [vmem:[%s11495_s3 + $0x848] sm:$0xff] }
 0x4d4   :  { %v6193_v58 = vpack.c.bf16 %v2610_v34, %v2606_v32  ;;  %v5125_v31 = vld [vmem:[%s11495_s3 + $0x868] sm:$0xff]  ;;  %v5120_v32 = vld [vmem:[%s11495_s3 + $0x840] sm:$0xff] }
 0x4d5   :  { %6174 = vmatpush1.bf16.msra.mxu0 %v6173_v56  ;;  %6238 = vmatpush1.bf16.msra.mxu1 %v6237_v63  ;;  %v2617_v56 = vld [vmem:[%s11495_s3 + $0x358] sm:$0xff]  ;;  %v5124_v34 = vld [vmem:[%s11495_s3 + $0x860] sm:$0xff] }
 0x4d6   :  { %6176 = vmatprep.subr.bf16.mxu0 %v6175_v52  ;;  %6240 = vmatprep.subr.bf16.mxu1 %v6239_v57  ;;  %v2621_v63 = vld [vmem:[%s11495_s3 + $0x378] sm:$0xff]  ;;  %v2614_v52 = vld [vmem:[%s11495_s3 + $0x340] sm:$0xff]  ;;  %v6277_v17 = vpack.c.bf16 %v5124_v34, %v5120_v32 }
 0x4d7   :  { %v2618_v57 = vld [vmem:[%s11495_s3 + $0x360] sm:$0xff]  ;;  %v6259_v12 = vpack.c.bf16 %v2621_v63, %v2617_v56  ;;  %v2506_v56 = vld [vmem:[#allocation4] sm:$0xff]  ;;  %v6275_v63 = vpack.c.bf16 %v5125_v31, %v5121_v29 }
 0x4d8   :  { %v6197_v41 = vpack.c.bf16 %v2618_v57, %v2614_v52  ;;  %v5133_v52 = vld [vmem:[%s11495_s3 + $0x8a8] sm:$0xff]  ;;  %v2509_v57 = vld [vmem:[#allocation4 + $0x18] sm:$0xf]  ;;  %v5155_v29 = vld [vmem:[%s11495_s3 + $0x958] sm:$0xff] }
 0x4d9   :  { %6178 = vmatpush1.bf16.msra.mxu0 %v6177_v5  ;;  %6242 = vmatpush1.bf16.msra.mxu1 %v6241_v9  ;;  %v2625_v5 = vld [vmem:[%s11495_s3 + $0x398] sm:$0xff]  ;;  %v5152_v32 = vld [vmem:[%s11495_s3 + $0x940] sm:$0xff] }
 0x4da   :  { %6180 = vmatprep.subr.bf16.mxu0 %v6179_v54  ;;  %6244 = vmatprep.subr.bf16.mxu1 %v6243_v10  ;;  %v2629_v9 = vld [vmem:[%s11495_s3 + $0x3b8] sm:$0xff]  ;;  %v2622_v54 = vld [vmem:[%s11495_s3 + $0x380] sm:$0xff] }
 0x4db   :  { %v2626_v10 = vld [vmem:[%s11495_s3 + $0x3a0] sm:$0xff]  ;;  %v6263_v44 = vpack.c.bf16 %v2629_v9, %v2625_v5  ;;  %v5159_v31 = vld [vmem:[%s11495_s3 + $0x978] sm:$0xff] }
 0x4dc   :  { %v6201_v8 = vpack.c.bf16 %v2626_v10, %v2622_v54  ;;  %v5128_v5 = vld [vmem:[%s11495_s3 + $0x880] sm:$0xff]  ;;  %v6279_v54 = vpack.c.bf16 %v5133_v52, %v5129_v40  ;;  %v5165_v40 = vld [vmem:[%s11495_s3 + $0x9a8] sm:$0xff] }
 0x4dd   :  { %6182 = vmatpush1.bf16.msra.mxu0 %v6181_v28  ;;  %6246 = vmatpush1.bf16.msra.mxu1 %v6245_v45  ;;  %v2633_v28 = vld [vmem:[%s11495_s3 + $0x3d8] sm:$0xff]  ;;  %v5132_v9 = vld [vmem:[%s11495_s3 + $0x8a0] sm:$0xff] }
 0x4de   :  { %6184 = vmatprep.subr.bf16.mxu0 %v6183_v21  ;;  %6248 = vmatprep.subr.bf16.mxu1 %v6247_v22  ;;  %v2637_v45 = vld [vmem:[%s11495_s3 + $0x3f8] sm:$0xff]  ;;  %v2630_v21 = vld [vmem:[%s11495_s3 + $0x3c0] sm:$0xff] }
 0x4df   :  { %v2634_v22 = vld [vmem:[%s11495_s3 + $0x3e0] sm:$0xff]  ;;  %v6267_v14 = vpack.c.bf16 %v2637_v45, %v2633_v28  ;;  %v6281_v28 = vpack.c.bf16 %v5132_v9, %v5128_v5  ;;  %v5173_v5 = vld [vmem:[%s11495_s3 + $0x9e8] sm:$0xff]  ;;  %v5171_v9 = vld [vmem:[%s11495_s3 + $0x9d8] sm:$0xff] }
 0x4e0   :  { %v6205_v25 = vpack.c.bf16 %v2634_v22, %v2630_v21  ;;  %v6347_v22 = vpack.c.bf16 %v5143_v0, %v5139_v18  ;;  %v5156_v34 = vld [vmem:[%s11495_s3 + $0x960] sm:$0xff]  ;;  %v5174_v18 = vld [vmem:[%s11495_s3 + $0x9f0] sm:$0xff]  ;;  %v5177_v0 = vld [vmem:[%s11495_s3 + $0xa08] sm:$0xff] }
 0x4e1   :  { %6186 = vmatpush1.bf16.msra.mxu0 %v6185_v60  ;;  %6250 = vmatpush1.bf16.msra.mxu1 %v6249_v47  ;;  %v5115_v60 = vld [vmem:[%s11495_s3 + $0x818] sm:$0xff]  ;;  %v5160_v52 = vld [vmem:[%s11495_s3 + $0x980] sm:$0xff] }
 0x4e2   :  { %6188 = vmatprep.subr.bf16.mxu0 %v6187_v50  ;;  %6252 = vmatprep.subr.bf16.mxu1 %v6251_v35  ;;  %v5119_v47 = vld [vmem:[%s11495_s3 + $0x838] sm:$0xff]  ;;  %v6271_v50 = vpack.c.bf16 %v5117_v24, %v5113_v23 }
 0x4e3   :  { %v6335_v35 = vpack.c.bf16 %v5119_v47, %v5115_v60  ;;  %v5147_v23 = vld [vmem:[%s11495_s3 + $0x918] sm:$0xff] }
 0x4e4   :  { %v5151_v24 = vld [vmem:[%s11495_s3 + $0x938] sm:$0xff] }
 0x4e5   :  { %6190 = vmatpush1.bf16.msra.mxu0 %v6189_v59  ;;  %6254 = vmatpush1.bf16.msra.mxu1 %v6253_v6  ;;  %v5123_v59 = vld [vmem:[%s11495_s3 + $0x858] sm:$0xff] }
 0x4e6   :  { %6192 = vmatprep.subr.bf16.mxu0 %v6191_v36  ;;  %6256 = vmatprep.subr.bf16.mxu1 %v6255_v37  ;;  %v5127_v6 = vld [vmem:[%s11495_s3 + $0x878] sm:$0xff]  ;;  %v3096_v36 = vld [vmem:[#allocation4 + $0x18] sm:$0x3f]  ;;  %v6273_v37 = vpack.c.bf16 %v5116_v30, %v5112_v3 }
 0x4e7   :  { %v5146_v3 = vld [vmem:[%s11495_s3 + $0x910] sm:$0xff] }
 0x4e8   :  { %v5150_v30 = vld [vmem:[%s11495_s3 + $0x930] sm:$0xff] }
 0x4e9   :  { %6194 = vmatpush1.bf16.msra.mxu0 %v6193_v58  ;;  %6258 = vmatpush1.bf16.msra.mxu1 %v6257_v48  ;;  %v6339_v58 = vpack.c.bf16 %v5127_v6, %v5123_v59  ;;  %v3094_v48 = vld [vmem:[#allocation4 + $0x8] sm:$0xfc]  ;;  %v6353_v6 = vpack.c.bf16 %v5150_v30, %v5146_v3 }
 0x4ea   :  { %6196 = vmatprep.subr.bf16.mxu0 %v6195_v39  ;;  %6260 = vmatprep.subr.bf16.mxu1 %v6259_v12  ;;  %v9845_v39 = vrot.slane %v3096_v36, 2  ;;  %v5131_v12 = vld [vmem:[%s11495_s3 + $0x898] sm:$0xff]  ;;  %v3233_v53 = vrot.slane %v3094_v48, 2  ;;  %v6291_v36 = vpack.c.bf16 %v5157_v27, %v5153_v55  ;;  %v5188_v3 = vld [vmem:[%s11495_s3 + $0xa60] sm:$0xff]  ;;  %v5186_v27 = vld [vmem:[%s11495_s3 + $0xa50] sm:$0xff] }
 0x4eb   :  { %v6343_v10 = vpack.c.bf16 %v5135_v1, %v5131_v12  ;;  %v6295_v12 = vpack.c.bf16 %v5165_v40, %v5161_v33  ;;  %v5194_v40 = vld [vmem:[%s11495_s3 + $0xa90] sm:$0xff] }
 0x4ec   :  { %v3235_v2 = vsel %vm2073_vm12, %v3233_v53, %v9845_v39  ;;  %v5166_v53 = vld [vmem:[%s11495_s3 + $0x9b0] sm:$0xff] }
 0x4ed   :  { %6198 = vmatpush1.bf16.msra.mxu0 %v6197_v41  ;;  %6262 = vmatpush1.bf16.msra.mxu1 %v6261_v11  ;;  %v5130_v41 = vld [vmem:[%s11495_s3 + $0x890] sm:$0xff]  ;;  %v2508_v11 = vld [vmem:[#allocation4 + $0x10] sm:$0xf] }
 0x4ee   :  { %6200 = vmatprep.subr.bf16.mxu0 %v6199_v13  ;;  %6264 = vmatprep.subr.bf16.mxu1 %v6263_v44  ;;  %v5134_v13 = vld [vmem:[%s11495_s3 + $0x8b0] sm:$0xff]  ;;  %v5137_v44 = vld [vmem:[%s11495_s3 + $0x8c8] sm:$0xff] }
 0x4ef   :  { %v6345_v45 = vpack.c.bf16 %v5134_v13, %v5130_v41  ;;  %v6283_v21 = vpack.c.bf16 %v5141_v15, %v5137_v44  ;;  %v5175_v41 = vld [vmem:[%s11495_s3 + $0x9f8] sm:$0xff]  ;;  %v5172_v13 = vld [vmem:[%s11495_s3 + $0x9e0] sm:$0xff]  ;;  %v5170_v15 = vld [vmem:[%s11495_s3 + $0x9d0] sm:$0xff] }
 0x4f1   :  { %6202 = vmatpush1.bf16.msra.mxu0 %v6201_v8  ;;  %6266 = vmatpush1.bf16.msra.mxu1 %v6265_v26  ;;  %v5136_v8 = vld [vmem:[%s11495_s3 + $0x8c0] sm:$0xff] }
 0x4f2   :  { %6204 = vmatprep.subr.bf16.mxu0 %v6203_v7  ;;  %6268 = vmatprep.subr.bf16.mxu1 %v6267_v14  ;;  %v5140_v26 = vld [vmem:[%s11495_s3 + $0x8e0] sm:$0xff]  ;;  %v5138_v7 = vld [vmem:[%s11495_s3 + $0x8d0] sm:$0xff] }
 0x4f3   :  { %v5142_v14 = vld [vmem:[%s11495_s3 + $0x8f0] sm:$0xff]  ;;  %v6285_v60 = vpack.c.bf16 %v5140_v26, %v5136_v8  ;;  %v5183_v8 = vld [vmem:[%s11495_s3 + $0xa38] sm:$0xff] }
 0x4f4   :  { %v6349_v47 = vpack.c.bf16 %v5142_v14, %v5138_v7  ;;  %v5180_v7 = vld [vmem:[%s11495_s3 + $0xa20] sm:$0xff] }
 0x4f5   :  { %6206 = vmatpush1.bf16.msra.mxu0 %v6205_v25  ;;  %6270 = vmatpush1.bf16.msra.mxu1 %v6269_v42  ;;  %v5144_v25 = vld [vmem:[%s11495_s3 + $0x900] sm:$0xff] }
 0x4f6   :  { %6272 = vmatprep.subr.bf16.mxu0 %v6271_v50  ;;  %6336 = vmatprep.subr.bf16.mxu1 %v6335_v35  ;;  %v5148_v42 = vld [vmem:[%s11495_s3 + $0x920] sm:$0xff]  ;;  %v6287_v50 = vpack.c.bf16 %v5149_v43, %v5145_v16  ;;  %v6351_v35 = vpack.c.bf16 %v5151_v24, %v5147_v23  ;;  %v5178_v43 = vld [vmem:[%s11495_s3 + $0xa10] sm:$0xff]  ;;  %v5185_v24 = vld [vmem:[%s11495_s3 + $0xa48] sm:$0xff] }
 0x4f7   :  { %v6289_v59 = vpack.c.bf16 %v5148_v42, %v5144_v25  ;;  %v5182_v23 = vld [vmem:[%s11495_s3 + $0xa30] sm:$0xff]  ;;  %v5191_v25 = vld [vmem:[%s11495_s3 + $0xa78] sm:$0xff] }
 0x4f8   :  { %3004 = vmatmul.mubr.f32.vlgmr.msra.gmra.mrb[16].mxu0 %v2506_v56  ;;  %3081 = vmatmul.mubr.f32.vlgmr.msra.gmra.mrb[26].mxu1 %v2506_v56  ;;  %v5163_v56 = vld [vmem:[%s11495_s3 + $0x998] sm:$0xff] }
 0x4f9   :  { %3009 = vmatprep.mubr.f32.mxu0 %v2509_v57  ;;  %3086 = vmatprep.mubr.f32.mxu1 %v2509_v57  ;;  %v5164_v57 = vld [vmem:[%s11495_s3 + $0x9a0] sm:$0xff] }
 0x4fa   :  { %6274 = vmatpush1.bf16.msra.mxu0 %v6273_v37  ;;  %6338 = vmatpush1.bf16.msra.mxu1 %v6337_v38  ;;  %v6355_v37 = vpack.c.bf16 %v5159_v31, %v5155_v29  ;;  %v5154_v38 = vld [vmem:[%s11495_s3 + $0x950] sm:$0xff]  ;;  %v5193_v31 = vld [vmem:[%s11495_s3 + $0xa88] sm:$0xff] }
 0x4fb   :  { %6276 = vmatprep.subr.bf16.mxu0 %v6275_v63  ;;  %6340 = vmatprep.subr.bf16.mxu1 %v6339_v58  ;;  %v5167_v63 = vld [vmem:[%s11495_s3 + $0x9b8] sm:$0xff]  ;;  %v6293_v58 = vpack.c.bf16 %v5156_v34, %v5152_v32  ;;  %v6357_v48 = vpack.c.bf16 %v5158_v20, %v5154_v38  ;;  %v5190_v29 = vld [vmem:[%s11495_s3 + $0xa70] sm:$0xff]  ;;  %v5196_v38 = vld [vmem:[%s11495_s3 + $0xaa0] sm:$0xff] }
 0x4fc   :  { %3010 = vmatmul.mubr.f32.gmra.mrb[18].mxu0 %v2508_v11  ;;  %3087 = vmatmul.mubr.f32.gmra.mrb[28].mxu1 %v2508_v11  ;;  %v6359_v1 = vpack.c.bf16 %v5167_v63, %v5163_v56  ;;  %v6297_v11 = vpack.c.bf16 %v5164_v57, %v5160_v52  ;;  %v5199_v32 = vld [vmem:[%s11495_s3 + $0xab8] sm:$0xff]  ;;  %v5198_v56 = vld [vmem:[%s11495_s3 + $0xab0] sm:$0xff]  ;;  %v5201_v63 = vld [vmem:[%s11495_s3 + $0xac8] sm:$0xff] }
 0x4fd   :  { %3304 = vmatprep.mubr.f32.mxu0 %v3235_v2  ;;  %3381 = vmatprep.mubr.f32.mxu1 %v3235_v2  ;;  %v6363_v2 = vpack.c.bf16 %v5175_v41, %v5171_v9  ;;  %v5207_v52 = vld [vmem:[%s11495_s3 + $0xaf8] sm:$0xff]  ;;  %v5206_v9 = vld [vmem:[%s11495_s3 + $0xaf0] sm:$0xff]  ;;  %v5209_v41 = vld [vmem:[%s11495_s3 + $0xb08] sm:$0xff] }
 0x4fe   :  { %6278 = vmatpush1.bf16.msra.mxu0 %v6277_v17  ;;  %6342 = vmatpush1.bf16.msra.mxu1 %v6341_v4  ;;  %v5162_v17 = vld [vmem:[%s11495_s3 + $0x990] sm:$0xff]  ;;  %v5169_v4 = vld [vmem:[%s11495_s3 + $0x9c8] sm:$0xff] }
 0x4ff   :  { %6280 = vmatprep.subr.bf16.mxu0 %v6279_v54  ;;  %6344 = vmatprep.subr.bf16.mxu1 %v6343_v10  ;;  %v6361_v54 = vpack.c.bf16 %v5166_v53, %v5162_v17  ;;  %v5168_v10 = vld [vmem:[%s11495_s3 + $0x9c0] sm:$0xff]  ;;  %v6299_v44 = vpack.c.bf16 %v5173_v5, %v5169_v4  ;;  %v5202_v5 = vld [vmem:[%s11495_s3 + $0xad0] sm:$0xff] }
 0x500   :  { %v6301_v26 = vpack.c.bf16 %v5172_v13, %v5168_v10  ;;  %v5204_v17 = vld [vmem:[%s11495_s3 + $0xae0] sm:$0xff]  ;;  %v5215_v10 = vld [vmem:[%s11495_s3 + $0xb38] sm:$0xff] }
 0x502   :  { %6282 = vmatpush1.bf16.msra.mxu0 %v6281_v28  ;;  %6346 = vmatpush1.bf16.msra.mxu1 %v6345_v45  ;;  %v5181_v28 = vld [vmem:[%s11495_s3 + $0xa28] sm:$0xff]  ;;  %v5179_v45 = vld [vmem:[%s11495_s3 + $0xa18] sm:$0xff] }
 0x503   :  { %6284 = vmatprep.subr.bf16.mxu0 %v6283_v21  ;;  %6348 = vmatprep.subr.bf16.mxu1 %v6347_v22  ;;  %v6365_v21 = vpack.c.bf16 %v5174_v18, %v5170_v15  ;;  %v5176_v22 = vld [vmem:[%s11495_s3 + $0xa00] sm:$0xff]  ;;  %v6303_v14 = vpack.c.bf16 %v5181_v28, %v5177_v0  ;;  %v6367_v16 = vpack.c.bf16 %v5183_v8, %v5179_v45  ;;  %v5210_v28 = vld [vmem:[%s11495_s3 + $0xb10] sm:$0xff]  ;;  %v5217_v8 = vld [vmem:[%s11495_s3 + $0xb48] sm:$0xff] }
 0x504   :  { %v6305_v42 = vpack.c.bf16 %v5180_v7, %v5176_v22  ;;  %v5212_v15 = vld [vmem:[%s11495_s3 + $0xb20] sm:$0xff]  ;;  %v5214_v45 = vld [vmem:[%s11495_s3 + $0xb30] sm:$0xff]  ;;  %v5223_v22 = vld [vmem:[%s11495_s3 + $0xb78] sm:$0xff] }
 0x506   :  { %6286 = vmatpush1.bf16.msra.mxu0 %v6285_v60  ;;  %6350 = vmatpush1.bf16.msra.mxu1 %v6349_v47  ;;  %v5189_v60 = vld [vmem:[%s11495_s3 + $0xa68] sm:$0xff]  ;;  %v5187_v47 = vld [vmem:[%s11495_s3 + $0xa58] sm:$0xff] }
 0x507   :  { %6288 = vmatprep.subr.bf16.mxu0 %v6287_v50  ;;  %6352 = vmatprep.subr.bf16.mxu1 %v6351_v35  ;;  %v6369_v50 = vpack.c.bf16 %v5182_v23, %v5178_v43  ;;  %v5184_v35 = vld [vmem:[%s11495_s3 + $0xa40] sm:$0xff]  ;;  %v6307_v30 = vpack.c.bf16 %v5189_v60, %v5185_v24  ;;  %v6371_v55 = vpack.c.bf16 %v5191_v25, %v5187_v47  ;;  %v5218_v60 = vld [vmem:[%s11495_s3 + $0xb50] sm:$0xff]  ;;  %v5225_v25 = vld [vmem:[%s11495_s3 + $0xb88] sm:$0xff] }
 0x508   :  { %v6309_v34 = vpack.c.bf16 %v5188_v3, %v5184_v35  ;;  %v5220_v43 = vld [vmem:[%s11495_s3 + $0xb60] sm:$0xff]  ;;  %v5222_v47 = vld [vmem:[%s11495_s3 + $0xb70] sm:$0xff]  ;;  %v5231_v35 = vld [vmem:[%s11495_s3 + $0xbb8] sm:$0xff] }
 0x50a   :  { %6290 = vmatpush1.bf16.msra.mxu0 %v6289_v59  ;;  %6354 = vmatpush1.bf16.msra.mxu1 %v6353_v6  ;;  %v5197_v59 = vld [vmem:[%s11495_s3 + $0xaa8] sm:$0xff]  ;;  %v5195_v6 = vld [vmem:[%s11495_s3 + $0xa98] sm:$0xff] }
 0x50b   :  { %6292 = vmatprep.subr.bf16.mxu0 %v6291_v36  ;;  %6356 = vmatprep.subr.bf16.mxu1 %v6355_v37  ;;  %v6373_v36 = vpack.c.bf16 %v5190_v29, %v5186_v27  ;;  %v5192_v37 = vld [vmem:[%s11495_s3 + $0xa80] sm:$0xff]  ;;  %v6311_v20 = vpack.c.bf16 %v5197_v59, %v5193_v31  ;;  %v6375_v33 = vpack.c.bf16 %v5199_v32, %v5195_v6  ;;  %v5226_v59 = vld [vmem:[%s11495_s3 + $0xb90] sm:$0xff]  ;;  %v5233_v32 = vld [vmem:[%s11495_s3 + $0xbc8] sm:$0xff] }
 0x50c   :  { %v6313_v57 = vpack.c.bf16 %v5196_v38, %v5192_v37  ;;  %v5228_v27 = vld [vmem:[%s11495_s3 + $0xba0] sm:$0xff]  ;;  %v5230_v6 = vld [vmem:[%s11495_s3 + $0xbb0] sm:$0xff]  ;;  %v5239_v37 = vld [vmem:[%s11495_s3 + $0xbf8] sm:$0xff] }
 0x50e   :  { %6294 = vmatpush1.bf16.msra.mxu0 %v6293_v58  ;;  %6358 = vmatpush1.bf16.msra.mxu1 %v6357_v48  ;;  %v5205_v58 = vld [vmem:[%s11495_s3 + $0xae8] sm:$0xff]  ;;  %v5203_v48 = vld [vmem:[%s11495_s3 + $0xad8] sm:$0xff] }
 0x50f   :  { %6296 = vmatprep.subr.bf16.mxu0 %v6295_v12  ;;  %6360 = vmatprep.subr.bf16.mxu1 %v6359_v1  ;;  %v6377_v12 = vpack.c.bf16 %v5198_v56, %v5194_v40  ;;  %v5200_v1 = vld [vmem:[%s11495_s3 + $0xac0] sm:$0xff]  ;;  %v6315_v53 = vpack.c.bf16 %v5205_v58, %v5201_v63  ;;  %v6379_v4 = vpack.c.bf16 %v5207_v52, %v5203_v48  ;;  %v5234_v58 = vld [vmem:[%s11495_s3 + $0xbd0] sm:$0xff]  ;;  %v5241_v52 = vld [vmem:[%s11496_s4 + $0x408] sm:$0xff] }
 0x510   :  { %v6317_v13 = vpack.c.bf16 %v5204_v17, %v5200_v1  ;;  %v5236_v40 = vld [vmem:[%s11495_s3 + $0xbe0] sm:$0xff]  ;;  %v5238_v48 = vld [vmem:[%s11495_s3 + $0xbf0] sm:$0xff]  ;;  %v5247_v1 = vld [vmem:[%s11496_s4 + $0x438] sm:$0xff] }
 0x511   :  { %v3095_v17 = vld [vmem:[#allocation4 + $0x10] sm:$0x3f] }
 0x512   :  { %6298 = vmatpush1.bf16.msra.mxu0 %v6297_v11  ;;  %6362 = vmatpush1.bf16.msra.mxu1 %v6361_v54  ;;  %v5213_v11 = vld [vmem:[%s11495_s3 + $0xb28] sm:$0xff]  ;;  %v5211_v54 = vld [vmem:[%s11495_s3 + $0xb18] sm:$0xff] }
 0x513   :  { %6300 = vmatprep.subr.bf16.mxu0 %v6299_v44  ;;  %6364 = vmatprep.subr.bf16.mxu1 %v6363_v2  ;;  %v6381_v44 = vpack.c.bf16 %v5206_v9, %v5202_v5  ;;  %v5208_v2 = vld [vmem:[%s11495_s3 + $0xb00] sm:$0xff]  ;;  %v6319_v18 = vpack.c.bf16 %v5213_v11, %v5209_v41  ;;  %v6383_v0 = vpack.c.bf16 %v5215_v10, %v5211_v54  ;;  %v3093_v5 = vld [vmem:[#allocation4] sm:$0xfc]  ;;  %v3231_v10 = vrot.slane %v3095_v17, 2 }
 0x514   :  { %v6321_v7 = vpack.c.bf16 %v5212_v15, %v5208_v2  ;;  %v5240_v11 = vld [vmem:[%s11496_s4 + $0x400] sm:$0xff]  ;;  %v5249_v2 = vld [vmem:[%s11496_s4 + $0x448] sm:$0xff] }
 0x515   :  { %v5244_v54 = vld [vmem:[%s11496_s4 + $0x420] sm:$0xff]  ;;  %v5253_v15 = vld [vmem:[%s11496_s4 + $0x468] sm:$0xff] }
 0x516   :  { %6302 = vmatpush1.bf16.msra.mxu0 %v6301_v26  ;;  %6366 = vmatpush1.bf16.msra.mxu1 %v6365_v21  ;;  %v5221_v26 = vld [vmem:[%s11495_s3 + $0xb68] sm:$0xff]  ;;  %v5219_v21 = vld [vmem:[%s11495_s3 + $0xb58] sm:$0xff] }
 0x517   :  { %6304 = vmatprep.subr.bf16.mxu0 %v6303_v14  ;;  %6368 = vmatprep.subr.bf16.mxu1 %v6367_v16  ;;  %v6385_v14 = vpack.c.bf16 %v5214_v45, %v5210_v28  ;;  %v5216_v16 = vld [vmem:[%s11495_s3 + $0xb40] sm:$0xff]  ;;  %v6323_v23 = vpack.c.bf16 %v5221_v26, %v5217_v8  ;;  %v6387_v24 = vpack.c.bf16 %v5223_v22, %v5219_v21  ;;  %v3230_v28 = vrot.slane %v3093_v5, 2  ;;  %v5281_v5 = vld [vmem:[%s11496_s4 + $0x548] sm:$0xff] }
 0x518   :  { %v6325_v3 = vpack.c.bf16 %v5220_v43, %v5216_v16  ;;  %v6401_v45 = vpack.c.bf16 %v5244_v54, %v5240_v11  ;;  %v5248_v26 = vld [vmem:[%s11496_s4 + $0x440] sm:$0xff]  ;;  %v5250_v16 = vld [vmem:[%s11496_s4 + $0x450] sm:$0xff]  ;;  %v5287_v11 = vld [vmem:[%s11496_s4 + $0x578] sm:$0xff] }
 0x519   :  { %v5252_v21 = vld [vmem:[%s11496_s4 + $0x460] sm:$0xff]  ;;  %v3232_v22 = vsel %vm2073_vm12, %v3230_v28, %v3231_v10  ;;  %v5254_v43 = vld [vmem:[%s11496_s4 + $0x470] sm:$0xff]  ;;  %v5289_v28 = vld [vmem:[%s11496_s4 + $0x588] sm:$0xff] }
 0x51a   :  { %6306 = vmatpush1.bf16.msra.mxu0 %v6305_v42  ;;  %6370 = vmatpush1.bf16.msra.mxu1 %v6369_v50  ;;  %v5229_v42 = vld [vmem:[%s11495_s3 + $0xba8] sm:$0xff]  ;;  %v5227_v50 = vld [vmem:[%s11495_s3 + $0xb98] sm:$0xff] }
 0x51b   :  { %6308 = vmatprep.subr.bf16.mxu0 %v6307_v30  ;;  %6372 = vmatprep.subr.bf16.mxu1 %v6371_v55  ;;  %v6389_v30 = vpack.c.bf16 %v5222_v47, %v5218_v60  ;;  %v5224_v55 = vld [vmem:[%s11495_s3 + $0xb80] sm:$0xff]  ;;  %v6327_v29 = vpack.c.bf16 %v5229_v42, %v5225_v25  ;;  %v6391_v31 = vpack.c.bf16 %v5231_v35, %v5227_v50  ;;  %v5259_v60 = vld [vmem:[%s11496_s4 + $0x498] sm:$0xff] }
 0x51c   :  { %v6329_v38 = vpack.c.bf16 %v5228_v27, %v5224_v55  ;;  %v5263_v47 = vld [vmem:[%s11496_s4 + $0x4b8] sm:$0xff]  ;;  %v6405_v25 = vpack.c.bf16 %v5252_v21, %v5248_v26  ;;  %v6469_v42 = vpack.c.bf16 %v5254_v43, %v5250_v16  ;;  %v5256_v50 = vld [vmem:[%s11496_s4 + $0x480] sm:$0xff]  ;;  %v5262_v55 = vld [vmem:[%s11496_s4 + $0x4b0] sm:$0xff] }
 0x51d   :  { %v5260_v35 = vld [vmem:[%s11496_s4 + $0x4a0] sm:$0xff]  ;;  %v5265_v27 = vld [vmem:[%s11496_s4 + $0x4c8] sm:$0xff]  ;;  %v5295_v26 = vld [vmem:[%s11496_s4 + $0x5b8] sm:$0xff] }
 0x51e   :  { %6310 = vmatpush1.bf16.msra.mxu0 %v6309_v34  ;;  %6374 = vmatpush1.bf16.msra.mxu1 %v6373_v36  ;;  %v5237_v34 = vld [vmem:[%s11495_s3 + $0xbe8] sm:$0xff]  ;;  %v5235_v36 = vld [vmem:[%s11495_s3 + $0xbd8] sm:$0xff]  ;;  %v5292_v43 = vld [vmem:[%s11496_s4 + $0x5a0] sm:$0xff] }
 0x51f   :  { %6312 = vmatprep.subr.bf16.mxu0 %v6311_v20  ;;  %6376 = vmatprep.subr.bf16.mxu1 %v6375_v33  ;;  %v6393_v20 = vpack.c.bf16 %v5230_v6, %v5226_v59  ;;  %v5232_v33 = vld [vmem:[%s11495_s3 + $0xbc0] sm:$0xff]  ;;  %v6331_v56 = vpack.c.bf16 %v5237_v34, %v5233_v32  ;;  %v6395_v63 = vpack.c.bf16 %v5239_v37, %v5235_v36  ;;  %v5271_v59 = vld [vmem:[%s11496_s4 + $0x4f8] sm:$0xff]  ;;  %s4626_s3 = sshll.u32 %s6941_s27, 4  ;;  %s4627_s3 = int_to_ptr.vmem [resolvable:$true] %s4626_s3 }
 0x520   :  { %v6409_v6 = vpack.c.bf16 %v5260_v35, %v5256_v50  ;;  %v5264_v34 = vld [vmem:[%s11496_s4 + $0x4c0] sm:$0xff]  ;;  %v5299_v50 = vld [vmem:[%s11496_s4 + $0x5d8] sm:$0xff]  ;;  %s6912_s28 = scalar_lea.vmem %s4627_s3, 32  ;;  %p6917_p1 = scmp.lt.s32.totalorder %s4627_s3, %s4627_s3 }
 0x521   :  { %v5268_v36 = vld [vmem:[%s11496_s4 + $0x4e0] sm:$0xff]  ;;  %p6913_p0 = scmp.ne.s32.totalorder %s4627_s3, %s6912_s28  ;;  %p6918_p2 = scmp.lt.s32.totalorder %s6912_s28, %s6912_s28 }
 0x522   :  { %6314 = vmatpush1.bf16.msra.mxu0 %v6313_v57  ;;  %6378 = vmatpush1.bf16.msra.mxu1 %v6377_v12  ;;  %v5245_v57 = vld [vmem:[%s11496_s4 + $0x428] sm:$0xff]  ;;  %v5243_v12 = vld [vmem:[%s11496_s4 + $0x418] sm:$0xff] }
 0x523   :  { %6316 = vmatprep.subr.bf16.mxu0 %v6315_v53  ;;  %6380 = vmatprep.subr.bf16.mxu1 %v6379_v4  ;;  %v6333_v53 = vpack.c.bf16 %v5236_v40, %v5232_v33  ;;  %v6397_v4 = vpack.c.bf16 %v5238_v48, %v5234_v58  ;;  %v6399_v9 = vpack.c.bf16 %v5245_v57, %v5241_v52  ;;  %v5270_v33 = vld [vmem:[%s11496_s4 + $0x4f0] sm:$0xff]  ;;  %v5273_v40 = vld [vmem:[%s11496_s4 + $0x508] sm:$0xff]  ;;  %v5279_v58 = vld [vmem:[%s11496_s4 + $0x538] sm:$0xff]  ;;  %p6919_p3 = por %p6918_p2, %p6917_p1 }
 0x524   :  { %v6463_v41 = vpack.c.bf16 %v5247_v1, %v5243_v12  ;;  %v6413_v48 = vpack.c.bf16 %v5268_v36, %v5264_v34  ;;  %v5272_v57 = vld [vmem:[%s11496_s4 + $0x500] sm:$0xff]  ;;  %v5307_v34 = vld [vmem:[%s11496_s4 + $0x618] sm:$0xff] }
 0x525   :  { %v5276_v12 = vld [vmem:[%s11496_s4 + $0x520] sm:$0xff]  ;;  %p6920_p4 = pnand %p6919_p3, %p6913_p0 }
 0x526   :  { %6318 = vmatpush1.bf16.msra.mxu0 %v6317_v13  ;;  %6382 = vmatpush1.bf16.msra.mxu1 %v6381_v44  ;;  %v5242_v13 = vld [vmem:[%s11496_s4 + $0x410] sm:$0xff]  ;;  %v6417_v54 = vpack.c.bf16 %v5276_v12, %v5272_v57  ;;  %v5315_v57 = vld [vmem:[%s11496_s4 + $0x658] sm:$0xff] }
 0x527   :  { %6320 = vmatprep.subr.bf16.mxu0 %v6319_v18  ;;  %6384 = vmatprep.subr.bf16.mxu1 %v6383_v0  ;;  %v5246_v44 = vld [vmem:[%s11496_s4 + $0x430] sm:$0xff]  ;;  %v5251_v18 = vld [vmem:[%s11496_s4 + $0x458] sm:$0xff] }
 0x528   :  { %v5255_v0 = vld [vmem:[%s11496_s4 + $0x478] sm:$0xff]  ;;  %v6465_v8 = vpack.c.bf16 %v5246_v44, %v5242_v13  ;;  %v5280_v13 = vld [vmem:[%s11496_s4 + $0x540] sm:$0xff] }
 0x529   :  { %v5284_v44 = vld [vmem:[%s11496_s4 + $0x560] sm:$0xff] }
 0x52a   :  { %6322 = vmatpush1.bf16.msra.mxu0 %v6321_v7  ;;  %6386 = vmatpush1.bf16.msra.mxu1 %v6385_v14  ;;  %v6403_v7 = vpack.c.bf16 %v5253_v15, %v5249_v2  ;;  %v6467_v14 = vpack.c.bf16 %v5255_v0, %v5251_v18  ;;  %v5282_v18 = vld [vmem:[%s11496_s4 + $0x550] sm:$0xff]  ;;  %v6421_v21 = vpack.c.bf16 %v5284_v44, %v5280_v13  ;;  %v5323_v13 = vld [vmem:[%s11496_s4 + $0x698] sm:$0xff] }
 0x52b   :  { %6324 = vmatprep.subr.bf16.mxu0 %v6323_v23  ;;  %6388 = vmatprep.subr.bf16.mxu1 %v6387_v24  ;;  %v5257_v23 = vld [vmem:[%s11496_s4 + $0x488] sm:$0xff]  ;;  %v5286_v0 = vld [vmem:[%s11496_s4 + $0x570] sm:$0xff] }
 0x52c   :  { %v5261_v24 = vld [vmem:[%s11496_s4 + $0x4a8] sm:$0xff] }
 0x52e   :  { %6326 = vmatpush1.bf16.msra.mxu0 %v6325_v3  ;;  %6390 = vmatpush1.bf16.msra.mxu1 %v6389_v30  ;;  %v6407_v3 = vpack.c.bf16 %v5261_v24, %v5257_v23  ;;  %v6471_v30 = vpack.c.bf16 %v5263_v47, %v5259_v60  ;;  %v5290_v23 = vld [vmem:[%s11496_s4 + $0x590] sm:$0xff] }
 0x52f   :  { %6328 = vmatprep.subr.bf16.mxu0 %v6327_v29  ;;  %6392 = vmatprep.subr.bf16.mxu1 %v6391_v31  ;;  %v5269_v29 = vld [vmem:[%s11496_s4 + $0x4e8] sm:$0xff]  ;;  %v5267_v31 = vld [vmem:[%s11496_s4 + $0x4d8] sm:$0xff]  ;;  %v5294_v24 = vld [vmem:[%s11496_s4 + $0x5b0] sm:$0xff] }
 0x530   :  { %v6411_v37 = vpack.c.bf16 %v5269_v29, %v5265_v27  ;;  %v6489_v47 = vpack.c.bf16 %v5294_v24, %v5290_v23  ;;  %v5298_v29 = vld [vmem:[%s11496_s4 + $0x5d0] sm:$0xff]  ;;  %v5332_v23 = vld [vmem:[%s11496_s4 + $0x6e0] sm:$0xff] }
 0x532   :  { %6330 = vmatpush1.bf16.msra.mxu0 %v6329_v38  ;;  %6394 = vmatpush1.bf16.msra.mxu1 %v6393_v20  ;;  %v6475_v38 = vpack.c.bf16 %v5271_v59, %v5267_v31  ;;  %v5266_v20 = vld [vmem:[%s11496_s4 + $0x4d0] sm:$0xff] }
 0x533   :  { %6332 = vmatprep.subr.bf16.mxu0 %v6331_v56  ;;  %6396 = vmatprep.subr.bf16.mxu1 %v6395_v63  ;;  %v5277_v56 = vld [vmem:[%s11496_s4 + $0x528] sm:$0xff]  ;;  %v5275_v63 = vld [vmem:[%s11496_s4 + $0x518] sm:$0xff]  ;;  %v6477_v52 = vpack.c.bf16 %v5270_v33, %v5266_v20  ;;  %v5302_v31 = vld [vmem:[%s11496_s4 + $0x5f0] sm:$0xff] }
 0x534   :  { %v6415_v1 = vpack.c.bf16 %v5277_v56, %v5273_v40  ;;  %v6479_v17 = vpack.c.bf16 %v5279_v58, %v5275_v63  ;;  %v6493_v59 = vpack.c.bf16 %v5302_v31, %v5298_v29  ;;  %v5308_v20 = vld [vmem:[%s11496_s4 + $0x620] sm:$0xff]  ;;  %v5306_v56 = vld [vmem:[%s11496_s4 + $0x610] sm:$0xff] }
 0x535   :  { %v5310_v63 = vld [vmem:[%s11496_s4 + $0x630] sm:$0xff]  ;;  %v5340_v29 = vld [vmem:[%s11496_s4 + $0x720] sm:$0xff] }
 0x536   :  { %6334 = vmatpush1.bf16.msra.mxu0 %v6333_v53  ;;  %6398 = vmatpush1.bf16.msra.mxu1 %v6397_v4  ;;  %v5274_v53 = vld [vmem:[%s11496_s4 + $0x510] sm:$0xff]  ;;  %v6497_v58 = vpack.c.bf16 %v5310_v63, %v5306_v56  ;;  %v5348_v56 = vld [vmem:[%s11496_s4 + $0x760] sm:$0xff] }
 0x537   :  { %6400 = vmatprep.subr.bf16.mxu0 %v6399_v9  ;;  %6464 = vmatprep.subr.bf16.mxu1 %v6463_v41  ;;  %v5278_v4 = vld [vmem:[%s11496_s4 + $0x530] sm:$0xff]  ;;  %v5285_v9 = vld [vmem:[%s11496_s4 + $0x568] sm:$0xff]  ;;  %v5283_v41 = vld [vmem:[%s11496_s4 + $0x558] sm:$0xff] }
 0x538   :  { %v6419_v2 = vpack.c.bf16 %v5285_v9, %v5281_v5  ;;  %v6483_v15 = vpack.c.bf16 %v5287_v11, %v5283_v41  ;;  %v5314_v9 = vld [vmem:[%s11496_s4 + $0x650] sm:$0xff] }
 0x539   :  { %3305 = vmatmul.mubr.f32.vlgmr.msra.gmra.mrb[16].mxu0 %v3232_v22  ;;  %3382 = vmatmul.mubr.f32.vlgmr.msra.gmra.mrb[26].mxu1 %v3232_v22  ;;  %v6485_v22 = vpack.c.bf16 %v5286_v0, %v5282_v18  ;;  %v5318_v41 = vld [vmem:[%s11496_s4 + $0x670] sm:$0xff]  ;;  %v5324_v18 = vld [vmem:[%s11496_s4 + $0x6a0] sm:$0xff] }
 0x53a   :  { %3310 = vmatprep.mubr.f32.mxu0 %v9845_v39  ;;  %3387 = vmatprep.mubr.f32.mxu1 %v9845_v39  ;;  %v5258_v39 = vld [vmem:[%s11496_s4 + $0x490] sm:$0xff]  ;;  %v6501_v11 = vpack.c.bf16 %v5318_v41, %v5314_v9 }
 0x53b   :  { %6402 = vmatpush1.bf16.msra.mxu0 %v6401_v45  ;;  %6466 = vmatpush1.bf16.msra.mxu1 %v6465_v8  ;;  %v6473_v32 = vpack.c.bf16 %v5262_v55, %v5258_v39  ;;  %v5293_v45 = vld [vmem:[%s11496_s4 + $0x5a8] sm:$0xff]  ;;  %v5291_v8 = vld [vmem:[%s11496_s4 + $0x598] sm:$0xff]  ;;  %v5300_v39 = vld [vmem:[%s11496_s4 + $0x5e0] sm:$0xff] }
 0x53c   :  { %6404 = vmatprep.subr.bf16.mxu0 %v6403_v7  ;;  %6468 = vmatprep.subr.bf16.mxu1 %v6467_v14  ;;  %v5288_v7 = vld [vmem:[%s11496_s4 + $0x580] sm:$0xff]  ;;  %v6423_v14 = vpack.c.bf16 %v5293_v45, %v5289_v28  ;;  %v6487_v16 = vpack.c.bf16 %v5295_v26, %v5291_v8  ;;  %v5322_v45 = vld [vmem:[%s11496_s4 + $0x690] sm:$0xff] }
 0x53d   :  { %3311 = vmatmul.mubr.f32.gmra.mrb[18].mxu0 %v3231_v10  ;;  %3388 = vmatmul.mubr.f32.gmra.mrb[28].mxu1 %v3231_v10  ;;  %v6481_v10 = vpack.c.bf16 %v5278_v4, %v5274_v53  ;;  %v6425_v60 = vpack.c.bf16 %v5292_v43, %v5288_v7  ;;  %v5316_v53 = vld [vmem:[%s11496_s4 + $0x660] sm:$0xff]  ;;  %v5326_v8 = vld [vmem:[%s11496_s4 + $0x6b0] sm:$0xff]  ;;  %v5331_v7 = vld [vmem:[%s11496_s4 + $0x6d8] sm:$0xff] }
 0x53e   :  { %v6505_v26 = vpack.c.bf16 %v5326_v8, %v5322_v45  ;;  %v5328_v43 = vld [vmem:[%s11496_s4 + $0x6c0] sm:$0xff]  ;;  %v5338_v31 = vld [vmem:[%s11496_s4 + $0x710] sm:$0xff] }
 0x53f   :  { %6406 = vmatpush1.bf16.msra.mxu0 %v6405_v25  ;;  %6470 = vmatpush1.bf16.msra.mxu1 %v6469_v42  ;;  %v5297_v25 = vld [vmem:[%s11496_s4 + $0x5c8] sm:$0xff]  ;;  %v5346_v63 = vld [vmem:[%s11496_s4 + $0x750] sm:$0xff] }
 0x540   :  { %6408 = vmatprep.subr.bf16.mxu0 %v6407_v3  ;;  %6472 = vmatprep.subr.bf16.mxu1 %v6471_v30  ;;  %v5301_v42 = vld [vmem:[%s11496_s4 + $0x5e8] sm:$0xff]  ;;  %v5303_v3 = vld [vmem:[%s11496_s4 + $0x5f8] sm:$0xff]  ;;  %v5296_v30 = vld [vmem:[%s11496_s4 + $0x5c0] sm:$0xff] }
 0x541   :  { %v6427_v35 = vpack.c.bf16 %v5301_v42, %v5297_v25  ;;  %v6491_v55 = vpack.c.bf16 %v5303_v3, %v5299_v50  ;;  %v6429_v27 = vpack.c.bf16 %v5300_v39, %v5296_v30  ;;  %v5334_v25 = vld [vmem:[%s11496_s4 + $0x6f0] sm:$0xff]  ;;  %v5337_v42 = vld [vmem:[%s11496_s4 + $0x708] sm:$0xff]  ;;  %v5339_v3 = vld [vmem:[%s11496_s4 + $0x718] sm:$0xff] }
 0x542   :  { %v5343_v30 = vld [vmem:[%s11496_s4 + $0x738] sm:$0xff]  ;;  %v5354_v41 = vld [vmem:[%s11496_s4 + $0x790] sm:$0xff] }
 0x543   :  { %6410 = vmatpush1.bf16.msra.mxu0 %v6409_v6  ;;  %6474 = vmatpush1.bf16.msra.mxu1 %v6473_v32  ;;  %v5305_v6 = vld [vmem:[%s11496_s4 + $0x608] sm:$0xff]  ;;  %v5362_v45 = vld [vmem:[%s11496_s4 + $0x7d0] sm:$0xff] }
 0x544   :  { %6412 = vmatprep.subr.bf16.mxu0 %v6411_v37  ;;  %6476 = vmatprep.subr.bf16.mxu1 %v6475_v38  ;;  %v5309_v32 = vld [vmem:[%s11496_s4 + $0x628] sm:$0xff]  ;;  %v5311_v37 = vld [vmem:[%s11496_s4 + $0x638] sm:$0xff]  ;;  %v5304_v38 = vld [vmem:[%s11496_s4 + $0x600] sm:$0xff] }
 0x545   :  { %v6431_v36 = vpack.c.bf16 %v5309_v32, %v5305_v6  ;;  %v6495_v33 = vpack.c.bf16 %v5311_v37, %v5307_v34  ;;  %v6433_v40 = vpack.c.bf16 %v5308_v20, %v5304_v38  ;;  %v5342_v6 = vld [vmem:[%s11496_s4 + $0x730] sm:$0xff]  ;;  %v5345_v32 = vld [vmem:[%s11496_s4 + $0x748] sm:$0xff]  ;;  %v5347_v38 = vld [vmem:[%s11496_s4 + $0x758] sm:$0xff] }
 0x546   :  { %v5349_v34 = vld [vmem:[%s11496_s4 + $0x768] sm:$0xff]  ;;  %v5351_v20 = vld [vmem:[%s11496_s4 + $0x778] sm:$0xff] }
 0x547   :  { %6414 = vmatpush1.bf16.msra.mxu0 %v6413_v48  ;;  %6478 = vmatpush1.bf16.msra.mxu1 %v6477_v52  ;;  %v5313_v48 = vld [vmem:[%s11496_s4 + $0x648] sm:$0xff]  ;;  %v6451_v37 = vpack.c.bf16 %v5349_v34, %v5345_v32 }
 0x548   :  { %6416 = vmatprep.subr.bf16.mxu0 %v6415_v1  ;;  %6480 = vmatprep.subr.bf16.mxu1 %v6479_v17  ;;  %v5317_v52 = vld [vmem:[%s11496_s4 + $0x668] sm:$0xff]  ;;  %v5319_v1 = vld [vmem:[%s11496_s4 + $0x678] sm:$0xff]  ;;  %v5312_v17 = vld [vmem:[%s11496_s4 + $0x640] sm:$0xff] }
 0x549   :  { %v6435_v12 = vpack.c.bf16 %v5317_v52, %v5313_v48  ;;  %v6499_v4 = vpack.c.bf16 %v5319_v1, %v5315_v57  ;;  %v6437_v5 = vpack.c.bf16 %v5316_v53, %v5312_v17  ;;  %v5353_v52 = vld [vmem:[%s11496_s4 + $0x788] sm:$0xff]  ;;  %v5359_v53 = vld [vmem:[%s11496_s4 + $0x7b8] sm:$0xff] }
 0x54a   :  { %v5357_v57 = vld [vmem:[%s11496_s4 + $0x7a8] sm:$0xff] }
 0x54b   :  { %6418 = vmatpush1.bf16.msra.mxu0 %v6417_v54  ;;  %6482 = vmatpush1.bf16.msra.mxu1 %v6481_v10  ;;  %v5321_v54 = vld [vmem:[%s11496_s4 + $0x688] sm:$0xff]  ;;  %v6455_v17 = vpack.c.bf16 %v5357_v57, %v5353_v52 }
 0x54c   :  { %6420 = vmatprep.subr.bf16.mxu0 %v6419_v2  ;;  %6484 = vmatprep.subr.bf16.mxu1 %v6483_v15  ;;  %v5325_v10 = vld [vmem:[%s11496_s4 + $0x6a8] sm:$0xff]  ;;  %v5327_v2 = vld [vmem:[%s11496_s4 + $0x6b8] sm:$0xff]  ;;  %v5320_v15 = vld [vmem:[%s11496_s4 + $0x680] sm:$0xff] }
 0x54d   :  { %v6439_v44 = vpack.c.bf16 %v5325_v10, %v5321_v54  ;;  %v6503_v0 = vpack.c.bf16 %v5327_v2, %v5323_v13  ;;  %v6441_v28 = vpack.c.bf16 %v5324_v18, %v5320_v15  ;;  %v5361_v54 = vld [vmem:[%s11496_s4 + $0x7c8] sm:$0xff]  ;;  %v5363_v13 = vld [vmem:[%s11496_s4 + $0x7d8] sm:$0xff] }
 0x54e   :  { %v5365_v10 = vld [vmem:[%s11496_s4 + $0x7e8] sm:$0xff] }
 0x54f   :  { %6422 = vmatpush1.bf16.msra.mxu0 %v6421_v21  ;;  %6486 = vmatpush1.bf16.msra.mxu1 %v6485_v22  ;;  %v5329_v21 = vld [vmem:[%s11496_s4 + $0x6c8] sm:$0xff]  ;;  %v6459_v18 = vpack.c.bf16 %v5365_v10, %v5361_v54 }
 0x550   :  { %6424 = vmatprep.subr.bf16.mxu0 %v6423_v14  ;;  %6488 = vmatprep.subr.bf16.mxu1 %v6487_v16  ;;  %v5333_v22 = vld [vmem:[%s11496_s4 + $0x6e8] sm:$0xff]  ;;  %v5335_v16 = vld [vmem:[%s11496_s4 + $0x6f8] sm:$0xff] }
 0x551   :  { %v6443_v14 = vpack.c.bf16 %v5333_v22, %v5329_v21  ;;  %v6507_v24 = vpack.c.bf16 %v5335_v16, %v5331_v7  ;;  %v3507_v21 = vld [vmem:[%s11496_s4 + $0x8] sm:$0xff]  ;;  %v3509_v7 = vld [vmem:[%s11496_s4 + $0x18] sm:$0xff] }
 0x552   :  { %v3511_v22 = vld [vmem:[%s11496_s4 + $0x28] sm:$0xff] }
 0x553   :  { %6426 = vmatpush1.bf16.msra.mxu0 %v6425_v60  ;;  %6490 = vmatpush1.bf16.msra.mxu1 %v6489_v47  ;;  %v6445_v60 = vpack.c.bf16 %v5332_v23, %v5328_v43  ;;  %v5330_v47 = vld [vmem:[%s11496_s4 + $0x6d0] sm:$0xff]  ;;  %v6527_v23 = vpack.c.bf16 %v3511_v22, %v3507_v21 }
 0x554   :  { %6428 = vmatprep.subr.bf16.mxu0 %v6427_v35  ;;  %6492 = vmatprep.subr.bf16.mxu1 %v6491_v55  ;;  %v6509_v50 = vpack.c.bf16 %v5334_v25, %v5330_v47  ;;  %v5341_v35 = vld [vmem:[%s11496_s4 + $0x728] sm:$0xff]  ;;  %v6511_v55 = vpack.c.bf16 %v5343_v30, %v5339_v3 }
 0x555   :  { %v6447_v39 = vpack.c.bf16 %v5341_v35, %v5337_v42 }
 0x557   :  { %6430 = vmatpush1.bf16.msra.mxu0 %v6429_v27  ;;  %6494 = vmatpush1.bf16.msra.mxu1 %v6493_v59  ;;  %v5336_v27 = vld [vmem:[%s11496_s4 + $0x700] sm:$0xff] }
 0x558   :  { %6432 = vmatprep.subr.bf16.mxu0 %v6431_v36  ;;  %6496 = vmatprep.subr.bf16.mxu1 %v6495_v33  ;;  %v6449_v59 = vpack.c.bf16 %v5340_v29, %v5336_v27  ;;  %v6513_v36 = vpack.c.bf16 %v5342_v6, %v5338_v31  ;;  %v5344_v33 = vld [vmem:[%s11496_s4 + $0x740] sm:$0xff] }
 0x559   :  { %v6453_v48 = vpack.c.bf16 %v5348_v56, %v5344_v33 }
 0x55b   :  { %6434 = vmatpush1.bf16.msra.mxu0 %v6433_v40  ;;  %6498 = vmatpush1.bf16.msra.mxu1 %v6497_v58  ;;  %v6515_v40 = vpack.c.bf16 %v5351_v20, %v5347_v38  ;;  %v5350_v58 = vld [vmem:[%s11496_s4 + $0x770] sm:$0xff] }
 0x55c   :  { %6436 = vmatprep.subr.bf16.mxu0 %v6435_v12  ;;  %6500 = vmatprep.subr.bf16.mxu1 %v6499_v4  ;;  %v5355_v12 = vld [vmem:[%s11496_s4 + $0x798] sm:$0xff]  ;;  %v6517_v1 = vpack.c.bf16 %v5350_v58, %v5346_v63  ;;  %v5352_v4 = vld [vmem:[%s11496_s4 + $0x780] sm:$0xff] }
 0x55d   :  { %v6519_v9 = vpack.c.bf16 %v5359_v53, %v5355_v12 }
 0x55f   :  { %6438 = vmatpush1.bf16.msra.mxu0 %v6437_v5  ;;  %6502 = vmatpush1.bf16.msra.mxu1 %v6501_v11  ;;  %v5356_v5 = vld [vmem:[%s11496_s4 + $0x7a0] sm:$0xff]  ;;  %v5358_v11 = vld [vmem:[%s11496_s4 + $0x7b0] sm:$0xff] }
 0x560   :  { %6440 = vmatprep.subr.bf16.mxu0 %v6439_v44  ;;  %6504 = vmatprep.subr.bf16.mxu1 %v6503_v0  ;;  %v5367_v44 = vld [vmem:[%s11496_s4 + $0x7f8] sm:$0xff]  ;;  %v6457_v2 = vpack.c.bf16 %v5356_v5, %v5352_v4  ;;  %v6521_v15 = vpack.c.bf16 %v5358_v11, %v5354_v41  ;;  %v5360_v0 = vld [vmem:[%s11496_s4 + $0x7c0] sm:$0xff] }
 0x561   :  { %v6523_v8 = vpack.c.bf16 %v5367_v44, %v5363_v13 }
 0x563   :  { %6442 = vmatpush1.bf16.msra.mxu0 %v6441_v28  ;;  %6506 = vmatpush1.bf16.msra.mxu1 %v6505_v26  ;;  %v5364_v28 = vld [vmem:[%s11496_s4 + $0x7e0] sm:$0xff]  ;;  %v5366_v26 = vld [vmem:[%s11496_s4 + $0x7f0] sm:$0xff] }
 0x564   :  { %6444 = vmatprep.subr.bf16.mxu0 %v6443_v14  ;;  %6508 = vmatprep.subr.bf16.mxu1 %v6507_v24  ;;  %v3513_v14 = vld [vmem:[%s11496_s4 + $0x38] sm:$0xff]  ;;  %v6461_v16 = vpack.c.bf16 %v5364_v28, %v5360_v0  ;;  %v6525_v43 = vpack.c.bf16 %v5366_v26, %v5362_v45 }
 0x565   :  { %v6591_v24 = vpack.c.bf16 %v3513_v14, %v3509_v7 }
 0x567   :  { %6446 = vmatpush1.bf16.msra.mxu0 %v6445_v60  ;;  %6510 = vmatpush1.bf16.msra.mxu1 %v6509_v50  ;;  %v3402_v60 = vld [vmem:[%s11499_s7] sm:$0xf] }
 0x568   :  { %6448 = vmatprep.subr.bf16.mxu0 %v6447_v39  ;;  %6512 = vmatprep.subr.bf16.mxu1 %v6511_v55  ;;  %v3407_v47 = vrot.slane %v3402_v60, %v7456_v49  ;;  %v3415_v25 = vrot.slane %v3402_v60, %v7525_v61  ;;  %v3411_v42 = vrot.slane %v3402_v60, %v7464_v51 }
 0x569   :  { %v3419_v50 = vrot.slane %v3402_v60, %v7530_v62  ;;  %v3636_v60 = vld [vmem:[#allocation5 + $0x10] sm:$0x1] }
 0x56b   :  { %6450 = vmatpush1.bf16.msra.mxu0 %v6449_v59  ;;  %6514 = vmatpush1.bf16.msra.mxu1 %v6513_v36 }
 0x56c   :  { %6452 = vmatprep.subr.bf16.mxu0 %v6451_v37  ;;  %6516 = vmatprep.subr.bf16.mxu1 %v6515_v40 }
 0x56f   :  { %6454 = vmatpush1.bf16.msra.mxu0 %v6453_v48  ;;  %6518 = vmatpush1.bf16.msra.mxu1 %v6517_v1 }
 0x570   :  { %6456 = vmatprep.subr.bf16.mxu0 %v6455_v17  ;;  %6520 = vmatprep.subr.bf16.mxu1 %v6519_v9 }
 0x573   :  { %6458 = vmatpush1.bf16.msra.mxu0 %v6457_v2  ;;  %6522 = vmatpush1.bf16.msra.mxu1 %v6521_v15 }
 0x574   :  { %6460 = vmatprep.subr.bf16.mxu0 %v6459_v18  ;;  %6524 = vmatprep.subr.bf16.mxu1 %v6523_v8 }
 0x577   :  { %6462 = vmatpush1.bf16.msra.mxu0 %v6461_v16  ;;  %6526 = vmatpush1.bf16.msra.mxu1 %v6525_v43 }
 0x578   :  { %6528 = vmatprep.subr.bf16.mxu0 %v6527_v23  ;;  %6592 = vmatprep.subr.bf16.mxu1 %v6591_v24  ;;  %v3637_v24 = vld [vmem:[#allocation5 + $0x18] sm:$0x1] }
 0x60c   :  { %v3306_v35 = vpop.f32.mrb[16].mxu0  ;;  %v3383_v3 = vpop.f32.mrb[26].mxu1 }
 0x60d   :  { %v3424_v30 = vadd.f32 %v3407_v47, %v3306_v35  ;;  %v3426_v39 = vadd.f32 %v3415_v25, %v3383_v3  ;;  %v3308_v55 = vpop.f32.mrb[17].mxu0  ;;  %v3385_v27 = vpop.f32.mrb[27].mxu1  ;;  %v3508_v35 = vld [vmem:[%s11496_s4 + $0x10] sm:$0xff] }
 0x60e   :  { %v3425_v29 = vadd.f32 %v3411_v42, %v3308_v55  ;;  %v3427_v31 = vadd.f32 %v3419_v50, %v3385_v27  ;;  %v3512_v3 = vld [vmem:[%s11496_s4 + $0x30] sm:$0xff]  ;;  %v3515_v55 = vld [vmem:[%s11496_s4 + $0x48] sm:$0xff] }
 0x60f   :  { %v3432_v32 = vmax.f32 %v3424_v30, 0.0  ;;  %v3434_v34 = vmax.f32 %v3426_v39, 0.0 }
 0x610   :  { %v3312_v59 = vpop.f32.mrb[18].mxu0  ;;  %v3389_v6 = vpop.f32.mrb[28].mxu1  ;;  %v3433_v33 = vmax.f32 %v3425_v29, 0.0  ;;  %v3435_v40 = vmax.f32 %v3427_v31, 0.0  ;;  %v3519_v31 = vld [vmem:[%s11496_s4 + $0x68] sm:$0xff] }
 0x611   :  { %v3428_v36 = vadd.f32 %v3407_v47, %v3312_v59  ;;  %v3430_v37 = vadd.f32 %v3415_v25, %v3389_v6  ;;  %v3314_v38 = vpop.f32.mrb[19].mxu0  ;;  %v3391_v20 = vpop.f32.mrb[29].mxu1  ;;  %v3448_v12 = vrot.slane %v3432_v32, 1  ;;  %v3454_v1 = vrot.slane %v3434_v34, 1  ;;  %v3506_v47 = vld [vmem:[%s11496_s4] sm:$0xff]  ;;  %v3517_v59 = vld [vmem:[%s11496_s4 + $0x58] sm:$0xff] }
 0x612   :  { %v3429_v56 = vadd.f32 %v3411_v42, %v3314_v38  ;;  %v3431_v63 = vadd.f32 %v3419_v50, %v3391_v20  ;;  %v3451_v4 = vrot.slane %v3433_v33, 1  ;;  %v3457_v5 = vrot.slane %v3435_v40, 1  ;;  %v3510_v50 = vld [vmem:[%s11496_s4 + $0x20] sm:$0xff]  ;;  %v3521_v6 = vld [vmem:[%s11496_s4 + $0x78] sm:$0xff] }
 0x613   :  { %v3436_v58 = vmax.f32 %v3428_v36, 0.0  ;;  %v3438_v48 = vmax.f32 %v3430_v37, 0.0  ;;  %v3775_v25 = vrot.slane %v3637_v24, 1  ;;  %v3772_v42 = vrot.slane %v3636_v60, 1  ;;  %v3514_v36 = vld [vmem:[%s11496_s4 + $0x40] sm:$0xff] }
 0x614   :  { %v3437_v52 = vmax.f32 %v3429_v56, 0.0  ;;  %v3439_v57 = vmax.f32 %v3431_v63, 0.0  ;;  %v3518_v37 = vld [vmem:[%s11496_s4 + $0x60] sm:$0xff]  ;;  %v3523_v56 = vld [vmem:[%s11496_s4 + $0x88] sm:$0xff]  ;;  %v6531_v63 = vpack.c.bf16 %v3519_v31, %v3515_v55 }
 0x615   :  { %v3449_v17 = vrot.slane %v3436_v58, 1  ;;  %v3455_v53 = vrot.slane %v3438_v48, 1  ;;  %v3542_v24 = vld [vmem:[%s11496_s4 + $0x120] sm:$0xff] }
 0x616   :  { %v3452_v9 = vrot.slane %v3437_v52, 1  ;;  %v3458_v41 = vrot.slane %v3439_v57, 1 }
 0x617   :  { %v3450_v11 = vsel %vm890_vm2, %v3448_v12, %v3449_v17  ;;  %v3472_v54 = vmax.f32 %v3436_v58, %v3449_v17  ;;  %v3456_v10 = vsel %vm890_vm2, %v3454_v1, %v3455_v53  ;;  %v3474_v13 = vmax.f32 %v3438_v48, %v3455_v53  ;;  %v3527_v48 = vld [vmem:[%s11496_s4 + $0xa8] sm:$0xff]  ;;  %v3522_v53 = vld [vmem:[%s11496_s4 + $0x80] sm:$0xff] }
 0x618   :  { %v3468_v44 = vmax.f32 %v3432_v32, %v3450_v11  ;;  %v3470_v2 = vmax.f32 %v3434_v34, %v3456_v10  ;;  %v3453_v15 = vsel %vm890_vm2, %v3451_v4, %v3452_v9  ;;  %v3473_v18 = vmax.f32 %v3437_v52, %v3452_v9  ;;  %v3525_v52 = vld [vmem:[%s11496_s4 + $0x98] sm:$0xff]  ;;  %v3526_v4 = vld [vmem:[%s11496_s4 + $0xa0] sm:$0xff]  ;;  %v3528_v11 = vld [vmem:[%s11496_s4 + $0xb0] sm:$0xff] }
 0x619   :  { %v3469_v0 = vmax.f32 %v3433_v33, %v3453_v15  ;;  %v3459_v28 = vsel %vm890_vm2, %v3457_v5, %v3458_v41  ;;  %v3475_v45 = vmax.f32 %v3439_v57, %v3458_v41  ;;  %v6529_v32 = vpack.c.bf16 %v3510_v50, %v3506_v47  ;;  %v3516_v33 = vld [vmem:[%s11496_s4 + $0x50] sm:$0xff]  ;;  %v3529_v57 = vld [vmem:[%s11496_s4 + $0xb8] sm:$0xff]  ;;  %v3535_v10 = vld [vmem:[%s11496_s4 + $0xe8] sm:$0xff] }
 0x61a   :  { %v3477_v8 = vmax.f32 %v3472_v54, %v3473_v18  ;;  %v3471_v26 = vmax.f32 %v3435_v40, %v3459_v28  ;;  %v6593_v34 = vpack.c.bf16 %v3512_v3, %v3508_v35  ;;  %v3520_v40 = vld [vmem:[%s11496_s4 + $0x70] sm:$0xff]  ;;  %v6595_v58 = vpack.c.bf16 %v3521_v6, %v3517_v59  ;;  %v3531_v54 = vld [vmem:[%s11496_s4 + $0xc8] sm:$0xff]  ;;  %v3530_v18 = vld [vmem:[%s11496_s4 + $0xc0] sm:$0xff] }
 0x61b   :  { %v3476_v21 = vmax.f32 %v3468_v44, %v3469_v0  ;;  %v3481_v22 = vmax.f32 %v3474_v13, %v3475_v45  ;;  %v6533_v1 = vpack.c.bf16 %v3518_v37, %v3514_v36  ;;  %v6597_v17 = vpack.c.bf16 %v3520_v40, %v3516_v33  ;;  %v3524_v41 = vld [vmem:[%s11496_s4 + $0x90] sm:$0xff]  ;;  %v3533_v13 = vld [vmem:[%s11496_s4 + $0xd8] sm:$0xff]  ;;  %v3534_v0 = vld [vmem:[%s11496_s4 + $0xe0] sm:$0xff] }
 0x61c   :  { %3479 = vst [vmem:[#allocation6 + $0x10] sm:$0x7] %v3477_v8  ;;  %v3480_v7 = vmax.f32 %v3470_v2, %v3471_v26  ;;  %v6535_v5 = vpack.c.bf16 %v3527_v48, %v3523_v56  ;;  %v6599_v9 = vpack.c.bf16 %v3529_v57, %v3525_v52  ;;  %v3537_v44 = vld [vmem:[%s11496_s4 + $0xf8] sm:$0xff]  ;;  %v6537_v2 = vpack.c.bf16 %v3526_v4, %v3522_v53  ;;  %v3532_v8 = vld [vmem:[%s11496_s4 + $0xd0] sm:$0xff]  ;;  %v3547_v50 = vld [vmem:[%s11496_s4 + $0x148] sm:$0xff] }
 0x61d   :  { %3478 = vst [vmem:[#allocation6] sm:$0xff] %v3476_v21  ;;  %3483 = vst [vmem:[#allocation6 + $0x18] sm:$0x7] %v3481_v22  ;;  %v6601_v15 = vpack.c.bf16 %v3528_v11, %v3524_v41  ;;  %v6539_v28 = vpack.c.bf16 %v3535_v10, %v3531_v54  ;;  %v6603_v45 = vpack.c.bf16 %v3537_v44, %v3533_v13  ;;  %v3536_v26 = vld [vmem:[%s11496_s4 + $0xf0] sm:$0xff]  ;;  %v3539_v21 = vld [vmem:[%s11496_s4 + $0x108] sm:$0xff] }
 0x61e   :  { %3482 = vst [vmem:[#allocation6 + $0x8] sm:$0xff] %v3480_v7  ;;  %v3543_v22 = vld [vmem:[%s11496_s4 + $0x128] sm:$0xff]  ;;  %v3541_v7 = vld [vmem:[%s11496_s4 + $0x118] sm:$0xff]  ;;  %v3548_v6 = vld [vmem:[%s11496_s4 + $0x150] sm:$0xff] }
 0x61f   :  { %v6543_v60 = vpack.c.bf16 %v3543_v22, %v3539_v21  ;;  %v3551_v35 = vld [vmem:[%s11496_s4 + $0x168] sm:$0xff]  ;;  %v3549_v3 = vld [vmem:[%s11496_s4 + $0x158] sm:$0xff]  ;;  %v3554_v40 = vld [vmem:[%s11496_s4 + $0x180] sm:$0xff] }
 0x620   :  { %v6547_v31 = vpack.c.bf16 %v3551_v35, %v3547_v50  ;;  %v3559_v36 = vld [vmem:[%s11496_s4 + $0x1a8] sm:$0xff]  ;;  %v3557_v37 = vld [vmem:[%s11496_s4 + $0x198] sm:$0xff]  ;;  %v3558_v56 = vld [vmem:[%s11496_s4 + $0x1a0] sm:$0xff] }
 0x621   :  { %v3556_v48 = vld [vmem:[%s11496_s4 + $0x190] sm:$0xff]  ;;  %v3563_v57 = vld [vmem:[%s11496_s4 + $0x1c8] sm:$0xff]  ;;  %v6553_v53 = vpack.c.bf16 %v3558_v56, %v3554_v40 }
 0x622   :  { %v3560_v52 = vld [vmem:[%s11496_s4 + $0x1b0] sm:$0xff]  ;;  %v3571_v13 = vld [vmem:[%s11496_s4 + $0x208] sm:$0xff] }
 0x623   :  { %v6617_v4 = vpack.c.bf16 %v3560_v52, %v3556_v48  ;;  %v3564_v54 = vld [vmem:[%s11496_s4 + $0x1d0] sm:$0xff]  ;;  %v3575_v44 = vld [vmem:[%s11496_s4 + $0x228] sm:$0xff] }
 0x624   :  { %v3500_v14 = vld [vmem:[#allocation6 + $0x11] ss:$8 sm:$0x3] }
 0x625   :  { %3502 = vst.msk [vmem:[#allocation5 + $0x7] ss:$8 sm:$0x3] %vm8074_vm8, %v3500_v14  ;;  %v3488_v16 = vld [vmem:[#allocation6 + $0x1] ss:$8 sm:$0x3] }
 0x626   :  { %v3492_v43 = vld [vmem:[#allocation6 + $0x3] ss:$8 sm:$0x3]  ;;  %3490 = vst.msk [vmem:[#allocation5 + $0x2] ss:$8 sm:$0x3] %vm8074_vm8, %v3488_v16  ;;  %v6541_v16 = vpack.c.bf16 %v3534_v0, %v3530_v18 }
 0x627   :  { %3494 = vst.msk [vmem:[#allocation5 + $0x3] ss:$8 sm:$0x3] %vm8074_vm8, %v3492_v43  ;;  %v3496_v23 = vld [vmem:[#allocation6 + $0x7] ss:$8 sm:$0x3]  ;;  %v6605_v43 = vpack.c.bf16 %v3536_v26, %v3532_v8  ;;  %v6559_v8 = vpack.c.bf16 %v3575_v44, %v3571_v13 }
 0x628   :  { %3498 = vst.msk [vmem:[#allocation5 + $0x6] ss:$8 sm:$0x3] %vm8074_vm8, %v3496_v23  ;;  %v3545_v14 = vld [vmem:[%s11496_s4 + $0x138] sm:$0xff]  ;;  %v3538_v23 = vld [vmem:[%s11496_s4 + $0x100] sm:$0xff]  ;;  %v3568_v10 = vld [vmem:[%s11496_s4 + $0x1f0] sm:$0xff] }
 0x629   :  { %v6607_v47 = vpack.c.bf16 %v3545_v14, %v3541_v7  ;;  %v6621_v0 = vpack.c.bf16 %v3568_v10, %v3564_v54  ;;  %v3572_v21 = vld [vmem:[%s11496_s4 + $0x210] sm:$0xff]  ;;  %v3579_v7 = vld [vmem:[%s11496_s4 + $0x248] sm:$0xff] }
 0x62a   :  { %v3576_v22 = vld [vmem:[%s11496_s4 + $0x230] sm:$0xff]  ;;  %v3583_v14 = vld [vmem:[%s11496_s4 + $0x268] sm:$0xff] }
 0x62b   :  { %v3580_v50 = vld [vmem:[%s11496_s4 + $0x250] sm:$0xff] }
 0x62c   :  { %v3584_v35 = vld [vmem:[%s11496_s4 + $0x270] sm:$0xff] }
 0x62d   :  { %v3604_v13 = vld [vmem:[%s11496_s4 + $0x310] sm:$0xff] }
 0x62e   :  { %v3608_v44 = vld [vmem:[%s11496_s4 + $0x330] sm:$0xff] }
 0x62f   :  { %v3635_v30 = vld [vmem:[#allocation5 + $0x8] sm:$0xfe]  ;;  %v3634_v39 = vld [vmem:[#allocation5] sm:$0xfe] }
 0x630   :  { %v3774_v27 = vrot.slane %v3635_v30, 1  ;;  %v3771_v29 = vrot.slane %v3634_v39, 1  ;;  %v3505_v12 = vld [vmem:[#allocation5 + $0x8] sm:$0xff]  ;;  %v3553_v30 = vld [vmem:[%s11496_s4 + $0x178] sm:$0xff]  ;;  %v6545_v39 = vpack.c.bf16 %v3542_v24, %v3538_v23  ;;  %v6625_v24 = vpack.c.bf16 %v3576_v22, %v3572_v21 }
 0x631   :  { %v6611_v59 = vpack.c.bf16 %v3553_v30, %v3549_v3  ;;  %v3587_v3 = vld [vmem:[%s11496_s4 + $0x288] sm:$0xff] }
 0x632   :  { %v3776_v38 = vsel %vm890_vm2, %v3774_v27, %v3775_v25  ;;  %v3773_v20 = vsel %vm890_vm2, %v3771_v29, %v3772_v42  ;;  %v3540_v25 = vld [vmem:[%s11496_s4 + $0x110] sm:$0xff]  ;;  %v3546_v27 = vld [vmem:[%s11496_s4 + $0x140] sm:$0xff]  ;;  %v3591_v30 = vld [vmem:[%s11496_s4 + $0x2a8] sm:$0xff] }
 0x633   :  { %3843 = vmatprep.mubr.f32.mxu0 %v3776_v38  ;;  %3914 = vmatprep.mubr.f32.mxu1 %v3776_v38  ;;  %v3544_v42 = vld [vmem:[%s11496_s4 + $0x130] sm:$0xff]  ;;  %v3550_v29 = vld [vmem:[%s11496_s4 + $0x160] sm:$0xff]  ;;  %v3561_v38 = vld [vmem:[%s11496_s4 + $0x1b8] sm:$0xff] }
 0x634   :  { %3844 = vmatmul.mubr.f32.vlgmr.msra.gmra.mrb[20].mxu0 %v3773_v20  ;;  %3915 = vmatmul.mubr.f32.vlgmr.msra.gmra.mrb[30].mxu1 %v3773_v20  ;;  %v6609_v55 = vpack.c.bf16 %v3544_v42, %v3540_v25  ;;  %v6549_v20 = vpack.c.bf16 %v3550_v29, %v3546_v27  ;;  %v6563_v25 = vpack.c.bf16 %v3583_v14, %v3579_v7  ;;  %v3612_v7 = vld [vmem:[%s11496_s4 + $0x350] sm:$0xff] }
 0x635   :  { %6530 = vmatpush1.bf16.msra.mxu0 %v6529_v32  ;;  %6594 = vmatpush1.bf16.msra.mxu1 %v6593_v34  ;;  %v3552_v32 = vld [vmem:[%s11496_s4 + $0x170] sm:$0xff]  ;;  %v3555_v34 = vld [vmem:[%s11496_s4 + $0x188] sm:$0xff]  ;;  %v6629_v29 = vpack.c.bf16 %v3584_v35, %v3580_v50 }
 0x636   :  { %3985 = vmatprep.mubr.f32.mxu0 %v3505_v12  ;;  %4056 = vmatprep.mubr.f32.mxu1 %v3505_v12  ;;  %v6613_v33 = vpack.c.bf16 %v3552_v32, %v3548_v6  ;;  %v3567_v12 = vld [vmem:[%s11496_s4 + $0x1e8] sm:$0xff]  ;;  %v6567_v6 = vpack.c.bf16 %v3591_v30, %v3587_v3  ;;  %v3616_v14 = vld [vmem:[%s11496_s4 + $0x370] sm:$0xff] }
 0x637   :  { %6532 = vmatprep.subr.bf16.mxu0 %v6531_v63  ;;  %6596 = vmatprep.subr.bf16.mxu1 %v6595_v58  ;;  %v6551_v63 = vpack.c.bf16 %v3559_v36, %v3555_v34  ;;  %v6615_v58 = vpack.c.bf16 %v3561_v38, %v3557_v37  ;;  %v6555_v41 = vpack.c.bf16 %v3567_v12, %v3563_v57  ;;  %v3588_v34 = vld [vmem:[%s11496_s4 + $0x290] sm:$0xff]  ;;  %v3595_v37 = vld [vmem:[%s11496_s4 + $0x2c8] sm:$0xff] }
 0x638   :  { %v3592_v36 = vld [vmem:[%s11496_s4 + $0x2b0] sm:$0xff]  ;;  %v3599_v38 = vld [vmem:[%s11496_s4 + $0x2e8] sm:$0xff] }
 0x639   :  { %6534 = vmatpush1.bf16.msra.mxu0 %v6533_v1  ;;  %6598 = vmatpush1.bf16.msra.mxu1 %v6597_v17  ;;  %v3565_v1 = vld [vmem:[%s11496_s4 + $0x1d8] sm:$0xff]  ;;  %v6633_v56 = vpack.c.bf16 %v3592_v36, %v3588_v34  ;;  %v6571_v48 = vpack.c.bf16 %v3599_v38, %v3595_v37  ;;  %v3596_v57 = vld [vmem:[%s11496_s4 + $0x2d0] sm:$0xff] }
 0x63a   :  { %6536 = vmatprep.subr.bf16.mxu0 %v6535_v5  ;;  %6600 = vmatprep.subr.bf16.mxu1 %v6599_v9  ;;  %v3569_v17 = vld [vmem:[%s11496_s4 + $0x1f8] sm:$0xff]  ;;  %v3562_v5 = vld [vmem:[%s11496_s4 + $0x1c0] sm:$0xff]  ;;  %v3600_v12 = vld [vmem:[%s11496_s4 + $0x2f0] sm:$0xff] }
 0x63b   :  { %v3566_v9 = vld [vmem:[%s11496_s4 + $0x1e0] sm:$0xff]  ;;  %v6619_v11 = vpack.c.bf16 %v3569_v17, %v3565_v1  ;;  %v3603_v1 = vld [vmem:[%s11496_s4 + $0x308] sm:$0xff]  ;;  %v3620_v3 = vld [vmem:[%s11496_s4 + $0x390] sm:$0xff] }
 0x63c   :  { %v6557_v18 = vpack.c.bf16 %v3566_v9, %v3562_v5  ;;  %v3607_v17 = vld [vmem:[%s11496_s4 + $0x328] sm:$0xff]  ;;  %v6637_v9 = vpack.c.bf16 %v3600_v12, %v3596_v57  ;;  %v3624_v30 = vld [vmem:[%s11496_s4 + $0x3b0] sm:$0xff] }
 0x63d   :  { %6538 = vmatpush1.bf16.msra.mxu0 %v6537_v2  ;;  %6602 = vmatpush1.bf16.msra.mxu1 %v6601_v15  ;;  %v3573_v2 = vld [vmem:[%s11496_s4 + $0x218] sm:$0xff]  ;;  %v6575_v54 = vpack.c.bf16 %v3607_v17, %v3603_v1  ;;  %v3628_v37 = vld [vmem:[%s11496_s4 + $0x3d0] sm:$0xff]  ;;  %v5368_v1 = vld [vmem:[%s11496_s4 + $0x800] sm:$0xff] }
 0x63e   :  { %6540 = vmatprep.subr.bf16.mxu0 %v6539_v28  ;;  %6604 = vmatprep.subr.bf16.mxu1 %v6603_v45  ;;  %v3577_v15 = vld [vmem:[%s11496_s4 + $0x238] sm:$0xff]  ;;  %v3570_v28 = vld [vmem:[%s11496_s4 + $0x200] sm:$0xff]  ;;  %v3632_v38 = vld [vmem:[%s11496_s4 + $0x3f0] sm:$0xff] }
 0x63f   :  { %v3574_v45 = vld [vmem:[%s11496_s4 + $0x220] sm:$0xff]  ;;  %v6623_v26 = vpack.c.bf16 %v3577_v15, %v3573_v2  ;;  %v3611_v2 = vld [vmem:[%s11496_s4 + $0x348] sm:$0xff] }
 0x640   :  { %v6561_v23 = vpack.c.bf16 %v3574_v45, %v3570_v28  ;;  %v3615_v15 = vld [vmem:[%s11496_s4 + $0x368] sm:$0xff]  ;;  %v6641_v45 = vpack.c.bf16 %v3608_v44, %v3604_v13  ;;  %v5372_v17 = vld [vmem:[%s11496_s4 + $0x820] sm:$0xff] }
 0x641   :  { %6542 = vmatpush1.bf16.msra.mxu0 %v6541_v16  ;;  %6606 = vmatpush1.bf16.msra.mxu1 %v6605_v43  ;;  %v3581_v16 = vld [vmem:[%s11496_s4 + $0x258] sm:$0xff]  ;;  %v6579_v21 = vpack.c.bf16 %v3615_v15, %v3611_v2  ;;  %v6657_v13 = vpack.c.bf16 %v5372_v17, %v5368_v1  ;;  %v5376_v44 = vld [vmem:[%s11496_s4 + $0x840] sm:$0xff] }
 0x642   :  { %6544 = vmatprep.subr.bf16.mxu0 %v6543_v60  ;;  %6608 = vmatprep.subr.bf16.mxu1 %v6607_v47  ;;  %v3585_v43 = vld [vmem:[%s11496_s4 + $0x278] sm:$0xff]  ;;  %v3578_v60 = vld [vmem:[%s11496_s4 + $0x240] sm:$0xff] }
 0x643   :  { %v3582_v47 = vld [vmem:[%s11496_s4 + $0x260] sm:$0xff]  ;;  %v6627_v42 = vpack.c.bf16 %v3585_v43, %v3581_v16  ;;  %v3619_v16 = vld [vmem:[%s11496_s4 + $0x388] sm:$0xff]  ;;  %v5411_v1 = vld [vmem:[%s11496_s4 + $0x958] sm:$0xff] }
 0x644   :  { %v6565_v27 = vpack.c.bf16 %v3582_v47, %v3578_v60  ;;  %v3623_v43 = vld [vmem:[%s11496_s4 + $0x3a8] sm:$0xff]  ;;  %v6645_v47 = vpack.c.bf16 %v3616_v14, %v3612_v7  ;;  %v5380_v15 = vld [vmem:[%s11496_s4 + $0x860] sm:$0xff]  ;;  %v5387_v7 = vld [vmem:[%s11496_s4 + $0x898] sm:$0xff] }
 0x645   :  { %6546 = vmatpush1.bf16.msra.mxu0 %v6545_v39  ;;  %6610 = vmatpush1.bf16.msra.mxu1 %v6609_v55  ;;  %v3589_v39 = vld [vmem:[%s11496_s4 + $0x298] sm:$0xff]  ;;  %v6583_v50 = vpack.c.bf16 %v3623_v43, %v3619_v16  ;;  %v6661_v16 = vpack.c.bf16 %v5380_v15, %v5376_v44  ;;  %v5421_v44 = vld [vmem:[%s11496_s4 + $0x9a8] sm:$0xff] }
 0x646   :  { %6548 = vmatprep.subr.bf16.mxu0 %v6547_v31  ;;  %6612 = vmatprep.subr.bf16.mxu1 %v6611_v59  ;;  %v3593_v55 = vld [vmem:[%s11496_s4 + $0x2b8] sm:$0xff]  ;;  %v3586_v31 = vld [vmem:[%s11496_s4 + $0x280] sm:$0xff] }
 0x647   :  { %v3590_v59 = vld [vmem:[%s11496_s4 + $0x2a0] sm:$0xff]  ;;  %v6631_v32 = vpack.c.bf16 %v3593_v55, %v3589_v39  ;;  %v3627_v39 = vld [vmem:[%s11496_s4 + $0x3c8] sm:$0xff]  ;;  %v5391_v14 = vld [vmem:[%s11496_s4 + $0x8b8] sm:$0xff] }
 0x648   :  { %v6569_v40 = vpack.c.bf16 %v3590_v59, %v3586_v31  ;;  %v3631_v55 = vld [vmem:[%s11496_s4 + $0x3e8] sm:$0xff]  ;;  %v6649_v59 = vpack.c.bf16 %v3624_v30, %v3620_v3  ;;  %v5395_v3 = vld [vmem:[%s11496_s4 + $0x8d8] sm:$0xff] }
 0x649   :  { %6550 = vmatpush1.bf16.msra.mxu0 %v6549_v20  ;;  %6614 = vmatpush1.bf16.msra.mxu1 %v6613_v33  ;;  %v3597_v20 = vld [vmem:[%s11496_s4 + $0x2d8] sm:$0xff]  ;;  %v6587_v34 = vpack.c.bf16 %v3631_v55, %v3627_v39 }
 0x64a   :  { %6552 = vmatprep.subr.bf16.mxu0 %v6551_v63  ;;  %6616 = vmatprep.subr.bf16.mxu1 %v6615_v58  ;;  %v3601_v33 = vld [vmem:[%s11496_s4 + $0x2f8] sm:$0xff]  ;;  %v3594_v63 = vld [vmem:[%s11496_s4 + $0x2c0] sm:$0xff] }
 0x64b   :  { %v3598_v58 = vld [vmem:[%s11496_s4 + $0x2e0] sm:$0xff]  ;;  %v6635_v52 = vpack.c.bf16 %v3601_v33, %v3597_v20  ;;  %v5369_v20 = vld [vmem:[%s11496_s4 + $0x808] sm:$0xff]  ;;  %v5399_v30 = vld [vmem:[%s11496_s4 + $0x8f8] sm:$0xff] }
 0x64c   :  { %v6573_v5 = vpack.c.bf16 %v3598_v58, %v3594_v63  ;;  %v5373_v33 = vld [vmem:[%s11496_s4 + $0x828] sm:$0xff]  ;;  %v6653_v58 = vpack.c.bf16 %v3632_v38, %v3628_v37  ;;  %v5403_v37 = vld [vmem:[%s11496_s4 + $0x918] sm:$0xff] }
 0x64d   :  { %6554 = vmatpush1.bf16.msra.mxu0 %v6553_v53  ;;  %6618 = vmatpush1.bf16.msra.mxu1 %v6617_v4  ;;  %v3605_v53 = vld [vmem:[%s11496_s4 + $0x318] sm:$0xff]  ;;  %v6655_v57 = vpack.c.bf16 %v5373_v33, %v5369_v20 }
 0x64e   :  { %6556 = vmatprep.subr.bf16.mxu0 %v6555_v41  ;;  %6620 = vmatprep.subr.bf16.mxu1 %v6619_v11  ;;  %v3609_v4 = vld [vmem:[%s11496_s4 + $0x338] sm:$0xff]  ;;  %v3602_v41 = vld [vmem:[%s11496_s4 + $0x300] sm:$0xff] }
 0x64f   :  { %v3606_v11 = vld [vmem:[%s11496_s4 + $0x320] sm:$0xff]  ;;  %v6639_v10 = vpack.c.bf16 %v3609_v4, %v3605_v53  ;;  %v5370_v53 = vld [vmem:[%s11496_s4 + $0x810] sm:$0xff]  ;;  %v5407_v38 = vld [vmem:[%s11496_s4 + $0x938] sm:$0xff] }
 0x650   :  { %v6577_v28 = vpack.c.bf16 %v3606_v11, %v3602_v41  ;;  %v5374_v4 = vld [vmem:[%s11496_s4 + $0x830] sm:$0xff]  ;;  %v5381_v11 = vld [vmem:[%s11496_s4 + $0x868] sm:$0xff]  ;;  %v5415_v17 = vld [vmem:[%s11496_s4 + $0x978] sm:$0xff] }
 0x651   :  { %6558 = vmatpush1.bf16.msra.mxu0 %v6557_v18  ;;  %6622 = vmatpush1.bf16.msra.mxu1 %v6621_v0  ;;  %v3613_v18 = vld [vmem:[%s11496_s4 + $0x358] sm:$0xff]  ;;  %v6721_v2 = vpack.c.bf16 %v5374_v4, %v5370_v53 }
 0x652   :  { %6560 = vmatprep.subr.bf16.mxu0 %v6559_v8  ;;  %6624 = vmatprep.subr.bf16.mxu1 %v6623_v26  ;;  %v3617_v0 = vld [vmem:[%s11496_s4 + $0x378] sm:$0xff]  ;;  %v3610_v8 = vld [vmem:[%s11496_s4 + $0x340] sm:$0xff] }
 0x653   :  { %v3614_v26 = vld [vmem:[%s11496_s4 + $0x360] sm:$0xff]  ;;  %v6643_v22 = vpack.c.bf16 %v3617_v0, %v3613_v18  ;;  %v5378_v18 = vld [vmem:[%s11496_s4 + $0x850] sm:$0xff]  ;;  %v5423_v15 = vld [vmem:[%s11496_s4 + $0x9b8] sm:$0xff] }
 0x654   :  { %v6581_v60 = vpack.c.bf16 %v3614_v26, %v3610_v8  ;;  %v5382_v0 = vld [vmem:[%s11496_s4 + $0x870] sm:$0xff]  ;;  %v5385_v26 = vld [vmem:[%s11496_s4 + $0x888] sm:$0xff] }
 0x655   :  { %6562 = vmatpush1.bf16.msra.mxu0 %v6561_v23  ;;  %6626 = vmatpush1.bf16.msra.mxu1 %v6625_v24  ;;  %v3621_v23 = vld [vmem:[%s11496_s4 + $0x398] sm:$0xff]  ;;  %v6725_v43 = vpack.c.bf16 %v5382_v0, %v5378_v18 }
 0x656   :  { %6564 = vmatprep.subr.bf16.mxu0 %v6563_v25  ;;  %6628 = vmatprep.subr.bf16.mxu1 %v6627_v42  ;;  %v3625_v24 = vld [vmem:[%s11496_s4 + $0x3b8] sm:$0xff]  ;;  %v3618_v25 = vld [vmem:[%s11496_s4 + $0x380] sm:$0xff] }
 0x657   :  { %v3622_v42 = vld [vmem:[%s11496_s4 + $0x3a0] sm:$0xff]  ;;  %v6647_v35 = vpack.c.bf16 %v3625_v24, %v3621_v23 }
 0x658   :  { %v6585_v31 = vpack.c.bf16 %v3622_v42, %v3618_v25  ;;  %v5384_v24 = vld [vmem:[%s11496_s4 + $0x880] sm:$0xff]  ;;  %v6727_v25 = vpack.c.bf16 %v5391_v14, %v5387_v7  ;;  %v5390_v42 = vld [vmem:[%s11496_s4 + $0x8b0] sm:$0xff]  ;;  %v5425_v7 = vld [vmem:[%s11496_s4 + $0x9c8] sm:$0xff] }
 0x659   :  { %6566 = vmatpush1.bf16.msra.mxu0 %v6565_v27  ;;  %6630 = vmatpush1.bf16.msra.mxu1 %v6629_v29  ;;  %v3629_v27 = vld [vmem:[%s11496_s4 + $0x3d8] sm:$0xff]  ;;  %v5429_v14 = vld [vmem:[%s11496_s4 + $0x9e8] sm:$0xff] }
 0x65a   :  { %6568 = vmatprep.subr.bf16.mxu0 %v6567_v6  ;;  %6632 = vmatprep.subr.bf16.mxu1 %v6631_v32  ;;  %v3633_v29 = vld [vmem:[%s11496_s4 + $0x3f8] sm:$0xff]  ;;  %v3626_v6 = vld [vmem:[%s11496_s4 + $0x3c0] sm:$0xff] }
 0x65b   :  { %v3630_v32 = vld [vmem:[%s11496_s4 + $0x3e0] sm:$0xff]  ;;  %v6651_v36 = vpack.c.bf16 %v3633_v29, %v3629_v27 }
 0x65c   :  { %v6589_v63 = vpack.c.bf16 %v3630_v32, %v3626_v6  ;;  %v5392_v29 = vld [vmem:[%s11496_s4 + $0x8c0] sm:$0xff]  ;;  %v6731_v6 = vpack.c.bf16 %v5399_v30, %v5395_v3  ;;  %v5398_v32 = vld [vmem:[%s11496_s4 + $0x8f0] sm:$0xff]  ;;  %v5433_v3 = vld [vmem:[%s11496_s4 + $0xa08] sm:$0xff] }
 0x65d   :  { %6570 = vmatpush1.bf16.msra.mxu0 %v6569_v40  ;;  %6634 = vmatpush1.bf16.msra.mxu1 %v6633_v56  ;;  %v5371_v40 = vld [vmem:[%s11496_s4 + $0x818] sm:$0xff]  ;;  %v5437_v30 = vld [vmem:[%s11496_s4 + $0xa28] sm:$0xff] }
 0x65e   :  { %6572 = vmatprep.subr.bf16.mxu0 %v6571_v48  ;;  %6636 = vmatprep.subr.bf16.mxu1 %v6635_v52  ;;  %v5375_v56 = vld [vmem:[%s11496_s4 + $0x838] sm:$0xff]  ;;  %v4064_v48 = vld [vmem:[#allocation5 + $0x8] sm:$0xfc]  ;;  %v4066_v52 = vld [vmem:[#allocation5 + $0x18] sm:$0x3] }
 0x65f   :  { %v6719_v12 = vpack.c.bf16 %v5375_v56, %v5371_v40  ;;  %v4204_v41 = vrot.slane %v4066_v52, 2  ;;  %v5400_v56 = vld [vmem:[%s11496_s4 + $0x900] sm:$0xff]  ;;  %v5406_v52 = vld [vmem:[%s11496_s4 + $0x930] sm:$0xff] }
 0x661   :  { %6574 = vmatpush1.bf16.msra.mxu0 %v6573_v5  ;;  %6638 = vmatpush1.bf16.msra.mxu1 %v6637_v9  ;;  %v5377_v5 = vld [vmem:[%s11496_s4 + $0x848] sm:$0xff]  ;;  %v4203_v9 = vrot.slane %v4064_v48, 2  ;;  %v6735_v48 = vpack.c.bf16 %v5407_v38, %v5403_v37 }
 0x662   :  { %6576 = vmatprep.subr.bf16.mxu0 %v6575_v54  ;;  %6640 = vmatprep.subr.bf16.mxu1 %v6639_v10  ;;  %v5379_v54 = vld [vmem:[%s11496_s4 + $0x858] sm:$0xff]  ;;  %v5441_v37 = vld [vmem:[%s11496_s4 + $0xa48] sm:$0xff] }
 0x663   :  { %v5383_v10 = vld [vmem:[%s11496_s4 + $0x878] sm:$0xff]  ;;  %v5445_v38 = vld [vmem:[%s11496_s4 + $0xa68] sm:$0xff] }
 0x664   :  { %v6723_v8 = vpack.c.bf16 %v5383_v10, %v5379_v54  ;;  %v6739_v54 = vpack.c.bf16 %v5415_v17, %v5411_v1  ;;  %v5414_v10 = vld [vmem:[%s11496_s4 + $0x970] sm:$0xff]  ;;  %v5449_v1 = vld [vmem:[%s11496_s4 + $0xa88] sm:$0xff] }
 0x665   :  { %6578 = vmatpush1.bf16.msra.mxu0 %v6577_v28  ;;  %6642 = vmatpush1.bf16.msra.mxu1 %v6641_v45  ;;  %v3504_v28 = vld [vmem:[#allocation5] sm:$0xff]  ;;  %v6659_v45 = vpack.c.bf16 %v5381_v11, %v5377_v5  ;;  %v5410_v11 = vld [vmem:[%s11496_s4 + $0x950] sm:$0xff]  ;;  %v5453_v17 = vld [vmem:[%s11496_s4 + $0xaa8] sm:$0xff] }
 0x666   :  { %6580 = vmatprep.subr.bf16.mxu0 %v6579_v21  ;;  %6644 = vmatprep.subr.bf16.mxu1 %v6643_v22  ;;  %v5389_v21 = vld [vmem:[%s11496_s4 + $0x8a8] sm:$0xff]  ;;  %v4205_v22 = vsel %vm2073_vm12, %v4203_v9, %v4204_v41  ;;  %v5408_v9 = vld [vmem:[%s11496_s4 + $0x940] sm:$0xff]  ;;  %v6741_v0 = vpack.c.bf16 %v5414_v10, %v5410_v11  ;;  %v5450_v10 = vld [vmem:[%s11496_s4 + $0xa90] sm:$0xff] }
 0x667   :  { %v6663_v23 = vpack.c.bf16 %v5389_v21, %v5385_v26  ;;  %v5412_v41 = vld [vmem:[%s11496_s4 + $0x960] sm:$0xff]  ;;  %v5418_v26 = vld [vmem:[%s11496_s4 + $0x990] sm:$0xff] }
 0x668   :  { %v6677_v18 = vpack.c.bf16 %v5412_v41, %v5408_v9  ;;  %v6695_v41 = vpack.c.bf16 %v5453_v17, %v5449_v1  ;;  %v5448_v11 = vld [vmem:[%s11496_s4 + $0xa80] sm:$0xff]  ;;  %v5486_v17 = vld [vmem:[%s11496_s4 + $0xbb0] sm:$0xff] }
 0x669   :  { %6582 = vmatpush1.bf16.msra.mxu0 %v6581_v60  ;;  %6646 = vmatpush1.bf16.msra.mxu1 %v6645_v47  ;;  %v5388_v60 = vld [vmem:[%s11496_s4 + $0x8a0] sm:$0xff]  ;;  %v5386_v47 = vld [vmem:[%s11496_s4 + $0x890] sm:$0xff] }
 0x66a   :  { %6584 = vmatprep.subr.bf16.mxu0 %v6583_v50  ;;  %6648 = vmatprep.subr.bf16.mxu1 %v6647_v35  ;;  %v5393_v50 = vld [vmem:[%s11496_s4 + $0x8c8] sm:$0xff]  ;;  %v6665_v39 = vpack.c.bf16 %v5388_v60, %v5384_v24  ;;  %v6729_v55 = vpack.c.bf16 %v5390_v42, %v5386_v47  ;;  %v6683_v60 = vpack.c.bf16 %v5429_v14, %v5425_v7  ;;  %v5424_v47 = vld [vmem:[%s11496_s4 + $0x9c0] sm:$0xff]  ;;  %v5426_v42 = vld [vmem:[%s11496_s4 + $0x9d0] sm:$0xff] }
 0x66b   :  { %v5397_v35 = vld [vmem:[%s11496_s4 + $0x8e8] sm:$0xff]  ;;  %v5462_v14 = vld [vmem:[%s11496_s4 + $0xaf0] sm:$0xff] }
 0x66c   :  { %v6667_v27 = vpack.c.bf16 %v5397_v35, %v5393_v50  ;;  %v5430_v35 = vld [vmem:[%s11496_s4 + $0x9f0] sm:$0xff] }
 0x66d   :  { %6586 = vmatpush1.bf16.msra.mxu0 %v6585_v31  ;;  %6650 = vmatpush1.bf16.msra.mxu1 %v6649_v59  ;;  %v5396_v31 = vld [vmem:[%s11496_s4 + $0x8e0] sm:$0xff]  ;;  %v5394_v59 = vld [vmem:[%s11496_s4 + $0x8d0] sm:$0xff] }
 0x66e   :  { %6588 = vmatprep.subr.bf16.mxu0 %v6587_v34  ;;  %6652 = vmatprep.subr.bf16.mxu1 %v6651_v36  ;;  %v5401_v34 = vld [vmem:[%s11496_s4 + $0x908] sm:$0xff]  ;;  %v6669_v20 = vpack.c.bf16 %v5396_v31, %v5392_v29  ;;  %v6733_v33 = vpack.c.bf16 %v5398_v32, %v5394_v59  ;;  %v6749_v29 = vpack.c.bf16 %v5430_v35, %v5426_v42  ;;  %v5432_v59 = vld [vmem:[%s11496_s4 + $0xa00] sm:$0xff]  ;;  %v5434_v32 = vld [vmem:[%s11496_s4 + $0xa10] sm:$0xff] }
 0x66f   :  { %v5405_v36 = vld [vmem:[%s11496_s4 + $0x928] sm:$0xff]  ;;  %v6687_v31 = vpack.c.bf16 %v5437_v30, %v5433_v3  ;;  %v5464_v42 = vld [vmem:[%s11496_s4 + $0xb00] sm:$0xff]  ;;  %v5466_v35 = vld [vmem:[%s11496_s4 + $0xb10] sm:$0xff] }
 0x670   :  { %v6671_v40 = vpack.c.bf16 %v5405_v36, %v5401_v34  ;;  %v5438_v36 = vld [vmem:[%s11496_s4 + $0xa30] sm:$0xff] }
 0x671   :  { %6590 = vmatpush1.bf16.msra.mxu0 %v6589_v63  ;;  %6654 = vmatpush1.bf16.msra.mxu1 %v6653_v58  ;;  %v5404_v63 = vld [vmem:[%s11496_s4 + $0x920] sm:$0xff]  ;;  %v5402_v58 = vld [vmem:[%s11496_s4 + $0x910] sm:$0xff] }
 0x672   :  { %6656 = vmatprep.subr.bf16.mxu0 %v6655_v57  ;;  %6720 = vmatprep.subr.bf16.mxu1 %v6719_v12  ;;  %v5409_v57 = vld [vmem:[%s11496_s4 + $0x948] sm:$0xff]  ;;  %v6673_v53 = vpack.c.bf16 %v5404_v63, %v5400_v56  ;;  %v6737_v4 = vpack.c.bf16 %v5406_v52, %v5402_v58  ;;  %v6753_v56 = vpack.c.bf16 %v5438_v36, %v5434_v32  ;;  %v5440_v58 = vld [vmem:[%s11496_s4 + $0xa40] sm:$0xff]  ;;  %v5442_v52 = vld [vmem:[%s11496_s4 + $0xa50] sm:$0xff] }
 0x673   :  { %v5413_v12 = vld [vmem:[%s11496_s4 + $0x968] sm:$0xff]  ;;  %v6691_v63 = vpack.c.bf16 %v5445_v38, %v5441_v37  ;;  %v5470_v30 = vld [vmem:[%s11496_s4 + $0xb30] sm:$0xff]  ;;  %v5472_v32 = vld [vmem:[%s11496_s4 + $0xb40] sm:$0xff] }
 0x674   :  { %3986 = vmatmul.mubr.f32.vlgmr.msra.gmra.mrb[20].mxu0 %v3504_v28  ;;  %4057 = vmatmul.mubr.f32.vlgmr.msra.gmra.mrb[30].mxu1 %v3504_v28  ;;  %v6675_v5 = vpack.c.bf16 %v5413_v12, %v5409_v57  ;;  %v5446_v12 = vld [vmem:[%s11496_s4 + $0xa70] sm:$0xff] }
 0x675   :  { %6658 = vmatpush1.bf16.msra.mxu0 %v6657_v13  ;;  %4272 = vmatprep.mubr.f32.mxu0 %v4205_v22  ;;  %v5417_v13 = vld [vmem:[%s11496_s4 + $0x988] sm:$0xff]  ;;  %v6757_v9 = vpack.c.bf16 %v5446_v12, %v5442_v52  ;;  %v5474_v36 = vld [vmem:[%s11496_s4 + $0xb50] sm:$0xff]  ;;  %v5480_v52 = vld [vmem:[%s11496_s4 + $0xb80] sm:$0xff] }
 0x676   :  { %6722 = vmatpush1.bf16.msra.mxu1 %v6721_v2  ;;  %4343 = vmatprep.mubr.f32.mxu1 %v4205_v22  ;;  %v5419_v2 = vld [vmem:[%s11496_s4 + $0x998] sm:$0xff]  ;;  %v6679_v28 = vpack.c.bf16 %v5421_v44, %v5417_v13  ;;  %v5422_v22 = vld [vmem:[%s11496_s4 + $0x9b0] sm:$0xff] }
 0x677   :  { %6660 = vmatprep.subr.bf16.mxu0 %v6659_v45  ;;  %6724 = vmatprep.subr.bf16.mxu1 %v6723_v8  ;;  %v5416_v45 = vld [vmem:[%s11496_s4 + $0x980] sm:$0xff]  ;;  %v6743_v21 = vpack.c.bf16 %v5423_v15, %v5419_v2  ;;  %v6745_v24 = vpack.c.bf16 %v5422_v22, %v5418_v26  ;;  %v5454_v44 = vld [vmem:[%s11496_s4 + $0xab0] sm:$0xff]  ;;  %v5457_v2 = vld [vmem:[%s11496_s4 + $0xac8] sm:$0xff] }
 0x678   :  { %v5420_v8 = vld [vmem:[%s11496_s4 + $0x9a0] sm:$0xff]  ;;  %v5461_v15 = vld [vmem:[%s11496_s4 + $0xae8] sm:$0xff]  ;;  %v5458_v22 = vld [vmem:[%s11496_s4 + $0xad0] sm:$0xff] }
 0x679   :  { %6662 = vmatpush1.bf16.msra.mxu0 %v6661_v16  ;;  %v5427_v16 = vld [vmem:[%s11496_s4 + $0x9d8] sm:$0xff]  ;;  %v5456_v26 = vld [vmem:[%s11496_s4 + $0xac0] sm:$0xff]  ;;  %v5478_v38 = vld [vmem:[%s11496_s4 + $0xb70] sm:$0xff] }
 0x67a   :  { %6726 = vmatpush1.bf16.msra.mxu1 %v6725_v43  ;;  %6664 = vmatprep.subr.bf16.mxu0 %v6663_v23  ;;  %v5431_v43 = vld [vmem:[%s11496_s4 + $0x9f8] sm:$0xff]  ;;  %v6681_v23 = vpack.c.bf16 %v5420_v8, %v5416_v45  ;;  %v6761_v45 = vpack.c.bf16 %v5454_v44, %v5450_v10  ;;  %v6699_v8 = vpack.c.bf16 %v5461_v15, %v5457_v2  ;;  %v5482_v12 = vld [vmem:[%s11496_s4 + $0xb90] sm:$0xff]  ;;  %v5488_v10 = vld [vmem:[%s11496_s4 + $0xbc0] sm:$0xff] }
 0x67b   :  { %6728 = vmatprep.subr.bf16.mxu1 %v6727_v25  ;;  %v5428_v25 = vld [vmem:[%s11496_s4 + $0x9e0] sm:$0xff]  ;;  %v6747_v50 = vpack.c.bf16 %v5431_v43, %v5427_v16  ;;  %v5465_v16 = vld [vmem:[%s11496_s4 + $0xb08] sm:$0xff]  ;;  %v5490_v2 = vld [vmem:[%s11496_s4 + $0xbd0] sm:$0xff] }
 0x67c   :  { %v5469_v43 = vld [vmem:[%s11496_s4 + $0xb28] sm:$0xff]  ;;  %v5494_v15 = vld [vmem:[%s11496_s4 + $0xbf0] sm:$0xff] }
 0x67d   :  { %6666 = vmatpush1.bf16.msra.mxu0 %v6665_v39  ;;  %v5435_v39 = vld [vmem:[%s11496_s4 + $0xa18] sm:$0xff] }
 0x67e   :  { %6730 = vmatpush1.bf16.msra.mxu1 %v6729_v55  ;;  %6668 = vmatprep.subr.bf16.mxu0 %v6667_v27  ;;  %v5439_v55 = vld [vmem:[%s11496_s4 + $0xa38] sm:$0xff]  ;;  %v6685_v27 = vpack.c.bf16 %v5428_v25, %v5424_v47  ;;  %v6765_v47 = vpack.c.bf16 %v5462_v14, %v5458_v22  ;;  %v6703_v25 = vpack.c.bf16 %v5469_v43, %v5465_v16  ;;  %v4485_v22 = vld [vmem:[%s11501_s9 + $0x80] sm:$0xff]  ;;  %v4470_v43 = vld [vmem:[%s11501_s9 + $0x8] sm:$0xff] }
 0x67f   :  { %6732 = vmatprep.subr.bf16.mxu1 %v6731_v6  ;;  %v5436_v6 = vld [vmem:[%s11496_s4 + $0xa20] sm:$0xff]  ;;  %v6751_v34 = vpack.c.bf16 %v5439_v55, %v5435_v39  ;;  %v5473_v39 = vld [vmem:[%s11496_s4 + $0xb48] sm:$0xff] }
 0x680   :  { %v5477_v55 = vld [vmem:[%s11496_s4 + $0xb68] sm:$0xff]  ;;  %v4469_v16 = vld [vmem:[%s11501_s9] sm:$0xff] }
 0x681   :  { %6670 = vmatpush1.bf16.msra.mxu0 %v6669_v20  ;;  %v5443_v20 = vld [vmem:[%s11496_s4 + $0xa58] sm:$0xff] }
 0x682   :  { %6734 = vmatpush1.bf16.msra.mxu1 %v6733_v33  ;;  %6672 = vmatprep.subr.bf16.mxu0 %v6671_v40  ;;  %v5447_v33 = vld [vmem:[%s11496_s4 + $0xa78] sm:$0xff]  ;;  %v6689_v40 = vpack.c.bf16 %v5436_v6, %v5432_v59  ;;  %v6769_v59 = vpack.c.bf16 %v5470_v30, %v5466_v35  ;;  %v6707_v6 = vpack.c.bf16 %v5477_v55, %v5473_v39  ;;  %v4489_v35 = vld [vmem:[%s11501_s9 + $0xa0] sm:$0xff]  ;;  %v4474_v55 = vld [vmem:[%s11501_s9 + $0x28] sm:$0xff] }
 0x683   :  { %6736 = vmatprep.subr.bf16.mxu1 %v6735_v48  ;;  %v5444_v48 = vld [vmem:[%s11496_s4 + $0xa60] sm:$0xff]  ;;  %v6755_v57 = vpack.c.bf16 %v5447_v33, %v5443_v20  ;;  %v5481_v20 = vld [vmem:[%s11496_s4 + $0xb88] sm:$0xff] }
 0x684   :  { %v5485_v33 = vld [vmem:[%s11496_s4 + $0xba8] sm:$0xff]  ;;  %v4473_v39 = vld [vmem:[%s11501_s9 + $0x20] sm:$0xff] }
 0x685   :  { %6674 = vmatpush1.bf16.msra.mxu0 %v6673_v53  ;;  %v5451_v53 = vld [vmem:[%s11496_s4 + $0xa98] sm:$0xff] }
 0x686   :  { %6738 = vmatpush1.bf16.msra.mxu1 %v6737_v4  ;;  %6676 = vmatprep.subr.bf16.mxu0 %v6675_v5  ;;  %v5455_v4 = vld [vmem:[%s11496_s4 + $0xab8] sm:$0xff]  ;;  %v6693_v5 = vpack.c.bf16 %v5444_v48, %v5440_v58  ;;  %v6773_v58 = vpack.c.bf16 %v5478_v38, %v5474_v36  ;;  %v6711_v48 = vpack.c.bf16 %v5485_v33, %v5481_v20  ;;  %v4493_v36 = vld [vmem:[%s11501_s9 + $0xc0] sm:$0xff]  ;;  %v4478_v33 = vld [vmem:[%s11501_s9 + $0x48] sm:$0xff] }
 0x687   :  { %6740 = vmatprep.subr.bf16.mxu1 %v6739_v54  ;;  %v5452_v54 = vld [vmem:[%s11496_s4 + $0xaa0] sm:$0xff]  ;;  %v6759_v13 = vpack.c.bf16 %v5455_v4, %v5451_v53  ;;  %v5489_v53 = vld [vmem:[%s11496_s4 + $0xbc8] sm:$0xff] }
 0x688   :  { %v5493_v4 = vld [vmem:[%s11496_s4 + $0xbe8] sm:$0xff]  ;;  %v4477_v20 = vld [vmem:[%s11501_s9 + $0x40] sm:$0xff] }
 0x689   :  { %6678 = vmatpush1.bf16.msra.mxu0 %v6677_v18  ;;  %v5459_v18 = vld [vmem:[%s11496_s4 + $0xad8] sm:$0xff] }
 0x68a   :  { %6742 = vmatpush1.bf16.msra.mxu1 %v6741_v0  ;;  %6680 = vmatprep.subr.bf16.mxu0 %v6679_v28  ;;  %v5463_v0 = vld [vmem:[%s11496_s4 + $0xaf8] sm:$0xff]  ;;  %v6697_v28 = vpack.c.bf16 %v5452_v54, %v5448_v11  ;;  %v6777_v11 = vpack.c.bf16 %v5486_v17, %v5482_v12  ;;  %v6715_v54 = vpack.c.bf16 %v5493_v4, %v5489_v53  ;;  %v4498_v12 = vld [vmem:[%s11501_s9 + $0xe8] sm:$0xff]  ;;  %v4481_v53 = vld [vmem:[%s11501_s9 + $0x60] sm:$0xff] }
 0x68b   :  { %6744 = vmatprep.subr.bf16.mxu1 %v6743_v21  ;;  %v5460_v21 = vld [vmem:[%s11496_s4 + $0xae0] sm:$0xff]  ;;  %v6763_v7 = vpack.c.bf16 %v5463_v0, %v5459_v18  ;;  %v4063_v18 = vld [vmem:[#allocation5] sm:$0xfc]  ;;  %v4065_v0 = vld [vmem:[#allocation5 + $0x10] sm:$0x3] }
 0x68c   :  { %v4482_v4 = vld [vmem:[%s11501_s9 + $0x68] sm:$0xff] }
 0x68d   :  { %6682 = vmatpush1.bf16.msra.mxu0 %v6681_v23  ;;  %v5467_v23 = vld [vmem:[%s11496_s4 + $0xb18] sm:$0xff] }
 0x68e   :  { %6746 = vmatpush1.bf16.msra.mxu1 %v6745_v24  ;;  %6684 = vmatprep.subr.bf16.mxu0 %v6683_v60  ;;  %v5471_v24 = vld [vmem:[%s11496_s4 + $0xb38] sm:$0xff]  ;;  %v6701_v60 = vpack.c.bf16 %v5460_v21, %v5456_v26  ;;  %v4201_v26 = vrot.slane %v4065_v0, 2 }
 0x68f   :  { %6748 = vmatprep.subr.bf16.mxu1 %v6747_v50  ;;  %v5468_v50 = vld [vmem:[%s11496_s4 + $0xb20] sm:$0xff]  ;;  %v6767_v3 = vpack.c.bf16 %v5471_v24, %v5467_v23  ;;  %v6785_v23 = vpack.c.bf16 %v4470_v43, %v4469_v16  ;;  %v4487_v24 = vld [vmem:[%s11501_s9 + $0x90] sm:$0xff] }
 0x691   :  { %6686 = vmatpush1.bf16.msra.mxu0 %v6685_v27  ;;  %v5475_v27 = vld [vmem:[%s11496_s4 + $0xb58] sm:$0xff] }
 0x692   :  { %6750 = vmatpush1.bf16.msra.mxu1 %v6749_v29  ;;  %6688 = vmatprep.subr.bf16.mxu0 %v6687_v31  ;;  %v5479_v29 = vld [vmem:[%s11496_s4 + $0xb78] sm:$0xff]  ;;  %v6705_v31 = vpack.c.bf16 %v5468_v50, %v5464_v42 }
 0x693   :  { %6752 = vmatprep.subr.bf16.mxu1 %v6751_v34  ;;  %v5476_v34 = vld [vmem:[%s11496_s4 + $0xb60] sm:$0xff]  ;;  %v6771_v37 = vpack.c.bf16 %v5479_v29, %v5475_v27  ;;  %v4472_v42 = vld [vmem:[%s11501_s9 + $0x18] sm:$0xff]  ;;  %v6793_v27 = vpack.c.bf16 %v4474_v55, %v4473_v39  ;;  %v4491_v29 = vld [vmem:[%s11501_s9 + $0xb0] sm:$0xff] }
 0x695   :  { %6690 = vmatpush1.bf16.msra.mxu0 %v6689_v40  ;;  %v5483_v40 = vld [vmem:[%s11496_s4 + $0xb98] sm:$0xff] }
 0x696   :  { %6754 = vmatpush1.bf16.msra.mxu1 %v6753_v56  ;;  %6692 = vmatprep.subr.bf16.mxu0 %v6691_v63  ;;  %v5487_v56 = vld [vmem:[%s11496_s4 + $0xbb8] sm:$0xff]  ;;  %v6709_v63 = vpack.c.bf16 %v5476_v34, %v5472_v32 }
 0x697   :  { %6756 = vmatprep.subr.bf16.mxu1 %v6755_v57  ;;  %v5484_v57 = vld [vmem:[%s11496_s4 + $0xba0] sm:$0xff]  ;;  %v6775_v1 = vpack.c.bf16 %v5487_v56, %v5483_v40  ;;  %v4476_v32 = vld [vmem:[%s11501_s9 + $0x38] sm:$0xff]  ;;  %v4495_v40 = vld [vmem:[%s11501_s9 + $0xd0] sm:$0xff]  ;;  %v6801_v56 = vpack.c.bf16 %v4478_v33, %v4477_v20 }
 0x699   :  { %6694 = vmatpush1.bf16.msra.mxu0 %v6693_v5  ;;  %v5491_v5 = vld [vmem:[%s11496_s4 + $0xbd8] sm:$0xff] }
 0x69a   :  { %6758 = vmatpush1.bf16.msra.mxu1 %v6757_v9  ;;  %6696 = vmatprep.subr.bf16.mxu0 %v6695_v41  ;;  %v5495_v9 = vld [vmem:[%s11496_s4 + $0xbf8] sm:$0xff]  ;;  %v6713_v41 = vpack.c.bf16 %v5484_v57, %v5480_v52  ;;  %v4497_v57 = vld [vmem:[%s11501_s9 + $0xe0] sm:$0xff] }
 0x69b   :  { %6760 = vmatprep.subr.bf16.mxu1 %v6759_v13  ;;  %v5492_v13 = vld [vmem:[%s11496_s4 + $0xbe0] sm:$0xff]  ;;  %v6779_v44 = vpack.c.bf16 %v5495_v9, %v5491_v5  ;;  %v6807_v17 = vpack.c.bf16 %v4498_v12, %v4497_v57  ;;  %v4499_v5 = vld [vmem:[%s11501_s9 + $0xf0] sm:$0xff]  ;;  %v4500_v9 = vld [vmem:[%s11501_s9 + $0xf8] sm:$0xff] }
 0x69d   :  { %6698 = vmatpush1.bf16.msra.mxu0 %v6697_v28  ;;  %v6717_v28 = vpack.c.bf16 %v5492_v13, %v5488_v10  ;;  %v4484_v10 = vld [vmem:[%s11501_s9 + $0x78] sm:$0xff] }
 0x69e   :  { %6762 = vmatpush1.bf16.msra.mxu1 %v6761_v45  ;;  %6700 = vmatprep.subr.bf16.mxu0 %v6699_v8  ;;  %v6781_v45 = vpack.c.bf16 %v5494_v15, %v5490_v2  ;;  %v4200_v8 = vrot.slane %v4063_v18, 2 }
 0x69f   :  { %6764 = vmatprep.subr.bf16.mxu1 %v6763_v7  ;;  %v4486_v7 = vld [vmem:[%s11501_s9 + $0x88] sm:$0xff] }
 0x6a0   :  { %v4202_v21 = vsel %vm2073_vm12, %v4200_v8, %v4201_v26  ;;  %v6783_v14 = vpack.c.bf16 %v4486_v7, %v4485_v22 }
 0x6a1   :  { %6702 = vmatpush1.bf16.msra.mxu0 %v6701_v60  ;;  %v4488_v60 = vld [vmem:[%s11501_s9 + $0x98] sm:$0xff] }
 0x6a2   :  { %6766 = vmatpush1.bf16.msra.mxu1 %v6765_v47  ;;  %6704 = vmatprep.subr.bf16.mxu0 %v6703_v25  ;;  %v6787_v47 = vpack.c.bf16 %v4488_v60, %v4487_v24  ;;  %v4471_v25 = vld [vmem:[%s11501_s9 + $0x10] sm:$0xff] }
 0x6a3   :  { %6768 = vmatprep.subr.bf16.mxu1 %v6767_v3  ;;  %v6789_v50 = vpack.c.bf16 %v4472_v42, %v4471_v25  ;;  %v4490_v3 = vld [vmem:[%s11501_s9 + $0xa8] sm:$0xff] }
 0x6a4   :  { %v6791_v30 = vpack.c.bf16 %v4490_v3, %v4489_v35 }
 0x6a5   :  { %6706 = vmatpush1.bf16.msra.mxu0 %v6705_v31  ;;  %v4492_v31 = vld [vmem:[%s11501_s9 + $0xb8] sm:$0xff] }
 0x6a6   :  { %6770 = vmatpush1.bf16.msra.mxu1 %v6769_v59  ;;  %6708 = vmatprep.subr.bf16.mxu0 %v6707_v6  ;;  %v6795_v59 = vpack.c.bf16 %v4492_v31, %v4491_v29  ;;  %v4475_v6 = vld [vmem:[%s11501_s9 + $0x30] sm:$0xff] }
 0x6a7   :  { %6772 = vmatprep.subr.bf16.mxu1 %v6771_v37  ;;  %v6797_v34 = vpack.c.bf16 %v4476_v32, %v4475_v6  ;;  %v4494_v37 = vld [vmem:[%s11501_s9 + $0xc8] sm:$0xff] }
 0x6a8   :  { %v6799_v38 = vpack.c.bf16 %v4494_v37, %v4493_v36  ;;  %v6940_v36 = vmov 1966171168  }
 0x6a9   :  { %6710 = vmatpush1.bf16.msra.mxu0 %v6709_v63  ;;  %v4496_v63 = vld [vmem:[%s11501_s9 + $0xd8] sm:$0xff]  ;;  %v4413_v37 = vunpack.c.l.s4 %v6940_v36 }
 0x6aa   :  { %6774 = vmatpush1.bf16.msra.mxu1 %v6773_v58  ;;  %6712 = vmatprep.subr.bf16.mxu0 %v6711_v48  ;;  %v4479_v58 = vld [vmem:[%s11501_s9 + $0x50] sm:$0xff]  ;;  %v4480_v48 = vld [vmem:[%s11501_s9 + $0x58] sm:$0xff]  ;;  %v6803_v52 = vpack.c.bf16 %v4496_v63, %v4495_v40 }
 0x6ab   :  { %6776 = vmatprep.subr.bf16.mxu1 %v6775_v1  ;;  %v6805_v1 = vpack.c.bf16 %v4480_v48, %v4479_v58 }
 0x6ad   :  { %6714 = vmatpush1.bf16.msra.mxu0 %v6713_v41  ;;  %v6809_v41 = vpack.c.bf16 %v4482_v4, %v4481_v53 }
 0x6ae   :  { %6778 = vmatpush1.bf16.msra.mxu1 %v6777_v11  ;;  %6716 = vmatprep.subr.bf16.mxu0 %v6715_v54  ;;  %v6811_v11 = vpack.c.bf16 %v4500_v9, %v4499_v5  ;;  %v4483_v54 = vld [vmem:[%s11501_s9 + $0x70] sm:$0xff] }
 0x6af   :  { %6780 = vmatprep.subr.bf16.mxu1 %v6779_v44  ;;  %v6813_v13 = vpack.c.bf16 %v4484_v10, %v4483_v54  ;;  %v4354_v44 = vld [vmem:[%s11500_s8] sm:$0xf] }
 0x6b0   :  { %v4359_v2 = vrot.slane %v4354_v44, %v7456_v49  ;;  %v4367_v15 = vrot.slane %v4354_v44, %v7525_v61  ;;  %v4363_v18 = vrot.slane %v4354_v44, %v7464_v51  ;;  %v4371_v0 = vrot.slane %v4354_v44, %v7530_v62 }
 0x6b1   :  { %6718 = vmatpush1.bf16.msra.mxu0 %v6717_v28 }
 0x6b2   :  { %6782 = vmatpush1.bf16.msra.mxu1 %v6781_v45  ;;  %6784 = vmatprep.subr.bf16.mxu0 %v6783_v14 }
 0x6b4   :  { %4273 = vmatmul.mubr.f32.vlgmr.msra.gmra.mrb[20].mxu0 %v4202_v21 }
 0x6b5   :  { %4344 = vmatmul.mubr.f32.vlgmr.msra.gmra.mrb[30].mxu1 %v4202_v21  ;;  %6786 = vmatpush3.bf16.msra.mxu0 %v6785_v23 }
 0x6b6   :  { %6788 = vmatprep.subr.bf16.mxu0 %v6787_v47 }
 0x6b9   :  { %6790 = vmatpush3.bf16.msra.mxu0 %v6789_v50 }
 0x6ba   :  { %6792 = vmatprep.subr.bf16.mxu0 %v6791_v30 }
 0x6bd   :  { %6794 = vmatpush3.bf16.msra.mxu0 %v6793_v27 }
 0x6be   :  { %6796 = vmatprep.subr.bf16.mxu0 %v6795_v59 }
 0x6c1   :  { %6798 = vmatpush3.bf16.msra.mxu0 %v6797_v34 }
 0x6c2   :  { %6800 = vmatprep.subr.bf16.mxu0 %v6799_v38 }
 0x6c5   :  { %6802 = vmatpush3.bf16.msra.mxu0 %v6801_v56 }
 0x6c6   :  { %6804 = vmatprep.subr.bf16.mxu0 %v6803_v52  ;;  %v4414_v52 = vunpack.c.0.s8 %v4413_v37 }
 0x6c9   :  { %6806 = vmatpush3.bf16.msra.mxu0 %v6805_v1 }
 0x6ca   :  { %6808 = vmatprep.subr.bf16.mxu0 %v6807_v17 }
 0x6cd   :  { %6810 = vmatpush3.bf16.msra.mxu0 %v6809_v41  ;;  %v4417_v41 = vsub.s32 %v4414_v52, %v7453_v46  ;;  %v5496_v46 = vld [vmem:[%s11502_s10] ss:$0 sm:$0xff] }
 0x6ce   :  { %6812 = vmatprep.subr.bf16.mxu0 %v6811_v11 }
 0x6d1   :  { %6814 = vmatpush3.bf16.msra.mxu0 %v6813_v13 }
 0x787   :  { %v4274_v28 = vpop.f32.mrb[20].mxu0 }
 0x788   :  { %v4376_v45 = vadd.f32 %v4359_v2, %v4274_v28  ;;  %v4345_v8 = vpop.f32.mrb[30].mxu1  ;;  %v4276_v26 = vpop.f32.mrb[21].mxu0 }
 0x789   :  { %v4378_v21 = vadd.f32 %v4367_v15, %v4345_v8  ;;  %v4377_v22 = vadd.f32 %v4363_v18, %v4276_v26  ;;  %v4347_v7 = vpop.f32.mrb[31].mxu1 }
 0x78a   :  { %v4380_v14 = vmax.f32 %v4376_v45, 0.0  ;;  %v4379_v16 = vadd.f32 %v4371_v0, %v4347_v7 }
 0x78b   :  { %v4382_v43 = vmax.f32 %v4378_v21, 0.0  ;;  %v4381_v23 = vmax.f32 %v4377_v22, 0.0 }
 0x78c   :  { %v4383_v24 = vmax.f32 %v4379_v16, 0.0 }
 0x78d   :  { %v4384_v60 = vadd.f32 %v4382_v43, %v4380_v14 }
 0x78e   :  { %v4385_v49 = vadd.f32 %v4383_v24, %v4381_v23 }
 0x78f   :  { %v4388_v61 = vrot.slane %v4384_v60, 1  ;;  %v4428_v47 = vrot.slane %v4384_v60, 5 }
 0x790   :  { %v4389_v51 = vrot.slane %v4385_v49, 1  ;;  %v4429_v25 = vrot.slane %v4385_v49, 5  ;;  %v5498_v49 = vld [vmem:[%s11503_s11] ss:$0 sm:$0xff] }
 0x791   :  { %v4393_v62 = vsel %vm4392_vm0, %v4388_v61, 0.0  ;;  %v4432_v42 = vsel %vm4392_vm0, %v4428_v47, 0.0  ;;  %v5499_v47 = vld [vmem:[%s11504_s12] ss:$0 sm:$0xff] }
 0x792   :  { %v4394_v50 = vrot.slane %v4393_v62, 4  ;;  %v4433_v35 = vrot.slane %v4432_v42, 4  ;;  %v4400_v3 = vsel %vm4392_vm0, %v4389_v51, 0.0  ;;  %v4439_v30 = vsel %vm4392_vm0, %v4429_v25, 0.0 }
 0x793   :  { %v4401_v39 = vrot.slane %v4400_v3, 4  ;;  %v4440_v55 = vrot.slane %v4439_v30, 4 }
 0x794   :  { %v4395_v27 = vadd.f32 %v4394_v50, %v4393_v62  ;;  %v4434_v29 = vadd.f32 %v4433_v35, %v4432_v42 }
 0x795   :  { %v4402_v31 = vadd.f32 %v4401_v39, %v4400_v3  ;;  %v4441_v59 = vadd.f32 %v4440_v55, %v4439_v30 }
 0x796   :  { %v4396_v6 = vrot.slane %v4395_v27, 2  ;;  %v4435_v32 = vrot.slane %v4434_v29, 2 }
 0x797   :  { %v4403_v34 = vrot.slane %v4402_v31, 2  ;;  %v4442_v38 = vrot.slane %v4441_v59, 2 }
 0x798   :  { %v4397_v20 = vadd.f32 %v4396_v6, %v4395_v27  ;;  %v4436_v33 = vadd.f32 %v4435_v32, %v4434_v29 }
 0x799   :  { %v4404_v40 = vadd.f32 %v4403_v34, %v4402_v31  ;;  %v4443_v56 = vadd.f32 %v4442_v38, %v4441_v59 }
 0x79a   :  { %v4398_v63 = vrot.slane %v4397_v20, 1  ;;  %v4437_v58 = vrot.slane %v4436_v33, 1 }
 0x79b   :  { %v4405_v48 = vrot.slane %v4404_v40, 1  ;;  %v4444_v57 = vrot.slane %v4443_v56, 1 }
 0x79c   :  { %v4399_v12 = vadd.f32 %v4398_v63, %v4397_v20  ;;  %v4438_v1 = vadd.f32 %v4437_v58, %v4436_v33 }
 0x79d   :  { %v4406_v17 = vadd.f32 %v4405_v48, %v4404_v40  ;;  %v4445_v53 = vadd.f32 %v4444_v57, %v4443_v56 }
 0x79e   :  { %v4407_v4 = vmul.f32 0.25, %v4399_v12  ;;  %v4446_v5 = vmul.f32 0.25, %v4438_v1 }
 0x79f   :  { %v4408_v9 = vmul.f32 0.25, %v4406_v17  ;;  %v4447_v11 = vmul.f32 0.25, %v4445_v53 }
 0x7a1   :  { %v4411_v54 = vcombine.low %v4407_v4, %v4408_v9  ;;  %v4450_v10 = vcombine.low %v4446_v5, %v4447_v11 }
 0x7a3   :  { %v4418_v13 = vrot.slane %v4411_v54, %v4417_v41  ;;  %v4457_v44 = vrot.slane %v4450_v10, %v4417_v41 }
 0x7a5   :  { %v4425_v2 = vrot.slane %v4418_v13, %v4417_v41  ;;  %v4464_v15 = vrot.slane %v4457_v44, %v4417_v41 }
 0x7a7   :  { %4427 = vst.msk [vmem:[#allocation7] ss:$2 sm:$0x3] %vm8074_vm8, %v4425_v2  ;;  %4467 = vst.msk [vmem:[#allocation7 + $0x1] ss:$2 sm:$0x3] %vm8074_vm8, %v4464_v15 }
 0x7ae   :  { %v5497_v18 = vld.sshfl [vmem:[#allocation7] sm:$0x33 pattern:$0x76325410] }
 0x7af   :  { %v4516_v0 = vcombine.high %v5497_v18, %v5497_v18 }
 0x7b1   :  { %4583 = vmatprep.mubr.f32.mxu0 %v4516_v0 }
 0x7b2   :  { %4584 = vmatmul.mubr.f32.vlgmr.msra.gmra.mrb[22].mxu0 %v5497_v18 }
 0x885   :  { %v5532_v28 = vpop.f32.mrb[22].mxu0 }
 0x886   :  { %v5533_v45 = vpop.f32.mrb[23].mxu0 }
 0x887   :  { %v5534_v8 = vadd.f32 %v5533_v45, %v5532_v28 }
 0x889   :  { %v4586_v26 = vadd.f32 %v5534_v8, %v5496_v46 }
 0x88b   :  { %v4589_v21 = vsel %vm4392_vm0, %v4586_v26, 0.0 }
 0x88c   :  { %4590 = vadd.xlane.f32.xlu0 %v4589_v21 }
 0x919   :  { %v4591_v22 = vpop.xlane.xlu0 %4590 }
 0x91a   :  { %v4593_v7 = vmul.f32 0.0078125, %v4591_v22 }
 0x91c   :  { %v4594_v14 = vsub.f32 %v4586_v26, %v4593_v7 }
 0x91e   :  { %v4595_v19 = vmul.f32 %v4594_v14, %v4594_v14 }
 0x920   :  { %v4596_v16 = vsel %vm4392_vm0, %v4595_v19, 0.0 }
 0x921   :  { %4597 = vadd.xlane.f32.xlu1 %v4596_v16 }
 0x9ae   :  { %v4598_v43 = vpop.xlane.xlu1 %4597 }
 0x9af   :  { %v4599_v23 = vmul.f32 0.0078125, %v4598_v43 }
 0x9b1   :  { %v4600_v24 = vadd.f32 1e-05, %v4599_v23 }
 0x9b3   :  { %6909 = vrsqrt.f32 %v4600_v24 }
 0x9bd   :  { %v6910_v60 = vpop.eup %6909 }
 0x9be   :  { %v4602_v61 = vmul.f32 %v6910_v60, %v4594_v14 }
 0x9c0   :  { %v4610_v51 = vmul.f32 %v5498_v49, %v4602_v61 }
 0x9c2   :  { %v4618_v25 = vadd.f32 %v5499_v47, %v4610_v51 }
 0x9c4   :  { %4619 = vst [vmem:[#allocation8] sm:$0x3] %v4618_v25 }
 0x9c5   :  { %6923 = shalt.err (!%p6920_p4)
}
 0x9c6   :  { %s6924_s14 = scalar_lea.hbm %s11505_s13, 32 }
 0x9c7   :  { %p6925_p5 = scmp.ne.s32.totalorder %s11505_s13, %s6924_s14  ;;  %p6928_p6 = scmp.lt.u32.totalorder %s6924_s14, %s11505_s13 }
 0x9c9   :  { %p6930_p7 = pnand %p6928_p6, %p6925_p5 }
 0x9cb   :  { %6933 = shalt.err (!%p6930_p7)
}
 0x9cc   :  { %4629 = dma.vmem_to_hbm [thread:$0]  %s4627_s3, 32, %s11505_s13, [#allocation9]  }
 0x9cd   :  { %6934 = dma.done.wait [#allocation9], 32  }
 0x9ce   :  { %6935 = vsyncadd [#allocation9], 4294967264 }
 0x9cf   :  { %4633 = vsyncpa [#allocation9], 1 }

</bundles_post_ra>
